<compile_context>
chip_gen: v6e
topology: v6e:2x2x1
jax: 0.10.0
libtpu: 0.0.40
codegen_flags: <defaults>
</compile_context>

<pallas_src>
import jax
import jax.numpy as jnp
from jax.experimental import pallas as pl
from jax.experimental.pallas import tpu as pltpu

IN_F = 900
HID_F = 2200
OUT_F = 900

HID_PAD = 2304            # 18 * 128: lane-aligned hidden dim (zero padding -> exact math)
NUM_CORES = 2             # hidden reduction split into two halves (v7x megacore axis)
HID_HALF = HID_PAD // NUM_CORES   # 1152
TILE_H = 1152             # one hidden tile per half -> 2 grid steps total at B=1


def mlp_gelu_kernel(x_ref, w1_ref, b1_ref, w2_ref, b2_ref, o_ref):
    c = pl.program_id(0)          # hidden-half index (parallel across TCs on v7x)
    h = pl.program_id(2)          # hidden tile within the half (accumulation axis)

    # Initialize the resident output block once per (c, i): half 0 carries b2,
    # half 1 starts at zero; the two partial slabs are summed outside the kernel.
    @pl.when(h == 0)
    def _():
        init = jnp.broadcast_to(b2_ref[...], o_ref.shape)
        o_ref[...] = init * (c == 0).astype(o_ref.dtype)

    # linear1 partial: t1 = x @ W1[:, tile] + b1[tile]          (MXU, f32 accumulate)
    t1 = (
        jnp.dot(x_ref[...], w1_ref[...], preferred_element_type=jnp.float32)
        + b1_ref[...]
    )

    # tanh-GELU exactly as written in the PyTorch forward (VPU + EUP)
    t2 = t1 * 0.5
    t3 = t1 + t1 * t1 * t1 * 0.044715
    t4 = t3 * 0.7978845608028654
    t5 = jnp.tanh(t4)
    t7 = t2 * (t5 + 1.0)

    # linear2 partial, accumulated directly in the resident (f32) output block
    o_ref[...] += jnp.dot(t7, w2_ref[...], preferred_element_type=jnp.float32)


def prepare_params(w1, b1, w2, b2):
    """One-time (weight-load-time) padding to lane-aligned shapes.

    Exact math: padded W1 columns / b1 entries / W2 rows are zero, so padded hidden
    units contribute nothing to the output.
    """
    w1p = jnp.pad(w1, ((0, 0), (0, HID_PAD - HID_F)))
    b1p = jnp.pad(b1.reshape(1, -1), ((0, 0), (0, HID_PAD - HID_F)))
    w2p = jnp.pad(w2, ((0, HID_PAD - HID_F), (0, 0)))
    b2p = b2.reshape(1, -1)
    return w1p, b1p, w2p, b2p


def mlp_gelu(x, w1p, b1p, w2p, b2p, *, tile_m=256):
    """x: (B, 900); pre-padded params from prepare_params()."""
    B = x.shape[0]
    if B <= tile_m:
        tm, Bp, xp = B, B, x
    else:
        tm = tile_m
        Bp = pl.cdiv(B, tm) * tm
        xp = jnp.pad(x, ((0, Bp - B), (0, 0)))
    num_bt = Bp // tm
    num_ht = HID_HALF // TILE_H

    cost = pl.CostEstimate(
        flops=2 * Bp * (IN_F * HID_PAD + HID_PAD * OUT_F),
        transcendentals=Bp * HID_PAD,
        bytes_accessed=4 * (IN_F * HID_PAD + HID_PAD + HID_PAD * OUT_F + OUT_F
                            + Bp * IN_F + NUM_CORES * Bp * OUT_F),
    )

    partial = pl.pallas_call(
        mlp_gelu_kernel,
        out_shape=jax.ShapeDtypeStruct((NUM_CORES, Bp, OUT_F), jnp.float32),
        grid_spec=pltpu.PrefetchScalarGridSpec(
            num_scalar_prefetch=0,
            grid=(NUM_CORES, num_bt, num_ht),
            in_specs=[
                pl.BlockSpec((tm, IN_F), lambda c, i, h: (i, 0)),             # x tile
                pl.BlockSpec((IN_F, TILE_H),
                             lambda c, i, h: (0, c * num_ht + h)),            # W1 cols
                pl.BlockSpec((1, TILE_H),
                             lambda c, i, h: (0, c * num_ht + h)),            # b1 tile
                pl.BlockSpec((TILE_H, OUT_F),
                             lambda c, i, h: (c * num_ht + h, 0)),            # W2 rows
                pl.BlockSpec((1, OUT_F), lambda c, i, h: (0, 0)),             # b2 (resident)
            ],
            out_specs=pl.BlockSpec((None, tm, OUT_F), lambda c, i, h: (c, i, 0)),
        ),
        compiler_params=pltpu.CompilerParams(
            dimension_semantics=("parallel", "parallel", "arbitrary"),
            vmem_limit_bytes=32 * 1024 * 1024,
        ),
        cost_estimate=cost,
    )(xp, w1p, b1p, w2p, b2p)

    # Tiny cross-half combine: two (Bp, 900) partial slabs -> final output.
    out = partial[0] + partial[1]
    return out[:B]


def reference(x, w1, b1, w2, b2):
    t1 = x @ w1 + b1
    t2 = t1 * 0.5
    t3 = t1 + t1 * t1 * t1 * 0.044715
    t4 = t3 * 0.7978845608028654
    t5 = jnp.tanh(t4)
    t7 = t2 * (t5 + 1.0)
    return t7 @ w2 + b2


if __name__ == "__main__":
    key = jax.random.PRNGKey(0)
    kx, k1, kb1, k2, kb2 = jax.random.split(key, 5)

    # deterministic synthetic parameters (shapes from the nn.Linear declarations)
    x1 = jax.random.normal(kx, (1, IN_F), dtype=jnp.float32)
    w1 = jax.random.uniform(k1, (IN_F, HID_F), dtype=jnp.float32,
                            minval=-0.05, maxval=0.05)
    b1 = jax.random.uniform(kb1, (HID_F,), dtype=jnp.float32)
    w2 = jax.random.uniform(k2, (HID_F, OUT_F), dtype=jnp.float32,
                            minval=-0.05, maxval=0.05)
    b2 = jax.random.uniform(kb2, (OUT_F,), dtype=jnp.float32)

    # one-time, out of the per-call path (review item #1)
    params = prepare_params(w1, b1, w2, b2)

    fwd = jax.jit(mlp_gelu)
    out = fwd(x1, *params)
    out = jax.block_until_ready(out)

    ref = reference(x1, w1, b1, w2, b2)
    assert out.shape == (1, OUT_F)
    assert jnp.allclose(out, ref, rtol=1e-5, atol=1e-4), "mismatch vs reference"

    print("KERNEL_OK")
</pallas_src>

<mosaic_0001>
module attributes {stable_mosaic.version = 11 : i64} {
  func.func @mlp_gelu_kernel(%arg0: i32, %arg1: i32, %arg2: i32, %arg3: memref<1x900xf32, #tpu.memory_space<vmem>>, %arg4: memref<900x1152xf32, #tpu.memory_space<vmem>>, %arg5: memref<1x1152xf32, #tpu.memory_space<vmem>>, %arg6: memref<1152x900xf32, #tpu.memory_space<vmem>>, %arg7: memref<1x900xf32, #tpu.memory_space<vmem>>, %arg8: memref<1x1x900xf32, #tpu.memory_space<vmem>>) attributes {dimension_semantics = [#tpu.dimension_semantics<parallel>, #tpu.dimension_semantics<parallel>, #tpu.dimension_semantics<arbitrary>], iteration_bounds = array<i64: 2, 1, 1>, scalar_prefetch = 0 : i64, scratch_operands = 0 : i64, tpu.core_type = #tpu.core_type<tc>, window_params = [{transform_indices = @transform_0, window_bounds = array<i64: 1, 900>}, {transform_indices = @transform_1, window_bounds = array<i64: 900, 1152>}, {transform_indices = @transform_2, window_bounds = array<i64: 1, 1152>}, {transform_indices = @transform_3, window_bounds = array<i64: 1152, 900>}, {pipeline_mode = #tpu.pipeline_mode<synchronous>, transform_indices = @transform_4, window_bounds = array<i64: 1, 900>}, {transform_indices = @transform_5, window_bounds = array<i64: 1, 1, 900>}]} {
    %c0_i32 = arith.constant 0 : i32
    %0 = arith.cmpi eq, %arg2, %c0_i32 : i32
    %1 = arith.extui %0 : i1 to i32
    %c0_i32_0 = arith.constant 0 : i32
    %2 = arith.cmpi ne, %1, %c0_i32_0 : i32
    scf.if %2 {
      %c0_19 = arith.constant 0 : index
      %c0_20 = arith.constant 0 : index
      %29 = vector.load %arg7[%c0_19, %c0_20] : memref<1x900xf32, #tpu.memory_space<vmem>>, vector<1x900xf32>
      %c0_i32_21 = arith.constant 0 : i32
      %30 = arith.cmpi eq, %arg0, %c0_i32_21 : i32
      %31 = arith.extui %30 : i1 to i32
      %32 = arith.sitofp %31 : i32 to f32
      %33 = vector.broadcast %32 : f32 to vector<1x900xf32>
      %34 = arith.mulf %29, %33 : vector<1x900xf32>
      %c0_22 = arith.constant 0 : index
      %c0_23 = arith.constant 0 : index
      %c0_24 = arith.constant 0 : index
      %35 = vector.load %arg8[%c0_22, %c0_23, %c0_24] : memref<1x1x900xf32, #tpu.memory_space<vmem>>, vector<1x1x900xf32>
      %36 = vector.shape_cast %35 : vector<1x1x900xf32> to vector<1x900xf32>
      %37 = vector.shape_cast %34 : vector<1x900xf32> to vector<1x1x900xf32>
      tpu.vector_store %arg8[%c0_22, %c0_23, %c0_24], %37 {strides = array<i32>} : memref<1x1x900xf32, #tpu.memory_space<vmem>>, vector<1x1x900xf32>,
    } else {
    }
    %c0 = arith.constant 0 : index
    %c0_1 = arith.constant 0 : index
    %3 = vector.load %arg3[%c0, %c0_1] : memref<1x900xf32, #tpu.memory_space<vmem>>, vector<1x900xf32>
    %c0_2 = arith.constant 0 : index
    %c0_3 = arith.constant 0 : index
    %4 = vector.load %arg4[%c0_2, %c0_3] : memref<900x1152xf32, #tpu.memory_space<vmem>>, vector<900x1152xf32>
    %cst = arith.constant dense<0.000000e+00> : vector<1x1152xf32>
    %5 = tpu.matmul %3, %4, %cst {dimension_numbers = #tpu.dot_dimension_numbers<[1], [0], [0], [1], [0, 0, 1, 1], [], []>} : vector<1x900xf32>, vector<900x1152xf32>, vector<1x1152xf32> -> vector<1x1152xf32>
    %c0_4 = arith.constant 0 : index
    %c0_5 = arith.constant 0 : index
    %6 = vector.load %arg5[%c0_4, %c0_5] : memref<1x1152xf32, #tpu.memory_space<vmem>>, vector<1x1152xf32>
    %7 = arith.addf %5, %6 : vector<1x1152xf32>
    %cst_6 = arith.constant 5.000000e-01 : f32
    %8 = vector.broadcast %cst_6 : f32 to vector<1x1152xf32>
    %9 = arith.mulf %7, %8 : vector<1x1152xf32>
    %10 = arith.mulf %7, %7 : vector<1x1152xf32>
    %11 = arith.mulf %10, %7 : vector<1x1152xf32>
    %cst_7 = arith.constant 4.471500e-02 : f32
    %12 = vector.broadcast %cst_7 : f32 to vector<1x1152xf32>
    %13 = arith.mulf %11, %12 : vector<1x1152xf32>
    %14 = arith.addf %7, %13 : vector<1x1152xf32>
    %cst_8 = arith.constant 0.797884583 : f32
    %15 = vector.broadcast %cst_8 : f32 to vector<1x1152xf32>
    %16 = arith.mulf %14, %15 : vector<1x1152xf32>
    %17 = math.tanh %16 : vector<1x1152xf32>
    %cst_9 = arith.constant 1.000000e+00 : f32
    %18 = vector.broadcast %cst_9 : f32 to vector<1x1152xf32>
    %19 = arith.addf %17, %18 : vector<1x1152xf32>
    %20 = arith.mulf %9, %19 : vector<1x1152xf32>
    %c0_10 = arith.constant 0 : index
    %c0_11 = arith.constant 0 : index
    %c0_12 = arith.constant 0 : index
    %21 = vector.load %arg8[%c0_10, %c0_11, %c0_12] : memref<1x1x900xf32, #tpu.memory_space<vmem>>, vector<1x1x900xf32>
    %22 = vector.shape_cast %21 : vector<1x1x900xf32> to vector<1x900xf32>
    %c0_13 = arith.constant 0 : index
    %c0_14 = arith.constant 0 : index
    %23 = vector.load %arg6[%c0_13, %c0_14] : memref<1152x900xf32, #tpu.memory_space<vmem>>, vector<1152x900xf32>
    %cst_15 = arith.constant dense<0.000000e+00> : vector<1x900xf32>
    %24 = tpu.matmul %20, %23, %cst_15 {dimension_numbers = #tpu.dot_dimension_numbers<[1], [0], [0], [1], [0, 0, 1, 1], [], []>} : vector<1x1152xf32>, vector<1152x900xf32>, vector<1x900xf32> -> vector<1x900xf32>
    %25 = arith.addf %22, %24 : vector<1x900xf32>
    %c0_16 = arith.constant 0 : index
    %c0_17 = arith.constant 0 : index
    %c0_18 = arith.constant 0 : index
    %26 = vector.load %arg8[%c0_16, %c0_17, %c0_18] : memref<1x1x900xf32, #tpu.memory_space<vmem>>, vector<1x1x900xf32>
    %27 = vector.shape_cast %26 : vector<1x1x900xf32> to vector<1x900xf32>
    %28 = vector.shape_cast %25 : vector<1x900xf32> to vector<1x1x900xf32>
    tpu.vector_store %arg8[%c0_16, %c0_17, %c0_18], %28 {strides = array<i32>} : memref<1x1x900xf32, #tpu.memory_space<vmem>>, vector<1x1x900xf32>,
    return
  }
  func.func @transform_0(%arg0: i32, %arg1: i32, %arg2: i32) -> (i32, i32) {
    %c0_i32 = arith.constant 0 : i32
    %c0_i32_0 = arith.constant 0 : i32
    return %arg1, %c0_i32 : i32, i32
  }
  func.func @transform_1(%arg0: i32, %arg1: i32, %arg2: i32) -> (i32, i32) {
    %c1_i32 = arith.constant 1 : i32
    %0 = arith.muli %arg0, %c1_i32 : i32
    %1 = arith.addi %0, %arg2 : i32
    %c0_i32 = arith.constant 0 : i32
    %c0_i32_0 = arith.constant 0 : i32
    return %c0_i32, %1 : i32, i32
  }
  func.func @transform_2(%arg0: i32, %arg1: i32, %arg2: i32) -> (i32, i32) {
    %c1_i32 = arith.constant 1 : i32
    %0 = arith.muli %arg0, %c1_i32 : i32
    %1 = arith.addi %0, %arg2 : i32
    %c0_i32 = arith.constant 0 : i32
    %c0_i32_0 = arith.constant 0 : i32
    return %c0_i32, %1 : i32, i32
  }
  func.func @transform_3(%arg0: i32, %arg1: i32, %arg2: i32) -> (i32, i32) {
    %c1_i32 = arith.constant 1 : i32
    %0 = arith.muli %arg0, %c1_i32 : i32
    %1 = arith.addi %0, %arg2 : i32
    %c0_i32 = arith.constant 0 : i32
    %c0_i32_0 = arith.constant 0 : i32
    return %1, %c0_i32 : i32, i32
  }
  func.func @transform_4(%arg0: i32, %arg1: i32, %arg2: i32) -> (i32, i32) {
    %c0_i32 = arith.constant 0 : i32
    %c0_i32_0 = arith.constant 0 : i32
    %c0_i32_1 = arith.constant 0 : i32
    return %c0_i32, %c0_i32_0 : i32, i32
  }
  func.func @transform_5(%arg0: i32, %arg1: i32, %arg2: i32) -> (i32, i32, i32) {
    %c0_i32 = arith.constant 0 : i32
    %c0_i32_0 = arith.constant 0 : i32
    return %arg0, %arg1, %c0_i32 : i32, i32, i32
  }
}

</mosaic_0001>

<bundles_post_ra>
// kernel: mlp_gelu.1
= control target key start
LH: loop header
LB: loop body
LE: loop exit
PB: predicated region body
PF: predicated region fallthrough
CT: control target
= control target key end

     0   :  { %s8065_s18 = smov 0   ;;  %s8067_s19 = smov 0   ;;  %s12690_s0 = inlined_call_operand.vmem [shape: f32[1,900], index: 0, kind: input, shape index: {}]   ;;  %s12691_s1 = inlined_call_operand.vmem [shape: f32[900,2304], index: 1, kind: input, shape index: {}]   ;;  %s12692_s2 = inlined_call_operand.vmem [shape: f32[1,2304], index: 2, kind: input, shape index: {}]   ;;  %s12693_s3 = inlined_call_operand.vmem [shape: f32[2304,900], index: 3, kind: input, shape index: {}]   ;;  %s12694_s4 = inlined_call_operand.vmem [shape: f32[1,900], index: 4, kind: input, shape index: {}]   ;;  %s12695_s5 = inlined_call_operand.vmem [shape: f32[2,1,900], index: 5, kind: output, shape index: {}]  }
   0x1   :  { %s8069_s20 = smov 0   ;;  %s8071_s21 = smov 0  }
   0x2   :  { %s8073_s22 = smov 0  }
   0x3 LB: > { %s34_s23 = sadd.s32 1, %s8027_s21  ;;  %p76_p1 = scmp.ne.s32.totalorder %s8019_s19, %s8015_s18  ;;  %s8031_s22 = sphi %s8073_s22, %s15_s22   ;;  %s8027_s21 = sphi %s8071_s21, %s12703_s21   ;;  %s8023_s20 = sphi %s8069_s20, %s12702_s20   ;;  %s8019_s19 = sphi %s8067_s19, %s12701_s19   ;;  %s8015_s18 = sphi %s8065_s18, %s12700_s18  }
   0x4   : > { %p36_p0 = scmp.ge.s32.totalorder %s34_s23, 2  ;;  %p77_p2 = scmp.eq.s32.totalorder %s8031_s22, 0 }
   0x5   : > { %s69_s25 = sadd.s32 1, %s8019_s19  ;;  %p7799_p5 = scmp.ge.s32.totalorder %s8031_s22, 2 }
   0x6   : > { %s12705_s23 = smov (%p36_p0, %s34_s23), 0  ;;  %p78_p3 = por %p77_p2, %p76_p1 }
   0x7   : > { %s66_s24 = ssub.s32 %s8027_s21, %s12705_s23  ;;  %217 = sbr.rel (%p7799_p5) target bundleno = 526 (0x20e), region = 24 }
   0x8   : > { %p67_p4 = scmp.eq.s32.totalorder %s66_s24, 0 }
   0xa   : > { %s8100_s26 = scalar_select %p67_p4, %s8019_s19, %s69_s25  }
   0xc   : > { %220 = sbr.rel (!%p78_p3) target bundleno = 526 (0x20e), region = 28  ;;  %s222_s27 = sand.u32 (%p78_p3), 1, %s8019_s19  }
   0xd   : > { %s7822_s28 = smul.u32 (%p78_p3), 72, %s8027_s21 }
   0xe   : > { %s7929_s29 = smul.u32 (%p78_p3), 8136, %s222_s27 }
   0xf   : > { %s8108_s7 = scalar_lea.vmem (%p78_p3), %s12691_s1, %s7822_s28 }
  0x10   : > { %v241_v0 = vld [vmem:[%s8108_s7] sm:$0xff] (%p78_p3)  ;;  %v243_v1 = vld [vmem:[%s8108_s7 + $0x8] sm:$0xff] (%p78_p3)  ;;  %v245_v2 = vld [vmem:[%s8108_s7 + $0x10] sm:$0xff] (%p78_p3)  ;;  %s8113_s8 = scalar_lea.vmem (%p78_p3), [#allocation2], %s7929_s29 }
  0x11   : > { %242 = vst [vmem:[%s8113_s8] sm:$0xff] %v241_v0  ;;  %244 = vst [vmem:[%s8113_s8 + $0x8] sm:$0xff] %v243_v1  ;;  %v247_v3 = vld [vmem:[%s8108_s7 + $0x18] sm:$0xff]  ;;  %v249_v4 = vld [vmem:[%s8108_s7 + $0x20] sm:$0xff] }
  0x12   : > { %246 = vst [vmem:[%s8113_s8 + $0x10] sm:$0xff] %v245_v2  ;;  %v251_v5 = vld [vmem:[%s8108_s7 + $0x28] sm:$0xff]  ;;  %248 = vst [vmem:[%s8113_s8 + $0x18] sm:$0xff] %v247_v3  ;;  %v253_v6 = vld [vmem:[%s8108_s7 + $0x30] sm:$0xff] }
  0x13   : > { %250 = vst [vmem:[%s8113_s8 + $0x20] sm:$0xff] %v249_v4  ;;  %252 = vst [vmem:[%s8113_s8 + $0x28] sm:$0xff] %v251_v5  ;;  %v255_v7 = vld [vmem:[%s8108_s7 + $0x38] sm:$0xff]  ;;  %v257_v8 = vld [vmem:[%s8108_s7 + $0x40] sm:$0xff] }
  0x14   : > { %254 = vst [vmem:[%s8113_s8 + $0x30] sm:$0xff] %v253_v6  ;;  %256 = vst [vmem:[%s8113_s8 + $0x38] sm:$0xff] %v255_v7  ;;  %v259_v9 = vld [vmem:[%s8108_s7 + $0x90] sm:$0xff]  ;;  %v261_v10 = vld [vmem:[%s8108_s7 + $0x98] sm:$0xff] }
  0x15   : > { %258 = vst [vmem:[%s8113_s8 + $0x40] sm:$0xff] %v257_v8  ;;  %v263_v11 = vld [vmem:[%s8108_s7 + $0xa0] sm:$0xff]  ;;  %260 = vst [vmem:[%s8113_s8 + $0x48] sm:$0xff] %v259_v9  ;;  %v265_v12 = vld [vmem:[%s8108_s7 + $0xa8] sm:$0xff] }
  0x16   : > { %262 = vst [vmem:[%s8113_s8 + $0x50] sm:$0xff] %v261_v10  ;;  %264 = vst [vmem:[%s8113_s8 + $0x58] sm:$0xff] %v263_v11  ;;  %v267_v13 = vld [vmem:[%s8108_s7 + $0xb0] sm:$0xff]  ;;  %v269_v14 = vld [vmem:[%s8108_s7 + $0xb8] sm:$0xff] }
  0x17   : > { %266 = vst [vmem:[%s8113_s8 + $0x60] sm:$0xff] %v265_v12  ;;  %268 = vst [vmem:[%s8113_s8 + $0x68] sm:$0xff] %v267_v13  ;;  %v271_v15 = vld [vmem:[%s8108_s7 + $0xc0] sm:$0xff]  ;;  %v273_v16 = vld [vmem:[%s8108_s7 + $0xc8] sm:$0xff] }
  0x18   : > { %270 = vst [vmem:[%s8113_s8 + $0x70] sm:$0xff] %v269_v14  ;;  %v275_v17 = vld [vmem:[%s8108_s7 + $0xd0] sm:$0xff]  ;;  %272 = vst [vmem:[%s8113_s8 + $0x78] sm:$0xff] %v271_v15  ;;  %v277_v18 = vld [vmem:[%s8108_s7 + $0x120] sm:$0xff] }
  0x19   : > { %274 = vst [vmem:[%s8113_s8 + $0x80] sm:$0xff] %v273_v16  ;;  %276 = vst [vmem:[%s8113_s8 + $0x88] sm:$0xff] %v275_v17  ;;  %v279_v19 = vld [vmem:[%s8108_s7 + $0x128] sm:$0xff]  ;;  %v281_v20 = vld [vmem:[%s8108_s7 + $0x130] sm:$0xff] }
  0x1a   : > { %278 = vst [vmem:[%s8113_s8 + $0x90] sm:$0xff] %v277_v18  ;;  %280 = vst [vmem:[%s8113_s8 + $0x98] sm:$0xff] %v279_v19  ;;  %v283_v21 = vld [vmem:[%s8108_s7 + $0x138] sm:$0xff]  ;;  %v285_v22 = vld [vmem:[%s8108_s7 + $0x140] sm:$0xff] }
  0x1b   : > { %282 = vst [vmem:[%s8113_s8 + $0xa0] sm:$0xff] %v281_v20  ;;  %v287_v23 = vld [vmem:[%s8108_s7 + $0x148] sm:$0xff]  ;;  %284 = vst [vmem:[%s8113_s8 + $0xa8] sm:$0xff] %v283_v21  ;;  %v289_v24 = vld [vmem:[%s8108_s7 + $0x150] sm:$0xff] }
  0x1c   : > { %286 = vst [vmem:[%s8113_s8 + $0xb0] sm:$0xff] %v285_v22  ;;  %288 = vst [vmem:[%s8113_s8 + $0xb8] sm:$0xff] %v287_v23  ;;  %v291_v25 = vld [vmem:[%s8108_s7 + $0x158] sm:$0xff]  ;;  %v293_v26 = vld [vmem:[%s8108_s7 + $0x160] sm:$0xff] }
  0x1d   : > { %290 = vst [vmem:[%s8113_s8 + $0xc0] sm:$0xff] %v289_v24  ;;  %292 = vst [vmem:[%s8113_s8 + $0xc8] sm:$0xff] %v291_v25  ;;  %v295_v27 = vld [vmem:[%s8108_s7 + $0x1b0] sm:$0xff]  ;;  %v297_v28 = vld [vmem:[%s8108_s7 + $0x1b8] sm:$0xff] }
  0x1e   : > { %294 = vst [vmem:[%s8113_s8 + $0xd0] sm:$0xff] %v293_v26  ;;  %v299_v29 = vld [vmem:[%s8108_s7 + $0x1c0] sm:$0xff]  ;;  %296 = vst [vmem:[%s8113_s8 + $0xd8] sm:$0xff] %v295_v27  ;;  %v301_v30 = vld [vmem:[%s8108_s7 + $0x1c8] sm:$0xff] }
  0x1f   : > { %298 = vst [vmem:[%s8113_s8 + $0xe0] sm:$0xff] %v297_v28  ;;  %300 = vst [vmem:[%s8113_s8 + $0xe8] sm:$0xff] %v299_v29  ;;  %v303_v31 = vld [vmem:[%s8108_s7 + $0x1d0] sm:$0xff]  ;;  %v305_v32 = vld [vmem:[%s8108_s7 + $0x1d8] sm:$0xff] }
  0x20   : > { %302 = vst [vmem:[%s8113_s8 + $0xf0] sm:$0xff] %v301_v30  ;;  %304 = vst [vmem:[%s8113_s8 + $0xf8] sm:$0xff] %v303_v31  ;;  %v307_v33 = vld [vmem:[%s8108_s7 + $0x1e0] sm:$0xff]  ;;  %v309_v34 = vld [vmem:[%s8108_s7 + $0x1e8] sm:$0xff] }
  0x21   : > { %306 = vst [vmem:[%s8113_s8 + $0x100] sm:$0xff] %v305_v32  ;;  %v311_v35 = vld [vmem:[%s8108_s7 + $0x1f0] sm:$0xff]  ;;  %308 = vst [vmem:[%s8113_s8 + $0x108] sm:$0xff] %v307_v33  ;;  %v313_v36 = vld [vmem:[%s8108_s7 + $0x240] sm:$0xff] }
  0x22   : > { %310 = vst [vmem:[%s8113_s8 + $0x110] sm:$0xff] %v309_v34  ;;  %312 = vst [vmem:[%s8113_s8 + $0x118] sm:$0xff] %v311_v35  ;;  %v315_v37 = vld [vmem:[%s8108_s7 + $0x248] sm:$0xff]  ;;  %v317_v38 = vld [vmem:[%s8108_s7 + $0x250] sm:$0xff] }
  0x23   : > { %314 = vst [vmem:[%s8113_s8 + $0x120] sm:$0xff] %v313_v36  ;;  %316 = vst [vmem:[%s8113_s8 + $0x128] sm:$0xff] %v315_v37  ;;  %v319_v39 = vld [vmem:[%s8108_s7 + $0x258] sm:$0xff]  ;;  %v321_v40 = vld [vmem:[%s8108_s7 + $0x260] sm:$0xff] }
  0x24   : > { %318 = vst [vmem:[%s8113_s8 + $0x130] sm:$0xff] %v317_v38  ;;  %v323_v41 = vld [vmem:[%s8108_s7 + $0x268] sm:$0xff]  ;;  %320 = vst [vmem:[%s8113_s8 + $0x138] sm:$0xff] %v319_v39  ;;  %v325_v42 = vld [vmem:[%s8108_s7 + $0x270] sm:$0xff] }
  0x25   : > { %322 = vst [vmem:[%s8113_s8 + $0x140] sm:$0xff] %v321_v40  ;;  %324 = vst [vmem:[%s8113_s8 + $0x148] sm:$0xff] %v323_v41  ;;  %v327_v43 = vld [vmem:[%s8108_s7 + $0x278] sm:$0xff]  ;;  %v329_v44 = vld [vmem:[%s8108_s7 + $0x280] sm:$0xff] }
  0x26   : > { %326 = vst [vmem:[%s8113_s8 + $0x150] sm:$0xff] %v325_v42  ;;  %328 = vst [vmem:[%s8113_s8 + $0x158] sm:$0xff] %v327_v43  ;;  %v331_v45 = vld [vmem:[%s8108_s7 + $0x2d0] sm:$0xff]  ;;  %v333_v46 = vld [vmem:[%s8108_s7 + $0x2d8] sm:$0xff] }
  0x27   : > { %330 = vst [vmem:[%s8113_s8 + $0x160] sm:$0xff] %v329_v44  ;;  %v335_v47 = vld [vmem:[%s8108_s7 + $0x2e0] sm:$0xff]  ;;  %332 = vst [vmem:[%s8113_s8 + $0x168] sm:$0xff] %v331_v45  ;;  %v337_v48 = vld [vmem:[%s8108_s7 + $0x2e8] sm:$0xff] }
  0x28   : > { %334 = vst [vmem:[%s8113_s8 + $0x170] sm:$0xff] %v333_v46  ;;  %336 = vst [vmem:[%s8113_s8 + $0x178] sm:$0xff] %v335_v47  ;;  %v339_v49 = vld [vmem:[%s8108_s7 + $0x2f0] sm:$0xff]  ;;  %v341_v50 = vld [vmem:[%s8108_s7 + $0x2f8] sm:$0xff] }
  0x29   : > { %338 = vst [vmem:[%s8113_s8 + $0x180] sm:$0xff] %v337_v48  ;;  %340 = vst [vmem:[%s8113_s8 + $0x188] sm:$0xff] %v339_v49  ;;  %v343_v51 = vld [vmem:[%s8108_s7 + $0x300] sm:$0xff]  ;;  %v345_v52 = vld [vmem:[%s8108_s7 + $0x308] sm:$0xff] }
  0x2a   : > { %342 = vst [vmem:[%s8113_s8 + $0x190] sm:$0xff] %v341_v50  ;;  %v347_v53 = vld [vmem:[%s8108_s7 + $0x310] sm:$0xff]  ;;  %344 = vst [vmem:[%s8113_s8 + $0x198] sm:$0xff] %v343_v51  ;;  %v349_v54 = vld [vmem:[%s8108_s7 + $0x360] sm:$0xff] }
  0x2b   : > { %346 = vst [vmem:[%s8113_s8 + $0x1a0] sm:$0xff] %v345_v52  ;;  %348 = vst [vmem:[%s8113_s8 + $0x1a8] sm:$0xff] %v347_v53  ;;  %v351_v55 = vld [vmem:[%s8108_s7 + $0x368] sm:$0xff]  ;;  %v353_v56 = vld [vmem:[%s8108_s7 + $0x370] sm:$0xff] }
  0x2c   : > { %350 = vst [vmem:[%s8113_s8 + $0x1b0] sm:$0xff] %v349_v54  ;;  %352 = vst [vmem:[%s8113_s8 + $0x1b8] sm:$0xff] %v351_v55  ;;  %v355_v57 = vld [vmem:[%s8108_s7 + $0x378] sm:$0xff]  ;;  %v357_v58 = vld [vmem:[%s8108_s7 + $0x380] sm:$0xff] }
  0x2d   : > { %354 = vst [vmem:[%s8113_s8 + $0x1c0] sm:$0xff] %v353_v56  ;;  %v359_v59 = vld [vmem:[%s8108_s7 + $0x388] sm:$0xff]  ;;  %356 = vst [vmem:[%s8113_s8 + $0x1c8] sm:$0xff] %v355_v57  ;;  %v361_v60 = vld [vmem:[%s8108_s7 + $0x390] sm:$0xff] }
  0x2e   : > { %358 = vst [vmem:[%s8113_s8 + $0x1d0] sm:$0xff] %v357_v58  ;;  %360 = vst [vmem:[%s8113_s8 + $0x1d8] sm:$0xff] %v359_v59  ;;  %v363_v61 = vld [vmem:[%s8108_s7 + $0x398] sm:$0xff]  ;;  %v365_v62 = vld [vmem:[%s8108_s7 + $0x3a0] sm:$0xff] }
  0x2f   : > { %362 = vst [vmem:[%s8113_s8 + $0x1e0] sm:$0xff] %v361_v60  ;;  %364 = vst [vmem:[%s8113_s8 + $0x1e8] sm:$0xff] %v363_v61  ;;  %v367_v63 = vld [vmem:[%s8108_s7 + $0x3f0] sm:$0xff]  ;;  %v369_v0 = vld [vmem:[%s8108_s7 + $0x3f8] sm:$0xff] }
  0x30   : > { %366 = vst [vmem:[%s8113_s8 + $0x1f0] sm:$0xff] %v365_v62  ;;  %v371_v1 = vld [vmem:[%s8108_s7 + $0x400] sm:$0xff]  ;;  %368 = vst [vmem:[%s8113_s8 + $0x1f8] sm:$0xff] %v367_v63  ;;  %v373_v2 = vld [vmem:[%s8108_s7 + $0x408] sm:$0xff] }
  0x31   : > { %370 = vst [vmem:[%s8113_s8 + $0x200] sm:$0xff] %v369_v0  ;;  %372 = vst [vmem:[%s8113_s8 + $0x208] sm:$0xff] %v371_v1  ;;  %v375_v3 = vld [vmem:[%s8108_s7 + $0x410] sm:$0xff]  ;;  %v377_v4 = vld [vmem:[%s8108_s7 + $0x418] sm:$0xff] }
  0x32   : > { %374 = vst [vmem:[%s8113_s8 + $0x210] sm:$0xff] %v373_v2  ;;  %376 = vst [vmem:[%s8113_s8 + $0x218] sm:$0xff] %v375_v3  ;;  %v379_v5 = vld [vmem:[%s8108_s7 + $0x420] sm:$0xff]  ;;  %v381_v6 = vld [vmem:[%s8108_s7 + $0x428] sm:$0xff] }
  0x33   : > { %378 = vst [vmem:[%s8113_s8 + $0x220] sm:$0xff] %v377_v4  ;;  %v383_v7 = vld [vmem:[%s8108_s7 + $0x430] sm:$0xff]  ;;  %380 = vst [vmem:[%s8113_s8 + $0x228] sm:$0xff] %v379_v5  ;;  %v385_v8 = vld [vmem:[%s8108_s7 + $0x480] sm:$0xff] }
  0x34   : > { %382 = vst [vmem:[%s8113_s8 + $0x230] sm:$0xff] %v381_v6  ;;  %384 = vst [vmem:[%s8113_s8 + $0x238] sm:$0xff] %v383_v7  ;;  %v387_v9 = vld [vmem:[%s8108_s7 + $0x488] sm:$0xff]  ;;  %v389_v10 = vld [vmem:[%s8108_s7 + $0x490] sm:$0xff] }
  0x35   : > { %386 = vst [vmem:[%s8113_s8 + $0x240] sm:$0xff] %v385_v8  ;;  %388 = vst [vmem:[%s8113_s8 + $0x248] sm:$0xff] %v387_v9  ;;  %v391_v11 = vld [vmem:[%s8108_s7 + $0x498] sm:$0xff]  ;;  %v393_v12 = vld [vmem:[%s8108_s7 + $0x4a0] sm:$0xff] }
  0x36   : > { %390 = vst [vmem:[%s8113_s8 + $0x250] sm:$0xff] %v389_v10  ;;  %v395_v13 = vld [vmem:[%s8108_s7 + $0x4a8] sm:$0xff]  ;;  %392 = vst [vmem:[%s8113_s8 + $0x258] sm:$0xff] %v391_v11  ;;  %v397_v14 = vld [vmem:[%s8108_s7 + $0x4b0] sm:$0xff] }
  0x37   : > { %394 = vst [vmem:[%s8113_s8 + $0x260] sm:$0xff] %v393_v12  ;;  %396 = vst [vmem:[%s8113_s8 + $0x268] sm:$0xff] %v395_v13  ;;  %v399_v15 = vld [vmem:[%s8108_s7 + $0x4b8] sm:$0xff]  ;;  %v401_v16 = vld [vmem:[%s8108_s7 + $0x4c0] sm:$0xff] }
  0x38   : > { %398 = vst [vmem:[%s8113_s8 + $0x270] sm:$0xff] %v397_v14  ;;  %400 = vst [vmem:[%s8113_s8 + $0x278] sm:$0xff] %v399_v15  ;;  %v403_v17 = vld [vmem:[%s8108_s7 + $0x510] sm:$0xff]  ;;  %v405_v18 = vld [vmem:[%s8108_s7 + $0x518] sm:$0xff] }
  0x39   : > { %402 = vst [vmem:[%s8113_s8 + $0x280] sm:$0xff] %v401_v16  ;;  %v407_v19 = vld [vmem:[%s8108_s7 + $0x520] sm:$0xff]  ;;  %404 = vst [vmem:[%s8113_s8 + $0x288] sm:$0xff] %v403_v17  ;;  %v409_v20 = vld [vmem:[%s8108_s7 + $0x528] sm:$0xff] }
  0x3a   : > { %406 = vst [vmem:[%s8113_s8 + $0x290] sm:$0xff] %v405_v18  ;;  %408 = vst [vmem:[%s8113_s8 + $0x298] sm:$0xff] %v407_v19  ;;  %v411_v21 = vld [vmem:[%s8108_s7 + $0x530] sm:$0xff]  ;;  %v413_v22 = vld [vmem:[%s8108_s7 + $0x538] sm:$0xff] }
  0x3b   : > { %410 = vst [vmem:[%s8113_s8 + $0x2a0] sm:$0xff] %v409_v20  ;;  %412 = vst [vmem:[%s8113_s8 + $0x2a8] sm:$0xff] %v411_v21  ;;  %v415_v23 = vld [vmem:[%s8108_s7 + $0x540] sm:$0xff]  ;;  %v417_v24 = vld [vmem:[%s8108_s7 + $0x548] sm:$0xff] }
  0x3c   : > { %414 = vst [vmem:[%s8113_s8 + $0x2b0] sm:$0xff] %v413_v22  ;;  %v419_v25 = vld [vmem:[%s8108_s7 + $0x550] sm:$0xff]  ;;  %416 = vst [vmem:[%s8113_s8 + $0x2b8] sm:$0xff] %v415_v23  ;;  %v421_v26 = vld [vmem:[%s8108_s7 + $0x5a0] sm:$0xff] }
  0x3d   : > { %418 = vst [vmem:[%s8113_s8 + $0x2c0] sm:$0xff] %v417_v24  ;;  %420 = vst [vmem:[%s8113_s8 + $0x2c8] sm:$0xff] %v419_v25  ;;  %v423_v27 = vld [vmem:[%s8108_s7 + $0x5a8] sm:$0xff]  ;;  %v425_v28 = vld [vmem:[%s8108_s7 + $0x5b0] sm:$0xff] }
  0x3e   : > { %422 = vst [vmem:[%s8113_s8 + $0x2d0] sm:$0xff] %v421_v26  ;;  %424 = vst [vmem:[%s8113_s8 + $0x2d8] sm:$0xff] %v423_v27  ;;  %v427_v29 = vld [vmem:[%s8108_s7 + $0x5b8] sm:$0xff]  ;;  %v429_v30 = vld [vmem:[%s8108_s7 + $0x5c0] sm:$0xff] }
  0x3f   : > { %426 = vst [vmem:[%s8113_s8 + $0x2e0] sm:$0xff] %v425_v28  ;;  %v431_v31 = vld [vmem:[%s8108_s7 + $0x5c8] sm:$0xff]  ;;  %428 = vst [vmem:[%s8113_s8 + $0x2e8] sm:$0xff] %v427_v29  ;;  %v433_v32 = vld [vmem:[%s8108_s7 + $0x5d0] sm:$0xff] }
  0x40   : > { %430 = vst [vmem:[%s8113_s8 + $0x2f0] sm:$0xff] %v429_v30  ;;  %432 = vst [vmem:[%s8113_s8 + $0x2f8] sm:$0xff] %v431_v31  ;;  %v435_v33 = vld [vmem:[%s8108_s7 + $0x5d8] sm:$0xff]  ;;  %v437_v34 = vld [vmem:[%s8108_s7 + $0x5e0] sm:$0xff] }
  0x41   : > { %434 = vst [vmem:[%s8113_s8 + $0x300] sm:$0xff] %v433_v32  ;;  %436 = vst [vmem:[%s8113_s8 + $0x308] sm:$0xff] %v435_v33  ;;  %v439_v35 = vld [vmem:[%s8108_s7 + $0x630] sm:$0xff]  ;;  %v441_v36 = vld [vmem:[%s8108_s7 + $0x638] sm:$0xff] }
  0x42   : > { %438 = vst [vmem:[%s8113_s8 + $0x310] sm:$0xff] %v437_v34  ;;  %v443_v37 = vld [vmem:[%s8108_s7 + $0x640] sm:$0xff]  ;;  %440 = vst [vmem:[%s8113_s8 + $0x318] sm:$0xff] %v439_v35  ;;  %v445_v38 = vld [vmem:[%s8108_s7 + $0x648] sm:$0xff] }
  0x43   : > { %442 = vst [vmem:[%s8113_s8 + $0x320] sm:$0xff] %v441_v36  ;;  %444 = vst [vmem:[%s8113_s8 + $0x328] sm:$0xff] %v443_v37  ;;  %v447_v39 = vld [vmem:[%s8108_s7 + $0x650] sm:$0xff]  ;;  %v449_v40 = vld [vmem:[%s8108_s7 + $0x658] sm:$0xff] }
  0x44   : > { %446 = vst [vmem:[%s8113_s8 + $0x330] sm:$0xff] %v445_v38  ;;  %448 = vst [vmem:[%s8113_s8 + $0x338] sm:$0xff] %v447_v39  ;;  %v451_v41 = vld [vmem:[%s8108_s7 + $0x660] sm:$0xff]  ;;  %v453_v42 = vld [vmem:[%s8108_s7 + $0x668] sm:$0xff] }
  0x45   : > { %450 = vst [vmem:[%s8113_s8 + $0x340] sm:$0xff] %v449_v40  ;;  %v455_v43 = vld [vmem:[%s8108_s7 + $0x670] sm:$0xff]  ;;  %452 = vst [vmem:[%s8113_s8 + $0x348] sm:$0xff] %v451_v41  ;;  %v457_v44 = vld [vmem:[%s8108_s7 + $0x6c0] sm:$0xff] }
  0x46   : > { %454 = vst [vmem:[%s8113_s8 + $0x350] sm:$0xff] %v453_v42  ;;  %456 = vst [vmem:[%s8113_s8 + $0x358] sm:$0xff] %v455_v43  ;;  %v459_v45 = vld [vmem:[%s8108_s7 + $0x6c8] sm:$0xff]  ;;  %v461_v46 = vld [vmem:[%s8108_s7 + $0x6d0] sm:$0xff] }
  0x47   : > { %458 = vst [vmem:[%s8113_s8 + $0x360] sm:$0xff] %v457_v44  ;;  %460 = vst [vmem:[%s8113_s8 + $0x368] sm:$0xff] %v459_v45  ;;  %v463_v47 = vld [vmem:[%s8108_s7 + $0x6d8] sm:$0xff]  ;;  %v465_v48 = vld [vmem:[%s8108_s7 + $0x6e0] sm:$0xff] }
  0x48   : > { %462 = vst [vmem:[%s8113_s8 + $0x370] sm:$0xff] %v461_v46  ;;  %v467_v49 = vld [vmem:[%s8108_s7 + $0x6e8] sm:$0xff]  ;;  %464 = vst [vmem:[%s8113_s8 + $0x378] sm:$0xff] %v463_v47  ;;  %v469_v50 = vld [vmem:[%s8108_s7 + $0x6f0] sm:$0xff] }
  0x49   : > { %466 = vst [vmem:[%s8113_s8 + $0x380] sm:$0xff] %v465_v48  ;;  %468 = vst [vmem:[%s8113_s8 + $0x388] sm:$0xff] %v467_v49  ;;  %v471_v51 = vld [vmem:[%s8108_s7 + $0x6f8] sm:$0xff]  ;;  %v473_v52 = vld [vmem:[%s8108_s7 + $0x700] sm:$0xff] }
  0x4a   : > { %470 = vst [vmem:[%s8113_s8 + $0x390] sm:$0xff] %v469_v50  ;;  %472 = vst [vmem:[%s8113_s8 + $0x398] sm:$0xff] %v471_v51  ;;  %v475_v53 = vld [vmem:[%s8108_s7 + $0x750] sm:$0xff]  ;;  %v477_v54 = vld [vmem:[%s8108_s7 + $0x758] sm:$0xff] }
  0x4b   : > { %474 = vst [vmem:[%s8113_s8 + $0x3a0] sm:$0xff] %v473_v52  ;;  %v479_v55 = vld [vmem:[%s8108_s7 + $0x760] sm:$0xff]  ;;  %476 = vst [vmem:[%s8113_s8 + $0x3a8] sm:$0xff] %v475_v53  ;;  %v481_v56 = vld [vmem:[%s8108_s7 + $0x768] sm:$0xff] }
  0x4c   : > { %478 = vst [vmem:[%s8113_s8 + $0x3b0] sm:$0xff] %v477_v54  ;;  %480 = vst [vmem:[%s8113_s8 + $0x3b8] sm:$0xff] %v479_v55  ;;  %v483_v57 = vld [vmem:[%s8108_s7 + $0x770] sm:$0xff]  ;;  %v485_v58 = vld [vmem:[%s8108_s7 + $0x778] sm:$0xff] }
  0x4d   : > { %482 = vst [vmem:[%s8113_s8 + $0x3c0] sm:$0xff] %v481_v56  ;;  %484 = vst [vmem:[%s8113_s8 + $0x3c8] sm:$0xff] %v483_v57  ;;  %v487_v59 = vld [vmem:[%s8108_s7 + $0x780] sm:$0xff]  ;;  %v489_v60 = vld [vmem:[%s8108_s7 + $0x788] sm:$0xff] }
  0x4e   : > { %486 = vst [vmem:[%s8113_s8 + $0x3d0] sm:$0xff] %v485_v58  ;;  %v491_v61 = vld [vmem:[%s8108_s7 + $0x790] sm:$0xff]  ;;  %488 = vst [vmem:[%s8113_s8 + $0x3d8] sm:$0xff] %v487_v59  ;;  %v493_v62 = vld [vmem:[%s8108_s7 + $0x7e0] sm:$0xff] }
  0x4f   : > { %490 = vst [vmem:[%s8113_s8 + $0x3e0] sm:$0xff] %v489_v60  ;;  %492 = vst [vmem:[%s8113_s8 + $0x3e8] sm:$0xff] %v491_v61  ;;  %v495_v63 = vld [vmem:[%s8108_s7 + $0x7e8] sm:$0xff]  ;;  %v497_v0 = vld [vmem:[%s8108_s7 + $0x7f0] sm:$0xff] }
  0x50   : > { %494 = vst [vmem:[%s8113_s8 + $0x3f0] sm:$0xff] %v493_v62  ;;  %496 = vst [vmem:[%s8113_s8 + $0x3f8] sm:$0xff] %v495_v63  ;;  %v499_v1 = vld [vmem:[%s8108_s7 + $0x7f8] sm:$0xff]  ;;  %v501_v2 = vld [vmem:[%s8108_s7 + $0x800] sm:$0xff] }
  0x51   : > { %498 = vst [vmem:[%s8113_s8 + $0x400] sm:$0xff] %v497_v0  ;;  %v503_v3 = vld [vmem:[%s8108_s7 + $0x808] sm:$0xff]  ;;  %500 = vst [vmem:[%s8113_s8 + $0x408] sm:$0xff] %v499_v1  ;;  %v505_v4 = vld [vmem:[%s8108_s7 + $0x810] sm:$0xff] }
  0x52   : > { %502 = vst [vmem:[%s8113_s8 + $0x410] sm:$0xff] %v501_v2  ;;  %504 = vst [vmem:[%s8113_s8 + $0x418] sm:$0xff] %v503_v3  ;;  %v507_v5 = vld [vmem:[%s8108_s7 + $0x818] sm:$0xff]  ;;  %v509_v6 = vld [vmem:[%s8108_s7 + $0x820] sm:$0xff] }
  0x53   : > { %506 = vst [vmem:[%s8113_s8 + $0x420] sm:$0xff] %v505_v4  ;;  %508 = vst [vmem:[%s8113_s8 + $0x428] sm:$0xff] %v507_v5  ;;  %v511_v7 = vld [vmem:[%s8108_s7 + $0x870] sm:$0xff]  ;;  %v513_v8 = vld [vmem:[%s8108_s7 + $0x878] sm:$0xff] }
  0x54   : > { %510 = vst [vmem:[%s8113_s8 + $0x430] sm:$0xff] %v509_v6  ;;  %v515_v9 = vld [vmem:[%s8108_s7 + $0x880] sm:$0xff]  ;;  %512 = vst [vmem:[%s8113_s8 + $0x438] sm:$0xff] %v511_v7  ;;  %v517_v10 = vld [vmem:[%s8108_s7 + $0x888] sm:$0xff] }
  0x55   : > { %514 = vst [vmem:[%s8113_s8 + $0x440] sm:$0xff] %v513_v8  ;;  %516 = vst [vmem:[%s8113_s8 + $0x448] sm:$0xff] %v515_v9  ;;  %v519_v11 = vld [vmem:[%s8108_s7 + $0x890] sm:$0xff]  ;;  %v521_v12 = vld [vmem:[%s8108_s7 + $0x898] sm:$0xff] }
  0x56   : > { %518 = vst [vmem:[%s8113_s8 + $0x450] sm:$0xff] %v517_v10  ;;  %520 = vst [vmem:[%s8113_s8 + $0x458] sm:$0xff] %v519_v11  ;;  %v523_v13 = vld [vmem:[%s8108_s7 + $0x8a0] sm:$0xff]  ;;  %v525_v14 = vld [vmem:[%s8108_s7 + $0x8a8] sm:$0xff] }
  0x57   : > { %522 = vst [vmem:[%s8113_s8 + $0x460] sm:$0xff] %v521_v12  ;;  %v527_v15 = vld [vmem:[%s8108_s7 + $0x8b0] sm:$0xff]  ;;  %524 = vst [vmem:[%s8113_s8 + $0x468] sm:$0xff] %v523_v13  ;;  %v529_v16 = vld [vmem:[%s8108_s7 + $0x900] sm:$0xff] }
  0x58   : > { %526 = vst [vmem:[%s8113_s8 + $0x470] sm:$0xff] %v525_v14  ;;  %528 = vst [vmem:[%s8113_s8 + $0x478] sm:$0xff] %v527_v15  ;;  %v531_v17 = vld [vmem:[%s8108_s7 + $0x908] sm:$0xff]  ;;  %v533_v18 = vld [vmem:[%s8108_s7 + $0x910] sm:$0xff] }
  0x59   : > { %530 = vst [vmem:[%s8113_s8 + $0x480] sm:$0xff] %v529_v16  ;;  %532 = vst [vmem:[%s8113_s8 + $0x488] sm:$0xff] %v531_v17  ;;  %v535_v19 = vld [vmem:[%s8108_s7 + $0x918] sm:$0xff]  ;;  %v537_v20 = vld [vmem:[%s8108_s7 + $0x920] sm:$0xff] }
  0x5a   : > { %534 = vst [vmem:[%s8113_s8 + $0x490] sm:$0xff] %v533_v18  ;;  %v539_v21 = vld [vmem:[%s8108_s7 + $0x928] sm:$0xff]  ;;  %536 = vst [vmem:[%s8113_s8 + $0x498] sm:$0xff] %v535_v19  ;;  %v541_v22 = vld [vmem:[%s8108_s7 + $0x930] sm:$0xff] }
  0x5b   : > { %538 = vst [vmem:[%s8113_s8 + $0x4a0] sm:$0xff] %v537_v20  ;;  %540 = vst [vmem:[%s8113_s8 + $0x4a8] sm:$0xff] %v539_v21  ;;  %v543_v23 = vld [vmem:[%s8108_s7 + $0x938] sm:$0xff]  ;;  %v545_v24 = vld [vmem:[%s8108_s7 + $0x940] sm:$0xff] }
  0x5c   : > { %542 = vst [vmem:[%s8113_s8 + $0x4b0] sm:$0xff] %v541_v22  ;;  %544 = vst [vmem:[%s8113_s8 + $0x4b8] sm:$0xff] %v543_v23  ;;  %v547_v25 = vld [vmem:[%s8108_s7 + $0x990] sm:$0xff]  ;;  %v549_v26 = vld [vmem:[%s8108_s7 + $0x998] sm:$0xff] }
  0x5d   : > { %546 = vst [vmem:[%s8113_s8 + $0x4c0] sm:$0xff] %v545_v24  ;;  %v551_v27 = vld [vmem:[%s8108_s7 + $0x9a0] sm:$0xff]  ;;  %548 = vst [vmem:[%s8113_s8 + $0x4c8] sm:$0xff] %v547_v25  ;;  %v553_v28 = vld [vmem:[%s8108_s7 + $0x9a8] sm:$0xff] }
  0x5e   : > { %550 = vst [vmem:[%s8113_s8 + $0x4d0] sm:$0xff] %v549_v26  ;;  %552 = vst [vmem:[%s8113_s8 + $0x4d8] sm:$0xff] %v551_v27  ;;  %v555_v29 = vld [vmem:[%s8108_s7 + $0x9b0] sm:$0xff]  ;;  %v557_v30 = vld [vmem:[%s8108_s7 + $0x9b8] sm:$0xff] }
  0x5f   : > { %554 = vst [vmem:[%s8113_s8 + $0x4e0] sm:$0xff] %v553_v28  ;;  %556 = vst [vmem:[%s8113_s8 + $0x4e8] sm:$0xff] %v555_v29  ;;  %v559_v31 = vld [vmem:[%s8108_s7 + $0x9c0] sm:$0xff]  ;;  %v561_v32 = vld [vmem:[%s8108_s7 + $0x9c8] sm:$0xff] }
  0x60   : > { %558 = vst [vmem:[%s8113_s8 + $0x4f0] sm:$0xff] %v557_v30  ;;  %v563_v33 = vld [vmem:[%s8108_s7 + $0x9d0] sm:$0xff]  ;;  %560 = vst [vmem:[%s8113_s8 + $0x4f8] sm:$0xff] %v559_v31  ;;  %v565_v34 = vld [vmem:[%s8108_s7 + $0xa20] sm:$0xff] }
  0x61   : > { %562 = vst [vmem:[%s8113_s8 + $0x500] sm:$0xff] %v561_v32  ;;  %564 = vst [vmem:[%s8113_s8 + $0x508] sm:$0xff] %v563_v33  ;;  %v567_v35 = vld [vmem:[%s8108_s7 + $0xa28] sm:$0xff]  ;;  %v569_v36 = vld [vmem:[%s8108_s7 + $0xa30] sm:$0xff] }
  0x62   : > { %566 = vst [vmem:[%s8113_s8 + $0x510] sm:$0xff] %v565_v34  ;;  %568 = vst [vmem:[%s8113_s8 + $0x518] sm:$0xff] %v567_v35  ;;  %v571_v37 = vld [vmem:[%s8108_s7 + $0xa38] sm:$0xff]  ;;  %v573_v38 = vld [vmem:[%s8108_s7 + $0xa40] sm:$0xff] }
  0x63   : > { %570 = vst [vmem:[%s8113_s8 + $0x520] sm:$0xff] %v569_v36  ;;  %v575_v39 = vld [vmem:[%s8108_s7 + $0xa48] sm:$0xff]  ;;  %572 = vst [vmem:[%s8113_s8 + $0x528] sm:$0xff] %v571_v37  ;;  %v577_v40 = vld [vmem:[%s8108_s7 + $0xa50] sm:$0xff] }
  0x64   : > { %574 = vst [vmem:[%s8113_s8 + $0x530] sm:$0xff] %v573_v38  ;;  %576 = vst [vmem:[%s8113_s8 + $0x538] sm:$0xff] %v575_v39  ;;  %v579_v41 = vld [vmem:[%s8108_s7 + $0xa58] sm:$0xff]  ;;  %v581_v42 = vld [vmem:[%s8108_s7 + $0xa60] sm:$0xff] }
  0x65   : > { %578 = vst [vmem:[%s8113_s8 + $0x540] sm:$0xff] %v577_v40  ;;  %580 = vst [vmem:[%s8113_s8 + $0x548] sm:$0xff] %v579_v41  ;;  %v583_v43 = vld [vmem:[%s8108_s7 + $0xab0] sm:$0xff]  ;;  %v585_v44 = vld [vmem:[%s8108_s7 + $0xab8] sm:$0xff] }
  0x66   : > { %582 = vst [vmem:[%s8113_s8 + $0x550] sm:$0xff] %v581_v42  ;;  %v587_v45 = vld [vmem:[%s8108_s7 + $0xac0] sm:$0xff]  ;;  %584 = vst [vmem:[%s8113_s8 + $0x558] sm:$0xff] %v583_v43  ;;  %v589_v46 = vld [vmem:[%s8108_s7 + $0xac8] sm:$0xff] }
  0x67   : > { %586 = vst [vmem:[%s8113_s8 + $0x560] sm:$0xff] %v585_v44  ;;  %588 = vst [vmem:[%s8113_s8 + $0x568] sm:$0xff] %v587_v45  ;;  %v591_v47 = vld [vmem:[%s8108_s7 + $0xad0] sm:$0xff]  ;;  %v593_v48 = vld [vmem:[%s8108_s7 + $0xad8] sm:$0xff] }
  0x68   : > { %590 = vst [vmem:[%s8113_s8 + $0x570] sm:$0xff] %v589_v46  ;;  %592 = vst [vmem:[%s8113_s8 + $0x578] sm:$0xff] %v591_v47  ;;  %v595_v49 = vld [vmem:[%s8108_s7 + $0xae0] sm:$0xff]  ;;  %v597_v50 = vld [vmem:[%s8108_s7 + $0xae8] sm:$0xff] }
  0x69   : > { %594 = vst [vmem:[%s8113_s8 + $0x580] sm:$0xff] %v593_v48  ;;  %v599_v51 = vld [vmem:[%s8108_s7 + $0xaf0] sm:$0xff]  ;;  %596 = vst [vmem:[%s8113_s8 + $0x588] sm:$0xff] %v595_v49  ;;  %v601_v52 = vld [vmem:[%s8108_s7 + $0xb40] sm:$0xff] }
  0x6a   : > { %598 = vst [vmem:[%s8113_s8 + $0x590] sm:$0xff] %v597_v50  ;;  %600 = vst [vmem:[%s8113_s8 + $0x598] sm:$0xff] %v599_v51  ;;  %v603_v53 = vld [vmem:[%s8108_s7 + $0xb48] sm:$0xff]  ;;  %v605_v54 = vld [vmem:[%s8108_s7 + $0xb50] sm:$0xff] }
  0x6b   : > { %602 = vst [vmem:[%s8113_s8 + $0x5a0] sm:$0xff] %v601_v52  ;;  %604 = vst [vmem:[%s8113_s8 + $0x5a8] sm:$0xff] %v603_v53  ;;  %v607_v55 = vld [vmem:[%s8108_s7 + $0xb58] sm:$0xff]  ;;  %v609_v56 = vld [vmem:[%s8108_s7 + $0xb60] sm:$0xff] }
  0x6c   : > { %606 = vst [vmem:[%s8113_s8 + $0x5b0] sm:$0xff] %v605_v54  ;;  %v611_v57 = vld [vmem:[%s8108_s7 + $0xb68] sm:$0xff]  ;;  %608 = vst [vmem:[%s8113_s8 + $0x5b8] sm:$0xff] %v607_v55  ;;  %v613_v58 = vld [vmem:[%s8108_s7 + $0xb70] sm:$0xff] }
  0x6d   : > { %610 = vst [vmem:[%s8113_s8 + $0x5c0] sm:$0xff] %v609_v56  ;;  %612 = vst [vmem:[%s8113_s8 + $0x5c8] sm:$0xff] %v611_v57  ;;  %v615_v59 = vld [vmem:[%s8108_s7 + $0xb78] sm:$0xff]  ;;  %v617_v60 = vld [vmem:[%s8108_s7 + $0xb80] sm:$0xff] }
  0x6e   : > { %614 = vst [vmem:[%s8113_s8 + $0x5d0] sm:$0xff] %v613_v58  ;;  %616 = vst [vmem:[%s8113_s8 + $0x5d8] sm:$0xff] %v615_v59  ;;  %v619_v61 = vld [vmem:[%s8108_s7 + $0xbd0] sm:$0xff]  ;;  %v621_v62 = vld [vmem:[%s8108_s7 + $0xbd8] sm:$0xff] }
  0x6f   : > { %618 = vst [vmem:[%s8113_s8 + $0x5e0] sm:$0xff] %v617_v60  ;;  %v623_v63 = vld [vmem:[%s8108_s7 + $0xbe0] sm:$0xff]  ;;  %620 = vst [vmem:[%s8113_s8 + $0x5e8] sm:$0xff] %v619_v61  ;;  %v625_v0 = vld [vmem:[%s8108_s7 + $0xbe8] sm:$0xff] }
  0x70   : > { %622 = vst [vmem:[%s8113_s8 + $0x5f0] sm:$0xff] %v621_v62  ;;  %624 = vst [vmem:[%s8113_s8 + $0x5f8] sm:$0xff] %v623_v63  ;;  %v627_v1 = vld [vmem:[%s8108_s7 + $0xbf0] sm:$0xff]  ;;  %v629_v2 = vld [vmem:[%s8108_s7 + $0xbf8] sm:$0xff] }
  0x71   : > { %626 = vst [vmem:[%s8113_s8 + $0x600] sm:$0xff] %v625_v0  ;;  %628 = vst [vmem:[%s8113_s8 + $0x608] sm:$0xff] %v627_v1  ;;  %v631_v3 = vld [vmem:[%s8108_s7 + $0xc00] sm:$0xff]  ;;  %v633_v4 = vld [vmem:[%s8108_s7 + $0xc08] sm:$0xff] }
  0x72   : > { %630 = vst [vmem:[%s8113_s8 + $0x610] sm:$0xff] %v629_v2  ;;  %v635_v5 = vld [vmem:[%s8108_s7 + $0xc10] sm:$0xff]  ;;  %632 = vst [vmem:[%s8113_s8 + $0x618] sm:$0xff] %v631_v3  ;;  %v637_v6 = vld [vmem:[%s8108_s7 + $0xc60] sm:$0xff] }
  0x73   : > { %634 = vst [vmem:[%s8113_s8 + $0x620] sm:$0xff] %v633_v4  ;;  %636 = vst [vmem:[%s8113_s8 + $0x628] sm:$0xff] %v635_v5  ;;  %v639_v7 = vld [vmem:[%s8108_s7 + $0xc68] sm:$0xff]  ;;  %v641_v8 = vld [vmem:[%s8108_s7 + $0xc70] sm:$0xff] }
  0x74   : > { %638 = vst [vmem:[%s8113_s8 + $0x630] sm:$0xff] %v637_v6  ;;  %640 = vst [vmem:[%s8113_s8 + $0x638] sm:$0xff] %v639_v7  ;;  %v643_v9 = vld [vmem:[%s8108_s7 + $0xc78] sm:$0xff]  ;;  %v645_v10 = vld [vmem:[%s8108_s7 + $0xc80] sm:$0xff] }
  0x75   : > { %642 = vst [vmem:[%s8113_s8 + $0x640] sm:$0xff] %v641_v8  ;;  %v647_v11 = vld [vmem:[%s8108_s7 + $0xc88] sm:$0xff]  ;;  %644 = vst [vmem:[%s8113_s8 + $0x648] sm:$0xff] %v643_v9  ;;  %v649_v12 = vld [vmem:[%s8108_s7 + $0xc90] sm:$0xff] }
  0x76   : > { %646 = vst [vmem:[%s8113_s8 + $0x650] sm:$0xff] %v645_v10  ;;  %648 = vst [vmem:[%s8113_s8 + $0x658] sm:$0xff] %v647_v11  ;;  %v651_v13 = vld [vmem:[%s8108_s7 + $0xc98] sm:$0xff]  ;;  %v653_v14 = vld [vmem:[%s8108_s7 + $0xca0] sm:$0xff] }
  0x77   : > { %650 = vst [vmem:[%s8113_s8 + $0x660] sm:$0xff] %v649_v12  ;;  %652 = vst [vmem:[%s8113_s8 + $0x668] sm:$0xff] %v651_v13  ;;  %v655_v15 = vld [vmem:[%s8108_s7 + $0xcf0] sm:$0xff]  ;;  %v657_v16 = vld [vmem:[%s8108_s7 + $0xcf8] sm:$0xff] }
  0x78   : > { %654 = vst [vmem:[%s8113_s8 + $0x670] sm:$0xff] %v653_v14  ;;  %v659_v17 = vld [vmem:[%s8108_s7 + $0xd00] sm:$0xff]  ;;  %656 = vst [vmem:[%s8113_s8 + $0x678] sm:$0xff] %v655_v15  ;;  %v661_v18 = vld [vmem:[%s8108_s7 + $0xd08] sm:$0xff] }
  0x79   : > { %658 = vst [vmem:[%s8113_s8 + $0x680] sm:$0xff] %v657_v16  ;;  %660 = vst [vmem:[%s8113_s8 + $0x688] sm:$0xff] %v659_v17  ;;  %v663_v19 = vld [vmem:[%s8108_s7 + $0xd10] sm:$0xff]  ;;  %v665_v20 = vld [vmem:[%s8108_s7 + $0xd18] sm:$0xff] }
  0x7a   : > { %662 = vst [vmem:[%s8113_s8 + $0x690] sm:$0xff] %v661_v18  ;;  %664 = vst [vmem:[%s8113_s8 + $0x698] sm:$0xff] %v663_v19  ;;  %v667_v21 = vld [vmem:[%s8108_s7 + $0xd20] sm:$0xff]  ;;  %v669_v22 = vld [vmem:[%s8108_s7 + $0xd28] sm:$0xff] }
  0x7b   : > { %666 = vst [vmem:[%s8113_s8 + $0x6a0] sm:$0xff] %v665_v20  ;;  %v671_v23 = vld [vmem:[%s8108_s7 + $0xd30] sm:$0xff]  ;;  %668 = vst [vmem:[%s8113_s8 + $0x6a8] sm:$0xff] %v667_v21  ;;  %v673_v24 = vld [vmem:[%s8108_s7 + $0xd80] sm:$0xff] }
  0x7c   : > { %670 = vst [vmem:[%s8113_s8 + $0x6b0] sm:$0xff] %v669_v22  ;;  %672 = vst [vmem:[%s8113_s8 + $0x6b8] sm:$0xff] %v671_v23  ;;  %v675_v25 = vld [vmem:[%s8108_s7 + $0xd88] sm:$0xff]  ;;  %v677_v26 = vld [vmem:[%s8108_s7 + $0xd90] sm:$0xff] }
  0x7d   : > { %674 = vst [vmem:[%s8113_s8 + $0x6c0] sm:$0xff] %v673_v24  ;;  %676 = vst [vmem:[%s8113_s8 + $0x6c8] sm:$0xff] %v675_v25  ;;  %v679_v27 = vld [vmem:[%s8108_s7 + $0xd98] sm:$0xff]  ;;  %v681_v28 = vld [vmem:[%s8108_s7 + $0xda0] sm:$0xff] }
  0x7e   : > { %678 = vst [vmem:[%s8113_s8 + $0x6d0] sm:$0xff] %v677_v26  ;;  %v683_v29 = vld [vmem:[%s8108_s7 + $0xda8] sm:$0xff]  ;;  %680 = vst [vmem:[%s8113_s8 + $0x6d8] sm:$0xff] %v679_v27  ;;  %v685_v30 = vld [vmem:[%s8108_s7 + $0xdb0] sm:$0xff] }
  0x7f   : > { %682 = vst [vmem:[%s8113_s8 + $0x6e0] sm:$0xff] %v681_v28  ;;  %684 = vst [vmem:[%s8113_s8 + $0x6e8] sm:$0xff] %v683_v29  ;;  %v687_v31 = vld [vmem:[%s8108_s7 + $0xdb8] sm:$0xff]  ;;  %v689_v32 = vld [vmem:[%s8108_s7 + $0xdc0] sm:$0xff] }
  0x80   : > { %686 = vst [vmem:[%s8113_s8 + $0x6f0] sm:$0xff] %v685_v30  ;;  %688 = vst [vmem:[%s8113_s8 + $0x6f8] sm:$0xff] %v687_v31  ;;  %v691_v33 = vld [vmem:[%s8108_s7 + $0xe10] sm:$0xff]  ;;  %v693_v34 = vld [vmem:[%s8108_s7 + $0xe18] sm:$0xff] }
  0x81   : > { %690 = vst [vmem:[%s8113_s8 + $0x700] sm:$0xff] %v689_v32  ;;  %v695_v35 = vld [vmem:[%s8108_s7 + $0xe20] sm:$0xff]  ;;  %692 = vst [vmem:[%s8113_s8 + $0x708] sm:$0xff] %v691_v33  ;;  %v697_v36 = vld [vmem:[%s8108_s7 + $0xe28] sm:$0xff] }
  0x82   : > { %694 = vst [vmem:[%s8113_s8 + $0x710] sm:$0xff] %v693_v34  ;;  %696 = vst [vmem:[%s8113_s8 + $0x718] sm:$0xff] %v695_v35  ;;  %v699_v37 = vld [vmem:[%s8108_s7 + $0xe30] sm:$0xff]  ;;  %v701_v38 = vld [vmem:[%s8108_s7 + $0xe38] sm:$0xff] }
  0x83   : > { %698 = vst [vmem:[%s8113_s8 + $0x720] sm:$0xff] %v697_v36  ;;  %700 = vst [vmem:[%s8113_s8 + $0x728] sm:$0xff] %v699_v37  ;;  %v703_v39 = vld [vmem:[%s8108_s7 + $0xe40] sm:$0xff]  ;;  %v705_v40 = vld [vmem:[%s8108_s7 + $0xe48] sm:$0xff] }
  0x84   : > { %702 = vst [vmem:[%s8113_s8 + $0x730] sm:$0xff] %v701_v38  ;;  %v707_v41 = vld [vmem:[%s8108_s7 + $0xe50] sm:$0xff]  ;;  %704 = vst [vmem:[%s8113_s8 + $0x738] sm:$0xff] %v703_v39  ;;  %v709_v42 = vld [vmem:[%s8108_s7 + $0xea0] sm:$0xff] }
  0x85   : > { %706 = vst [vmem:[%s8113_s8 + $0x740] sm:$0xff] %v705_v40  ;;  %708 = vst [vmem:[%s8113_s8 + $0x748] sm:$0xff] %v707_v41  ;;  %v711_v43 = vld [vmem:[%s8108_s7 + $0xea8] sm:$0xff]  ;;  %v713_v44 = vld [vmem:[%s8108_s7 + $0xeb0] sm:$0xff] }
  0x86   : > { %710 = vst [vmem:[%s8113_s8 + $0x750] sm:$0xff] %v709_v42  ;;  %712 = vst [vmem:[%s8113_s8 + $0x758] sm:$0xff] %v711_v43  ;;  %v715_v45 = vld [vmem:[%s8108_s7 + $0xeb8] sm:$0xff]  ;;  %v717_v46 = vld [vmem:[%s8108_s7 + $0xec0] sm:$0xff] }
  0x87   : > { %714 = vst [vmem:[%s8113_s8 + $0x760] sm:$0xff] %v713_v44  ;;  %v719_v47 = vld [vmem:[%s8108_s7 + $0xec8] sm:$0xff]  ;;  %716 = vst [vmem:[%s8113_s8 + $0x768] sm:$0xff] %v715_v45  ;;  %v721_v48 = vld [vmem:[%s8108_s7 + $0xed0] sm:$0xff] }
  0x88   : > { %718 = vst [vmem:[%s8113_s8 + $0x770] sm:$0xff] %v717_v46  ;;  %720 = vst [vmem:[%s8113_s8 + $0x778] sm:$0xff] %v719_v47  ;;  %v723_v49 = vld [vmem:[%s8108_s7 + $0xed8] sm:$0xff]  ;;  %v725_v50 = vld [vmem:[%s8108_s7 + $0xee0] sm:$0xff] }
  0x89   : > { %722 = vst [vmem:[%s8113_s8 + $0x780] sm:$0xff] %v721_v48  ;;  %724 = vst [vmem:[%s8113_s8 + $0x788] sm:$0xff] %v723_v49  ;;  %v727_v51 = vld [vmem:[%s8108_s7 + $0xf30] sm:$0xff]  ;;  %v729_v52 = vld [vmem:[%s8108_s7 + $0xf38] sm:$0xff] }
  0x8a   : > { %726 = vst [vmem:[%s8113_s8 + $0x790] sm:$0xff] %v725_v50  ;;  %v731_v53 = vld [vmem:[%s8108_s7 + $0xf40] sm:$0xff]  ;;  %728 = vst [vmem:[%s8113_s8 + $0x798] sm:$0xff] %v727_v51  ;;  %v733_v54 = vld [vmem:[%s8108_s7 + $0xf48] sm:$0xff] }
  0x8b   : > { %730 = vst [vmem:[%s8113_s8 + $0x7a0] sm:$0xff] %v729_v52  ;;  %732 = vst [vmem:[%s8113_s8 + $0x7a8] sm:$0xff] %v731_v53  ;;  %v735_v55 = vld [vmem:[%s8108_s7 + $0xf50] sm:$0xff]  ;;  %v737_v56 = vld [vmem:[%s8108_s7 + $0xf58] sm:$0xff] }
  0x8c   : > { %734 = vst [vmem:[%s8113_s8 + $0x7b0] sm:$0xff] %v733_v54  ;;  %736 = vst [vmem:[%s8113_s8 + $0x7b8] sm:$0xff] %v735_v55  ;;  %v739_v57 = vld [vmem:[%s8108_s7 + $0xf60] sm:$0xff]  ;;  %v741_v58 = vld [vmem:[%s8108_s7 + $0xf68] sm:$0xff] }
  0x8d   : > { %738 = vst [vmem:[%s8113_s8 + $0x7c0] sm:$0xff] %v737_v56  ;;  %v743_v59 = vld [vmem:[%s8108_s7 + $0xf70] sm:$0xff]  ;;  %740 = vst [vmem:[%s8113_s8 + $0x7c8] sm:$0xff] %v739_v57  ;;  %v745_v60 = vld [vmem:[%s8108_s7 + $0xfc0] sm:$0xff] }
  0x8e   : > { %742 = vst [vmem:[%s8113_s8 + $0x7d0] sm:$0xff] %v741_v58  ;;  %744 = vst [vmem:[%s8113_s8 + $0x7d8] sm:$0xff] %v743_v59  ;;  %v747_v61 = vld [vmem:[%s8108_s7 + $0xfc8] sm:$0xff]  ;;  %v749_v62 = vld [vmem:[%s8108_s7 + $0xfd0] sm:$0xff] }
  0x8f   : > { %746 = vst [vmem:[%s8113_s8 + $0x7e0] sm:$0xff] %v745_v60  ;;  %748 = vst [vmem:[%s8113_s8 + $0x7e8] sm:$0xff] %v747_v61  ;;  %v751_v63 = vld [vmem:[%s8108_s7 + $0xfd8] sm:$0xff]  ;;  %v753_v0 = vld [vmem:[%s8108_s7 + $0xfe0] sm:$0xff] }
  0x90   : > { %750 = vst [vmem:[%s8113_s8 + $0x7f0] sm:$0xff] %v749_v62  ;;  %v755_v1 = vld [vmem:[%s8108_s7 + $0xfe8] sm:$0xff]  ;;  %752 = vst [vmem:[%s8113_s8 + $0x7f8] sm:$0xff] %v751_v63  ;;  %v757_v2 = vld [vmem:[%s8108_s7 + $0xff0] sm:$0xff] }
  0x91   : > { %754 = vst [vmem:[%s8113_s8 + $0x800] sm:$0xff] %v753_v0  ;;  %756 = vst [vmem:[%s8113_s8 + $0x808] sm:$0xff] %v755_v1  ;;  %v759_v3 = vld [vmem:[%s8108_s7 + $0xff8] sm:$0xff]  ;;  %v761_v4 = vld [vmem:[%s8108_s7 + $0x1000] sm:$0xff] }
  0x92   : > { %758 = vst [vmem:[%s8113_s8 + $0x810] sm:$0xff] %v757_v2  ;;  %760 = vst [vmem:[%s8113_s8 + $0x818] sm:$0xff] %v759_v3  ;;  %v763_v5 = vld [vmem:[%s8108_s7 + $0x1050] sm:$0xff]  ;;  %v765_v6 = vld [vmem:[%s8108_s7 + $0x1058] sm:$0xff] }
  0x93   : > { %762 = vst [vmem:[%s8113_s8 + $0x820] sm:$0xff] %v761_v4  ;;  %v767_v7 = vld [vmem:[%s8108_s7 + $0x1060] sm:$0xff]  ;;  %764 = vst [vmem:[%s8113_s8 + $0x828] sm:$0xff] %v763_v5  ;;  %v769_v8 = vld [vmem:[%s8108_s7 + $0x1068] sm:$0xff] }
  0x94   : > { %766 = vst [vmem:[%s8113_s8 + $0x830] sm:$0xff] %v765_v6  ;;  %768 = vst [vmem:[%s8113_s8 + $0x838] sm:$0xff] %v767_v7  ;;  %v771_v9 = vld [vmem:[%s8108_s7 + $0x1070] sm:$0xff]  ;;  %v773_v10 = vld [vmem:[%s8108_s7 + $0x1078] sm:$0xff] }
  0x95   : > { %770 = vst [vmem:[%s8113_s8 + $0x840] sm:$0xff] %v769_v8  ;;  %772 = vst [vmem:[%s8113_s8 + $0x848] sm:$0xff] %v771_v9  ;;  %v775_v11 = vld [vmem:[%s8108_s7 + $0x1080] sm:$0xff]  ;;  %v777_v12 = vld [vmem:[%s8108_s7 + $0x1088] sm:$0xff] }
  0x96   : > { %774 = vst [vmem:[%s8113_s8 + $0x850] sm:$0xff] %v773_v10  ;;  %v779_v13 = vld [vmem:[%s8108_s7 + $0x1090] sm:$0xff]  ;;  %776 = vst [vmem:[%s8113_s8 + $0x858] sm:$0xff] %v775_v11  ;;  %v781_v14 = vld [vmem:[%s8108_s7 + $0x10e0] sm:$0xff] }
  0x97   : > { %778 = vst [vmem:[%s8113_s8 + $0x860] sm:$0xff] %v777_v12  ;;  %780 = vst [vmem:[%s8113_s8 + $0x868] sm:$0xff] %v779_v13  ;;  %v783_v15 = vld [vmem:[%s8108_s7 + $0x10e8] sm:$0xff]  ;;  %v785_v16 = vld [vmem:[%s8108_s7 + $0x10f0] sm:$0xff] }
  0x98   : > { %782 = vst [vmem:[%s8113_s8 + $0x870] sm:$0xff] %v781_v14  ;;  %784 = vst [vmem:[%s8113_s8 + $0x878] sm:$0xff] %v783_v15  ;;  %v787_v17 = vld [vmem:[%s8108_s7 + $0x10f8] sm:$0xff]  ;;  %v789_v18 = vld [vmem:[%s8108_s7 + $0x1100] sm:$0xff] }
  0x99   : > { %786 = vst [vmem:[%s8113_s8 + $0x880] sm:$0xff] %v785_v16  ;;  %v791_v19 = vld [vmem:[%s8108_s7 + $0x1108] sm:$0xff]  ;;  %788 = vst [vmem:[%s8113_s8 + $0x888] sm:$0xff] %v787_v17  ;;  %v793_v20 = vld [vmem:[%s8108_s7 + $0x1110] sm:$0xff] }
  0x9a   : > { %790 = vst [vmem:[%s8113_s8 + $0x890] sm:$0xff] %v789_v18  ;;  %792 = vst [vmem:[%s8113_s8 + $0x898] sm:$0xff] %v791_v19  ;;  %v795_v21 = vld [vmem:[%s8108_s7 + $0x1118] sm:$0xff]  ;;  %v797_v22 = vld [vmem:[%s8108_s7 + $0x1120] sm:$0xff] }
  0x9b   : > { %794 = vst [vmem:[%s8113_s8 + $0x8a0] sm:$0xff] %v793_v20  ;;  %796 = vst [vmem:[%s8113_s8 + $0x8a8] sm:$0xff] %v795_v21  ;;  %v799_v23 = vld [vmem:[%s8108_s7 + $0x1170] sm:$0xff]  ;;  %v801_v24 = vld [vmem:[%s8108_s7 + $0x1178] sm:$0xff] }
  0x9c   : > { %798 = vst [vmem:[%s8113_s8 + $0x8b0] sm:$0xff] %v797_v22  ;;  %v803_v25 = vld [vmem:[%s8108_s7 + $0x1180] sm:$0xff]  ;;  %800 = vst [vmem:[%s8113_s8 + $0x8b8] sm:$0xff] %v799_v23  ;;  %v805_v26 = vld [vmem:[%s8108_s7 + $0x1188] sm:$0xff] }
  0x9d   : > { %802 = vst [vmem:[%s8113_s8 + $0x8c0] sm:$0xff] %v801_v24  ;;  %804 = vst [vmem:[%s8113_s8 + $0x8c8] sm:$0xff] %v803_v25  ;;  %v807_v27 = vld [vmem:[%s8108_s7 + $0x1190] sm:$0xff]  ;;  %v809_v28 = vld [vmem:[%s8108_s7 + $0x1198] sm:$0xff] }
  0x9e   : > { %806 = vst [vmem:[%s8113_s8 + $0x8d0] sm:$0xff] %v805_v26  ;;  %808 = vst [vmem:[%s8113_s8 + $0x8d8] sm:$0xff] %v807_v27  ;;  %v811_v29 = vld [vmem:[%s8108_s7 + $0x11a0] sm:$0xff]  ;;  %v813_v30 = vld [vmem:[%s8108_s7 + $0x11a8] sm:$0xff] }
  0x9f   : > { %810 = vst [vmem:[%s8113_s8 + $0x8e0] sm:$0xff] %v809_v28  ;;  %v815_v31 = vld [vmem:[%s8108_s7 + $0x11b0] sm:$0xff]  ;;  %812 = vst [vmem:[%s8113_s8 + $0x8e8] sm:$0xff] %v811_v29  ;;  %v817_v32 = vld [vmem:[%s8108_s7 + $0x1200] sm:$0xff] }
  0xa0   : > { %814 = vst [vmem:[%s8113_s8 + $0x8f0] sm:$0xff] %v813_v30  ;;  %816 = vst [vmem:[%s8113_s8 + $0x8f8] sm:$0xff] %v815_v31  ;;  %v819_v33 = vld [vmem:[%s8108_s7 + $0x1208] sm:$0xff]  ;;  %v821_v34 = vld [vmem:[%s8108_s7 + $0x1210] sm:$0xff] }
  0xa1   : > { %818 = vst [vmem:[%s8113_s8 + $0x900] sm:$0xff] %v817_v32  ;;  %820 = vst [vmem:[%s8113_s8 + $0x908] sm:$0xff] %v819_v33  ;;  %v823_v35 = vld [vmem:[%s8108_s7 + $0x1218] sm:$0xff]  ;;  %v825_v36 = vld [vmem:[%s8108_s7 + $0x1220] sm:$0xff] }
  0xa2   : > { %822 = vst [vmem:[%s8113_s8 + $0x910] sm:$0xff] %v821_v34  ;;  %v827_v37 = vld [vmem:[%s8108_s7 + $0x1228] sm:$0xff]  ;;  %824 = vst [vmem:[%s8113_s8 + $0x918] sm:$0xff] %v823_v35  ;;  %v829_v38 = vld [vmem:[%s8108_s7 + $0x1230] sm:$0xff] }
  0xa3   : > { %826 = vst [vmem:[%s8113_s8 + $0x920] sm:$0xff] %v825_v36  ;;  %828 = vst [vmem:[%s8113_s8 + $0x928] sm:$0xff] %v827_v37  ;;  %v831_v39 = vld [vmem:[%s8108_s7 + $0x1238] sm:$0xff]  ;;  %v833_v40 = vld [vmem:[%s8108_s7 + $0x1240] sm:$0xff] }
  0xa4   : > { %830 = vst [vmem:[%s8113_s8 + $0x930] sm:$0xff] %v829_v38  ;;  %832 = vst [vmem:[%s8113_s8 + $0x938] sm:$0xff] %v831_v39  ;;  %v835_v41 = vld [vmem:[%s8108_s7 + $0x1290] sm:$0xff]  ;;  %v837_v42 = vld [vmem:[%s8108_s7 + $0x1298] sm:$0xff] }
  0xa5   : > { %834 = vst [vmem:[%s8113_s8 + $0x940] sm:$0xff] %v833_v40  ;;  %v839_v43 = vld [vmem:[%s8108_s7 + $0x12a0] sm:$0xff]  ;;  %836 = vst [vmem:[%s8113_s8 + $0x948] sm:$0xff] %v835_v41  ;;  %v841_v44 = vld [vmem:[%s8108_s7 + $0x12a8] sm:$0xff] }
  0xa6   : > { %838 = vst [vmem:[%s8113_s8 + $0x950] sm:$0xff] %v837_v42  ;;  %840 = vst [vmem:[%s8113_s8 + $0x958] sm:$0xff] %v839_v43  ;;  %v843_v45 = vld [vmem:[%s8108_s7 + $0x12b0] sm:$0xff]  ;;  %v845_v46 = vld [vmem:[%s8108_s7 + $0x12b8] sm:$0xff] }
  0xa7   : > { %842 = vst [vmem:[%s8113_s8 + $0x960] sm:$0xff] %v841_v44  ;;  %844 = vst [vmem:[%s8113_s8 + $0x968] sm:$0xff] %v843_v45  ;;  %v847_v47 = vld [vmem:[%s8108_s7 + $0x12c0] sm:$0xff]  ;;  %v849_v48 = vld [vmem:[%s8108_s7 + $0x12c8] sm:$0xff] }
  0xa8   : > { %846 = vst [vmem:[%s8113_s8 + $0x970] sm:$0xff] %v845_v46  ;;  %v851_v49 = vld [vmem:[%s8108_s7 + $0x12d0] sm:$0xff]  ;;  %848 = vst [vmem:[%s8113_s8 + $0x978] sm:$0xff] %v847_v47  ;;  %v853_v50 = vld [vmem:[%s8108_s7 + $0x1320] sm:$0xff] }
  0xa9   : > { %850 = vst [vmem:[%s8113_s8 + $0x980] sm:$0xff] %v849_v48  ;;  %852 = vst [vmem:[%s8113_s8 + $0x988] sm:$0xff] %v851_v49  ;;  %v855_v51 = vld [vmem:[%s8108_s7 + $0x1328] sm:$0xff]  ;;  %v857_v52 = vld [vmem:[%s8108_s7 + $0x1330] sm:$0xff] }
  0xaa   : > { %854 = vst [vmem:[%s8113_s8 + $0x990] sm:$0xff] %v853_v50  ;;  %856 = vst [vmem:[%s8113_s8 + $0x998] sm:$0xff] %v855_v51  ;;  %v859_v53 = vld [vmem:[%s8108_s7 + $0x1338] sm:$0xff]  ;;  %v861_v54 = vld [vmem:[%s8108_s7 + $0x1340] sm:$0xff] }
  0xab   : > { %858 = vst [vmem:[%s8113_s8 + $0x9a0] sm:$0xff] %v857_v52  ;;  %v863_v55 = vld [vmem:[%s8108_s7 + $0x1348] sm:$0xff]  ;;  %860 = vst [vmem:[%s8113_s8 + $0x9a8] sm:$0xff] %v859_v53  ;;  %v865_v56 = vld [vmem:[%s8108_s7 + $0x1350] sm:$0xff] }
  0xac   : > { %862 = vst [vmem:[%s8113_s8 + $0x9b0] sm:$0xff] %v861_v54  ;;  %864 = vst [vmem:[%s8113_s8 + $0x9b8] sm:$0xff] %v863_v55  ;;  %v867_v57 = vld [vmem:[%s8108_s7 + $0x1358] sm:$0xff]  ;;  %v869_v58 = vld [vmem:[%s8108_s7 + $0x1360] sm:$0xff] }
  0xad   : > { %866 = vst [vmem:[%s8113_s8 + $0x9c0] sm:$0xff] %v865_v56  ;;  %868 = vst [vmem:[%s8113_s8 + $0x9c8] sm:$0xff] %v867_v57  ;;  %v871_v59 = vld [vmem:[%s8108_s7 + $0x13b0] sm:$0xff]  ;;  %v873_v60 = vld [vmem:[%s8108_s7 + $0x13b8] sm:$0xff] }
  0xae   : > { %870 = vst [vmem:[%s8113_s8 + $0x9d0] sm:$0xff] %v869_v58  ;;  %v875_v61 = vld [vmem:[%s8108_s7 + $0x13c0] sm:$0xff]  ;;  %872 = vst [vmem:[%s8113_s8 + $0x9d8] sm:$0xff] %v871_v59  ;;  %v877_v62 = vld [vmem:[%s8108_s7 + $0x13c8] sm:$0xff] }
  0xaf   : > { %874 = vst [vmem:[%s8113_s8 + $0x9e0] sm:$0xff] %v873_v60  ;;  %876 = vst [vmem:[%s8113_s8 + $0x9e8] sm:$0xff] %v875_v61  ;;  %v879_v63 = vld [vmem:[%s8108_s7 + $0x13d0] sm:$0xff]  ;;  %v881_v0 = vld [vmem:[%s8108_s7 + $0x13d8] sm:$0xff] }
  0xb0   : > { %878 = vst [vmem:[%s8113_s8 + $0x9f0] sm:$0xff] %v877_v62  ;;  %880 = vst [vmem:[%s8113_s8 + $0x9f8] sm:$0xff] %v879_v63  ;;  %v883_v1 = vld [vmem:[%s8108_s7 + $0x13e0] sm:$0xff]  ;;  %v885_v2 = vld [vmem:[%s8108_s7 + $0x13e8] sm:$0xff] }
  0xb1   : > { %882 = vst [vmem:[%s8113_s8 + $0xa00] sm:$0xff] %v881_v0  ;;  %v887_v3 = vld [vmem:[%s8108_s7 + $0x13f0] sm:$0xff]  ;;  %884 = vst [vmem:[%s8113_s8 + $0xa08] sm:$0xff] %v883_v1  ;;  %v889_v4 = vld [vmem:[%s8108_s7 + $0x1440] sm:$0xff] }
  0xb2   : > { %886 = vst [vmem:[%s8113_s8 + $0xa10] sm:$0xff] %v885_v2  ;;  %888 = vst [vmem:[%s8113_s8 + $0xa18] sm:$0xff] %v887_v3  ;;  %v891_v5 = vld [vmem:[%s8108_s7 + $0x1448] sm:$0xff]  ;;  %v893_v6 = vld [vmem:[%s8108_s7 + $0x1450] sm:$0xff] }
  0xb3   : > { %890 = vst [vmem:[%s8113_s8 + $0xa20] sm:$0xff] %v889_v4  ;;  %892 = vst [vmem:[%s8113_s8 + $0xa28] sm:$0xff] %v891_v5  ;;  %v895_v7 = vld [vmem:[%s8108_s7 + $0x1458] sm:$0xff]  ;;  %v897_v8 = vld [vmem:[%s8108_s7 + $0x1460] sm:$0xff] }
  0xb4   : > { %894 = vst [vmem:[%s8113_s8 + $0xa30] sm:$0xff] %v893_v6  ;;  %v899_v9 = vld [vmem:[%s8108_s7 + $0x1468] sm:$0xff]  ;;  %896 = vst [vmem:[%s8113_s8 + $0xa38] sm:$0xff] %v895_v7  ;;  %v901_v10 = vld [vmem:[%s8108_s7 + $0x1470] sm:$0xff] }
  0xb5   : > { %898 = vst [vmem:[%s8113_s8 + $0xa40] sm:$0xff] %v897_v8  ;;  %900 = vst [vmem:[%s8113_s8 + $0xa48] sm:$0xff] %v899_v9  ;;  %v903_v11 = vld [vmem:[%s8108_s7 + $0x1478] sm:$0xff]  ;;  %v905_v12 = vld [vmem:[%s8108_s7 + $0x1480] sm:$0xff] }
  0xb6   : > { %902 = vst [vmem:[%s8113_s8 + $0xa50] sm:$0xff] %v901_v10  ;;  %904 = vst [vmem:[%s8113_s8 + $0xa58] sm:$0xff] %v903_v11  ;;  %v907_v13 = vld [vmem:[%s8108_s7 + $0x14d0] sm:$0xff]  ;;  %v909_v14 = vld [vmem:[%s8108_s7 + $0x14d8] sm:$0xff] }
  0xb7   : > { %906 = vst [vmem:[%s8113_s8 + $0xa60] sm:$0xff] %v905_v12  ;;  %v911_v15 = vld [vmem:[%s8108_s7 + $0x14e0] sm:$0xff]  ;;  %908 = vst [vmem:[%s8113_s8 + $0xa68] sm:$0xff] %v907_v13  ;;  %v913_v16 = vld [vmem:[%s8108_s7 + $0x14e8] sm:$0xff] }
  0xb8   : > { %910 = vst [vmem:[%s8113_s8 + $0xa70] sm:$0xff] %v909_v14  ;;  %912 = vst [vmem:[%s8113_s8 + $0xa78] sm:$0xff] %v911_v15  ;;  %v915_v17 = vld [vmem:[%s8108_s7 + $0x14f0] sm:$0xff]  ;;  %v917_v18 = vld [vmem:[%s8108_s7 + $0x14f8] sm:$0xff] }
  0xb9   : > { %914 = vst [vmem:[%s8113_s8 + $0xa80] sm:$0xff] %v913_v16  ;;  %916 = vst [vmem:[%s8113_s8 + $0xa88] sm:$0xff] %v915_v17  ;;  %v919_v19 = vld [vmem:[%s8108_s7 + $0x1500] sm:$0xff]  ;;  %v921_v20 = vld [vmem:[%s8108_s7 + $0x1508] sm:$0xff] }
  0xba   : > { %918 = vst [vmem:[%s8113_s8 + $0xa90] sm:$0xff] %v917_v18  ;;  %v923_v21 = vld [vmem:[%s8108_s7 + $0x1510] sm:$0xff]  ;;  %920 = vst [vmem:[%s8113_s8 + $0xa98] sm:$0xff] %v919_v19  ;;  %v925_v22 = vld [vmem:[%s8108_s7 + $0x1560] sm:$0xff] }
  0xbb   : > { %922 = vst [vmem:[%s8113_s8 + $0xaa0] sm:$0xff] %v921_v20  ;;  %924 = vst [vmem:[%s8113_s8 + $0xaa8] sm:$0xff] %v923_v21  ;;  %v927_v23 = vld [vmem:[%s8108_s7 + $0x1568] sm:$0xff]  ;;  %v929_v24 = vld [vmem:[%s8108_s7 + $0x1570] sm:$0xff] }
  0xbc   : > { %926 = vst [vmem:[%s8113_s8 + $0xab0] sm:$0xff] %v925_v22  ;;  %928 = vst [vmem:[%s8113_s8 + $0xab8] sm:$0xff] %v927_v23  ;;  %v931_v25 = vld [vmem:[%s8108_s7 + $0x1578] sm:$0xff]  ;;  %v933_v26 = vld [vmem:[%s8108_s7 + $0x1580] sm:$0xff] }
  0xbd   : > { %930 = vst [vmem:[%s8113_s8 + $0xac0] sm:$0xff] %v929_v24  ;;  %v935_v27 = vld [vmem:[%s8108_s7 + $0x1588] sm:$0xff]  ;;  %932 = vst [vmem:[%s8113_s8 + $0xac8] sm:$0xff] %v931_v25  ;;  %v937_v28 = vld [vmem:[%s8108_s7 + $0x1590] sm:$0xff] }
  0xbe   : > { %934 = vst [vmem:[%s8113_s8 + $0xad0] sm:$0xff] %v933_v26  ;;  %936 = vst [vmem:[%s8113_s8 + $0xad8] sm:$0xff] %v935_v27  ;;  %v939_v29 = vld [vmem:[%s8108_s7 + $0x1598] sm:$0xff]  ;;  %v941_v30 = vld [vmem:[%s8108_s7 + $0x15a0] sm:$0xff] }
  0xbf   : > { %938 = vst [vmem:[%s8113_s8 + $0xae0] sm:$0xff] %v937_v28  ;;  %940 = vst [vmem:[%s8113_s8 + $0xae8] sm:$0xff] %v939_v29  ;;  %v943_v31 = vld [vmem:[%s8108_s7 + $0x15f0] sm:$0xff]  ;;  %v945_v32 = vld [vmem:[%s8108_s7 + $0x15f8] sm:$0xff] }
  0xc0   : > { %942 = vst [vmem:[%s8113_s8 + $0xaf0] sm:$0xff] %v941_v30  ;;  %v947_v33 = vld [vmem:[%s8108_s7 + $0x1600] sm:$0xff]  ;;  %944 = vst [vmem:[%s8113_s8 + $0xaf8] sm:$0xff] %v943_v31  ;;  %v949_v34 = vld [vmem:[%s8108_s7 + $0x1608] sm:$0xff] }
  0xc1   : > { %946 = vst [vmem:[%s8113_s8 + $0xb00] sm:$0xff] %v945_v32  ;;  %948 = vst [vmem:[%s8113_s8 + $0xb08] sm:$0xff] %v947_v33  ;;  %v951_v35 = vld [vmem:[%s8108_s7 + $0x1610] sm:$0xff]  ;;  %v953_v36 = vld [vmem:[%s8108_s7 + $0x1618] sm:$0xff] }
  0xc2   : > { %950 = vst [vmem:[%s8113_s8 + $0xb10] sm:$0xff] %v949_v34  ;;  %952 = vst [vmem:[%s8113_s8 + $0xb18] sm:$0xff] %v951_v35  ;;  %v955_v37 = vld [vmem:[%s8108_s7 + $0x1620] sm:$0xff]  ;;  %v957_v38 = vld [vmem:[%s8108_s7 + $0x1628] sm:$0xff] }
  0xc3   : > { %954 = vst [vmem:[%s8113_s8 + $0xb20] sm:$0xff] %v953_v36  ;;  %v959_v39 = vld [vmem:[%s8108_s7 + $0x1630] sm:$0xff]  ;;  %956 = vst [vmem:[%s8113_s8 + $0xb28] sm:$0xff] %v955_v37  ;;  %v961_v40 = vld [vmem:[%s8108_s7 + $0x1680] sm:$0xff] }
  0xc4   : > { %958 = vst [vmem:[%s8113_s8 + $0xb30] sm:$0xff] %v957_v38  ;;  %960 = vst [vmem:[%s8113_s8 + $0xb38] sm:$0xff] %v959_v39  ;;  %v963_v41 = vld [vmem:[%s8108_s7 + $0x1688] sm:$0xff]  ;;  %v965_v42 = vld [vmem:[%s8108_s7 + $0x1690] sm:$0xff] }
  0xc5   : > { %962 = vst [vmem:[%s8113_s8 + $0xb40] sm:$0xff] %v961_v40  ;;  %964 = vst [vmem:[%s8113_s8 + $0xb48] sm:$0xff] %v963_v41  ;;  %v967_v43 = vld [vmem:[%s8108_s7 + $0x1698] sm:$0xff]  ;;  %v969_v44 = vld [vmem:[%s8108_s7 + $0x16a0] sm:$0xff] }
  0xc6   : > { %966 = vst [vmem:[%s8113_s8 + $0xb50] sm:$0xff] %v965_v42  ;;  %v971_v45 = vld [vmem:[%s8108_s7 + $0x16a8] sm:$0xff]  ;;  %968 = vst [vmem:[%s8113_s8 + $0xb58] sm:$0xff] %v967_v43  ;;  %v973_v46 = vld [vmem:[%s8108_s7 + $0x16b0] sm:$0xff] }
  0xc7   : > { %970 = vst [vmem:[%s8113_s8 + $0xb60] sm:$0xff] %v969_v44  ;;  %972 = vst [vmem:[%s8113_s8 + $0xb68] sm:$0xff] %v971_v45  ;;  %v975_v47 = vld [vmem:[%s8108_s7 + $0x16b8] sm:$0xff]  ;;  %v977_v48 = vld [vmem:[%s8108_s7 + $0x16c0] sm:$0xff] }
  0xc8   : > { %974 = vst [vmem:[%s8113_s8 + $0xb70] sm:$0xff] %v973_v46  ;;  %976 = vst [vmem:[%s8113_s8 + $0xb78] sm:$0xff] %v975_v47  ;;  %v979_v49 = vld [vmem:[%s8108_s7 + $0x1710] sm:$0xff]  ;;  %v981_v50 = vld [vmem:[%s8108_s7 + $0x1718] sm:$0xff] }
  0xc9   : > { %978 = vst [vmem:[%s8113_s8 + $0xb80] sm:$0xff] %v977_v48  ;;  %v983_v51 = vld [vmem:[%s8108_s7 + $0x1720] sm:$0xff]  ;;  %980 = vst [vmem:[%s8113_s8 + $0xb88] sm:$0xff] %v979_v49  ;;  %v985_v52 = vld [vmem:[%s8108_s7 + $0x1728] sm:$0xff] }
  0xca   : > { %982 = vst [vmem:[%s8113_s8 + $0xb90] sm:$0xff] %v981_v50  ;;  %984 = vst [vmem:[%s8113_s8 + $0xb98] sm:$0xff] %v983_v51  ;;  %v987_v53 = vld [vmem:[%s8108_s7 + $0x1730] sm:$0xff]  ;;  %v989_v54 = vld [vmem:[%s8108_s7 + $0x1738] sm:$0xff] }
  0xcb   : > { %986 = vst [vmem:[%s8113_s8 + $0xba0] sm:$0xff] %v985_v52  ;;  %988 = vst [vmem:[%s8113_s8 + $0xba8] sm:$0xff] %v987_v53  ;;  %v991_v55 = vld [vmem:[%s8108_s7 + $0x1740] sm:$0xff]  ;;  %v993_v56 = vld [vmem:[%s8108_s7 + $0x1748] sm:$0xff] }
  0xcc   : > { %990 = vst [vmem:[%s8113_s8 + $0xbb0] sm:$0xff] %v989_v54  ;;  %v995_v57 = vld [vmem:[%s8108_s7 + $0x1750] sm:$0xff]  ;;  %992 = vst [vmem:[%s8113_s8 + $0xbb8] sm:$0xff] %v991_v55  ;;  %v997_v58 = vld [vmem:[%s8108_s7 + $0x17a0] sm:$0xff] }
  0xcd   : > { %994 = vst [vmem:[%s8113_s8 + $0xbc0] sm:$0xff] %v993_v56  ;;  %996 = vst [vmem:[%s8113_s8 + $0xbc8] sm:$0xff] %v995_v57  ;;  %v999_v59 = vld [vmem:[%s8108_s7 + $0x17a8] sm:$0xff]  ;;  %v1001_v60 = vld [vmem:[%s8108_s7 + $0x17b0] sm:$0xff] }
  0xce   : > { %998 = vst [vmem:[%s8113_s8 + $0xbd0] sm:$0xff] %v997_v58  ;;  %1000 = vst [vmem:[%s8113_s8 + $0xbd8] sm:$0xff] %v999_v59  ;;  %v1003_v61 = vld [vmem:[%s8108_s7 + $0x17b8] sm:$0xff]  ;;  %v1005_v62 = vld [vmem:[%s8108_s7 + $0x17c0] sm:$0xff] }
  0xcf   : > { %1002 = vst [vmem:[%s8113_s8 + $0xbe0] sm:$0xff] %v1001_v60  ;;  %v1007_v63 = vld [vmem:[%s8108_s7 + $0x17c8] sm:$0xff]  ;;  %1004 = vst [vmem:[%s8113_s8 + $0xbe8] sm:$0xff] %v1003_v61  ;;  %v1009_v0 = vld [vmem:[%s8108_s7 + $0x17d0] sm:$0xff] }
  0xd0   : > { %1006 = vst [vmem:[%s8113_s8 + $0xbf0] sm:$0xff] %v1005_v62  ;;  %1008 = vst [vmem:[%s8113_s8 + $0xbf8] sm:$0xff] %v1007_v63  ;;  %v1011_v1 = vld [vmem:[%s8108_s7 + $0x17d8] sm:$0xff]  ;;  %v1013_v2 = vld [vmem:[%s8108_s7 + $0x17e0] sm:$0xff] }
  0xd1   : > { %1010 = vst [vmem:[%s8113_s8 + $0xc00] sm:$0xff] %v1009_v0  ;;  %1012 = vst [vmem:[%s8113_s8 + $0xc08] sm:$0xff] %v1011_v1  ;;  %v1015_v3 = vld [vmem:[%s8108_s7 + $0x1830] sm:$0xff]  ;;  %v1017_v4 = vld [vmem:[%s8108_s7 + $0x1838] sm:$0xff] }
  0xd2   : > { %1014 = vst [vmem:[%s8113_s8 + $0xc10] sm:$0xff] %v1013_v2  ;;  %v1019_v5 = vld [vmem:[%s8108_s7 + $0x1840] sm:$0xff]  ;;  %1016 = vst [vmem:[%s8113_s8 + $0xc18] sm:$0xff] %v1015_v3  ;;  %v1021_v6 = vld [vmem:[%s8108_s7 + $0x1848] sm:$0xff] }
  0xd3   : > { %1018 = vst [vmem:[%s8113_s8 + $0xc20] sm:$0xff] %v1017_v4  ;;  %1020 = vst [vmem:[%s8113_s8 + $0xc28] sm:$0xff] %v1019_v5  ;;  %v1023_v7 = vld [vmem:[%s8108_s7 + $0x1850] sm:$0xff]  ;;  %v1025_v8 = vld [vmem:[%s8108_s7 + $0x1858] sm:$0xff] }
  0xd4   : > { %1022 = vst [vmem:[%s8113_s8 + $0xc30] sm:$0xff] %v1021_v6  ;;  %1024 = vst [vmem:[%s8113_s8 + $0xc38] sm:$0xff] %v1023_v7  ;;  %v1027_v9 = vld [vmem:[%s8108_s7 + $0x1860] sm:$0xff]  ;;  %v1029_v10 = vld [vmem:[%s8108_s7 + $0x1868] sm:$0xff] }
  0xd5   : > { %1026 = vst [vmem:[%s8113_s8 + $0xc40] sm:$0xff] %v1025_v8  ;;  %v1031_v11 = vld [vmem:[%s8108_s7 + $0x1870] sm:$0xff]  ;;  %1028 = vst [vmem:[%s8113_s8 + $0xc48] sm:$0xff] %v1027_v9  ;;  %v1033_v12 = vld [vmem:[%s8108_s7 + $0x18c0] sm:$0xff] }
  0xd6   : > { %1030 = vst [vmem:[%s8113_s8 + $0xc50] sm:$0xff] %v1029_v10  ;;  %1032 = vst [vmem:[%s8113_s8 + $0xc58] sm:$0xff] %v1031_v11  ;;  %v1035_v13 = vld [vmem:[%s8108_s7 + $0x18c8] sm:$0xff]  ;;  %v1037_v14 = vld [vmem:[%s8108_s7 + $0x18d0] sm:$0xff] }
  0xd7   : > { %1034 = vst [vmem:[%s8113_s8 + $0xc60] sm:$0xff] %v1033_v12  ;;  %1036 = vst [vmem:[%s8113_s8 + $0xc68] sm:$0xff] %v1035_v13  ;;  %v1039_v15 = vld [vmem:[%s8108_s7 + $0x18d8] sm:$0xff]  ;;  %v1041_v16 = vld [vmem:[%s8108_s7 + $0x18e0] sm:$0xff] }
  0xd8   : > { %1038 = vst [vmem:[%s8113_s8 + $0xc70] sm:$0xff] %v1037_v14  ;;  %v1043_v17 = vld [vmem:[%s8108_s7 + $0x18e8] sm:$0xff]  ;;  %1040 = vst [vmem:[%s8113_s8 + $0xc78] sm:$0xff] %v1039_v15  ;;  %v1045_v18 = vld [vmem:[%s8108_s7 + $0x18f0] sm:$0xff] }
  0xd9   : > { %1042 = vst [vmem:[%s8113_s8 + $0xc80] sm:$0xff] %v1041_v16  ;;  %1044 = vst [vmem:[%s8113_s8 + $0xc88] sm:$0xff] %v1043_v17  ;;  %v1047_v19 = vld [vmem:[%s8108_s7 + $0x18f8] sm:$0xff]  ;;  %v1049_v20 = vld [vmem:[%s8108_s7 + $0x1900] sm:$0xff] }
  0xda   : > { %1046 = vst [vmem:[%s8113_s8 + $0xc90] sm:$0xff] %v1045_v18  ;;  %1048 = vst [vmem:[%s8113_s8 + $0xc98] sm:$0xff] %v1047_v19  ;;  %v1051_v21 = vld [vmem:[%s8108_s7 + $0x1950] sm:$0xff]  ;;  %v1053_v22 = vld [vmem:[%s8108_s7 + $0x1958] sm:$0xff] }
  0xdb   : > { %1050 = vst [vmem:[%s8113_s8 + $0xca0] sm:$0xff] %v1049_v20  ;;  %v1055_v23 = vld [vmem:[%s8108_s7 + $0x1960] sm:$0xff]  ;;  %1052 = vst [vmem:[%s8113_s8 + $0xca8] sm:$0xff] %v1051_v21  ;;  %v1057_v24 = vld [vmem:[%s8108_s7 + $0x1968] sm:$0xff] }
  0xdc   : > { %1054 = vst [vmem:[%s8113_s8 + $0xcb0] sm:$0xff] %v1053_v22  ;;  %1056 = vst [vmem:[%s8113_s8 + $0xcb8] sm:$0xff] %v1055_v23  ;;  %v1059_v25 = vld [vmem:[%s8108_s7 + $0x1970] sm:$0xff]  ;;  %v1061_v26 = vld [vmem:[%s8108_s7 + $0x1978] sm:$0xff] }
  0xdd   : > { %1058 = vst [vmem:[%s8113_s8 + $0xcc0] sm:$0xff] %v1057_v24  ;;  %1060 = vst [vmem:[%s8113_s8 + $0xcc8] sm:$0xff] %v1059_v25  ;;  %v1063_v27 = vld [vmem:[%s8108_s7 + $0x1980] sm:$0xff]  ;;  %v1065_v28 = vld [vmem:[%s8108_s7 + $0x1988] sm:$0xff] }
  0xde   : > { %1062 = vst [vmem:[%s8113_s8 + $0xcd0] sm:$0xff] %v1061_v26  ;;  %v1067_v29 = vld [vmem:[%s8108_s7 + $0x1990] sm:$0xff]  ;;  %1064 = vst [vmem:[%s8113_s8 + $0xcd8] sm:$0xff] %v1063_v27  ;;  %v1069_v30 = vld [vmem:[%s8108_s7 + $0x19e0] sm:$0xff] }
  0xdf   : > { %1066 = vst [vmem:[%s8113_s8 + $0xce0] sm:$0xff] %v1065_v28  ;;  %1068 = vst [vmem:[%s8113_s8 + $0xce8] sm:$0xff] %v1067_v29  ;;  %v1071_v31 = vld [vmem:[%s8108_s7 + $0x19e8] sm:$0xff]  ;;  %v1073_v32 = vld [vmem:[%s8108_s7 + $0x19f0] sm:$0xff] }
  0xe0   : > { %1070 = vst [vmem:[%s8113_s8 + $0xcf0] sm:$0xff] %v1069_v30  ;;  %1072 = vst [vmem:[%s8113_s8 + $0xcf8] sm:$0xff] %v1071_v31  ;;  %v1075_v33 = vld [vmem:[%s8108_s7 + $0x19f8] sm:$0xff]  ;;  %v1077_v34 = vld [vmem:[%s8108_s7 + $0x1a00] sm:$0xff] }
  0xe1   : > { %1074 = vst [vmem:[%s8113_s8 + $0xd00] sm:$0xff] %v1073_v32  ;;  %v1079_v35 = vld [vmem:[%s8108_s7 + $0x1a08] sm:$0xff]  ;;  %1076 = vst [vmem:[%s8113_s8 + $0xd08] sm:$0xff] %v1075_v33  ;;  %v1081_v36 = vld [vmem:[%s8108_s7 + $0x1a10] sm:$0xff] }
  0xe2   : > { %1078 = vst [vmem:[%s8113_s8 + $0xd10] sm:$0xff] %v1077_v34  ;;  %1080 = vst [vmem:[%s8113_s8 + $0xd18] sm:$0xff] %v1079_v35  ;;  %v1083_v37 = vld [vmem:[%s8108_s7 + $0x1a18] sm:$0xff]  ;;  %v1085_v38 = vld [vmem:[%s8108_s7 + $0x1a20] sm:$0xff] }
  0xe3   : > { %1082 = vst [vmem:[%s8113_s8 + $0xd20] sm:$0xff] %v1081_v36  ;;  %1084 = vst [vmem:[%s8113_s8 + $0xd28] sm:$0xff] %v1083_v37  ;;  %v1087_v39 = vld [vmem:[%s8108_s7 + $0x1a70] sm:$0xff]  ;;  %v1089_v40 = vld [vmem:[%s8108_s7 + $0x1a78] sm:$0xff] }
  0xe4   : > { %1086 = vst [vmem:[%s8113_s8 + $0xd30] sm:$0xff] %v1085_v38  ;;  %v1091_v41 = vld [vmem:[%s8108_s7 + $0x1a80] sm:$0xff]  ;;  %1088 = vst [vmem:[%s8113_s8 + $0xd38] sm:$0xff] %v1087_v39  ;;  %v1093_v42 = vld [vmem:[%s8108_s7 + $0x1a88] sm:$0xff] }
  0xe5   : > { %1090 = vst [vmem:[%s8113_s8 + $0xd40] sm:$0xff] %v1089_v40  ;;  %1092 = vst [vmem:[%s8113_s8 + $0xd48] sm:$0xff] %v1091_v41  ;;  %v1095_v43 = vld [vmem:[%s8108_s7 + $0x1a90] sm:$0xff]  ;;  %v1097_v44 = vld [vmem:[%s8108_s7 + $0x1a98] sm:$0xff] }
  0xe6   : > { %1094 = vst [vmem:[%s8113_s8 + $0xd50] sm:$0xff] %v1093_v42  ;;  %1096 = vst [vmem:[%s8113_s8 + $0xd58] sm:$0xff] %v1095_v43  ;;  %v1099_v45 = vld [vmem:[%s8108_s7 + $0x1aa0] sm:$0xff]  ;;  %v1101_v46 = vld [vmem:[%s8108_s7 + $0x1aa8] sm:$0xff] }
  0xe7   : > { %1098 = vst [vmem:[%s8113_s8 + $0xd60] sm:$0xff] %v1097_v44  ;;  %v1103_v47 = vld [vmem:[%s8108_s7 + $0x1ab0] sm:$0xff]  ;;  %1100 = vst [vmem:[%s8113_s8 + $0xd68] sm:$0xff] %v1099_v45  ;;  %v1105_v48 = vld [vmem:[%s8108_s7 + $0x1b00] sm:$0xff] }
  0xe8   : > { %1102 = vst [vmem:[%s8113_s8 + $0xd70] sm:$0xff] %v1101_v46  ;;  %1104 = vst [vmem:[%s8113_s8 + $0xd78] sm:$0xff] %v1103_v47  ;;  %v1107_v49 = vld [vmem:[%s8108_s7 + $0x1b08] sm:$0xff]  ;;  %v1109_v50 = vld [vmem:[%s8108_s7 + $0x1b10] sm:$0xff] }
  0xe9   : > { %1106 = vst [vmem:[%s8113_s8 + $0xd80] sm:$0xff] %v1105_v48  ;;  %1108 = vst [vmem:[%s8113_s8 + $0xd88] sm:$0xff] %v1107_v49  ;;  %v1111_v51 = vld [vmem:[%s8108_s7 + $0x1b18] sm:$0xff]  ;;  %v1113_v52 = vld [vmem:[%s8108_s7 + $0x1b20] sm:$0xff] }
  0xea   : > { %1110 = vst [vmem:[%s8113_s8 + $0xd90] sm:$0xff] %v1109_v50  ;;  %v1115_v53 = vld [vmem:[%s8108_s7 + $0x1b28] sm:$0xff]  ;;  %1112 = vst [vmem:[%s8113_s8 + $0xd98] sm:$0xff] %v1111_v51  ;;  %v1117_v54 = vld [vmem:[%s8108_s7 + $0x1b30] sm:$0xff] }
  0xeb   : > { %1114 = vst [vmem:[%s8113_s8 + $0xda0] sm:$0xff] %v1113_v52  ;;  %1116 = vst [vmem:[%s8113_s8 + $0xda8] sm:$0xff] %v1115_v53  ;;  %v1119_v55 = vld [vmem:[%s8108_s7 + $0x1b38] sm:$0xff]  ;;  %v1121_v56 = vld [vmem:[%s8108_s7 + $0x1b40] sm:$0xff] }
  0xec   : > { %1118 = vst [vmem:[%s8113_s8 + $0xdb0] sm:$0xff] %v1117_v54  ;;  %1120 = vst [vmem:[%s8113_s8 + $0xdb8] sm:$0xff] %v1119_v55  ;;  %v1123_v57 = vld [vmem:[%s8108_s7 + $0x1b90] sm:$0xff]  ;;  %v1125_v58 = vld [vmem:[%s8108_s7 + $0x1b98] sm:$0xff] }
  0xed   : > { %1122 = vst [vmem:[%s8113_s8 + $0xdc0] sm:$0xff] %v1121_v56  ;;  %v1127_v59 = vld [vmem:[%s8108_s7 + $0x1ba0] sm:$0xff]  ;;  %1124 = vst [vmem:[%s8113_s8 + $0xdc8] sm:$0xff] %v1123_v57  ;;  %v1129_v60 = vld [vmem:[%s8108_s7 + $0x1ba8] sm:$0xff] }
  0xee   : > { %1126 = vst [vmem:[%s8113_s8 + $0xdd0] sm:$0xff] %v1125_v58  ;;  %1128 = vst [vmem:[%s8113_s8 + $0xdd8] sm:$0xff] %v1127_v59  ;;  %v1131_v61 = vld [vmem:[%s8108_s7 + $0x1bb0] sm:$0xff]  ;;  %v1133_v62 = vld [vmem:[%s8108_s7 + $0x1bb8] sm:$0xff] }
  0xef   : > { %1130 = vst [vmem:[%s8113_s8 + $0xde0] sm:$0xff] %v1129_v60  ;;  %1132 = vst [vmem:[%s8113_s8 + $0xde8] sm:$0xff] %v1131_v61  ;;  %v1135_v63 = vld [vmem:[%s8108_s7 + $0x1bc0] sm:$0xff]  ;;  %v1137_v0 = vld [vmem:[%s8108_s7 + $0x1bc8] sm:$0xff] }
  0xf0   : > { %1134 = vst [vmem:[%s8113_s8 + $0xdf0] sm:$0xff] %v1133_v62  ;;  %v1139_v1 = vld [vmem:[%s8108_s7 + $0x1bd0] sm:$0xff]  ;;  %1136 = vst [vmem:[%s8113_s8 + $0xdf8] sm:$0xff] %v1135_v63  ;;  %v1141_v2 = vld [vmem:[%s8108_s7 + $0x1c20] sm:$0xff] }
  0xf1   : > { %1138 = vst [vmem:[%s8113_s8 + $0xe00] sm:$0xff] %v1137_v0  ;;  %1140 = vst [vmem:[%s8113_s8 + $0xe08] sm:$0xff] %v1139_v1  ;;  %v1143_v3 = vld [vmem:[%s8108_s7 + $0x1c28] sm:$0xff]  ;;  %v1145_v4 = vld [vmem:[%s8108_s7 + $0x1c30] sm:$0xff] }
  0xf2   : > { %1142 = vst [vmem:[%s8113_s8 + $0xe10] sm:$0xff] %v1141_v2  ;;  %1144 = vst [vmem:[%s8113_s8 + $0xe18] sm:$0xff] %v1143_v3  ;;  %v1147_v5 = vld [vmem:[%s8108_s7 + $0x1c38] sm:$0xff]  ;;  %v1149_v6 = vld [vmem:[%s8108_s7 + $0x1c40] sm:$0xff] }
  0xf3   : > { %1146 = vst [vmem:[%s8113_s8 + $0xe20] sm:$0xff] %v1145_v4  ;;  %v1151_v7 = vld [vmem:[%s8108_s7 + $0x1c48] sm:$0xff]  ;;  %1148 = vst [vmem:[%s8113_s8 + $0xe28] sm:$0xff] %v1147_v5  ;;  %v1153_v8 = vld [vmem:[%s8108_s7 + $0x1c50] sm:$0xff] }
  0xf4   : > { %1150 = vst [vmem:[%s8113_s8 + $0xe30] sm:$0xff] %v1149_v6  ;;  %1152 = vst [vmem:[%s8113_s8 + $0xe38] sm:$0xff] %v1151_v7  ;;  %v1155_v9 = vld [vmem:[%s8108_s7 + $0x1c58] sm:$0xff]  ;;  %v1157_v10 = vld [vmem:[%s8108_s7 + $0x1c60] sm:$0xff] }
  0xf5   : > { %1154 = vst [vmem:[%s8113_s8 + $0xe40] sm:$0xff] %v1153_v8  ;;  %1156 = vst [vmem:[%s8113_s8 + $0xe48] sm:$0xff] %v1155_v9  ;;  %v1159_v11 = vld [vmem:[%s8108_s7 + $0x1cb0] sm:$0xff]  ;;  %v1161_v12 = vld [vmem:[%s8108_s7 + $0x1cb8] sm:$0xff] }
  0xf6   : > { %1158 = vst [vmem:[%s8113_s8 + $0xe50] sm:$0xff] %v1157_v10  ;;  %v1163_v13 = vld [vmem:[%s8108_s7 + $0x1cc0] sm:$0xff]  ;;  %1160 = vst [vmem:[%s8113_s8 + $0xe58] sm:$0xff] %v1159_v11  ;;  %v1165_v14 = vld [vmem:[%s8108_s7 + $0x1cc8] sm:$0xff] }
  0xf7   : > { %1162 = vst [vmem:[%s8113_s8 + $0xe60] sm:$0xff] %v1161_v12  ;;  %1164 = vst [vmem:[%s8113_s8 + $0xe68] sm:$0xff] %v1163_v13  ;;  %v1167_v15 = vld [vmem:[%s8108_s7 + $0x1cd0] sm:$0xff]  ;;  %v1169_v16 = vld [vmem:[%s8108_s7 + $0x1cd8] sm:$0xff] }
  0xf8   : > { %1166 = vst [vmem:[%s8113_s8 + $0xe70] sm:$0xff] %v1165_v14  ;;  %1168 = vst [vmem:[%s8113_s8 + $0xe78] sm:$0xff] %v1167_v15  ;;  %v1171_v17 = vld [vmem:[%s8108_s7 + $0x1ce0] sm:$0xff]  ;;  %v1173_v18 = vld [vmem:[%s8108_s7 + $0x1ce8] sm:$0xff] }
  0xf9   : > { %1170 = vst [vmem:[%s8113_s8 + $0xe80] sm:$0xff] %v1169_v16  ;;  %v1175_v19 = vld [vmem:[%s8108_s7 + $0x1cf0] sm:$0xff]  ;;  %1172 = vst [vmem:[%s8113_s8 + $0xe88] sm:$0xff] %v1171_v17  ;;  %v1177_v20 = vld [vmem:[%s8108_s7 + $0x1d40] sm:$0xff] }
  0xfa   : > { %1174 = vst [vmem:[%s8113_s8 + $0xe90] sm:$0xff] %v1173_v18  ;;  %1176 = vst [vmem:[%s8113_s8 + $0xe98] sm:$0xff] %v1175_v19  ;;  %v1179_v21 = vld [vmem:[%s8108_s7 + $0x1d48] sm:$0xff]  ;;  %v1181_v22 = vld [vmem:[%s8108_s7 + $0x1d50] sm:$0xff] }
  0xfb   : > { %1178 = vst [vmem:[%s8113_s8 + $0xea0] sm:$0xff] %v1177_v20  ;;  %1180 = vst [vmem:[%s8113_s8 + $0xea8] sm:$0xff] %v1179_v21  ;;  %v1183_v23 = vld [vmem:[%s8108_s7 + $0x1d58] sm:$0xff]  ;;  %v1185_v24 = vld [vmem:[%s8108_s7 + $0x1d60] sm:$0xff] }
  0xfc   : > { %1182 = vst [vmem:[%s8113_s8 + $0xeb0] sm:$0xff] %v1181_v22  ;;  %v1187_v25 = vld [vmem:[%s8108_s7 + $0x1d68] sm:$0xff]  ;;  %1184 = vst [vmem:[%s8113_s8 + $0xeb8] sm:$0xff] %v1183_v23  ;;  %v1189_v26 = vld [vmem:[%s8108_s7 + $0x1d70] sm:$0xff] }
  0xfd   : > { %1186 = vst [vmem:[%s8113_s8 + $0xec0] sm:$0xff] %v1185_v24  ;;  %1188 = vst [vmem:[%s8113_s8 + $0xec8] sm:$0xff] %v1187_v25  ;;  %v1191_v27 = vld [vmem:[%s8108_s7 + $0x1d78] sm:$0xff]  ;;  %v1193_v28 = vld [vmem:[%s8108_s7 + $0x1d80] sm:$0xff] }
  0xfe   : > { %1190 = vst [vmem:[%s8113_s8 + $0xed0] sm:$0xff] %v1189_v26  ;;  %1192 = vst [vmem:[%s8113_s8 + $0xed8] sm:$0xff] %v1191_v27  ;;  %v1195_v29 = vld [vmem:[%s8108_s7 + $0x1dd0] sm:$0xff]  ;;  %v1197_v30 = vld [vmem:[%s8108_s7 + $0x1dd8] sm:$0xff] }
  0xff   : > { %1194 = vst [vmem:[%s8113_s8 + $0xee0] sm:$0xff] %v1193_v28  ;;  %v1199_v31 = vld [vmem:[%s8108_s7 + $0x1de0] sm:$0xff]  ;;  %1196 = vst [vmem:[%s8113_s8 + $0xee8] sm:$0xff] %v1195_v29  ;;  %v1201_v32 = vld [vmem:[%s8108_s7 + $0x1de8] sm:$0xff] }
 0x100   : > { %1198 = vst [vmem:[%s8113_s8 + $0xef0] sm:$0xff] %v1197_v30  ;;  %1200 = vst [vmem:[%s8113_s8 + $0xef8] sm:$0xff] %v1199_v31  ;;  %v1203_v33 = vld [vmem:[%s8108_s7 + $0x1df0] sm:$0xff]  ;;  %v1205_v34 = vld [vmem:[%s8108_s7 + $0x1df8] sm:$0xff] }
 0x101   : > { %1202 = vst [vmem:[%s8113_s8 + $0xf00] sm:$0xff] %v1201_v32  ;;  %1204 = vst [vmem:[%s8113_s8 + $0xf08] sm:$0xff] %v1203_v33  ;;  %v1207_v35 = vld [vmem:[%s8108_s7 + $0x1e00] sm:$0xff]  ;;  %v1209_v36 = vld [vmem:[%s8108_s7 + $0x1e08] sm:$0xff] }
 0x102   : > { %1206 = vst [vmem:[%s8113_s8 + $0xf10] sm:$0xff] %v1205_v34  ;;  %v1211_v37 = vld [vmem:[%s8108_s7 + $0x1e10] sm:$0xff]  ;;  %1208 = vst [vmem:[%s8113_s8 + $0xf18] sm:$0xff] %v1207_v35  ;;  %v1213_v38 = vld [vmem:[%s8108_s7 + $0x1e60] sm:$0xff] }
 0x103   : > { %1210 = vst [vmem:[%s8113_s8 + $0xf20] sm:$0xff] %v1209_v36  ;;  %1212 = vst [vmem:[%s8113_s8 + $0xf28] sm:$0xff] %v1211_v37  ;;  %v1215_v39 = vld [vmem:[%s8108_s7 + $0x1e68] sm:$0xff]  ;;  %v1217_v40 = vld [vmem:[%s8108_s7 + $0x1e70] sm:$0xff] }
 0x104   : > { %1214 = vst [vmem:[%s8113_s8 + $0xf30] sm:$0xff] %v1213_v38  ;;  %1216 = vst [vmem:[%s8113_s8 + $0xf38] sm:$0xff] %v1215_v39  ;;  %v1219_v41 = vld [vmem:[%s8108_s7 + $0x1e78] sm:$0xff]  ;;  %v1221_v42 = vld [vmem:[%s8108_s7 + $0x1e80] sm:$0xff] }
 0x105   : > { %1218 = vst [vmem:[%s8113_s8 + $0xf40] sm:$0xff] %v1217_v40  ;;  %v1223_v43 = vld [vmem:[%s8108_s7 + $0x1e88] sm:$0xff]  ;;  %1220 = vst [vmem:[%s8113_s8 + $0xf48] sm:$0xff] %v1219_v41  ;;  %v1225_v44 = vld [vmem:[%s8108_s7 + $0x1e90] sm:$0xff] }
 0x106   : > { %1222 = vst [vmem:[%s8113_s8 + $0xf50] sm:$0xff] %v1221_v42  ;;  %1224 = vst [vmem:[%s8113_s8 + $0xf58] sm:$0xff] %v1223_v43  ;;  %v1227_v45 = vld [vmem:[%s8108_s7 + $0x1e98] sm:$0xff]  ;;  %v1229_v46 = vld [vmem:[%s8108_s7 + $0x1ea0] sm:$0xff] }
 0x107   : > { %1226 = vst [vmem:[%s8113_s8 + $0xf60] sm:$0xff] %v1225_v44  ;;  %1228 = vst [vmem:[%s8113_s8 + $0xf68] sm:$0xff] %v1227_v45  ;;  %v1231_v47 = vld [vmem:[%s8108_s7 + $0x1ef0] sm:$0xff]  ;;  %v1233_v48 = vld [vmem:[%s8108_s7 + $0x1ef8] sm:$0xff] }
 0x108   : > { %1230 = vst [vmem:[%s8113_s8 + $0xf70] sm:$0xff] %v1229_v46  ;;  %v1235_v49 = vld [vmem:[%s8108_s7 + $0x1f00] sm:$0xff]  ;;  %1232 = vst [vmem:[%s8113_s8 + $0xf78] sm:$0xff] %v1231_v47  ;;  %v1237_v50 = vld [vmem:[%s8108_s7 + $0x1f08] sm:$0xff] }
 0x109   : > { %1234 = vst [vmem:[%s8113_s8 + $0xf80] sm:$0xff] %v1233_v48  ;;  %1236 = vst [vmem:[%s8113_s8 + $0xf88] sm:$0xff] %v1235_v49  ;;  %v1239_v51 = vld [vmem:[%s8108_s7 + $0x1f10] sm:$0xff]  ;;  %v1241_v52 = vld [vmem:[%s8108_s7 + $0x1f18] sm:$0xff] }
 0x10a   : > { %1238 = vst [vmem:[%s8113_s8 + $0xf90] sm:$0xff] %v1237_v50  ;;  %1240 = vst [vmem:[%s8113_s8 + $0xf98] sm:$0xff] %v1239_v51  ;;  %v1243_v53 = vld [vmem:[%s8108_s7 + $0x1f20] sm:$0xff]  ;;  %v1245_v54 = vld [vmem:[%s8108_s7 + $0x1f28] sm:$0xff] }
 0x10b   : > { %1242 = vst [vmem:[%s8113_s8 + $0xfa0] sm:$0xff] %v1241_v52  ;;  %v1247_v55 = vld [vmem:[%s8108_s7 + $0x1f30] sm:$0xff]  ;;  %1244 = vst [vmem:[%s8113_s8 + $0xfa8] sm:$0xff] %v1243_v53  ;;  %v1249_v56 = vld [vmem:[%s8108_s7 + $0x1f80] sm:$0xff] }
 0x10c   : > { %1246 = vst [vmem:[%s8113_s8 + $0xfb0] sm:$0xff] %v1245_v54  ;;  %1248 = vst [vmem:[%s8113_s8 + $0xfb8] sm:$0xff] %v1247_v55  ;;  %v1251_v57 = vld [vmem:[%s8108_s7 + $0x1f88] sm:$0xff]  ;;  %v1253_v58 = vld [vmem:[%s8108_s7 + $0x1f90] sm:$0xff] }
 0x10d   : > { %1250 = vst [vmem:[%s8113_s8 + $0xfc0] sm:$0xff] %v1249_v56  ;;  %1252 = vst [vmem:[%s8113_s8 + $0xfc8] sm:$0xff] %v1251_v57  ;;  %v1255_v59 = vld [vmem:[%s8108_s7 + $0x1f98] sm:$0xff]  ;;  %v1257_v60 = vld [vmem:[%s8108_s7 + $0x1fa0] sm:$0xff] }
 0x10e   : > { %1254 = vst [vmem:[%s8113_s8 + $0xfd0] sm:$0xff] %v1253_v58  ;;  %v1259_v61 = vld [vmem:[%s8108_s7 + $0x1fa8] sm:$0xff]  ;;  %1256 = vst [vmem:[%s8113_s8 + $0xfd8] sm:$0xff] %v1255_v59  ;;  %v1261_v62 = vld [vmem:[%s8108_s7 + $0x1fb0] sm:$0xff] }
 0x10f   : > { %1258 = vst [vmem:[%s8113_s8 + $0xfe0] sm:$0xff] %v1257_v60  ;;  %1260 = vst [vmem:[%s8113_s8 + $0xfe8] sm:$0xff] %v1259_v61  ;;  %v1263_v63 = vld [vmem:[%s8108_s7 + $0x1fb8] sm:$0xff]  ;;  %v1265_v0 = vld [vmem:[%s8108_s7 + $0x1fc0] sm:$0xff] }
 0x110   : > { %1262 = vst [vmem:[%s8113_s8 + $0xff0] sm:$0xff] %v1261_v62  ;;  %1264 = vst [vmem:[%s8113_s8 + $0xff8] sm:$0xff] %v1263_v63  ;;  %v1267_v1 = vld [vmem:[%s8108_s7 + $0x2010] sm:$0xff]  ;;  %v1269_v2 = vld [vmem:[%s8108_s7 + $0x2018] sm:$0xff] }
 0x111   : > { %1266 = vst [vmem:[%s8113_s8 + $0x1000] sm:$0xff] %v1265_v0  ;;  %v1271_v3 = vld [vmem:[%s8108_s7 + $0x2020] sm:$0xff]  ;;  %1268 = vst [vmem:[%s8113_s8 + $0x1008] sm:$0xff] %v1267_v1  ;;  %v1273_v4 = vld [vmem:[%s8108_s7 + $0x2028] sm:$0xff] }
 0x112   : > { %1270 = vst [vmem:[%s8113_s8 + $0x1010] sm:$0xff] %v1269_v2  ;;  %1272 = vst [vmem:[%s8113_s8 + $0x1018] sm:$0xff] %v1271_v3  ;;  %v1275_v5 = vld [vmem:[%s8108_s7 + $0x2030] sm:$0xff]  ;;  %v1277_v6 = vld [vmem:[%s8108_s7 + $0x2038] sm:$0xff] }
 0x113   : > { %1274 = vst [vmem:[%s8113_s8 + $0x1020] sm:$0xff] %v1273_v4  ;;  %1276 = vst [vmem:[%s8113_s8 + $0x1028] sm:$0xff] %v1275_v5  ;;  %v1279_v7 = vld [vmem:[%s8108_s7 + $0x2040] sm:$0xff]  ;;  %v1281_v8 = vld [vmem:[%s8108_s7 + $0x2048] sm:$0xff] }
 0x114   : > { %1278 = vst [vmem:[%s8113_s8 + $0x1030] sm:$0xff] %v1277_v6  ;;  %v1283_v9 = vld [vmem:[%s8108_s7 + $0x2050] sm:$0xff]  ;;  %1280 = vst [vmem:[%s8113_s8 + $0x1038] sm:$0xff] %v1279_v7  ;;  %v1285_v10 = vld [vmem:[%s8108_s7 + $0x20a0] sm:$0xff] }
 0x115   : > { %1282 = vst [vmem:[%s8113_s8 + $0x1040] sm:$0xff] %v1281_v8  ;;  %1284 = vst [vmem:[%s8113_s8 + $0x1048] sm:$0xff] %v1283_v9  ;;  %v1287_v11 = vld [vmem:[%s8108_s7 + $0x20a8] sm:$0xff]  ;;  %v1289_v12 = vld [vmem:[%s8108_s7 + $0x20b0] sm:$0xff] }
 0x116   : > { %1286 = vst [vmem:[%s8113_s8 + $0x1050] sm:$0xff] %v1285_v10  ;;  %1288 = vst [vmem:[%s8113_s8 + $0x1058] sm:$0xff] %v1287_v11  ;;  %v1291_v13 = vld [vmem:[%s8108_s7 + $0x20b8] sm:$0xff]  ;;  %v1293_v14 = vld [vmem:[%s8108_s7 + $0x20c0] sm:$0xff] }
 0x117   : > { %1290 = vst [vmem:[%s8113_s8 + $0x1060] sm:$0xff] %v1289_v12  ;;  %v1295_v15 = vld [vmem:[%s8108_s7 + $0x20c8] sm:$0xff]  ;;  %1292 = vst [vmem:[%s8113_s8 + $0x1068] sm:$0xff] %v1291_v13  ;;  %v1297_v16 = vld [vmem:[%s8108_s7 + $0x20d0] sm:$0xff] }
 0x118   : > { %1294 = vst [vmem:[%s8113_s8 + $0x1070] sm:$0xff] %v1293_v14  ;;  %1296 = vst [vmem:[%s8113_s8 + $0x1078] sm:$0xff] %v1295_v15  ;;  %v1299_v17 = vld [vmem:[%s8108_s7 + $0x20d8] sm:$0xff]  ;;  %v1301_v18 = vld [vmem:[%s8108_s7 + $0x20e0] sm:$0xff] }
 0x119   : > { %1298 = vst [vmem:[%s8113_s8 + $0x1080] sm:$0xff] %v1297_v16  ;;  %1300 = vst [vmem:[%s8113_s8 + $0x1088] sm:$0xff] %v1299_v17  ;;  %v1303_v19 = vld [vmem:[%s8108_s7 + $0x2130] sm:$0xff]  ;;  %v1305_v20 = vld [vmem:[%s8108_s7 + $0x2138] sm:$0xff] }
 0x11a   : > { %1302 = vst [vmem:[%s8113_s8 + $0x1090] sm:$0xff] %v1301_v18  ;;  %v1307_v21 = vld [vmem:[%s8108_s7 + $0x2140] sm:$0xff]  ;;  %1304 = vst [vmem:[%s8113_s8 + $0x1098] sm:$0xff] %v1303_v19  ;;  %v1309_v22 = vld [vmem:[%s8108_s7 + $0x2148] sm:$0xff] }
 0x11b   : > { %1306 = vst [vmem:[%s8113_s8 + $0x10a0] sm:$0xff] %v1305_v20  ;;  %1308 = vst [vmem:[%s8113_s8 + $0x10a8] sm:$0xff] %v1307_v21  ;;  %v1311_v23 = vld [vmem:[%s8108_s7 + $0x2150] sm:$0xff]  ;;  %v1313_v24 = vld [vmem:[%s8108_s7 + $0x2158] sm:$0xff] }
 0x11c   : > { %1310 = vst [vmem:[%s8113_s8 + $0x10b0] sm:$0xff] %v1309_v22  ;;  %1312 = vst [vmem:[%s8113_s8 + $0x10b8] sm:$0xff] %v1311_v23  ;;  %v1315_v25 = vld [vmem:[%s8108_s7 + $0x2160] sm:$0xff]  ;;  %v1317_v26 = vld [vmem:[%s8108_s7 + $0x2168] sm:$0xff] }
 0x11d   : > { %1314 = vst [vmem:[%s8113_s8 + $0x10c0] sm:$0xff] %v1313_v24  ;;  %v1319_v27 = vld [vmem:[%s8108_s7 + $0x2170] sm:$0xff]  ;;  %1316 = vst [vmem:[%s8113_s8 + $0x10c8] sm:$0xff] %v1315_v25  ;;  %v1321_v28 = vld [vmem:[%s8108_s7 + $0x21c0] sm:$0xff] }
 0x11e   : > { %1318 = vst [vmem:[%s8113_s8 + $0x10d0] sm:$0xff] %v1317_v26  ;;  %1320 = vst [vmem:[%s8113_s8 + $0x10d8] sm:$0xff] %v1319_v27  ;;  %v1323_v29 = vld [vmem:[%s8108_s7 + $0x21c8] sm:$0xff]  ;;  %v1325_v30 = vld [vmem:[%s8108_s7 + $0x21d0] sm:$0xff] }
 0x11f   : > { %1322 = vst [vmem:[%s8113_s8 + $0x10e0] sm:$0xff] %v1321_v28  ;;  %1324 = vst [vmem:[%s8113_s8 + $0x10e8] sm:$0xff] %v1323_v29  ;;  %v1327_v31 = vld [vmem:[%s8108_s7 + $0x21d8] sm:$0xff]  ;;  %v1329_v32 = vld [vmem:[%s8108_s7 + $0x21e0] sm:$0xff] }
 0x120   : > { %1326 = vst [vmem:[%s8113_s8 + $0x10f0] sm:$0xff] %v1325_v30  ;;  %v1331_v33 = vld [vmem:[%s8108_s7 + $0x21e8] sm:$0xff]  ;;  %1328 = vst [vmem:[%s8113_s8 + $0x10f8] sm:$0xff] %v1327_v31  ;;  %v1333_v34 = vld [vmem:[%s8108_s7 + $0x21f0] sm:$0xff] }
 0x121   : > { %1330 = vst [vmem:[%s8113_s8 + $0x1100] sm:$0xff] %v1329_v32  ;;  %1332 = vst [vmem:[%s8113_s8 + $0x1108] sm:$0xff] %v1331_v33  ;;  %v1335_v35 = vld [vmem:[%s8108_s7 + $0x21f8] sm:$0xff]  ;;  %v1337_v36 = vld [vmem:[%s8108_s7 + $0x2200] sm:$0xff] }
 0x122   : > { %1334 = vst [vmem:[%s8113_s8 + $0x1110] sm:$0xff] %v1333_v34  ;;  %1336 = vst [vmem:[%s8113_s8 + $0x1118] sm:$0xff] %v1335_v35  ;;  %v1339_v37 = vld [vmem:[%s8108_s7 + $0x2250] sm:$0xff]  ;;  %v1341_v38 = vld [vmem:[%s8108_s7 + $0x2258] sm:$0xff] }
 0x123   : > { %1338 = vst [vmem:[%s8113_s8 + $0x1120] sm:$0xff] %v1337_v36  ;;  %v1343_v39 = vld [vmem:[%s8108_s7 + $0x2260] sm:$0xff]  ;;  %1340 = vst [vmem:[%s8113_s8 + $0x1128] sm:$0xff] %v1339_v37  ;;  %v1345_v40 = vld [vmem:[%s8108_s7 + $0x2268] sm:$0xff] }
 0x124   : > { %1342 = vst [vmem:[%s8113_s8 + $0x1130] sm:$0xff] %v1341_v38  ;;  %1344 = vst [vmem:[%s8113_s8 + $0x1138] sm:$0xff] %v1343_v39  ;;  %v1347_v41 = vld [vmem:[%s8108_s7 + $0x2270] sm:$0xff]  ;;  %v1349_v42 = vld [vmem:[%s8108_s7 + $0x2278] sm:$0xff] }
 0x125   : > { %1346 = vst [vmem:[%s8113_s8 + $0x1140] sm:$0xff] %v1345_v40  ;;  %1348 = vst [vmem:[%s8113_s8 + $0x1148] sm:$0xff] %v1347_v41  ;;  %v1351_v43 = vld [vmem:[%s8108_s7 + $0x2280] sm:$0xff]  ;;  %v1353_v44 = vld [vmem:[%s8108_s7 + $0x2288] sm:$0xff] }
 0x126   : > { %1350 = vst [vmem:[%s8113_s8 + $0x1150] sm:$0xff] %v1349_v42  ;;  %v1355_v45 = vld [vmem:[%s8108_s7 + $0x2290] sm:$0xff]  ;;  %1352 = vst [vmem:[%s8113_s8 + $0x1158] sm:$0xff] %v1351_v43  ;;  %v1357_v46 = vld [vmem:[%s8108_s7 + $0x22e0] sm:$0xff] }
 0x127   : > { %1354 = vst [vmem:[%s8113_s8 + $0x1160] sm:$0xff] %v1353_v44  ;;  %1356 = vst [vmem:[%s8113_s8 + $0x1168] sm:$0xff] %v1355_v45  ;;  %v1359_v47 = vld [vmem:[%s8108_s7 + $0x22e8] sm:$0xff]  ;;  %v1361_v48 = vld [vmem:[%s8108_s7 + $0x22f0] sm:$0xff] }
 0x128   : > { %1358 = vst [vmem:[%s8113_s8 + $0x1170] sm:$0xff] %v1357_v46  ;;  %1360 = vst [vmem:[%s8113_s8 + $0x1178] sm:$0xff] %v1359_v47  ;;  %v1363_v49 = vld [vmem:[%s8108_s7 + $0x22f8] sm:$0xff]  ;;  %v1365_v50 = vld [vmem:[%s8108_s7 + $0x2300] sm:$0xff] }
 0x129   : > { %1362 = vst [vmem:[%s8113_s8 + $0x1180] sm:$0xff] %v1361_v48  ;;  %v1367_v51 = vld [vmem:[%s8108_s7 + $0x2308] sm:$0xff]  ;;  %1364 = vst [vmem:[%s8113_s8 + $0x1188] sm:$0xff] %v1363_v49  ;;  %v1369_v52 = vld [vmem:[%s8108_s7 + $0x2310] sm:$0xff] }
 0x12a   : > { %1366 = vst [vmem:[%s8113_s8 + $0x1190] sm:$0xff] %v1365_v50  ;;  %1368 = vst [vmem:[%s8113_s8 + $0x1198] sm:$0xff] %v1367_v51  ;;  %v1371_v53 = vld [vmem:[%s8108_s7 + $0x2318] sm:$0xff]  ;;  %v1373_v54 = vld [vmem:[%s8108_s7 + $0x2320] sm:$0xff] }
 0x12b   : > { %1370 = vst [vmem:[%s8113_s8 + $0x11a0] sm:$0xff] %v1369_v52  ;;  %1372 = vst [vmem:[%s8113_s8 + $0x11a8] sm:$0xff] %v1371_v53  ;;  %v1375_v55 = vld [vmem:[%s8108_s7 + $0x2370] sm:$0xff]  ;;  %v1377_v56 = vld [vmem:[%s8108_s7 + $0x2378] sm:$0xff] }
 0x12c   : > { %1374 = vst [vmem:[%s8113_s8 + $0x11b0] sm:$0xff] %v1373_v54  ;;  %v1379_v57 = vld [vmem:[%s8108_s7 + $0x2380] sm:$0xff]  ;;  %1376 = vst [vmem:[%s8113_s8 + $0x11b8] sm:$0xff] %v1375_v55  ;;  %v1381_v58 = vld [vmem:[%s8108_s7 + $0x2388] sm:$0xff] }
 0x12d   : > { %1378 = vst [vmem:[%s8113_s8 + $0x11c0] sm:$0xff] %v1377_v56  ;;  %1380 = vst [vmem:[%s8113_s8 + $0x11c8] sm:$0xff] %v1379_v57  ;;  %v1383_v59 = vld [vmem:[%s8108_s7 + $0x2390] sm:$0xff]  ;;  %v1385_v60 = vld [vmem:[%s8108_s7 + $0x2398] sm:$0xff] }
 0x12e   : > { %1382 = vst [vmem:[%s8113_s8 + $0x11d0] sm:$0xff] %v1381_v58  ;;  %1384 = vst [vmem:[%s8113_s8 + $0x11d8] sm:$0xff] %v1383_v59  ;;  %v1387_v61 = vld [vmem:[%s8108_s7 + $0x23a0] sm:$0xff]  ;;  %v1389_v62 = vld [vmem:[%s8108_s7 + $0x23a8] sm:$0xff] }
 0x12f   : > { %1386 = vst [vmem:[%s8113_s8 + $0x11e0] sm:$0xff] %v1385_v60  ;;  %v1391_v63 = vld [vmem:[%s8108_s7 + $0x23b0] sm:$0xff]  ;;  %1388 = vst [vmem:[%s8113_s8 + $0x11e8] sm:$0xff] %v1387_v61  ;;  %v1393_v0 = vld [vmem:[%s8108_s7 + $0x2400] sm:$0xff] }
 0x130   : > { %1390 = vst [vmem:[%s8113_s8 + $0x11f0] sm:$0xff] %v1389_v62  ;;  %1392 = vst [vmem:[%s8113_s8 + $0x11f8] sm:$0xff] %v1391_v63  ;;  %v1395_v1 = vld [vmem:[%s8108_s7 + $0x2408] sm:$0xff]  ;;  %v1397_v2 = vld [vmem:[%s8108_s7 + $0x2410] sm:$0xff] }
 0x131   : > { %1394 = vst [vmem:[%s8113_s8 + $0x1200] sm:$0xff] %v1393_v0  ;;  %1396 = vst [vmem:[%s8113_s8 + $0x1208] sm:$0xff] %v1395_v1  ;;  %v1399_v3 = vld [vmem:[%s8108_s7 + $0x2418] sm:$0xff]  ;;  %v1401_v4 = vld [vmem:[%s8108_s7 + $0x2420] sm:$0xff] }
 0x132   : > { %1398 = vst [vmem:[%s8113_s8 + $0x1210] sm:$0xff] %v1397_v2  ;;  %v1403_v5 = vld [vmem:[%s8108_s7 + $0x2428] sm:$0xff]  ;;  %1400 = vst [vmem:[%s8113_s8 + $0x1218] sm:$0xff] %v1399_v3  ;;  %v1405_v6 = vld [vmem:[%s8108_s7 + $0x2430] sm:$0xff] }
 0x133   : > { %1402 = vst [vmem:[%s8113_s8 + $0x1220] sm:$0xff] %v1401_v4  ;;  %1404 = vst [vmem:[%s8113_s8 + $0x1228] sm:$0xff] %v1403_v5  ;;  %v1407_v7 = vld [vmem:[%s8108_s7 + $0x2438] sm:$0xff]  ;;  %v1409_v8 = vld [vmem:[%s8108_s7 + $0x2440] sm:$0xff] }
 0x134   : > { %1406 = vst [vmem:[%s8113_s8 + $0x1230] sm:$0xff] %v1405_v6  ;;  %1408 = vst [vmem:[%s8113_s8 + $0x1238] sm:$0xff] %v1407_v7  ;;  %v1411_v9 = vld [vmem:[%s8108_s7 + $0x2490] sm:$0xff]  ;;  %v1413_v10 = vld [vmem:[%s8108_s7 + $0x2498] sm:$0xff] }
 0x135   : > { %1410 = vst [vmem:[%s8113_s8 + $0x1240] sm:$0xff] %v1409_v8  ;;  %v1415_v11 = vld [vmem:[%s8108_s7 + $0x24a0] sm:$0xff]  ;;  %1412 = vst [vmem:[%s8113_s8 + $0x1248] sm:$0xff] %v1411_v9  ;;  %v1417_v12 = vld [vmem:[%s8108_s7 + $0x24a8] sm:$0xff] }
 0x136   : > { %1414 = vst [vmem:[%s8113_s8 + $0x1250] sm:$0xff] %v1413_v10  ;;  %1416 = vst [vmem:[%s8113_s8 + $0x1258] sm:$0xff] %v1415_v11  ;;  %v1419_v13 = vld [vmem:[%s8108_s7 + $0x24b0] sm:$0xff]  ;;  %v1421_v14 = vld [vmem:[%s8108_s7 + $0x24b8] sm:$0xff] }
 0x137   : > { %1418 = vst [vmem:[%s8113_s8 + $0x1260] sm:$0xff] %v1417_v12  ;;  %1420 = vst [vmem:[%s8113_s8 + $0x1268] sm:$0xff] %v1419_v13  ;;  %v1423_v15 = vld [vmem:[%s8108_s7 + $0x24c0] sm:$0xff]  ;;  %v1425_v16 = vld [vmem:[%s8108_s7 + $0x24c8] sm:$0xff] }
 0x138   : > { %1422 = vst [vmem:[%s8113_s8 + $0x1270] sm:$0xff] %v1421_v14  ;;  %v1427_v17 = vld [vmem:[%s8108_s7 + $0x24d0] sm:$0xff]  ;;  %1424 = vst [vmem:[%s8113_s8 + $0x1278] sm:$0xff] %v1423_v15  ;;  %v1429_v18 = vld [vmem:[%s8108_s7 + $0x2520] sm:$0xff] }
 0x139   : > { %1426 = vst [vmem:[%s8113_s8 + $0x1280] sm:$0xff] %v1425_v16  ;;  %1428 = vst [vmem:[%s8113_s8 + $0x1288] sm:$0xff] %v1427_v17  ;;  %v1431_v19 = vld [vmem:[%s8108_s7 + $0x2528] sm:$0xff]  ;;  %v1433_v20 = vld [vmem:[%s8108_s7 + $0x2530] sm:$0xff] }
 0x13a   : > { %1430 = vst [vmem:[%s8113_s8 + $0x1290] sm:$0xff] %v1429_v18  ;;  %1432 = vst [vmem:[%s8113_s8 + $0x1298] sm:$0xff] %v1431_v19  ;;  %v1435_v21 = vld [vmem:[%s8108_s7 + $0x2538] sm:$0xff]  ;;  %v1437_v22 = vld [vmem:[%s8108_s7 + $0x2540] sm:$0xff] }
 0x13b   : > { %1434 = vst [vmem:[%s8113_s8 + $0x12a0] sm:$0xff] %v1433_v20  ;;  %v1439_v23 = vld [vmem:[%s8108_s7 + $0x2548] sm:$0xff]  ;;  %1436 = vst [vmem:[%s8113_s8 + $0x12a8] sm:$0xff] %v1435_v21  ;;  %v1441_v24 = vld [vmem:[%s8108_s7 + $0x2550] sm:$0xff] }
 0x13c   : > { %1438 = vst [vmem:[%s8113_s8 + $0x12b0] sm:$0xff] %v1437_v22  ;;  %1440 = vst [vmem:[%s8113_s8 + $0x12b8] sm:$0xff] %v1439_v23  ;;  %v1443_v25 = vld [vmem:[%s8108_s7 + $0x2558] sm:$0xff]  ;;  %v1445_v26 = vld [vmem:[%s8108_s7 + $0x2560] sm:$0xff] }
 0x13d   : > { %1442 = vst [vmem:[%s8113_s8 + $0x12c0] sm:$0xff] %v1441_v24  ;;  %1444 = vst [vmem:[%s8113_s8 + $0x12c8] sm:$0xff] %v1443_v25  ;;  %v1447_v27 = vld [vmem:[%s8108_s7 + $0x25b0] sm:$0xff]  ;;  %v1449_v28 = vld [vmem:[%s8108_s7 + $0x25b8] sm:$0xff] }
 0x13e   : > { %1446 = vst [vmem:[%s8113_s8 + $0x12d0] sm:$0xff] %v1445_v26  ;;  %v1451_v29 = vld [vmem:[%s8108_s7 + $0x25c0] sm:$0xff]  ;;  %1448 = vst [vmem:[%s8113_s8 + $0x12d8] sm:$0xff] %v1447_v27  ;;  %v1453_v30 = vld [vmem:[%s8108_s7 + $0x25c8] sm:$0xff] }
 0x13f   : > { %1450 = vst [vmem:[%s8113_s8 + $0x12e0] sm:$0xff] %v1449_v28  ;;  %1452 = vst [vmem:[%s8113_s8 + $0x12e8] sm:$0xff] %v1451_v29  ;;  %v1455_v31 = vld [vmem:[%s8108_s7 + $0x25d0] sm:$0xff]  ;;  %v1457_v32 = vld [vmem:[%s8108_s7 + $0x25d8] sm:$0xff] }
 0x140   : > { %1454 = vst [vmem:[%s8113_s8 + $0x12f0] sm:$0xff] %v1453_v30  ;;  %1456 = vst [vmem:[%s8113_s8 + $0x12f8] sm:$0xff] %v1455_v31  ;;  %v1459_v33 = vld [vmem:[%s8108_s7 + $0x25e0] sm:$0xff]  ;;  %v1461_v34 = vld [vmem:[%s8108_s7 + $0x25e8] sm:$0xff] }
 0x141   : > { %1458 = vst [vmem:[%s8113_s8 + $0x1300] sm:$0xff] %v1457_v32  ;;  %v1463_v35 = vld [vmem:[%s8108_s7 + $0x25f0] sm:$0xff]  ;;  %1460 = vst [vmem:[%s8113_s8 + $0x1308] sm:$0xff] %v1459_v33  ;;  %v1465_v36 = vld [vmem:[%s8108_s7 + $0x2640] sm:$0xff] }
 0x142   : > { %1462 = vst [vmem:[%s8113_s8 + $0x1310] sm:$0xff] %v1461_v34  ;;  %1464 = vst [vmem:[%s8113_s8 + $0x1318] sm:$0xff] %v1463_v35  ;;  %v1467_v37 = vld [vmem:[%s8108_s7 + $0x2648] sm:$0xff]  ;;  %v1469_v38 = vld [vmem:[%s8108_s7 + $0x2650] sm:$0xff] }
 0x143   : > { %1466 = vst [vmem:[%s8113_s8 + $0x1320] sm:$0xff] %v1465_v36  ;;  %1468 = vst [vmem:[%s8113_s8 + $0x1328] sm:$0xff] %v1467_v37  ;;  %v1471_v39 = vld [vmem:[%s8108_s7 + $0x2658] sm:$0xff]  ;;  %v1473_v40 = vld [vmem:[%s8108_s7 + $0x2660] sm:$0xff] }
 0x144   : > { %1470 = vst [vmem:[%s8113_s8 + $0x1330] sm:$0xff] %v1469_v38  ;;  %v1475_v41 = vld [vmem:[%s8108_s7 + $0x2668] sm:$0xff]  ;;  %1472 = vst [vmem:[%s8113_s8 + $0x1338] sm:$0xff] %v1471_v39  ;;  %v1477_v42 = vld [vmem:[%s8108_s7 + $0x2670] sm:$0xff] }
 0x145   : > { %1474 = vst [vmem:[%s8113_s8 + $0x1340] sm:$0xff] %v1473_v40  ;;  %1476 = vst [vmem:[%s8113_s8 + $0x1348] sm:$0xff] %v1475_v41  ;;  %v1479_v43 = vld [vmem:[%s8108_s7 + $0x2678] sm:$0xff]  ;;  %v1481_v44 = vld [vmem:[%s8108_s7 + $0x2680] sm:$0xff] }
 0x146   : > { %1478 = vst [vmem:[%s8113_s8 + $0x1350] sm:$0xff] %v1477_v42  ;;  %1480 = vst [vmem:[%s8113_s8 + $0x1358] sm:$0xff] %v1479_v43  ;;  %v1483_v45 = vld [vmem:[%s8108_s7 + $0x26d0] sm:$0xff]  ;;  %v1485_v46 = vld [vmem:[%s8108_s7 + $0x26d8] sm:$0xff] }
 0x147   : > { %1482 = vst [vmem:[%s8113_s8 + $0x1360] sm:$0xff] %v1481_v44  ;;  %v1487_v47 = vld [vmem:[%s8108_s7 + $0x26e0] sm:$0xff]  ;;  %1484 = vst [vmem:[%s8113_s8 + $0x1368] sm:$0xff] %v1483_v45  ;;  %v1489_v48 = vld [vmem:[%s8108_s7 + $0x26e8] sm:$0xff] }
 0x148   : > { %1486 = vst [vmem:[%s8113_s8 + $0x1370] sm:$0xff] %v1485_v46  ;;  %1488 = vst [vmem:[%s8113_s8 + $0x1378] sm:$0xff] %v1487_v47  ;;  %v1491_v49 = vld [vmem:[%s8108_s7 + $0x26f0] sm:$0xff]  ;;  %v1493_v50 = vld [vmem:[%s8108_s7 + $0x26f8] sm:$0xff] }
 0x149   : > { %1490 = vst [vmem:[%s8113_s8 + $0x1380] sm:$0xff] %v1489_v48  ;;  %1492 = vst [vmem:[%s8113_s8 + $0x1388] sm:$0xff] %v1491_v49  ;;  %v1495_v51 = vld [vmem:[%s8108_s7 + $0x2700] sm:$0xff]  ;;  %v1497_v52 = vld [vmem:[%s8108_s7 + $0x2708] sm:$0xff] }
 0x14a   : > { %1494 = vst [vmem:[%s8113_s8 + $0x1390] sm:$0xff] %v1493_v50  ;;  %v1499_v53 = vld [vmem:[%s8108_s7 + $0x2710] sm:$0xff]  ;;  %1496 = vst [vmem:[%s8113_s8 + $0x1398] sm:$0xff] %v1495_v51  ;;  %v1501_v54 = vld [vmem:[%s8108_s7 + $0x2760] sm:$0xff] }
 0x14b   : > { %1498 = vst [vmem:[%s8113_s8 + $0x13a0] sm:$0xff] %v1497_v52  ;;  %1500 = vst [vmem:[%s8113_s8 + $0x13a8] sm:$0xff] %v1499_v53  ;;  %v1503_v55 = vld [vmem:[%s8108_s7 + $0x2768] sm:$0xff]  ;;  %v1505_v56 = vld [vmem:[%s8108_s7 + $0x2770] sm:$0xff] }
 0x14c   : > { %1502 = vst [vmem:[%s8113_s8 + $0x13b0] sm:$0xff] %v1501_v54  ;;  %1504 = vst [vmem:[%s8113_s8 + $0x13b8] sm:$0xff] %v1503_v55  ;;  %v1507_v57 = vld [vmem:[%s8108_s7 + $0x2778] sm:$0xff]  ;;  %v1509_v58 = vld [vmem:[%s8108_s7 + $0x2780] sm:$0xff] }
 0x14d   : > { %1506 = vst [vmem:[%s8113_s8 + $0x13c0] sm:$0xff] %v1505_v56  ;;  %v1511_v59 = vld [vmem:[%s8108_s7 + $0x2788] sm:$0xff]  ;;  %1508 = vst [vmem:[%s8113_s8 + $0x13c8] sm:$0xff] %v1507_v57  ;;  %v1513_v60 = vld [vmem:[%s8108_s7 + $0x2790] sm:$0xff] }
 0x14e   : > { %1510 = vst [vmem:[%s8113_s8 + $0x13d0] sm:$0xff] %v1509_v58  ;;  %1512 = vst [vmem:[%s8113_s8 + $0x13d8] sm:$0xff] %v1511_v59  ;;  %v1515_v61 = vld [vmem:[%s8108_s7 + $0x2798] sm:$0xff]  ;;  %v1517_v62 = vld [vmem:[%s8108_s7 + $0x27a0] sm:$0xff] }
 0x14f   : > { %1514 = vst [vmem:[%s8113_s8 + $0x13e0] sm:$0xff] %v1513_v60  ;;  %1516 = vst [vmem:[%s8113_s8 + $0x13e8] sm:$0xff] %v1515_v61  ;;  %v1519_v63 = vld [vmem:[%s8108_s7 + $0x27f0] sm:$0xff]  ;;  %v1521_v0 = vld [vmem:[%s8108_s7 + $0x27f8] sm:$0xff] }
 0x150   : > { %1518 = vst [vmem:[%s8113_s8 + $0x13f0] sm:$0xff] %v1517_v62  ;;  %v1523_v1 = vld [vmem:[%s8108_s7 + $0x2800] sm:$0xff]  ;;  %1520 = vst [vmem:[%s8113_s8 + $0x13f8] sm:$0xff] %v1519_v63  ;;  %v1525_v2 = vld [vmem:[%s8108_s7 + $0x2808] sm:$0xff] }
 0x151   : > { %1522 = vst [vmem:[%s8113_s8 + $0x1400] sm:$0xff] %v1521_v0  ;;  %1524 = vst [vmem:[%s8113_s8 + $0x1408] sm:$0xff] %v1523_v1  ;;  %v1527_v3 = vld [vmem:[%s8108_s7 + $0x2810] sm:$0xff]  ;;  %v1529_v4 = vld [vmem:[%s8108_s7 + $0x2818] sm:$0xff] }
 0x152   : > { %1526 = vst [vmem:[%s8113_s8 + $0x1410] sm:$0xff] %v1525_v2  ;;  %1528 = vst [vmem:[%s8113_s8 + $0x1418] sm:$0xff] %v1527_v3  ;;  %v1531_v5 = vld [vmem:[%s8108_s7 + $0x2820] sm:$0xff]  ;;  %v1533_v6 = vld [vmem:[%s8108_s7 + $0x2828] sm:$0xff] }
 0x153   : > { %1530 = vst [vmem:[%s8113_s8 + $0x1420] sm:$0xff] %v1529_v4  ;;  %v1535_v7 = vld [vmem:[%s8108_s7 + $0x2830] sm:$0xff]  ;;  %1532 = vst [vmem:[%s8113_s8 + $0x1428] sm:$0xff] %v1531_v5  ;;  %v1537_v8 = vld [vmem:[%s8108_s7 + $0x2880] sm:$0xff] }
 0x154   : > { %1534 = vst [vmem:[%s8113_s8 + $0x1430] sm:$0xff] %v1533_v6  ;;  %1536 = vst [vmem:[%s8113_s8 + $0x1438] sm:$0xff] %v1535_v7  ;;  %v1539_v9 = vld [vmem:[%s8108_s7 + $0x2888] sm:$0xff]  ;;  %v1541_v10 = vld [vmem:[%s8108_s7 + $0x2890] sm:$0xff] }
 0x155   : > { %1538 = vst [vmem:[%s8113_s8 + $0x1440] sm:$0xff] %v1537_v8  ;;  %1540 = vst [vmem:[%s8113_s8 + $0x1448] sm:$0xff] %v1539_v9  ;;  %v1543_v11 = vld [vmem:[%s8108_s7 + $0x2898] sm:$0xff]  ;;  %v1545_v12 = vld [vmem:[%s8108_s7 + $0x28a0] sm:$0xff] }
 0x156   : > { %1542 = vst [vmem:[%s8113_s8 + $0x1450] sm:$0xff] %v1541_v10  ;;  %v1547_v13 = vld [vmem:[%s8108_s7 + $0x28a8] sm:$0xff]  ;;  %1544 = vst [vmem:[%s8113_s8 + $0x1458] sm:$0xff] %v1543_v11  ;;  %v1549_v14 = vld [vmem:[%s8108_s7 + $0x28b0] sm:$0xff] }
 0x157   : > { %1546 = vst [vmem:[%s8113_s8 + $0x1460] sm:$0xff] %v1545_v12  ;;  %1548 = vst [vmem:[%s8113_s8 + $0x1468] sm:$0xff] %v1547_v13  ;;  %v1551_v15 = vld [vmem:[%s8108_s7 + $0x28b8] sm:$0xff]  ;;  %v1553_v16 = vld [vmem:[%s8108_s7 + $0x28c0] sm:$0xff] }
 0x158   : > { %1550 = vst [vmem:[%s8113_s8 + $0x1470] sm:$0xff] %v1549_v14  ;;  %1552 = vst [vmem:[%s8113_s8 + $0x1478] sm:$0xff] %v1551_v15  ;;  %v1555_v17 = vld [vmem:[%s8108_s7 + $0x2910] sm:$0xff]  ;;  %v1557_v18 = vld [vmem:[%s8108_s7 + $0x2918] sm:$0xff] }
 0x159   : > { %1554 = vst [vmem:[%s8113_s8 + $0x1480] sm:$0xff] %v1553_v16  ;;  %v1559_v19 = vld [vmem:[%s8108_s7 + $0x2920] sm:$0xff]  ;;  %1556 = vst [vmem:[%s8113_s8 + $0x1488] sm:$0xff] %v1555_v17  ;;  %v1561_v20 = vld [vmem:[%s8108_s7 + $0x2928] sm:$0xff] }
 0x15a   : > { %1558 = vst [vmem:[%s8113_s8 + $0x1490] sm:$0xff] %v1557_v18  ;;  %1560 = vst [vmem:[%s8113_s8 + $0x1498] sm:$0xff] %v1559_v19  ;;  %v1563_v21 = vld [vmem:[%s8108_s7 + $0x2930] sm:$0xff]  ;;  %v1565_v22 = vld [vmem:[%s8108_s7 + $0x2938] sm:$0xff] }
 0x15b   : > { %1562 = vst [vmem:[%s8113_s8 + $0x14a0] sm:$0xff] %v1561_v20  ;;  %1564 = vst [vmem:[%s8113_s8 + $0x14a8] sm:$0xff] %v1563_v21  ;;  %v1567_v23 = vld [vmem:[%s8108_s7 + $0x2940] sm:$0xff]  ;;  %v1569_v24 = vld [vmem:[%s8108_s7 + $0x2948] sm:$0xff] }
 0x15c   : > { %1566 = vst [vmem:[%s8113_s8 + $0x14b0] sm:$0xff] %v1565_v22  ;;  %v1571_v25 = vld [vmem:[%s8108_s7 + $0x2950] sm:$0xff]  ;;  %1568 = vst [vmem:[%s8113_s8 + $0x14b8] sm:$0xff] %v1567_v23  ;;  %v1573_v26 = vld [vmem:[%s8108_s7 + $0x29a0] sm:$0xff] }
 0x15d   : > { %1570 = vst [vmem:[%s8113_s8 + $0x14c0] sm:$0xff] %v1569_v24  ;;  %1572 = vst [vmem:[%s8113_s8 + $0x14c8] sm:$0xff] %v1571_v25  ;;  %v1575_v27 = vld [vmem:[%s8108_s7 + $0x29a8] sm:$0xff]  ;;  %v1577_v28 = vld [vmem:[%s8108_s7 + $0x29b0] sm:$0xff] }
 0x15e   : > { %1574 = vst [vmem:[%s8113_s8 + $0x14d0] sm:$0xff] %v1573_v26  ;;  %1576 = vst [vmem:[%s8113_s8 + $0x14d8] sm:$0xff] %v1575_v27  ;;  %v1579_v29 = vld [vmem:[%s8108_s7 + $0x29b8] sm:$0xff]  ;;  %v1581_v30 = vld [vmem:[%s8108_s7 + $0x29c0] sm:$0xff] }
 0x15f   : > { %1578 = vst [vmem:[%s8113_s8 + $0x14e0] sm:$0xff] %v1577_v28  ;;  %v1583_v31 = vld [vmem:[%s8108_s7 + $0x29c8] sm:$0xff]  ;;  %1580 = vst [vmem:[%s8113_s8 + $0x14e8] sm:$0xff] %v1579_v29  ;;  %v1585_v32 = vld [vmem:[%s8108_s7 + $0x29d0] sm:$0xff] }
 0x160   : > { %1582 = vst [vmem:[%s8113_s8 + $0x14f0] sm:$0xff] %v1581_v30  ;;  %1584 = vst [vmem:[%s8113_s8 + $0x14f8] sm:$0xff] %v1583_v31  ;;  %v1587_v33 = vld [vmem:[%s8108_s7 + $0x29d8] sm:$0xff]  ;;  %v1589_v34 = vld [vmem:[%s8108_s7 + $0x29e0] sm:$0xff] }
 0x161   : > { %1586 = vst [vmem:[%s8113_s8 + $0x1500] sm:$0xff] %v1585_v32  ;;  %1588 = vst [vmem:[%s8113_s8 + $0x1508] sm:$0xff] %v1587_v33  ;;  %v1591_v35 = vld [vmem:[%s8108_s7 + $0x2a30] sm:$0xff]  ;;  %v1593_v36 = vld [vmem:[%s8108_s7 + $0x2a38] sm:$0xff] }
 0x162   : > { %1590 = vst [vmem:[%s8113_s8 + $0x1510] sm:$0xff] %v1589_v34  ;;  %v1595_v37 = vld [vmem:[%s8108_s7 + $0x2a40] sm:$0xff]  ;;  %1592 = vst [vmem:[%s8113_s8 + $0x1518] sm:$0xff] %v1591_v35  ;;  %v1597_v38 = vld [vmem:[%s8108_s7 + $0x2a48] sm:$0xff] }
 0x163   : > { %1594 = vst [vmem:[%s8113_s8 + $0x1520] sm:$0xff] %v1593_v36  ;;  %1596 = vst [vmem:[%s8113_s8 + $0x1528] sm:$0xff] %v1595_v37  ;;  %v1599_v39 = vld [vmem:[%s8108_s7 + $0x2a50] sm:$0xff]  ;;  %v1601_v40 = vld [vmem:[%s8108_s7 + $0x2a58] sm:$0xff] }
 0x164   : > { %1598 = vst [vmem:[%s8113_s8 + $0x1530] sm:$0xff] %v1597_v38  ;;  %1600 = vst [vmem:[%s8113_s8 + $0x1538] sm:$0xff] %v1599_v39  ;;  %v1603_v41 = vld [vmem:[%s8108_s7 + $0x2a60] sm:$0xff]  ;;  %v1605_v42 = vld [vmem:[%s8108_s7 + $0x2a68] sm:$0xff] }
 0x165   : > { %1602 = vst [vmem:[%s8113_s8 + $0x1540] sm:$0xff] %v1601_v40  ;;  %v1607_v43 = vld [vmem:[%s8108_s7 + $0x2a70] sm:$0xff]  ;;  %1604 = vst [vmem:[%s8113_s8 + $0x1548] sm:$0xff] %v1603_v41  ;;  %v1609_v44 = vld [vmem:[%s8108_s7 + $0x2ac0] sm:$0xff] }
 0x166   : > { %1606 = vst [vmem:[%s8113_s8 + $0x1550] sm:$0xff] %v1605_v42  ;;  %1608 = vst [vmem:[%s8113_s8 + $0x1558] sm:$0xff] %v1607_v43  ;;  %v1611_v45 = vld [vmem:[%s8108_s7 + $0x2ac8] sm:$0xff]  ;;  %v1613_v46 = vld [vmem:[%s8108_s7 + $0x2ad0] sm:$0xff] }
 0x167   : > { %1610 = vst [vmem:[%s8113_s8 + $0x1560] sm:$0xff] %v1609_v44  ;;  %1612 = vst [vmem:[%s8113_s8 + $0x1568] sm:$0xff] %v1611_v45  ;;  %v1615_v47 = vld [vmem:[%s8108_s7 + $0x2ad8] sm:$0xff]  ;;  %v1617_v48 = vld [vmem:[%s8108_s7 + $0x2ae0] sm:$0xff] }
 0x168   : > { %1614 = vst [vmem:[%s8113_s8 + $0x1570] sm:$0xff] %v1613_v46  ;;  %v1619_v49 = vld [vmem:[%s8108_s7 + $0x2ae8] sm:$0xff]  ;;  %1616 = vst [vmem:[%s8113_s8 + $0x1578] sm:$0xff] %v1615_v47  ;;  %v1621_v50 = vld [vmem:[%s8108_s7 + $0x2af0] sm:$0xff] }
 0x169   : > { %1618 = vst [vmem:[%s8113_s8 + $0x1580] sm:$0xff] %v1617_v48  ;;  %1620 = vst [vmem:[%s8113_s8 + $0x1588] sm:$0xff] %v1619_v49  ;;  %v1623_v51 = vld [vmem:[%s8108_s7 + $0x2af8] sm:$0xff]  ;;  %v1625_v52 = vld [vmem:[%s8108_s7 + $0x2b00] sm:$0xff] }
 0x16a   : > { %1622 = vst [vmem:[%s8113_s8 + $0x1590] sm:$0xff] %v1621_v50  ;;  %1624 = vst [vmem:[%s8113_s8 + $0x1598] sm:$0xff] %v1623_v51  ;;  %v1627_v53 = vld [vmem:[%s8108_s7 + $0x2b50] sm:$0xff]  ;;  %v1629_v54 = vld [vmem:[%s8108_s7 + $0x2b58] sm:$0xff] }
 0x16b   : > { %1626 = vst [vmem:[%s8113_s8 + $0x15a0] sm:$0xff] %v1625_v52  ;;  %v1631_v55 = vld [vmem:[%s8108_s7 + $0x2b60] sm:$0xff]  ;;  %1628 = vst [vmem:[%s8113_s8 + $0x15a8] sm:$0xff] %v1627_v53  ;;  %v1633_v56 = vld [vmem:[%s8108_s7 + $0x2b68] sm:$0xff] }
 0x16c   : > { %1630 = vst [vmem:[%s8113_s8 + $0x15b0] sm:$0xff] %v1629_v54  ;;  %1632 = vst [vmem:[%s8113_s8 + $0x15b8] sm:$0xff] %v1631_v55  ;;  %v1635_v57 = vld [vmem:[%s8108_s7 + $0x2b70] sm:$0xff]  ;;  %v1637_v58 = vld [vmem:[%s8108_s7 + $0x2b78] sm:$0xff] }
 0x16d   : > { %1634 = vst [vmem:[%s8113_s8 + $0x15c0] sm:$0xff] %v1633_v56  ;;  %1636 = vst [vmem:[%s8113_s8 + $0x15c8] sm:$0xff] %v1635_v57  ;;  %v1639_v59 = vld [vmem:[%s8108_s7 + $0x2b80] sm:$0xff]  ;;  %v1641_v60 = vld [vmem:[%s8108_s7 + $0x2b88] sm:$0xff] }
 0x16e   : > { %1638 = vst [vmem:[%s8113_s8 + $0x15d0] sm:$0xff] %v1637_v58  ;;  %v1643_v61 = vld [vmem:[%s8108_s7 + $0x2b90] sm:$0xff]  ;;  %1640 = vst [vmem:[%s8113_s8 + $0x15d8] sm:$0xff] %v1639_v59  ;;  %v1645_v62 = vld [vmem:[%s8108_s7 + $0x2be0] sm:$0xff] }
 0x16f   : > { %1642 = vst [vmem:[%s8113_s8 + $0x15e0] sm:$0xff] %v1641_v60  ;;  %1644 = vst [vmem:[%s8113_s8 + $0x15e8] sm:$0xff] %v1643_v61  ;;  %v1647_v63 = vld [vmem:[%s8108_s7 + $0x2be8] sm:$0xff]  ;;  %v1649_v0 = vld [vmem:[%s8108_s7 + $0x2bf0] sm:$0xff] }
 0x170   : > { %1646 = vst [vmem:[%s8113_s8 + $0x15f0] sm:$0xff] %v1645_v62  ;;  %1648 = vst [vmem:[%s8113_s8 + $0x15f8] sm:$0xff] %v1647_v63  ;;  %v1651_v1 = vld [vmem:[%s8108_s7 + $0x2bf8] sm:$0xff]  ;;  %v1653_v2 = vld [vmem:[%s8108_s7 + $0x2c00] sm:$0xff] }
 0x171   : > { %1650 = vst [vmem:[%s8113_s8 + $0x1600] sm:$0xff] %v1649_v0  ;;  %v1655_v3 = vld [vmem:[%s8108_s7 + $0x2c08] sm:$0xff]  ;;  %1652 = vst [vmem:[%s8113_s8 + $0x1608] sm:$0xff] %v1651_v1  ;;  %v1657_v4 = vld [vmem:[%s8108_s7 + $0x2c10] sm:$0xff] }
 0x172   : > { %1654 = vst [vmem:[%s8113_s8 + $0x1610] sm:$0xff] %v1653_v2  ;;  %1656 = vst [vmem:[%s8113_s8 + $0x1618] sm:$0xff] %v1655_v3  ;;  %v1659_v5 = vld [vmem:[%s8108_s7 + $0x2c18] sm:$0xff]  ;;  %v1661_v6 = vld [vmem:[%s8108_s7 + $0x2c20] sm:$0xff] }
 0x173   : > { %1658 = vst [vmem:[%s8113_s8 + $0x1620] sm:$0xff] %v1657_v4  ;;  %1660 = vst [vmem:[%s8113_s8 + $0x1628] sm:$0xff] %v1659_v5  ;;  %v1663_v7 = vld [vmem:[%s8108_s7 + $0x2c70] sm:$0xff]  ;;  %v1665_v8 = vld [vmem:[%s8108_s7 + $0x2c78] sm:$0xff] }
 0x174   : > { %1662 = vst [vmem:[%s8113_s8 + $0x1630] sm:$0xff] %v1661_v6  ;;  %v1667_v9 = vld [vmem:[%s8108_s7 + $0x2c80] sm:$0xff]  ;;  %1664 = vst [vmem:[%s8113_s8 + $0x1638] sm:$0xff] %v1663_v7  ;;  %v1669_v10 = vld [vmem:[%s8108_s7 + $0x2c88] sm:$0xff] }
 0x175   : > { %1666 = vst [vmem:[%s8113_s8 + $0x1640] sm:$0xff] %v1665_v8  ;;  %1668 = vst [vmem:[%s8113_s8 + $0x1648] sm:$0xff] %v1667_v9  ;;  %v1671_v11 = vld [vmem:[%s8108_s7 + $0x2c90] sm:$0xff]  ;;  %v1673_v12 = vld [vmem:[%s8108_s7 + $0x2c98] sm:$0xff] }
 0x176   : > { %1670 = vst [vmem:[%s8113_s8 + $0x1650] sm:$0xff] %v1669_v10  ;;  %1672 = vst [vmem:[%s8113_s8 + $0x1658] sm:$0xff] %v1671_v11  ;;  %v1675_v13 = vld [vmem:[%s8108_s7 + $0x2ca0] sm:$0xff]  ;;  %v1677_v14 = vld [vmem:[%s8108_s7 + $0x2ca8] sm:$0xff] }
 0x177   : > { %1674 = vst [vmem:[%s8113_s8 + $0x1660] sm:$0xff] %v1673_v12  ;;  %v1679_v15 = vld [vmem:[%s8108_s7 + $0x2cb0] sm:$0xff]  ;;  %1676 = vst [vmem:[%s8113_s8 + $0x1668] sm:$0xff] %v1675_v13  ;;  %v1681_v16 = vld [vmem:[%s8108_s7 + $0x2d00] sm:$0xff] }
 0x178   : > { %1678 = vst [vmem:[%s8113_s8 + $0x1670] sm:$0xff] %v1677_v14  ;;  %1680 = vst [vmem:[%s8113_s8 + $0x1678] sm:$0xff] %v1679_v15  ;;  %v1683_v17 = vld [vmem:[%s8108_s7 + $0x2d08] sm:$0xff]  ;;  %v1685_v18 = vld [vmem:[%s8108_s7 + $0x2d10] sm:$0xff] }
 0x179   : > { %1682 = vst [vmem:[%s8113_s8 + $0x1680] sm:$0xff] %v1681_v16  ;;  %1684 = vst [vmem:[%s8113_s8 + $0x1688] sm:$0xff] %v1683_v17  ;;  %v1687_v19 = vld [vmem:[%s8108_s7 + $0x2d18] sm:$0xff]  ;;  %v1689_v20 = vld [vmem:[%s8108_s7 + $0x2d20] sm:$0xff] }
 0x17a   : > { %1686 = vst [vmem:[%s8113_s8 + $0x1690] sm:$0xff] %v1685_v18  ;;  %v1691_v21 = vld [vmem:[%s8108_s7 + $0x2d28] sm:$0xff]  ;;  %1688 = vst [vmem:[%s8113_s8 + $0x1698] sm:$0xff] %v1687_v19  ;;  %v1693_v22 = vld [vmem:[%s8108_s7 + $0x2d30] sm:$0xff] }
 0x17b   : > { %1690 = vst [vmem:[%s8113_s8 + $0x16a0] sm:$0xff] %v1689_v20  ;;  %1692 = vst [vmem:[%s8113_s8 + $0x16a8] sm:$0xff] %v1691_v21  ;;  %v1695_v23 = vld [vmem:[%s8108_s7 + $0x2d38] sm:$0xff]  ;;  %v1697_v24 = vld [vmem:[%s8108_s7 + $0x2d40] sm:$0xff] }
 0x17c   : > { %1694 = vst [vmem:[%s8113_s8 + $0x16b0] sm:$0xff] %v1693_v22  ;;  %1696 = vst [vmem:[%s8113_s8 + $0x16b8] sm:$0xff] %v1695_v23  ;;  %v1699_v25 = vld [vmem:[%s8108_s7 + $0x2d90] sm:$0xff]  ;;  %v1701_v26 = vld [vmem:[%s8108_s7 + $0x2d98] sm:$0xff] }
 0x17d   : > { %1698 = vst [vmem:[%s8113_s8 + $0x16c0] sm:$0xff] %v1697_v24  ;;  %v1703_v27 = vld [vmem:[%s8108_s7 + $0x2da0] sm:$0xff]  ;;  %1700 = vst [vmem:[%s8113_s8 + $0x16c8] sm:$0xff] %v1699_v25  ;;  %v1705_v28 = vld [vmem:[%s8108_s7 + $0x2da8] sm:$0xff] }
 0x17e   : > { %1702 = vst [vmem:[%s8113_s8 + $0x16d0] sm:$0xff] %v1701_v26  ;;  %1704 = vst [vmem:[%s8113_s8 + $0x16d8] sm:$0xff] %v1703_v27  ;;  %v1707_v29 = vld [vmem:[%s8108_s7 + $0x2db0] sm:$0xff]  ;;  %v1709_v30 = vld [vmem:[%s8108_s7 + $0x2db8] sm:$0xff] }
 0x17f   : > { %1706 = vst [vmem:[%s8113_s8 + $0x16e0] sm:$0xff] %v1705_v28  ;;  %1708 = vst [vmem:[%s8113_s8 + $0x16e8] sm:$0xff] %v1707_v29  ;;  %v1711_v31 = vld [vmem:[%s8108_s7 + $0x2dc0] sm:$0xff]  ;;  %v1713_v32 = vld [vmem:[%s8108_s7 + $0x2dc8] sm:$0xff] }
 0x180   : > { %1710 = vst [vmem:[%s8113_s8 + $0x16f0] sm:$0xff] %v1709_v30  ;;  %v1715_v33 = vld [vmem:[%s8108_s7 + $0x2dd0] sm:$0xff]  ;;  %1712 = vst [vmem:[%s8113_s8 + $0x16f8] sm:$0xff] %v1711_v31  ;;  %v1717_v34 = vld [vmem:[%s8108_s7 + $0x2e20] sm:$0xff] }
 0x181   : > { %1714 = vst [vmem:[%s8113_s8 + $0x1700] sm:$0xff] %v1713_v32  ;;  %1716 = vst [vmem:[%s8113_s8 + $0x1708] sm:$0xff] %v1715_v33  ;;  %v1719_v35 = vld [vmem:[%s8108_s7 + $0x2e28] sm:$0xff]  ;;  %v1721_v36 = vld [vmem:[%s8108_s7 + $0x2e30] sm:$0xff] }
 0x182   : > { %1718 = vst [vmem:[%s8113_s8 + $0x1710] sm:$0xff] %v1717_v34  ;;  %1720 = vst [vmem:[%s8113_s8 + $0x1718] sm:$0xff] %v1719_v35  ;;  %v1723_v37 = vld [vmem:[%s8108_s7 + $0x2e38] sm:$0xff]  ;;  %v1725_v38 = vld [vmem:[%s8108_s7 + $0x2e40] sm:$0xff] }
 0x183   : > { %1722 = vst [vmem:[%s8113_s8 + $0x1720] sm:$0xff] %v1721_v36  ;;  %v1727_v39 = vld [vmem:[%s8108_s7 + $0x2e48] sm:$0xff]  ;;  %1724 = vst [vmem:[%s8113_s8 + $0x1728] sm:$0xff] %v1723_v37  ;;  %v1729_v40 = vld [vmem:[%s8108_s7 + $0x2e50] sm:$0xff] }
 0x184   : > { %1726 = vst [vmem:[%s8113_s8 + $0x1730] sm:$0xff] %v1725_v38  ;;  %1728 = vst [vmem:[%s8113_s8 + $0x1738] sm:$0xff] %v1727_v39  ;;  %v1731_v41 = vld [vmem:[%s8108_s7 + $0x2e58] sm:$0xff]  ;;  %v1733_v42 = vld [vmem:[%s8108_s7 + $0x2e60] sm:$0xff] }
 0x185   : > { %1730 = vst [vmem:[%s8113_s8 + $0x1740] sm:$0xff] %v1729_v40  ;;  %1732 = vst [vmem:[%s8113_s8 + $0x1748] sm:$0xff] %v1731_v41  ;;  %v1735_v43 = vld [vmem:[%s8108_s7 + $0x2eb0] sm:$0xff]  ;;  %v1737_v44 = vld [vmem:[%s8108_s7 + $0x2eb8] sm:$0xff] }
 0x186   : > { %1734 = vst [vmem:[%s8113_s8 + $0x1750] sm:$0xff] %v1733_v42  ;;  %v1739_v45 = vld [vmem:[%s8108_s7 + $0x2ec0] sm:$0xff]  ;;  %1736 = vst [vmem:[%s8113_s8 + $0x1758] sm:$0xff] %v1735_v43  ;;  %v1741_v46 = vld [vmem:[%s8108_s7 + $0x2ec8] sm:$0xff] }
 0x187   : > { %1738 = vst [vmem:[%s8113_s8 + $0x1760] sm:$0xff] %v1737_v44  ;;  %1740 = vst [vmem:[%s8113_s8 + $0x1768] sm:$0xff] %v1739_v45  ;;  %v1743_v47 = vld [vmem:[%s8108_s7 + $0x2ed0] sm:$0xff]  ;;  %v1745_v48 = vld [vmem:[%s8108_s7 + $0x2ed8] sm:$0xff] }
 0x188   : > { %1742 = vst [vmem:[%s8113_s8 + $0x1770] sm:$0xff] %v1741_v46  ;;  %1744 = vst [vmem:[%s8113_s8 + $0x1778] sm:$0xff] %v1743_v47  ;;  %v1747_v49 = vld [vmem:[%s8108_s7 + $0x2ee0] sm:$0xff]  ;;  %v1749_v50 = vld [vmem:[%s8108_s7 + $0x2ee8] sm:$0xff] }
 0x189   : > { %1746 = vst [vmem:[%s8113_s8 + $0x1780] sm:$0xff] %v1745_v48  ;;  %v1751_v51 = vld [vmem:[%s8108_s7 + $0x2ef0] sm:$0xff]  ;;  %1748 = vst [vmem:[%s8113_s8 + $0x1788] sm:$0xff] %v1747_v49  ;;  %v1753_v52 = vld [vmem:[%s8108_s7 + $0x2f40] sm:$0xff] }
 0x18a   : > { %1750 = vst [vmem:[%s8113_s8 + $0x1790] sm:$0xff] %v1749_v50  ;;  %1752 = vst [vmem:[%s8113_s8 + $0x1798] sm:$0xff] %v1751_v51  ;;  %v1755_v53 = vld [vmem:[%s8108_s7 + $0x2f48] sm:$0xff]  ;;  %v1757_v54 = vld [vmem:[%s8108_s7 + $0x2f50] sm:$0xff] }
 0x18b   : > { %1754 = vst [vmem:[%s8113_s8 + $0x17a0] sm:$0xff] %v1753_v52  ;;  %1756 = vst [vmem:[%s8113_s8 + $0x17a8] sm:$0xff] %v1755_v53  ;;  %v1759_v55 = vld [vmem:[%s8108_s7 + $0x2f58] sm:$0xff]  ;;  %v1761_v56 = vld [vmem:[%s8108_s7 + $0x2f60] sm:$0xff] }
 0x18c   : > { %1758 = vst [vmem:[%s8113_s8 + $0x17b0] sm:$0xff] %v1757_v54  ;;  %v1763_v57 = vld [vmem:[%s8108_s7 + $0x2f68] sm:$0xff]  ;;  %1760 = vst [vmem:[%s8113_s8 + $0x17b8] sm:$0xff] %v1759_v55  ;;  %v1765_v58 = vld [vmem:[%s8108_s7 + $0x2f70] sm:$0xff] }
 0x18d   : > { %1762 = vst [vmem:[%s8113_s8 + $0x17c0] sm:$0xff] %v1761_v56  ;;  %1764 = vst [vmem:[%s8113_s8 + $0x17c8] sm:$0xff] %v1763_v57  ;;  %v1767_v59 = vld [vmem:[%s8108_s7 + $0x2f78] sm:$0xff]  ;;  %v1769_v60 = vld [vmem:[%s8108_s7 + $0x2f80] sm:$0xff] }
 0x18e   : > { %1766 = vst [vmem:[%s8113_s8 + $0x17d0] sm:$0xff] %v1765_v58  ;;  %1768 = vst [vmem:[%s8113_s8 + $0x17d8] sm:$0xff] %v1767_v59  ;;  %v1771_v61 = vld [vmem:[%s8108_s7 + $0x2fd0] sm:$0xff]  ;;  %v1773_v62 = vld [vmem:[%s8108_s7 + $0x2fd8] sm:$0xff] }
 0x18f   : > { %1770 = vst [vmem:[%s8113_s8 + $0x17e0] sm:$0xff] %v1769_v60  ;;  %v1775_v63 = vld [vmem:[%s8108_s7 + $0x2fe0] sm:$0xff]  ;;  %1772 = vst [vmem:[%s8113_s8 + $0x17e8] sm:$0xff] %v1771_v61  ;;  %v1777_v0 = vld [vmem:[%s8108_s7 + $0x2fe8] sm:$0xff] }
 0x190   : > { %1774 = vst [vmem:[%s8113_s8 + $0x17f0] sm:$0xff] %v1773_v62  ;;  %1776 = vst [vmem:[%s8113_s8 + $0x17f8] sm:$0xff] %v1775_v63  ;;  %v1779_v1 = vld [vmem:[%s8108_s7 + $0x2ff0] sm:$0xff]  ;;  %v1781_v2 = vld [vmem:[%s8108_s7 + $0x2ff8] sm:$0xff] }
 0x191   : > { %1778 = vst [vmem:[%s8113_s8 + $0x1800] sm:$0xff] %v1777_v0  ;;  %1780 = vst [vmem:[%s8113_s8 + $0x1808] sm:$0xff] %v1779_v1  ;;  %v1783_v3 = vld [vmem:[%s8108_s7 + $0x3000] sm:$0xff]  ;;  %v1785_v4 = vld [vmem:[%s8108_s7 + $0x3008] sm:$0xff] }
 0x192   : > { %1782 = vst [vmem:[%s8113_s8 + $0x1810] sm:$0xff] %v1781_v2  ;;  %v1787_v5 = vld [vmem:[%s8108_s7 + $0x3010] sm:$0xff]  ;;  %1784 = vst [vmem:[%s8113_s8 + $0x1818] sm:$0xff] %v1783_v3  ;;  %v1789_v6 = vld [vmem:[%s8108_s7 + $0x3060] sm:$0xff] }
 0x193   : > { %1786 = vst [vmem:[%s8113_s8 + $0x1820] sm:$0xff] %v1785_v4  ;;  %1788 = vst [vmem:[%s8113_s8 + $0x1828] sm:$0xff] %v1787_v5  ;;  %v1791_v7 = vld [vmem:[%s8108_s7 + $0x3068] sm:$0xff]  ;;  %v1793_v8 = vld [vmem:[%s8108_s7 + $0x3070] sm:$0xff] }
 0x194   : > { %1790 = vst [vmem:[%s8113_s8 + $0x1830] sm:$0xff] %v1789_v6  ;;  %1792 = vst [vmem:[%s8113_s8 + $0x1838] sm:$0xff] %v1791_v7  ;;  %v1795_v9 = vld [vmem:[%s8108_s7 + $0x3078] sm:$0xff]  ;;  %v1797_v10 = vld [vmem:[%s8108_s7 + $0x3080] sm:$0xff] }
 0x195   : > { %1794 = vst [vmem:[%s8113_s8 + $0x1840] sm:$0xff] %v1793_v8  ;;  %v1799_v11 = vld [vmem:[%s8108_s7 + $0x3088] sm:$0xff]  ;;  %1796 = vst [vmem:[%s8113_s8 + $0x1848] sm:$0xff] %v1795_v9  ;;  %v1801_v12 = vld [vmem:[%s8108_s7 + $0x3090] sm:$0xff] }
 0x196   : > { %1798 = vst [vmem:[%s8113_s8 + $0x1850] sm:$0xff] %v1797_v10  ;;  %1800 = vst [vmem:[%s8113_s8 + $0x1858] sm:$0xff] %v1799_v11  ;;  %v1803_v13 = vld [vmem:[%s8108_s7 + $0x3098] sm:$0xff]  ;;  %v1805_v14 = vld [vmem:[%s8108_s7 + $0x30a0] sm:$0xff] }
 0x197   : > { %1802 = vst [vmem:[%s8113_s8 + $0x1860] sm:$0xff] %v1801_v12  ;;  %1804 = vst [vmem:[%s8113_s8 + $0x1868] sm:$0xff] %v1803_v13  ;;  %v1807_v15 = vld [vmem:[%s8108_s7 + $0x30f0] sm:$0xff]  ;;  %v1809_v16 = vld [vmem:[%s8108_s7 + $0x30f8] sm:$0xff] }
 0x198   : > { %1806 = vst [vmem:[%s8113_s8 + $0x1870] sm:$0xff] %v1805_v14  ;;  %v1811_v17 = vld [vmem:[%s8108_s7 + $0x3100] sm:$0xff]  ;;  %1808 = vst [vmem:[%s8113_s8 + $0x1878] sm:$0xff] %v1807_v15  ;;  %v1813_v18 = vld [vmem:[%s8108_s7 + $0x3108] sm:$0xff] }
 0x199   : > { %1810 = vst [vmem:[%s8113_s8 + $0x1880] sm:$0xff] %v1809_v16  ;;  %1812 = vst [vmem:[%s8113_s8 + $0x1888] sm:$0xff] %v1811_v17  ;;  %v1815_v19 = vld [vmem:[%s8108_s7 + $0x3110] sm:$0xff]  ;;  %v1817_v20 = vld [vmem:[%s8108_s7 + $0x3118] sm:$0xff] }
 0x19a   : > { %1814 = vst [vmem:[%s8113_s8 + $0x1890] sm:$0xff] %v1813_v18  ;;  %1816 = vst [vmem:[%s8113_s8 + $0x1898] sm:$0xff] %v1815_v19  ;;  %v1819_v21 = vld [vmem:[%s8108_s7 + $0x3120] sm:$0xff]  ;;  %v1821_v22 = vld [vmem:[%s8108_s7 + $0x3128] sm:$0xff] }
 0x19b   : > { %1818 = vst [vmem:[%s8113_s8 + $0x18a0] sm:$0xff] %v1817_v20  ;;  %v1823_v23 = vld [vmem:[%s8108_s7 + $0x3130] sm:$0xff]  ;;  %1820 = vst [vmem:[%s8113_s8 + $0x18a8] sm:$0xff] %v1819_v21  ;;  %v1825_v24 = vld [vmem:[%s8108_s7 + $0x3180] sm:$0xff] }
 0x19c   : > { %1822 = vst [vmem:[%s8113_s8 + $0x18b0] sm:$0xff] %v1821_v22  ;;  %1824 = vst [vmem:[%s8113_s8 + $0x18b8] sm:$0xff] %v1823_v23  ;;  %v1827_v25 = vld [vmem:[%s8108_s7 + $0x3188] sm:$0xff]  ;;  %v1829_v26 = vld [vmem:[%s8108_s7 + $0x3190] sm:$0xff] }
 0x19d   : > { %1826 = vst [vmem:[%s8113_s8 + $0x18c0] sm:$0xff] %v1825_v24  ;;  %1828 = vst [vmem:[%s8113_s8 + $0x18c8] sm:$0xff] %v1827_v25  ;;  %v1831_v27 = vld [vmem:[%s8108_s7 + $0x3198] sm:$0xff]  ;;  %v1833_v28 = vld [vmem:[%s8108_s7 + $0x31a0] sm:$0xff] }
 0x19e   : > { %1830 = vst [vmem:[%s8113_s8 + $0x18d0] sm:$0xff] %v1829_v26  ;;  %v1835_v29 = vld [vmem:[%s8108_s7 + $0x31a8] sm:$0xff]  ;;  %1832 = vst [vmem:[%s8113_s8 + $0x18d8] sm:$0xff] %v1831_v27  ;;  %v1837_v30 = vld [vmem:[%s8108_s7 + $0x31b0] sm:$0xff] }
 0x19f   : > { %1834 = vst [vmem:[%s8113_s8 + $0x18e0] sm:$0xff] %v1833_v28  ;;  %1836 = vst [vmem:[%s8113_s8 + $0x18e8] sm:$0xff] %v1835_v29  ;;  %v1839_v31 = vld [vmem:[%s8108_s7 + $0x31b8] sm:$0xff]  ;;  %v1841_v32 = vld [vmem:[%s8108_s7 + $0x31c0] sm:$0xff] }
 0x1a0   : > { %1838 = vst [vmem:[%s8113_s8 + $0x18f0] sm:$0xff] %v1837_v30  ;;  %1840 = vst [vmem:[%s8113_s8 + $0x18f8] sm:$0xff] %v1839_v31  ;;  %v1843_v33 = vld [vmem:[%s8108_s7 + $0x3210] sm:$0xff]  ;;  %v1845_v34 = vld [vmem:[%s8108_s7 + $0x3218] sm:$0xff] }
 0x1a1   : > { %1842 = vst [vmem:[%s8113_s8 + $0x1900] sm:$0xff] %v1841_v32  ;;  %v1847_v35 = vld [vmem:[%s8108_s7 + $0x3220] sm:$0xff]  ;;  %1844 = vst [vmem:[%s8113_s8 + $0x1908] sm:$0xff] %v1843_v33  ;;  %v1849_v36 = vld [vmem:[%s8108_s7 + $0x3228] sm:$0xff] }
 0x1a2   : > { %1846 = vst [vmem:[%s8113_s8 + $0x1910] sm:$0xff] %v1845_v34  ;;  %1848 = vst [vmem:[%s8113_s8 + $0x1918] sm:$0xff] %v1847_v35  ;;  %v1851_v37 = vld [vmem:[%s8108_s7 + $0x3230] sm:$0xff]  ;;  %v1853_v38 = vld [vmem:[%s8108_s7 + $0x3238] sm:$0xff] }
 0x1a3   : > { %1850 = vst [vmem:[%s8113_s8 + $0x1920] sm:$0xff] %v1849_v36  ;;  %1852 = vst [vmem:[%s8113_s8 + $0x1928] sm:$0xff] %v1851_v37  ;;  %v1855_v39 = vld [vmem:[%s8108_s7 + $0x3240] sm:$0xff]  ;;  %v1857_v40 = vld [vmem:[%s8108_s7 + $0x3248] sm:$0xff] }
 0x1a4   : > { %1854 = vst [vmem:[%s8113_s8 + $0x1930] sm:$0xff] %v1853_v38  ;;  %v1859_v41 = vld [vmem:[%s8108_s7 + $0x3250] sm:$0xff]  ;;  %1856 = vst [vmem:[%s8113_s8 + $0x1938] sm:$0xff] %v1855_v39  ;;  %v1861_v42 = vld [vmem:[%s8108_s7 + $0x32a0] sm:$0xff] }
 0x1a5   : > { %1858 = vst [vmem:[%s8113_s8 + $0x1940] sm:$0xff] %v1857_v40  ;;  %1860 = vst [vmem:[%s8113_s8 + $0x1948] sm:$0xff] %v1859_v41  ;;  %v1863_v43 = vld [vmem:[%s8108_s7 + $0x32a8] sm:$0xff]  ;;  %v1865_v44 = vld [vmem:[%s8108_s7 + $0x32b0] sm:$0xff] }
 0x1a6   : > { %1862 = vst [vmem:[%s8113_s8 + $0x1950] sm:$0xff] %v1861_v42  ;;  %1864 = vst [vmem:[%s8113_s8 + $0x1958] sm:$0xff] %v1863_v43  ;;  %v1867_v45 = vld [vmem:[%s8108_s7 + $0x32b8] sm:$0xff]  ;;  %v1869_v46 = vld [vmem:[%s8108_s7 + $0x32c0] sm:$0xff] }
 0x1a7   : > { %1866 = vst [vmem:[%s8113_s8 + $0x1960] sm:$0xff] %v1865_v44  ;;  %v1871_v47 = vld [vmem:[%s8108_s7 + $0x32c8] sm:$0xff]  ;;  %1868 = vst [vmem:[%s8113_s8 + $0x1968] sm:$0xff] %v1867_v45  ;;  %v1873_v48 = vld [vmem:[%s8108_s7 + $0x32d0] sm:$0xff] }
 0x1a8   : > { %1870 = vst [vmem:[%s8113_s8 + $0x1970] sm:$0xff] %v1869_v46  ;;  %1872 = vst [vmem:[%s8113_s8 + $0x1978] sm:$0xff] %v1871_v47  ;;  %v1875_v49 = vld [vmem:[%s8108_s7 + $0x32d8] sm:$0xff]  ;;  %v1877_v50 = vld [vmem:[%s8108_s7 + $0x32e0] sm:$0xff] }
 0x1a9   : > { %1874 = vst [vmem:[%s8113_s8 + $0x1980] sm:$0xff] %v1873_v48  ;;  %1876 = vst [vmem:[%s8113_s8 + $0x1988] sm:$0xff] %v1875_v49  ;;  %v1879_v51 = vld [vmem:[%s8108_s7 + $0x3330] sm:$0xff]  ;;  %v1881_v52 = vld [vmem:[%s8108_s7 + $0x3338] sm:$0xff] }
 0x1aa   : > { %1878 = vst [vmem:[%s8113_s8 + $0x1990] sm:$0xff] %v1877_v50  ;;  %v1883_v53 = vld [vmem:[%s8108_s7 + $0x3340] sm:$0xff]  ;;  %1880 = vst [vmem:[%s8113_s8 + $0x1998] sm:$0xff] %v1879_v51  ;;  %v1885_v54 = vld [vmem:[%s8108_s7 + $0x3348] sm:$0xff] }
 0x1ab   : > { %1882 = vst [vmem:[%s8113_s8 + $0x19a0] sm:$0xff] %v1881_v52  ;;  %1884 = vst [vmem:[%s8113_s8 + $0x19a8] sm:$0xff] %v1883_v53  ;;  %v1887_v55 = vld [vmem:[%s8108_s7 + $0x3350] sm:$0xff]  ;;  %v1889_v56 = vld [vmem:[%s8108_s7 + $0x3358] sm:$0xff] }
 0x1ac   : > { %1886 = vst [vmem:[%s8113_s8 + $0x19b0] sm:$0xff] %v1885_v54  ;;  %1888 = vst [vmem:[%s8113_s8 + $0x19b8] sm:$0xff] %v1887_v55  ;;  %v1891_v57 = vld [vmem:[%s8108_s7 + $0x3360] sm:$0xff]  ;;  %v1893_v58 = vld [vmem:[%s8108_s7 + $0x3368] sm:$0xff] }
 0x1ad   : > { %1890 = vst [vmem:[%s8113_s8 + $0x19c0] sm:$0xff] %v1889_v56  ;;  %v1895_v59 = vld [vmem:[%s8108_s7 + $0x3370] sm:$0xff]  ;;  %1892 = vst [vmem:[%s8113_s8 + $0x19c8] sm:$0xff] %v1891_v57  ;;  %v1897_v60 = vld [vmem:[%s8108_s7 + $0x33c0] sm:$0xff] }
 0x1ae   : > { %1894 = vst [vmem:[%s8113_s8 + $0x19d0] sm:$0xff] %v1893_v58  ;;  %1896 = vst [vmem:[%s8113_s8 + $0x19d8] sm:$0xff] %v1895_v59  ;;  %v1899_v61 = vld [vmem:[%s8108_s7 + $0x33c8] sm:$0xff]  ;;  %v1901_v62 = vld [vmem:[%s8108_s7 + $0x33d0] sm:$0xff] }
 0x1af   : > { %1898 = vst [vmem:[%s8113_s8 + $0x19e0] sm:$0xff] %v1897_v60  ;;  %1900 = vst [vmem:[%s8113_s8 + $0x19e8] sm:$0xff] %v1899_v61  ;;  %v1903_v63 = vld [vmem:[%s8108_s7 + $0x33d8] sm:$0xff]  ;;  %v1905_v0 = vld [vmem:[%s8108_s7 + $0x33e0] sm:$0xff] }
 0x1b0   : > { %1902 = vst [vmem:[%s8113_s8 + $0x19f0] sm:$0xff] %v1901_v62  ;;  %v1907_v1 = vld [vmem:[%s8108_s7 + $0x33e8] sm:$0xff]  ;;  %1904 = vst [vmem:[%s8113_s8 + $0x19f8] sm:$0xff] %v1903_v63  ;;  %v1909_v2 = vld [vmem:[%s8108_s7 + $0x33f0] sm:$0xff] }
 0x1b1   : > { %1906 = vst [vmem:[%s8113_s8 + $0x1a00] sm:$0xff] %v1905_v0  ;;  %1908 = vst [vmem:[%s8113_s8 + $0x1a08] sm:$0xff] %v1907_v1  ;;  %v1911_v3 = vld [vmem:[%s8108_s7 + $0x33f8] sm:$0xff]  ;;  %v1913_v4 = vld [vmem:[%s8108_s7 + $0x3400] sm:$0xff] }
 0x1b2   : > { %1910 = vst [vmem:[%s8113_s8 + $0x1a10] sm:$0xff] %v1909_v2  ;;  %1912 = vst [vmem:[%s8113_s8 + $0x1a18] sm:$0xff] %v1911_v3  ;;  %v1915_v5 = vld [vmem:[%s8108_s7 + $0x3450] sm:$0xff]  ;;  %v1917_v6 = vld [vmem:[%s8108_s7 + $0x3458] sm:$0xff] }
 0x1b3   : > { %1914 = vst [vmem:[%s8113_s8 + $0x1a20] sm:$0xff] %v1913_v4  ;;  %v1919_v7 = vld [vmem:[%s8108_s7 + $0x3460] sm:$0xff]  ;;  %1916 = vst [vmem:[%s8113_s8 + $0x1a28] sm:$0xff] %v1915_v5  ;;  %v1921_v8 = vld [vmem:[%s8108_s7 + $0x3468] sm:$0xff] }
 0x1b4   : > { %1918 = vst [vmem:[%s8113_s8 + $0x1a30] sm:$0xff] %v1917_v6  ;;  %1920 = vst [vmem:[%s8113_s8 + $0x1a38] sm:$0xff] %v1919_v7  ;;  %v1923_v9 = vld [vmem:[%s8108_s7 + $0x3470] sm:$0xff]  ;;  %v1925_v10 = vld [vmem:[%s8108_s7 + $0x3478] sm:$0xff] }
 0x1b5   : > { %1922 = vst [vmem:[%s8113_s8 + $0x1a40] sm:$0xff] %v1921_v8  ;;  %1924 = vst [vmem:[%s8113_s8 + $0x1a48] sm:$0xff] %v1923_v9  ;;  %v1927_v11 = vld [vmem:[%s8108_s7 + $0x3480] sm:$0xff]  ;;  %v1929_v12 = vld [vmem:[%s8108_s7 + $0x3488] sm:$0xff] }
 0x1b6   : > { %1926 = vst [vmem:[%s8113_s8 + $0x1a50] sm:$0xff] %v1925_v10  ;;  %v1931_v13 = vld [vmem:[%s8108_s7 + $0x3490] sm:$0xff]  ;;  %1928 = vst [vmem:[%s8113_s8 + $0x1a58] sm:$0xff] %v1927_v11  ;;  %v1933_v14 = vld [vmem:[%s8108_s7 + $0x34e0] sm:$0xff] }
 0x1b7   : > { %1930 = vst [vmem:[%s8113_s8 + $0x1a60] sm:$0xff] %v1929_v12  ;;  %1932 = vst [vmem:[%s8113_s8 + $0x1a68] sm:$0xff] %v1931_v13  ;;  %v1935_v15 = vld [vmem:[%s8108_s7 + $0x34e8] sm:$0xff]  ;;  %v1937_v16 = vld [vmem:[%s8108_s7 + $0x34f0] sm:$0xff] }
 0x1b8   : > { %1934 = vst [vmem:[%s8113_s8 + $0x1a70] sm:$0xff] %v1933_v14  ;;  %1936 = vst [vmem:[%s8113_s8 + $0x1a78] sm:$0xff] %v1935_v15  ;;  %v1939_v17 = vld [vmem:[%s8108_s7 + $0x34f8] sm:$0xff]  ;;  %v1941_v18 = vld [vmem:[%s8108_s7 + $0x3500] sm:$0xff] }
 0x1b9   : > { %1938 = vst [vmem:[%s8113_s8 + $0x1a80] sm:$0xff] %v1937_v16  ;;  %v1943_v19 = vld [vmem:[%s8108_s7 + $0x3508] sm:$0xff]  ;;  %1940 = vst [vmem:[%s8113_s8 + $0x1a88] sm:$0xff] %v1939_v17  ;;  %v1945_v20 = vld [vmem:[%s8108_s7 + $0x3510] sm:$0xff] }
 0x1ba   : > { %1942 = vst [vmem:[%s8113_s8 + $0x1a90] sm:$0xff] %v1941_v18  ;;  %1944 = vst [vmem:[%s8113_s8 + $0x1a98] sm:$0xff] %v1943_v19  ;;  %v1947_v21 = vld [vmem:[%s8108_s7 + $0x3518] sm:$0xff]  ;;  %v1949_v22 = vld [vmem:[%s8108_s7 + $0x3520] sm:$0xff] }
 0x1bb   : > { %1946 = vst [vmem:[%s8113_s8 + $0x1aa0] sm:$0xff] %v1945_v20  ;;  %1948 = vst [vmem:[%s8113_s8 + $0x1aa8] sm:$0xff] %v1947_v21  ;;  %v1951_v23 = vld [vmem:[%s8108_s7 + $0x3570] sm:$0xff]  ;;  %v1953_v24 = vld [vmem:[%s8108_s7 + $0x3578] sm:$0xff] }
 0x1bc   : > { %1950 = vst [vmem:[%s8113_s8 + $0x1ab0] sm:$0xff] %v1949_v22  ;;  %v1955_v25 = vld [vmem:[%s8108_s7 + $0x3580] sm:$0xff]  ;;  %1952 = vst [vmem:[%s8113_s8 + $0x1ab8] sm:$0xff] %v1951_v23  ;;  %v1957_v26 = vld [vmem:[%s8108_s7 + $0x3588] sm:$0xff] }
 0x1bd   : > { %1954 = vst [vmem:[%s8113_s8 + $0x1ac0] sm:$0xff] %v1953_v24  ;;  %1956 = vst [vmem:[%s8113_s8 + $0x1ac8] sm:$0xff] %v1955_v25  ;;  %v1959_v27 = vld [vmem:[%s8108_s7 + $0x3590] sm:$0xff]  ;;  %v1961_v28 = vld [vmem:[%s8108_s7 + $0x3598] sm:$0xff] }
 0x1be   : > { %1958 = vst [vmem:[%s8113_s8 + $0x1ad0] sm:$0xff] %v1957_v26  ;;  %1960 = vst [vmem:[%s8113_s8 + $0x1ad8] sm:$0xff] %v1959_v27  ;;  %v1963_v29 = vld [vmem:[%s8108_s7 + $0x35a0] sm:$0xff]  ;;  %v1965_v30 = vld [vmem:[%s8108_s7 + $0x35a8] sm:$0xff] }
 0x1bf   : > { %1962 = vst [vmem:[%s8113_s8 + $0x1ae0] sm:$0xff] %v1961_v28  ;;  %v1967_v31 = vld [vmem:[%s8108_s7 + $0x35b0] sm:$0xff]  ;;  %1964 = vst [vmem:[%s8113_s8 + $0x1ae8] sm:$0xff] %v1963_v29  ;;  %v1969_v32 = vld [vmem:[%s8108_s7 + $0x3600] sm:$0xff] }
 0x1c0   : > { %1966 = vst [vmem:[%s8113_s8 + $0x1af0] sm:$0xff] %v1965_v30  ;;  %1968 = vst [vmem:[%s8113_s8 + $0x1af8] sm:$0xff] %v1967_v31  ;;  %v1971_v33 = vld [vmem:[%s8108_s7 + $0x3608] sm:$0xff]  ;;  %v1973_v34 = vld [vmem:[%s8108_s7 + $0x3610] sm:$0xff] }
 0x1c1   : > { %1970 = vst [vmem:[%s8113_s8 + $0x1b00] sm:$0xff] %v1969_v32  ;;  %1972 = vst [vmem:[%s8113_s8 + $0x1b08] sm:$0xff] %v1971_v33  ;;  %v1975_v35 = vld [vmem:[%s8108_s7 + $0x3618] sm:$0xff]  ;;  %v1977_v36 = vld [vmem:[%s8108_s7 + $0x3620] sm:$0xff] }
 0x1c2   : > { %1974 = vst [vmem:[%s8113_s8 + $0x1b10] sm:$0xff] %v1973_v34  ;;  %v1979_v37 = vld [vmem:[%s8108_s7 + $0x3628] sm:$0xff]  ;;  %1976 = vst [vmem:[%s8113_s8 + $0x1b18] sm:$0xff] %v1975_v35  ;;  %v1981_v38 = vld [vmem:[%s8108_s7 + $0x3630] sm:$0xff] }
 0x1c3   : > { %1978 = vst [vmem:[%s8113_s8 + $0x1b20] sm:$0xff] %v1977_v36  ;;  %1980 = vst [vmem:[%s8113_s8 + $0x1b28] sm:$0xff] %v1979_v37  ;;  %v1983_v39 = vld [vmem:[%s8108_s7 + $0x3638] sm:$0xff]  ;;  %v1985_v40 = vld [vmem:[%s8108_s7 + $0x3640] sm:$0xff] }
 0x1c4   : > { %1982 = vst [vmem:[%s8113_s8 + $0x1b30] sm:$0xff] %v1981_v38  ;;  %1984 = vst [vmem:[%s8113_s8 + $0x1b38] sm:$0xff] %v1983_v39  ;;  %v1987_v41 = vld [vmem:[%s8108_s7 + $0x3690] sm:$0xff]  ;;  %v1989_v42 = vld [vmem:[%s8108_s7 + $0x3698] sm:$0xff] }
 0x1c5   : > { %1986 = vst [vmem:[%s8113_s8 + $0x1b40] sm:$0xff] %v1985_v40  ;;  %v1991_v43 = vld [vmem:[%s8108_s7 + $0x36a0] sm:$0xff]  ;;  %1988 = vst [vmem:[%s8113_s8 + $0x1b48] sm:$0xff] %v1987_v41  ;;  %v1993_v44 = vld [vmem:[%s8108_s7 + $0x36a8] sm:$0xff] }
 0x1c6   : > { %1990 = vst [vmem:[%s8113_s8 + $0x1b50] sm:$0xff] %v1989_v42  ;;  %1992 = vst [vmem:[%s8113_s8 + $0x1b58] sm:$0xff] %v1991_v43  ;;  %v1995_v45 = vld [vmem:[%s8108_s7 + $0x36b0] sm:$0xff]  ;;  %v1997_v46 = vld [vmem:[%s8108_s7 + $0x36b8] sm:$0xff] }
 0x1c7   : > { %1994 = vst [vmem:[%s8113_s8 + $0x1b60] sm:$0xff] %v1993_v44  ;;  %1996 = vst [vmem:[%s8113_s8 + $0x1b68] sm:$0xff] %v1995_v45  ;;  %v1999_v47 = vld [vmem:[%s8108_s7 + $0x36c0] sm:$0xff]  ;;  %v2001_v48 = vld [vmem:[%s8108_s7 + $0x36c8] sm:$0xff] }
 0x1c8   : > { %1998 = vst [vmem:[%s8113_s8 + $0x1b70] sm:$0xff] %v1997_v46  ;;  %v2003_v49 = vld [vmem:[%s8108_s7 + $0x36d0] sm:$0xff]  ;;  %2000 = vst [vmem:[%s8113_s8 + $0x1b78] sm:$0xff] %v1999_v47  ;;  %v2005_v50 = vld [vmem:[%s8108_s7 + $0x3720] sm:$0xff] }
 0x1c9   : > { %2002 = vst [vmem:[%s8113_s8 + $0x1b80] sm:$0xff] %v2001_v48  ;;  %2004 = vst [vmem:[%s8113_s8 + $0x1b88] sm:$0xff] %v2003_v49  ;;  %v2007_v51 = vld [vmem:[%s8108_s7 + $0x3728] sm:$0xff]  ;;  %v2009_v52 = vld [vmem:[%s8108_s7 + $0x3730] sm:$0xff] }
 0x1ca   : > { %2006 = vst [vmem:[%s8113_s8 + $0x1b90] sm:$0xff] %v2005_v50  ;;  %2008 = vst [vmem:[%s8113_s8 + $0x1b98] sm:$0xff] %v2007_v51  ;;  %v2011_v53 = vld [vmem:[%s8108_s7 + $0x3738] sm:$0xff]  ;;  %v2013_v54 = vld [vmem:[%s8108_s7 + $0x3740] sm:$0xff] }
 0x1cb   : > { %2010 = vst [vmem:[%s8113_s8 + $0x1ba0] sm:$0xff] %v2009_v52  ;;  %v2015_v55 = vld [vmem:[%s8108_s7 + $0x3748] sm:$0xff]  ;;  %2012 = vst [vmem:[%s8113_s8 + $0x1ba8] sm:$0xff] %v2011_v53  ;;  %v2017_v56 = vld [vmem:[%s8108_s7 + $0x3750] sm:$0xff] }
 0x1cc   : > { %2014 = vst [vmem:[%s8113_s8 + $0x1bb0] sm:$0xff] %v2013_v54  ;;  %2016 = vst [vmem:[%s8113_s8 + $0x1bb8] sm:$0xff] %v2015_v55  ;;  %v2019_v57 = vld [vmem:[%s8108_s7 + $0x3758] sm:$0xff]  ;;  %v2021_v58 = vld [vmem:[%s8108_s7 + $0x3760] sm:$0xff] }
 0x1cd   : > { %2018 = vst [vmem:[%s8113_s8 + $0x1bc0] sm:$0xff] %v2017_v56  ;;  %2020 = vst [vmem:[%s8113_s8 + $0x1bc8] sm:$0xff] %v2019_v57  ;;  %v2023_v59 = vld [vmem:[%s8108_s7 + $0x37b0] sm:$0xff]  ;;  %v2025_v60 = vld [vmem:[%s8108_s7 + $0x37b8] sm:$0xff] }
 0x1ce   : > { %2022 = vst [vmem:[%s8113_s8 + $0x1bd0] sm:$0xff] %v2021_v58  ;;  %v2027_v61 = vld [vmem:[%s8108_s7 + $0x37c0] sm:$0xff]  ;;  %2024 = vst [vmem:[%s8113_s8 + $0x1bd8] sm:$0xff] %v2023_v59  ;;  %v2029_v62 = vld [vmem:[%s8108_s7 + $0x37c8] sm:$0xff] }
 0x1cf   : > { %2026 = vst [vmem:[%s8113_s8 + $0x1be0] sm:$0xff] %v2025_v60  ;;  %2028 = vst [vmem:[%s8113_s8 + $0x1be8] sm:$0xff] %v2027_v61  ;;  %v2031_v63 = vld [vmem:[%s8108_s7 + $0x37d0] sm:$0xff]  ;;  %v2033_v0 = vld [vmem:[%s8108_s7 + $0x37d8] sm:$0xff] }
 0x1d0   : > { %2030 = vst [vmem:[%s8113_s8 + $0x1bf0] sm:$0xff] %v2029_v62  ;;  %2032 = vst [vmem:[%s8113_s8 + $0x1bf8] sm:$0xff] %v2031_v63  ;;  %v2035_v1 = vld [vmem:[%s8108_s7 + $0x37e0] sm:$0xff]  ;;  %v2037_v2 = vld [vmem:[%s8108_s7 + $0x37e8] sm:$0xff] }
 0x1d1   : > { %2034 = vst [vmem:[%s8113_s8 + $0x1c00] sm:$0xff] %v2033_v0  ;;  %v2039_v3 = vld [vmem:[%s8108_s7 + $0x37f0] sm:$0xff]  ;;  %2036 = vst [vmem:[%s8113_s8 + $0x1c08] sm:$0xff] %v2035_v1  ;;  %v2041_v4 = vld [vmem:[%s8108_s7 + $0x3840] sm:$0xff] }
 0x1d2   : > { %2038 = vst [vmem:[%s8113_s8 + $0x1c10] sm:$0xff] %v2037_v2  ;;  %2040 = vst [vmem:[%s8113_s8 + $0x1c18] sm:$0xff] %v2039_v3  ;;  %v2043_v5 = vld [vmem:[%s8108_s7 + $0x3848] sm:$0xff]  ;;  %v2045_v6 = vld [vmem:[%s8108_s7 + $0x3850] sm:$0xff] }
 0x1d3   : > { %2042 = vst [vmem:[%s8113_s8 + $0x1c20] sm:$0xff] %v2041_v4  ;;  %2044 = vst [vmem:[%s8113_s8 + $0x1c28] sm:$0xff] %v2043_v5  ;;  %v2047_v7 = vld [vmem:[%s8108_s7 + $0x3858] sm:$0xff]  ;;  %v2049_v8 = vld [vmem:[%s8108_s7 + $0x3860] sm:$0xff] }
 0x1d4   : > { %2046 = vst [vmem:[%s8113_s8 + $0x1c30] sm:$0xff] %v2045_v6  ;;  %v2051_v9 = vld [vmem:[%s8108_s7 + $0x3868] sm:$0xff]  ;;  %2048 = vst [vmem:[%s8113_s8 + $0x1c38] sm:$0xff] %v2047_v7  ;;  %v2053_v10 = vld [vmem:[%s8108_s7 + $0x3870] sm:$0xff] }
 0x1d5   : > { %2050 = vst [vmem:[%s8113_s8 + $0x1c40] sm:$0xff] %v2049_v8  ;;  %2052 = vst [vmem:[%s8113_s8 + $0x1c48] sm:$0xff] %v2051_v9  ;;  %v2055_v11 = vld [vmem:[%s8108_s7 + $0x3878] sm:$0xff]  ;;  %v2057_v12 = vld [vmem:[%s8108_s7 + $0x3880] sm:$0xff] }
 0x1d6   : > { %2054 = vst [vmem:[%s8113_s8 + $0x1c50] sm:$0xff] %v2053_v10  ;;  %2056 = vst [vmem:[%s8113_s8 + $0x1c58] sm:$0xff] %v2055_v11  ;;  %v2059_v13 = vld [vmem:[%s8108_s7 + $0x38d0] sm:$0xff]  ;;  %v2061_v14 = vld [vmem:[%s8108_s7 + $0x38d8] sm:$0xff] }
 0x1d7   : > { %2058 = vst [vmem:[%s8113_s8 + $0x1c60] sm:$0xff] %v2057_v12  ;;  %v2063_v15 = vld [vmem:[%s8108_s7 + $0x38e0] sm:$0xff]  ;;  %2060 = vst [vmem:[%s8113_s8 + $0x1c68] sm:$0xff] %v2059_v13  ;;  %v2065_v16 = vld [vmem:[%s8108_s7 + $0x38e8] sm:$0xff] }
 0x1d8   : > { %2062 = vst [vmem:[%s8113_s8 + $0x1c70] sm:$0xff] %v2061_v14  ;;  %2064 = vst [vmem:[%s8113_s8 + $0x1c78] sm:$0xff] %v2063_v15  ;;  %v2067_v17 = vld [vmem:[%s8108_s7 + $0x38f0] sm:$0xff]  ;;  %v2069_v18 = vld [vmem:[%s8108_s7 + $0x38f8] sm:$0xff] }
 0x1d9   : > { %2066 = vst [vmem:[%s8113_s8 + $0x1c80] sm:$0xff] %v2065_v16  ;;  %2068 = vst [vmem:[%s8113_s8 + $0x1c88] sm:$0xff] %v2067_v17  ;;  %v2071_v19 = vld [vmem:[%s8108_s7 + $0x3900] sm:$0xff]  ;;  %v2073_v20 = vld [vmem:[%s8108_s7 + $0x3908] sm:$0xff] }
 0x1da   : > { %2070 = vst [vmem:[%s8113_s8 + $0x1c90] sm:$0xff] %v2069_v18  ;;  %v2075_v21 = vld [vmem:[%s8108_s7 + $0x3910] sm:$0xff]  ;;  %2072 = vst [vmem:[%s8113_s8 + $0x1c98] sm:$0xff] %v2071_v19  ;;  %v2077_v22 = vld [vmem:[%s8108_s7 + $0x3960] sm:$0xff] }
 0x1db   : > { %2074 = vst [vmem:[%s8113_s8 + $0x1ca0] sm:$0xff] %v2073_v20  ;;  %2076 = vst [vmem:[%s8113_s8 + $0x1ca8] sm:$0xff] %v2075_v21  ;;  %v2079_v23 = vld [vmem:[%s8108_s7 + $0x3968] sm:$0xff]  ;;  %v2081_v24 = vld [vmem:[%s8108_s7 + $0x3970] sm:$0xff] }
 0x1dc   : > { %2078 = vst [vmem:[%s8113_s8 + $0x1cb0] sm:$0xff] %v2077_v22  ;;  %2080 = vst [vmem:[%s8113_s8 + $0x1cb8] sm:$0xff] %v2079_v23  ;;  %v2083_v25 = vld [vmem:[%s8108_s7 + $0x3978] sm:$0xff]  ;;  %v2085_v26 = vld [vmem:[%s8108_s7 + $0x3980] sm:$0xff] }
 0x1dd   : > { %2082 = vst [vmem:[%s8113_s8 + $0x1cc0] sm:$0xff] %v2081_v24  ;;  %v2087_v27 = vld [vmem:[%s8108_s7 + $0x3988] sm:$0xff]  ;;  %2084 = vst [vmem:[%s8113_s8 + $0x1cc8] sm:$0xff] %v2083_v25  ;;  %v2089_v28 = vld [vmem:[%s8108_s7 + $0x3990] sm:$0xff] }
 0x1de   : > { %2086 = vst [vmem:[%s8113_s8 + $0x1cd0] sm:$0xff] %v2085_v26  ;;  %2088 = vst [vmem:[%s8113_s8 + $0x1cd8] sm:$0xff] %v2087_v27  ;;  %v2091_v29 = vld [vmem:[%s8108_s7 + $0x3998] sm:$0xff]  ;;  %v2093_v30 = vld [vmem:[%s8108_s7 + $0x39a0] sm:$0xff] }
 0x1df   : > { %2090 = vst [vmem:[%s8113_s8 + $0x1ce0] sm:$0xff] %v2089_v28  ;;  %2092 = vst [vmem:[%s8113_s8 + $0x1ce8] sm:$0xff] %v2091_v29  ;;  %v2095_v31 = vld [vmem:[%s8108_s7 + $0x39f0] sm:$0xff]  ;;  %v2097_v32 = vld [vmem:[%s8108_s7 + $0x39f8] sm:$0xff] }
 0x1e0   : > { %2094 = vst [vmem:[%s8113_s8 + $0x1cf0] sm:$0xff] %v2093_v30  ;;  %v2099_v33 = vld [vmem:[%s8108_s7 + $0x3a00] sm:$0xff]  ;;  %2096 = vst [vmem:[%s8113_s8 + $0x1cf8] sm:$0xff] %v2095_v31  ;;  %v2101_v34 = vld [vmem:[%s8108_s7 + $0x3a08] sm:$0xff] }
 0x1e1   : > { %2098 = vst [vmem:[%s8113_s8 + $0x1d00] sm:$0xff] %v2097_v32  ;;  %2100 = vst [vmem:[%s8113_s8 + $0x1d08] sm:$0xff] %v2099_v33  ;;  %v2103_v35 = vld [vmem:[%s8108_s7 + $0x3a10] sm:$0xff]  ;;  %v2105_v36 = vld [vmem:[%s8108_s7 + $0x3a18] sm:$0xff] }
 0x1e2   : > { %2102 = vst [vmem:[%s8113_s8 + $0x1d10] sm:$0xff] %v2101_v34  ;;  %2104 = vst [vmem:[%s8113_s8 + $0x1d18] sm:$0xff] %v2103_v35  ;;  %v2107_v37 = vld [vmem:[%s8108_s7 + $0x3a20] sm:$0xff]  ;;  %v2109_v38 = vld [vmem:[%s8108_s7 + $0x3a28] sm:$0xff] }
 0x1e3   : > { %2106 = vst [vmem:[%s8113_s8 + $0x1d20] sm:$0xff] %v2105_v36  ;;  %v2111_v39 = vld [vmem:[%s8108_s7 + $0x3a30] sm:$0xff]  ;;  %2108 = vst [vmem:[%s8113_s8 + $0x1d28] sm:$0xff] %v2107_v37  ;;  %v2113_v40 = vld [vmem:[%s8108_s7 + $0x3a80] sm:$0xff] }
 0x1e4   : > { %2110 = vst [vmem:[%s8113_s8 + $0x1d30] sm:$0xff] %v2109_v38  ;;  %2112 = vst [vmem:[%s8113_s8 + $0x1d38] sm:$0xff] %v2111_v39  ;;  %v2115_v41 = vld [vmem:[%s8108_s7 + $0x3a88] sm:$0xff]  ;;  %v2117_v42 = vld [vmem:[%s8108_s7 + $0x3a90] sm:$0xff] }
 0x1e5   : > { %2114 = vst [vmem:[%s8113_s8 + $0x1d40] sm:$0xff] %v2113_v40  ;;  %2116 = vst [vmem:[%s8113_s8 + $0x1d48] sm:$0xff] %v2115_v41  ;;  %v2119_v43 = vld [vmem:[%s8108_s7 + $0x3a98] sm:$0xff]  ;;  %v2121_v44 = vld [vmem:[%s8108_s7 + $0x3aa0] sm:$0xff] }
 0x1e6   : > { %2118 = vst [vmem:[%s8113_s8 + $0x1d50] sm:$0xff] %v2117_v42  ;;  %v2123_v45 = vld [vmem:[%s8108_s7 + $0x3aa8] sm:$0xff]  ;;  %2120 = vst [vmem:[%s8113_s8 + $0x1d58] sm:$0xff] %v2119_v43  ;;  %v2125_v46 = vld [vmem:[%s8108_s7 + $0x3ab0] sm:$0xff] }
 0x1e7   : > { %2122 = vst [vmem:[%s8113_s8 + $0x1d60] sm:$0xff] %v2121_v44  ;;  %2124 = vst [vmem:[%s8113_s8 + $0x1d68] sm:$0xff] %v2123_v45  ;;  %v2127_v47 = vld [vmem:[%s8108_s7 + $0x3ab8] sm:$0xff]  ;;  %v2129_v48 = vld [vmem:[%s8108_s7 + $0x3ac0] sm:$0xff] }
 0x1e8   : > { %2126 = vst [vmem:[%s8113_s8 + $0x1d70] sm:$0xff] %v2125_v46  ;;  %2128 = vst [vmem:[%s8113_s8 + $0x1d78] sm:$0xff] %v2127_v47  ;;  %v2131_v49 = vld [vmem:[%s8108_s7 + $0x3b10] sm:$0xff]  ;;  %v2133_v50 = vld [vmem:[%s8108_s7 + $0x3b18] sm:$0xff] }
 0x1e9   : > { %2130 = vst [vmem:[%s8113_s8 + $0x1d80] sm:$0xff] %v2129_v48  ;;  %v2135_v51 = vld [vmem:[%s8108_s7 + $0x3b20] sm:$0xff]  ;;  %2132 = vst [vmem:[%s8113_s8 + $0x1d88] sm:$0xff] %v2131_v49  ;;  %v2137_v52 = vld [vmem:[%s8108_s7 + $0x3b28] sm:$0xff] }
 0x1ea   : > { %2134 = vst [vmem:[%s8113_s8 + $0x1d90] sm:$0xff] %v2133_v50  ;;  %2136 = vst [vmem:[%s8113_s8 + $0x1d98] sm:$0xff] %v2135_v51  ;;  %v2139_v53 = vld [vmem:[%s8108_s7 + $0x3b30] sm:$0xff]  ;;  %v2141_v54 = vld [vmem:[%s8108_s7 + $0x3b38] sm:$0xff] }
 0x1eb   : > { %2138 = vst [vmem:[%s8113_s8 + $0x1da0] sm:$0xff] %v2137_v52  ;;  %2140 = vst [vmem:[%s8113_s8 + $0x1da8] sm:$0xff] %v2139_v53  ;;  %v2143_v55 = vld [vmem:[%s8108_s7 + $0x3b40] sm:$0xff]  ;;  %v2145_v56 = vld [vmem:[%s8108_s7 + $0x3b48] sm:$0xff] }
 0x1ec   : > { %2142 = vst [vmem:[%s8113_s8 + $0x1db0] sm:$0xff] %v2141_v54  ;;  %v2147_v57 = vld [vmem:[%s8108_s7 + $0x3b50] sm:$0xff]  ;;  %2144 = vst [vmem:[%s8113_s8 + $0x1db8] sm:$0xff] %v2143_v55  ;;  %v2149_v58 = vld [vmem:[%s8108_s7 + $0x3ba0] sm:$0xff] }
 0x1ed   : > { %2146 = vst [vmem:[%s8113_s8 + $0x1dc0] sm:$0xff] %v2145_v56  ;;  %2148 = vst [vmem:[%s8113_s8 + $0x1dc8] sm:$0xff] %v2147_v57  ;;  %v2151_v59 = vld [vmem:[%s8108_s7 + $0x3ba8] sm:$0xff]  ;;  %v2153_v60 = vld [vmem:[%s8108_s7 + $0x3bb0] sm:$0xff] }
 0x1ee   : > { %2150 = vst [vmem:[%s8113_s8 + $0x1dd0] sm:$0xff] %v2149_v58  ;;  %2152 = vst [vmem:[%s8113_s8 + $0x1dd8] sm:$0xff] %v2151_v59  ;;  %v2155_v61 = vld [vmem:[%s8108_s7 + $0x3bb8] sm:$0xff]  ;;  %v2157_v62 = vld [vmem:[%s8108_s7 + $0x3bc0] sm:$0xff] }
 0x1ef   : > { %2154 = vst [vmem:[%s8113_s8 + $0x1de0] sm:$0xff] %v2153_v60  ;;  %v2159_v63 = vld [vmem:[%s8108_s7 + $0x3bc8] sm:$0xff]  ;;  %2156 = vst [vmem:[%s8113_s8 + $0x1de8] sm:$0xff] %v2155_v61  ;;  %v2161_v0 = vld [vmem:[%s8108_s7 + $0x3bd0] sm:$0xff] }
 0x1f0   : > { %2158 = vst [vmem:[%s8113_s8 + $0x1df0] sm:$0xff] %v2157_v62  ;;  %2160 = vst [vmem:[%s8113_s8 + $0x1df8] sm:$0xff] %v2159_v63  ;;  %v2163_v1 = vld [vmem:[%s8108_s7 + $0x3bd8] sm:$0xff]  ;;  %v2165_v2 = vld [vmem:[%s8108_s7 + $0x3be0] sm:$0xff] }
 0x1f1   : > { %2162 = vst [vmem:[%s8113_s8 + $0x1e00] sm:$0xff] %v2161_v0  ;;  %2164 = vst [vmem:[%s8113_s8 + $0x1e08] sm:$0xff] %v2163_v1  ;;  %v2167_v3 = vld [vmem:[%s8108_s7 + $0x3c30] sm:$0xff]  ;;  %v2169_v4 = vld [vmem:[%s8108_s7 + $0x3c38] sm:$0xff] }
 0x1f2   : > { %2166 = vst [vmem:[%s8113_s8 + $0x1e10] sm:$0xff] %v2165_v2  ;;  %v2171_v5 = vld [vmem:[%s8108_s7 + $0x3c40] sm:$0xff]  ;;  %2168 = vst [vmem:[%s8113_s8 + $0x1e18] sm:$0xff] %v2167_v3  ;;  %v2173_v6 = vld [vmem:[%s8108_s7 + $0x3c48] sm:$0xff] }
 0x1f3   : > { %2170 = vst [vmem:[%s8113_s8 + $0x1e20] sm:$0xff] %v2169_v4  ;;  %2172 = vst [vmem:[%s8113_s8 + $0x1e28] sm:$0xff] %v2171_v5  ;;  %v2175_v7 = vld [vmem:[%s8108_s7 + $0x3c50] sm:$0xff]  ;;  %v2177_v8 = vld [vmem:[%s8108_s7 + $0x3c58] sm:$0xff] }
 0x1f4   : > { %2174 = vst [vmem:[%s8113_s8 + $0x1e30] sm:$0xff] %v2173_v6  ;;  %2176 = vst [vmem:[%s8113_s8 + $0x1e38] sm:$0xff] %v2175_v7  ;;  %v2179_v9 = vld [vmem:[%s8108_s7 + $0x3c60] sm:$0xff]  ;;  %v2181_v10 = vld [vmem:[%s8108_s7 + $0x3c68] sm:$0xff] }
 0x1f5   : > { %2178 = vst [vmem:[%s8113_s8 + $0x1e40] sm:$0xff] %v2177_v8  ;;  %v2183_v11 = vld [vmem:[%s8108_s7 + $0x3c70] sm:$0xff]  ;;  %2180 = vst [vmem:[%s8113_s8 + $0x1e48] sm:$0xff] %v2179_v9  ;;  %v2185_v12 = vld [vmem:[%s8108_s7 + $0x3cc0] sm:$0xff] }
 0x1f6   : > { %2182 = vst [vmem:[%s8113_s8 + $0x1e50] sm:$0xff] %v2181_v10  ;;  %2184 = vst [vmem:[%s8113_s8 + $0x1e58] sm:$0xff] %v2183_v11  ;;  %v2187_v13 = vld [vmem:[%s8108_s7 + $0x3cc8] sm:$0xff]  ;;  %v2189_v14 = vld [vmem:[%s8108_s7 + $0x3cd0] sm:$0xff] }
 0x1f7   : > { %2186 = vst [vmem:[%s8113_s8 + $0x1e60] sm:$0xff] %v2185_v12  ;;  %2188 = vst [vmem:[%s8113_s8 + $0x1e68] sm:$0xff] %v2187_v13  ;;  %v2191_v15 = vld [vmem:[%s8108_s7 + $0x3cd8] sm:$0xff]  ;;  %v2193_v16 = vld [vmem:[%s8108_s7 + $0x3ce0] sm:$0xff] }
 0x1f8   : > { %2190 = vst [vmem:[%s8113_s8 + $0x1e70] sm:$0xff] %v2189_v14  ;;  %v2195_v17 = vld [vmem:[%s8108_s7 + $0x3ce8] sm:$0xff]  ;;  %2192 = vst [vmem:[%s8113_s8 + $0x1e78] sm:$0xff] %v2191_v15  ;;  %v2197_v18 = vld [vmem:[%s8108_s7 + $0x3cf0] sm:$0xff] }
 0x1f9   : > { %2194 = vst [vmem:[%s8113_s8 + $0x1e80] sm:$0xff] %v2193_v16  ;;  %2196 = vst [vmem:[%s8113_s8 + $0x1e88] sm:$0xff] %v2195_v17  ;;  %v2199_v19 = vld [vmem:[%s8108_s7 + $0x3cf8] sm:$0xff]  ;;  %v2201_v20 = vld [vmem:[%s8108_s7 + $0x3d00] sm:$0xff] }
 0x1fa   : > { %2198 = vst [vmem:[%s8113_s8 + $0x1e90] sm:$0xff] %v2197_v18  ;;  %2200 = vst [vmem:[%s8113_s8 + $0x1e98] sm:$0xff] %v2199_v19  ;;  %v2203_v21 = vld [vmem:[%s8108_s7 + $0x3d50] sm:$0xff]  ;;  %v2205_v22 = vld [vmem:[%s8108_s7 + $0x3d58] sm:$0xff] }
 0x1fb   : > { %2202 = vst [vmem:[%s8113_s8 + $0x1ea0] sm:$0xff] %v2201_v20  ;;  %v2207_v23 = vld [vmem:[%s8108_s7 + $0x3d60] sm:$0xff]  ;;  %2204 = vst [vmem:[%s8113_s8 + $0x1ea8] sm:$0xff] %v2203_v21  ;;  %v2209_v24 = vld [vmem:[%s8108_s7 + $0x3d68] sm:$0xff] }
 0x1fc   : > { %2206 = vst [vmem:[%s8113_s8 + $0x1eb0] sm:$0xff] %v2205_v22  ;;  %2208 = vst [vmem:[%s8113_s8 + $0x1eb8] sm:$0xff] %v2207_v23  ;;  %v2211_v25 = vld [vmem:[%s8108_s7 + $0x3d70] sm:$0xff]  ;;  %v2213_v26 = vld [vmem:[%s8108_s7 + $0x3d78] sm:$0xff] }
 0x1fd   : > { %2210 = vst [vmem:[%s8113_s8 + $0x1ec0] sm:$0xff] %v2209_v24  ;;  %2212 = vst [vmem:[%s8113_s8 + $0x1ec8] sm:$0xff] %v2211_v25  ;;  %v2215_v27 = vld [vmem:[%s8108_s7 + $0x3d80] sm:$0xff]  ;;  %v2217_v28 = vld [vmem:[%s8108_s7 + $0x3d88] sm:$0xff] }
 0x1fe   : > { %2214 = vst [vmem:[%s8113_s8 + $0x1ed0] sm:$0xff] %v2213_v26  ;;  %v2219_v29 = vld [vmem:[%s8108_s7 + $0x3d90] sm:$0xff]  ;;  %2216 = vst [vmem:[%s8113_s8 + $0x1ed8] sm:$0xff] %v2215_v27  ;;  %v2221_v30 = vld [vmem:[%s8108_s7 + $0x3de0] sm:$0xff] }
 0x1ff   : > { %2218 = vst [vmem:[%s8113_s8 + $0x1ee0] sm:$0xff] %v2217_v28  ;;  %2220 = vst [vmem:[%s8113_s8 + $0x1ee8] sm:$0xff] %v2219_v29  ;;  %v2223_v31 = vld [vmem:[%s8108_s7 + $0x3de8] sm:$0xff]  ;;  %v2225_v32 = vld [vmem:[%s8108_s7 + $0x3df0] sm:$0xff] }
 0x200   : > { %2222 = vst [vmem:[%s8113_s8 + $0x1ef0] sm:$0xff] %v2221_v30  ;;  %2224 = vst [vmem:[%s8113_s8 + $0x1ef8] sm:$0xff] %v2223_v31  ;;  %v2227_v33 = vld [vmem:[%s8108_s7 + $0x3df8] sm:$0xff]  ;;  %v2229_v34 = vld [vmem:[%s8108_s7 + $0x3e00] sm:$0xff] }
 0x201   : > { %2226 = vst [vmem:[%s8113_s8 + $0x1f00] sm:$0xff] %v2225_v32  ;;  %v2231_v35 = vld [vmem:[%s8108_s7 + $0x3e08] sm:$0xff]  ;;  %2228 = vst [vmem:[%s8113_s8 + $0x1f08] sm:$0xff] %v2227_v33  ;;  %v2233_v36 = vld [vmem:[%s8108_s7 + $0x3e10] sm:$0xff] }
 0x202   : > { %2230 = vst [vmem:[%s8113_s8 + $0x1f10] sm:$0xff] %v2229_v34  ;;  %2232 = vst [vmem:[%s8113_s8 + $0x1f18] sm:$0xff] %v2231_v35  ;;  %v2235_v37 = vld [vmem:[%s8108_s7 + $0x3e18] sm:$0xff]  ;;  %v2237_v38 = vld [vmem:[%s8108_s7 + $0x3e20] sm:$0xff] }
 0x203   : > { %2234 = vst [vmem:[%s8113_s8 + $0x1f20] sm:$0xff] %v2233_v36  ;;  %2236 = vst [vmem:[%s8113_s8 + $0x1f28] sm:$0xff] %v2235_v37  ;;  %v2239_v39 = vld [vmem:[%s8108_s7 + $0x3e70] sm:$0xff]  ;;  %v2241_v40 = vld [vmem:[%s8108_s7 + $0x3e78] sm:$0xff] }
 0x204   : > { %2238 = vst [vmem:[%s8113_s8 + $0x1f30] sm:$0xff] %v2237_v38  ;;  %v2243_v41 = vld [vmem:[%s8108_s7 + $0x3e80] sm:$0xff]  ;;  %2240 = vst [vmem:[%s8113_s8 + $0x1f38] sm:$0xff] %v2239_v39  ;;  %v2245_v42 = vld [vmem:[%s8108_s7 + $0x3e88] sm:$0xff] }
 0x205   : > { %2242 = vst [vmem:[%s8113_s8 + $0x1f40] sm:$0xff] %v2241_v40  ;;  %2244 = vst [vmem:[%s8113_s8 + $0x1f48] sm:$0xff] %v2243_v41  ;;  %v2247_v43 = vld [vmem:[%s8108_s7 + $0x3e90] sm:$0xff]  ;;  %v2249_v44 = vld [vmem:[%s8108_s7 + $0x3e98] sm:$0xff] }
 0x206   : > { %2246 = vst [vmem:[%s8113_s8 + $0x1f50] sm:$0xff] %v2245_v42  ;;  %2248 = vst [vmem:[%s8113_s8 + $0x1f58] sm:$0xff] %v2247_v43  ;;  %v2251_v45 = vld [vmem:[%s8108_s7 + $0x3ea0] sm:$0xff]  ;;  %v2253_v46 = vld [vmem:[%s8108_s7 + $0x3ea8] sm:$0xff] }
 0x207   : > { %2250 = vst [vmem:[%s8113_s8 + $0x1f60] sm:$0xff] %v2249_v44  ;;  %v2255_v47 = vld [vmem:[%s8108_s7 + $0x3eb0] sm:$0xff]  ;;  %2252 = vst [vmem:[%s8113_s8 + $0x1f68] sm:$0xff] %v2251_v45  ;;  %v2257_v48 = vld [vmem:[%s8108_s7 + $0x3f00] sm:$0xff] }
 0x208   : > { %2254 = vst [vmem:[%s8113_s8 + $0x1f70] sm:$0xff] %v2253_v46  ;;  %2256 = vst [vmem:[%s8113_s8 + $0x1f78] sm:$0xff] %v2255_v47  ;;  %v2259_v49 = vld [vmem:[%s8108_s7 + $0x3f08] sm:$0xff]  ;;  %v2261_v50 = vld [vmem:[%s8108_s7 + $0x3f10] sm:$0xff] }
 0x209   : > { %2258 = vst [vmem:[%s8113_s8 + $0x1f80] sm:$0xff] %v2257_v48  ;;  %2260 = vst [vmem:[%s8113_s8 + $0x1f88] sm:$0xff] %v2259_v49  ;;  %v2263_v51 = vld [vmem:[%s8108_s7 + $0x3f18] sm:$0xff]  ;;  %v2265_v52 = vld [vmem:[%s8108_s7 + $0x3f20] sm:$0xff] }
 0x20a   : > { %2262 = vst [vmem:[%s8113_s8 + $0x1f90] sm:$0xff] %v2261_v50  ;;  %v2267_v53 = vld [vmem:[%s8108_s7 + $0x3f28] sm:$0xff]  ;;  %2264 = vst [vmem:[%s8113_s8 + $0x1f98] sm:$0xff] %v2263_v51  ;;  %v2269_v54 = vld [vmem:[%s8108_s7 + $0x3f30] sm:$0xff] }
 0x20b   : > { %2266 = vst [vmem:[%s8113_s8 + $0x1fa0] sm:$0xff] %v2265_v52  ;;  %2268 = vst [vmem:[%s8113_s8 + $0x1fa8] sm:$0xff] %v2267_v53  ;;  %v2271_v55 = vld [vmem:[%s8108_s7 + $0x3f38] sm:$0xff]  ;;  %v2273_v56 = vld [vmem:[%s8108_s7 + $0x3f40] sm:$0xff] }
 0x20c   : > { %2270 = vst [vmem:[%s8113_s8 + $0x1fb0] sm:$0xff] %v2269_v54  ;;  %2272 = vst [vmem:[%s8113_s8 + $0x1fb8] sm:$0xff] %v2271_v55 }
 0x20d   : > { %2274 = vst [vmem:[%s8113_s8 + $0x1fc0] sm:$0xff] %v2273_v56 }
 0x20e PF: > { %p7801_p6 = scmp.ge.s32.totalorder %s8031_s22, 1  ;;  %p2301_p7 = scmp.lt.s32.totalorder %s8031_s22, 3 }
 0x210   : > { %p2302_p8 = pnand %p7801_p6, %p2301_p7 }
 0x211   : > { %s2308_s9 = sand.u32 (!%p2302_p8), 1, %s8015_s18   ;;  %s2361_s14 = smul.u32 (!%p2302_p8), 9, %s8023_s20 }
 0x212   : > { %2305 = sbr.rel (%p2302_p8) target bundleno = 1938 (0x792), region = 59  ;;  %p2389_p11 = scmp.eq.s32.totalorder (!%p2302_p8), %s8023_s20, 0 }
 0x213   : > { %s7930_s10 = smul.u32 (!%p2302_p8), 8136, %s2308_s9  ;;  %p10702_p9 = scmp.lt.s32.totalorder (!%p2302_p8), %s2361_s14, 17 }
 0x214   : > { %s2368_s24 = smul.u32 (!%p2302_p8), 144, %s8023_s20  ;;  %p2376_p12 = scmp.lt.s32.totalorder (!%p2302_p8), %s8023_s20, 1 }
 0x215   : > { %s10149_s11 = scalar_lea.vmem (!%p2302_p8), [#allocation2], %s7930_s10 }
 0x216   : > { %p11341_p10 = scmp.lt.s32.totalorder (!%p2302_p8), %s2368_s24, 287 }
 0x217   : > { %v2536_v57 = vld [vmem:[%s10149_s11 + $0x440] sm:$0xff]  ;;  %v2535_v59 = vld [vmem:[%s10149_s11 + $0x438] sm:$0xff]  ;;  %v2526_v63 = vld [vmem:[%s10149_s11 + $0x3f0] sm:$0xff]  ;;  %vm3509_vm0 = vcmask 1043456   ;;  %vm3506_vm1 = vcmask 31744   ;;  %s12707_s14 = smov (!%p10702_p9, %s2361_s14), 17 }
 0x218   : > { %v2824_v58 = vld [vmem:[%s10149_s11 + $0xd40] sm:$0xff]  ;;  %3537 = vmatprep.subr.mxu0 %v2536_v57  ;;  %v2823_v60 = vld [vmem:[%s10149_s11 + $0xd38] sm:$0xff]  ;;  %v2814_v0 = vld [vmem:[%s10149_s11 + $0xcf0] sm:$0xff]  ;;  %s10729_s18 = scalar_lea.vmem %s12692_s2, %s12707_s14  ;;  %s12709_s24 = smov (!%p11341_p10, %s2368_s24), 287 }
 0x219   : > { %3608 = vmatprep.subr.mxu1 %v2824_v58  ;;  %v2527_v61 = vld [vmem:[%s10149_s11 + $0x3f8] sm:$0xff]  ;;  %3538 = vmatpush1.msra.mxu0 %v2535_v59  ;;  %v2518_v1 = vld [vmem:[%s10149_s11 + $0x3b0] sm:$0xff]  ;;  %v2517_v3 = vld [vmem:[%s10149_s11 + $0x3a8] sm:$0xff]  ;;  %s7823_s27 = sshll.u32 %s12709_s24, 6  ;;  %s12711_s20 = smov (!%p2376_p12, %s8023_s20), 1 }
 0x21a   : > { %v2815_v62 = vld [vmem:[%s10149_s11 + $0xcf8] sm:$0xff]  ;;  %3609 = vmatpush1.msra.mxu1 %v2823_v60  ;;  %3539 = vmatprep.subr.mxu0 %v2527_v61  ;;  %v2806_v2 = vld [vmem:[%s10149_s11 + $0xcb0] sm:$0xff]  ;;  %v2805_v4 = vld [vmem:[%s10149_s11 + $0xca8] sm:$0xff]  ;;  %s11373_s30 = scalar_lea.vmem %s12693_s3, %s7823_s27  ;;  %s7804_s10 = sshll.u32 %s12711_s20, 3 }
 0x21b   : > { %3610 = vmatprep.subr.mxu1 %v2815_v62  ;;  %3540 = vmatpush1.msra.mxu0 %v2526_v63  ;;  %v2509_v5 = vld [vmem:[%s10149_s11 + $0x368] sm:$0xff]  ;;  %v2508_v7 = vld [vmem:[%s10149_s11 + $0x360] sm:$0xff]  ;;  %v2499_v11 = vld [vmem:[%s10149_s11 + $0x318] sm:$0xff]  ;;  %s2390_s6 = scalar_select %p2389_p11, 1, 0 }
 0x21c   : > { %3611 = vmatpush1.msra.mxu1 %v2814_v0  ;;  %v2797_v6 = vld [vmem:[%s10149_s11 + $0xc68] sm:$0xff]  ;;  %3541 = vmatprep.subr.mxu0 %v2518_v1  ;;  %v2796_v8 = vld [vmem:[%s10149_s11 + $0xc60] sm:$0xff]  ;;  %v2787_v12 = vld [vmem:[%s10149_s11 + $0xc18] sm:$0xff]  ;;  %s12665_s13 = scalar_lea.vmem %s12695_s5, %s7804_s10 }
 0x21d   : > { %3612 = vmatprep.subr.mxu1 %v2806_v2  ;;  %3542 = vmatpush1.msra.mxu0 %v2517_v3  ;;  %v2500_v9 = vld [vmem:[%s10149_s11 + $0x320] sm:$0xff]  ;;  %v2491_v13 = vld [vmem:[%s10149_s11 + $0x2d8] sm:$0xff]  ;;  %v2490_v15 = vld [vmem:[%s10149_s11 + $0x2d0] sm:$0xff]  ;;  %s2391_s9 = scvt.s32.f32 %s2390_s6 }
 0x21e   : > { %3613 = vmatpush1.msra.mxu1 %v2805_v4  ;;  %v2788_v10 = vld [vmem:[%s10149_s11 + $0xc20] sm:$0xff]  ;;  %3543 = vmatprep.subr.mxu0 %v2509_v5  ;;  %v2779_v14 = vld [vmem:[%s10149_s11 + $0xbd8] sm:$0xff]  ;;  %v2778_v16 = vld [vmem:[%s10149_s11 + $0xbd0] sm:$0xff] }
 0x21f   : > { %3614 = vmatprep.subr.mxu1 %v2797_v6  ;;  %3544 = vmatpush1.msra.mxu0 %v2508_v7  ;;  %v2482_v17 = vld [vmem:[%s10149_s11 + $0x290] sm:$0xff]  ;;  %v2481_v19 = vld [vmem:[%s10149_s11 + $0x288] sm:$0xff]  ;;  %v2472_v23 = vld [vmem:[%s10149_s11 + $0x240] sm:$0xff] }
 0x220   : > { %3615 = vmatpush1.msra.mxu1 %v2796_v8  ;;  %3545 = vmatprep.subr.mxu0 %v2500_v9  ;;  %v2770_v18 = vld [vmem:[%s10149_s11 + $0xb90] sm:$0xff]  ;;  %v2769_v20 = vld [vmem:[%s10149_s11 + $0xb88] sm:$0xff]  ;;  %v2760_v24 = vld [vmem:[%s10149_s11 + $0xb40] sm:$0xff] }
 0x221   : > { %3616 = vmatprep.subr.mxu1 %v2788_v10  ;;  %3546 = vmatpush1.msra.mxu0 %v2499_v11  ;;  %v2473_v21 = vld [vmem:[%s10149_s11 + $0x248] sm:$0xff]  ;;  %v2464_v25 = vld [vmem:[%s10149_s11 + $0x200] sm:$0xff]  ;;  %v2463_v27 = vld [vmem:[%s10149_s11 + $0x1f8] sm:$0xff] }
 0x222   : > { %3617 = vmatpush1.msra.mxu1 %v2787_v12  ;;  %3547 = vmatprep.subr.mxu0 %v2491_v13  ;;  %v2761_v22 = vld [vmem:[%s10149_s11 + $0xb48] sm:$0xff]  ;;  %v2752_v26 = vld [vmem:[%s10149_s11 + $0xb00] sm:$0xff]  ;;  %v2751_v28 = vld [vmem:[%s10149_s11 + $0xaf8] sm:$0xff] }
 0x223   : > { %3618 = vmatprep.subr.mxu1 %v2779_v14  ;;  %3548 = vmatpush1.msra.mxu0 %v2490_v15  ;;  %v2455_v29 = vld [vmem:[%s10149_s11 + $0x1b8] sm:$0xff]  ;;  %v2454_v31 = vld [vmem:[%s10149_s11 + $0x1b0] sm:$0xff]  ;;  %v2445_v35 = vld [vmem:[%s10149_s11 + $0x168] sm:$0xff] }
 0x224   : > { %3619 = vmatpush1.msra.mxu1 %v2778_v16  ;;  %3549 = vmatprep.subr.mxu0 %v2482_v17  ;;  %v2743_v30 = vld [vmem:[%s10149_s11 + $0xab8] sm:$0xff]  ;;  %v2742_v32 = vld [vmem:[%s10149_s11 + $0xab0] sm:$0xff]  ;;  %v2733_v36 = vld [vmem:[%s10149_s11 + $0xa68] sm:$0xff] }
 0x225   : > { %3620 = vmatprep.subr.mxu1 %v2770_v18  ;;  %3550 = vmatpush1.msra.mxu0 %v2481_v19  ;;  %v2446_v33 = vld [vmem:[%s10149_s11 + $0x170] sm:$0xff]  ;;  %v2437_v37 = vld [vmem:[%s10149_s11 + $0x128] sm:$0xff]  ;;  %v2436_v39 = vld [vmem:[%s10149_s11 + $0x120] sm:$0xff] }
 0x226   : > { %3621 = vmatpush1.msra.mxu1 %v2769_v20  ;;  %3551 = vmatprep.subr.mxu0 %v2473_v21  ;;  %v2734_v34 = vld [vmem:[%s10149_s11 + $0xa70] sm:$0xff]  ;;  %v2725_v38 = vld [vmem:[%s10149_s11 + $0xa28] sm:$0xff]  ;;  %v2724_v40 = vld [vmem:[%s10149_s11 + $0xa20] sm:$0xff] }
 0x227   : > { %3622 = vmatprep.subr.mxu1 %v2761_v22  ;;  %3552 = vmatpush1.msra.mxu0 %v2472_v23  ;;  %v2428_v41 = vld [vmem:[%s10149_s11 + $0xe0] sm:$0xff]  ;;  %v2427_v43 = vld [vmem:[%s10149_s11 + $0xd8] sm:$0xff]  ;;  %v2418_v47 = vld [vmem:[%s10149_s11 + $0x90] sm:$0xff] }
 0x228   : > { %3623 = vmatpush1.msra.mxu1 %v2760_v24  ;;  %3553 = vmatprep.subr.mxu0 %v2464_v25  ;;  %v2716_v42 = vld [vmem:[%s10149_s11 + $0x9e0] sm:$0xff]  ;;  %v2715_v44 = vld [vmem:[%s10149_s11 + $0x9d8] sm:$0xff]  ;;  %v2706_v48 = vld [vmem:[%s10149_s11 + $0x990] sm:$0xff] }
 0x229   : > { %3624 = vmatprep.subr.mxu1 %v2752_v26  ;;  %3554 = vmatpush1.msra.mxu0 %v2463_v27  ;;  %v2419_v45 = vld [vmem:[%s10149_s11 + $0x98] sm:$0xff]  ;;  %v2410_v49 = vld [vmem:[%s10149_s11 + $0x50] sm:$0xff]  ;;  %v2409_v51 = vld [vmem:[%s10149_s11 + $0x48] sm:$0xff] }
 0x22a   : > { %3625 = vmatpush1.msra.mxu1 %v2751_v28  ;;  %3555 = vmatprep.subr.mxu0 %v2455_v29  ;;  %v2707_v46 = vld [vmem:[%s10149_s11 + $0x998] sm:$0xff]  ;;  %v2698_v50 = vld [vmem:[%s10149_s11 + $0x950] sm:$0xff]  ;;  %v2697_v52 = vld [vmem:[%s10149_s11 + $0x948] sm:$0xff] }
 0x22b   : > { %3626 = vmatprep.subr.mxu1 %v2743_v30  ;;  %3556 = vmatpush1.msra.mxu0 %v2454_v31  ;;  %v2401_v53 = vld [vmem:[%s10149_s11 + $0x8] sm:$0xff]  ;;  %v2400_v55 = vld [vmem:[%s10149_s11] sm:$0xff]  ;;  %v2679_v59 = vld [vmem:[%s10149_s11 + $0x8b8] sm:$0xff]  ;;  %v2394_v31 = vlaneseq }
 0x22c   : > { %3627 = vmatpush1.msra.mxu1 %v2742_v32  ;;  %3557 = vmatprep.subr.mxu0 %v2446_v33  ;;  %v2689_v54 = vld [vmem:[%s10149_s11 + $0x908] sm:$0xff]  ;;  %v2688_v56 = vld [vmem:[%s10149_s11 + $0x900] sm:$0xff]  ;;  %v2967_v60 = vld [vmem:[%s10149_s11 + $0x11b8] sm:$0xff] }
 0x22d   : > { %3628 = vmatprep.subr.mxu1 %v2734_v34  ;;  %3558 = vmatpush1.msra.mxu0 %v2445_v35  ;;  %v2680_v57 = vld [vmem:[%s10149_s11 + $0x8c0] sm:$0xff]  ;;  %v2671_v61 = vld [vmem:[%s10149_s11 + $0x878] sm:$0xff]  ;;  %v2670_v63 = vld [vmem:[%s10149_s11 + $0x870] sm:$0xff]  ;;  %vm12658_vm2 = vcmp.lt.s32.totalorder %v2394_v31, 900 }
 0x22e   : > { %3629 = vmatpush1.msra.mxu1 %v2733_v36  ;;  %3559 = vmatprep.subr.mxu0 %v2437_v37  ;;  %v2968_v58 = vld [vmem:[%s10149_s11 + $0x11c0] sm:$0xff]  ;;  %v2959_v62 = vld [vmem:[%s10149_s11 + $0x1178] sm:$0xff]  ;;  %v2958_v0 = vld [vmem:[%s10149_s11 + $0x1170] sm:$0xff] }
 0x22f   : > { %3630 = vmatprep.subr.mxu1 %v2725_v38  ;;  %3560 = vmatpush1.msra.mxu0 %v2436_v39  ;;  %v2662_v1 = vld [vmem:[%s10149_s11 + $0x830] sm:$0xff]  ;;  %v2661_v3 = vld [vmem:[%s10149_s11 + $0x828] sm:$0xff]  ;;  %v2652_v7 = vld [vmem:[%s10149_s11 + $0x7e0] sm:$0xff] }
 0x230   : > { %3631 = vmatpush1.msra.mxu1 %v2724_v40  ;;  %3561 = vmatprep.subr.mxu0 %v2428_v41  ;;  %v2950_v2 = vld [vmem:[%s10149_s11 + $0x1130] sm:$0xff]  ;;  %v2949_v4 = vld [vmem:[%s10149_s11 + $0x1128] sm:$0xff]  ;;  %v2940_v8 = vld [vmem:[%s10149_s11 + $0x10e0] sm:$0xff]  ;;  %v10262_v40 = vshrl.u32 %v2394_v31, 7 }
 0x231   : > { %3632 = vmatprep.subr.mxu1 %v2716_v42  ;;  %3562 = vmatpush1.msra.mxu0 %v2427_v43  ;;  %v2653_v5 = vld [vmem:[%s10149_s11 + $0x7e8] sm:$0xff]  ;;  %v2644_v9 = vld [vmem:[%s10149_s11 + $0x7a0] sm:$0xff]  ;;  %v2643_v11 = vld [vmem:[%s10149_s11 + $0x798] sm:$0xff] }
 0x232   : > { %3633 = vmatpush1.msra.mxu1 %v2715_v44  ;;  %3563 = vmatprep.subr.mxu0 %v2419_v45  ;;  %v2941_v6 = vld [vmem:[%s10149_s11 + $0x10e8] sm:$0xff]  ;;  %v2932_v10 = vld [vmem:[%s10149_s11 + $0x10a0] sm:$0xff]  ;;  %v2931_v12 = vld [vmem:[%s10149_s11 + $0x1098] sm:$0xff] }
 0x233   : > { %3634 = vmatprep.subr.mxu1 %v2707_v46  ;;  %3564 = vmatpush1.msra.mxu0 %v2418_v47  ;;  %v2635_v13 = vld [vmem:[%s10149_s11 + $0x758] sm:$0xff]  ;;  %v2634_v15 = vld [vmem:[%s10149_s11 + $0x750] sm:$0xff]  ;;  %v2625_v19 = vld [vmem:[%s10149_s11 + $0x708] sm:$0xff] }
 0x234   : > { %3635 = vmatpush1.msra.mxu1 %v2706_v48  ;;  %3565 = vmatprep.subr.mxu0 %v2410_v49  ;;  %v2923_v14 = vld [vmem:[%s10149_s11 + $0x1058] sm:$0xff]  ;;  %v2922_v16 = vld [vmem:[%s10149_s11 + $0x1050] sm:$0xff]  ;;  %v2913_v20 = vld [vmem:[%s10149_s11 + $0x1008] sm:$0xff]  ;;  %v3426_v49 = vsub.s32 1, %v10262_v40 }
 0x235   : > { %3636 = vmatprep.subr.mxu1 %v2698_v50  ;;  %3566 = vmatpush1.msra.mxu0 %v2409_v51  ;;  %v2626_v17 = vld [vmem:[%s10149_s11 + $0x710] sm:$0xff]  ;;  %v2617_v21 = vld [vmem:[%s10149_s11 + $0x6c8] sm:$0xff]  ;;  %v2616_v23 = vld [vmem:[%s10149_s11 + $0x6c0] sm:$0xff] }
 0x236   : > { %3637 = vmatpush1.msra.mxu1 %v2697_v52  ;;  %3567 = vmatprep.subr.mxu0 %v2401_v53  ;;  %v2914_v18 = vld [vmem:[%s10149_s11 + $0x1010] sm:$0xff]  ;;  %v2905_v22 = vld [vmem:[%s10149_s11 + $0xfc8] sm:$0xff]  ;;  %v2904_v24 = vld [vmem:[%s10149_s11 + $0xfc0] sm:$0xff]  ;;  %v3422_v53 = vsub.s32 0, %v10262_v40 }
 0x237   : > { %3638 = vmatprep.subr.mxu1 %v2689_v54  ;;  %3568 = vmatpush1.msra.mxu0 %v2400_v55  ;;  %v2608_v25 = vld [vmem:[%s10149_s11 + $0x680] sm:$0xff]  ;;  %v2607_v27 = vld [vmem:[%s10149_s11 + $0x678] sm:$0xff]  ;;  %v2598_v32 = vld [vmem:[%s10149_s11 + $0x630] sm:$0xff] }
 0x238   : > { %3639 = vmatpush1.msra.mxu1 %v2688_v56  ;;  %3569 = vmatprep.subr.mxu0 %v2680_v57  ;;  %v2896_v26 = vld [vmem:[%s10149_s11 + $0xf80] sm:$0xff]  ;;  %v2895_v28 = vld [vmem:[%s10149_s11 + $0xf78] sm:$0xff]  ;;  %v2886_v33 = vld [vmem:[%s10149_s11 + $0xf30] sm:$0xff]  ;;  %v3434_v56 = vsub.s32 3, %v10262_v40 }
 0x239   : > { %3640 = vmatprep.subr.mxu1 %v2968_v58  ;;  %3570 = vmatpush2.msra.mxu0 %v2679_v59  ;;  %v2599_v29 = vld [vmem:[%s10149_s11 + $0x638] sm:$0xff]  ;;  %v2590_v34 = vld [vmem:[%s10149_s11 + $0x5f0] sm:$0xff]  ;;  %v2589_v36 = vld [vmem:[%s10149_s11 + $0x5e8] sm:$0xff]  ;;  %v3430_v59 = vsub.s32 2, %v10262_v40 }
 0x23a   : > { %3641 = vmatpush2.msra.mxu1 %v2967_v60  ;;  %3571 = vmatprep.subr.mxu0 %v2671_v61  ;;  %v2887_v30 = vld [vmem:[%s10149_s11 + $0xf38] sm:$0xff]  ;;  %v2878_v35 = vld [vmem:[%s10149_s11 + $0xef0] sm:$0xff]  ;;  %v2877_v37 = vld [vmem:[%s10149_s11 + $0xee8] sm:$0xff] }
 0x23b   : > { %3642 = vmatprep.subr.mxu1 %v2959_v62  ;;  %3572 = vmatpush2.msra.mxu0 %v2670_v63  ;;  %v2581_v38 = vld [vmem:[%s10149_s11 + $0x5a8] sm:$0xff]  ;;  %v2580_v41 = vld [vmem:[%s10149_s11 + $0x5a0] sm:$0xff]  ;;  %v2571_v45 = vld [vmem:[%s10149_s11 + $0x558] sm:$0xff] }
 0x23c   : > { %3643 = vmatpush2.msra.mxu1 %v2958_v0  ;;  %3573 = vmatprep.subr.mxu0 %v2662_v1  ;;  %v2869_v39 = vld [vmem:[%s10149_s11 + $0xea8] sm:$0xff]  ;;  %v2868_v42 = vld [vmem:[%s10149_s11 + $0xea0] sm:$0xff]  ;;  %v2859_v46 = vld [vmem:[%s10149_s11 + $0xe58] sm:$0xff] }
 0x23d   : > { %3644 = vmatprep.subr.mxu1 %v2950_v2  ;;  %3574 = vmatpush2.msra.mxu0 %v2661_v3  ;;  %v2572_v43 = vld [vmem:[%s10149_s11 + $0x560] sm:$0xff]  ;;  %v2563_v47 = vld [vmem:[%s10149_s11 + $0x518] sm:$0xff]  ;;  %v2562_v50 = vld [vmem:[%s10149_s11 + $0x510] sm:$0xff] }
 0x23e   : > { %3645 = vmatpush2.msra.mxu1 %v2949_v4  ;;  %3575 = vmatprep.subr.mxu0 %v2653_v5  ;;  %v2860_v44 = vld [vmem:[%s10149_s11 + $0xe60] sm:$0xff]  ;;  %v2851_v48 = vld [vmem:[%s10149_s11 + $0xe18] sm:$0xff]  ;;  %v2850_v51 = vld [vmem:[%s10149_s11 + $0xe10] sm:$0xff] }
 0x23f   : > { %3646 = vmatprep.subr.mxu1 %v2941_v6  ;;  %3576 = vmatpush2.msra.mxu0 %v2652_v7  ;;  %v10278_v52 = vld [vmem:[%s12690_s0] sm:$0xff]  ;;  %v2554_v54 = vld [vmem:[%s10149_s11 + $0x4d0] sm:$0xff]  ;;  %v2553_v57 = vld [vmem:[%s10149_s11 + $0x4c8] sm:$0xff] }
 0x240   : > { %3647 = vmatpush2.msra.mxu1 %v2940_v8  ;;  %3577 = vmatprep.subr.mxu0 %v2644_v9  ;;  %v2842_v55 = vld [vmem:[%s10149_s11 + $0xdd0] sm:$0xff]  ;;  %v2841_v58 = vld [vmem:[%s10149_s11 + $0xdc8] sm:$0xff]  ;;  %v10292_v62 = vrot.slane %v10278_v52, %v3426_v49  ;;  %v2544_v63 = vld [vmem:[%s10149_s11 + $0x480] sm:$0xff]  ;;  %v10298_v0 = vrot.slane %v10278_v52, %v3422_v53  ;;  %v10304_v2 = vrot.slane %v10278_v52, %v3434_v56 }
 0x241   : > { %3648 = vmatprep.subr.mxu1 %v2932_v10  ;;  %3578 = vmatpush2.msra.mxu0 %v2643_v11  ;;  %v2545_v60 = vld [vmem:[%s10149_s11 + $0x488] sm:$0xff]  ;;  %v2832_v1 = vld [vmem:[%s10149_s11 + $0xd80] sm:$0xff]  ;;  %v10310_v4 = vrot.slane %v10278_v52, %v3430_v59  ;;  %v3111_v6 = vld [vmem:[%s10149_s11 + $0x1638] sm:$0xff] }
 0x242   : > { %3649 = vmatpush2.msra.mxu1 %v2931_v12  ;;  %3579 = vmatprep.subr.mxu0 %v2635_v13  ;;  %v2833_v61 = vld [vmem:[%s10149_s11 + $0xd88] sm:$0xff]  ;;  %v3112_v3 = vld [vmem:[%s10149_s11 + $0x1640] sm:$0xff]  ;;  %v3399_v7 = vld [vmem:[%s10149_s11 + $0x1f38] sm:$0xff] }
 0x243   : > { %3650 = vmatprep.subr.mxu1 %v2923_v14  ;;  %3580 = vmatpush2.msra.mxu0 %v2634_v15  ;;  %v3400_v5 = vld [vmem:[%s10149_s11 + $0x1f40] sm:$0xff]  ;;  %v3103_v8 = vld [vmem:[%s10149_s11 + $0x15f8] sm:$0xff]  ;;  %v3102_v10 = vld [vmem:[%s10149_s11 + $0x15f0] sm:$0xff] }
 0x244   : > { %3651 = vmatpush2.msra.mxu1 %v2922_v16  ;;  %3581 = vmatprep.subr.mxu0 %v2626_v17  ;;  %v3391_v9 = vld [vmem:[%s10149_s11 + $0x1ef8] sm:$0xff]  ;;  %v3390_v11 = vld [vmem:[%s10149_s11 + $0x1ef0] sm:$0xff]  ;;  %v3093_v14 = vld [vmem:[%s10149_s11 + $0x15a8] sm:$0xff] }
 0x245   : > { %3652 = vmatprep.subr.mxu1 %v2914_v18  ;;  %3582 = vmatpush2.msra.mxu0 %v2625_v19  ;;  %v3094_v12 = vld [vmem:[%s10149_s11 + $0x15b0] sm:$0xff]  ;;  %v3381_v15 = vld [vmem:[%s10149_s11 + $0x1ea8] sm:$0xff]  ;;  %v3084_v18 = vld [vmem:[%s10149_s11 + $0x1560] sm:$0xff] }
 0x246   : > { %3653 = vmatpush2.msra.mxu1 %v2913_v20  ;;  %3583 = vmatprep.subr.mxu0 %v2617_v21  ;;  %v3382_v13 = vld [vmem:[%s10149_s11 + $0x1eb0] sm:$0xff]  ;;  %v3085_v16 = vld [vmem:[%s10149_s11 + $0x1568] sm:$0xff]  ;;  %v3372_v19 = vld [vmem:[%s10149_s11 + $0x1e60] sm:$0xff] }
 0x247   : > { %3654 = vmatprep.subr.mxu1 %v2905_v22  ;;  %3584 = vmatpush2.msra.mxu0 %v2616_v23  ;;  %v3373_v17 = vld [vmem:[%s10149_s11 + $0x1e68] sm:$0xff]  ;;  %v3076_v20 = vld [vmem:[%s10149_s11 + $0x1520] sm:$0xff]  ;;  %v3075_v22 = vld [vmem:[%s10149_s11 + $0x1518] sm:$0xff] }
 0x248   : > { %3655 = vmatpush2.msra.mxu1 %v2904_v24  ;;  %3585 = vmatprep.subr.mxu0 %v2608_v25  ;;  %v3364_v21 = vld [vmem:[%s10149_s11 + $0x1e20] sm:$0xff]  ;;  %v3363_v23 = vld [vmem:[%s10149_s11 + $0x1e18] sm:$0xff] }
 0x249   : > { %3656 = vmatprep.subr.mxu1 %v2896_v26  ;;  %3586 = vmatpush2.msra.mxu0 %v2607_v27  ;;  %v3067_v24 = vld [vmem:[%s10149_s11 + $0x14d8] sm:$0xff]  ;;  %v3066_v26 = vld [vmem:[%s10149_s11 + $0x14d0] sm:$0xff] }
 0x24a   : > { %3657 = vmatpush2.msra.mxu1 %v2895_v28  ;;  %3587 = vmatprep.subr.mxu0 %v2599_v29  ;;  %v3355_v25 = vld [vmem:[%s10149_s11 + $0x1dd8] sm:$0xff]  ;;  %v3354_v27 = vld [vmem:[%s10149_s11 + $0x1dd0] sm:$0xff] }
 0x24b   : > { %3658 = vmatprep.subr.mxu1 %v2887_v30  ;;  %3588 = vmatpush2.msra.mxu0 %v2598_v32  ;;  %v3058_v28 = vld [vmem:[%s10149_s11 + $0x1490] sm:$0xff]  ;;  %v3057_v30 = vld [vmem:[%s10149_s11 + $0x1488] sm:$0xff] }
 0x24c   : > { %3659 = vmatpush2.msra.mxu1 %v2886_v33  ;;  %3589 = vmatprep.subr.mxu0 %v2590_v34  ;;  %v3346_v29 = vld [vmem:[%s10149_s11 + $0x1d90] sm:$0xff]  ;;  %v3345_v32 = vld [vmem:[%s10149_s11 + $0x1d88] sm:$0xff] }
 0x24d   : > { %3660 = vmatprep.subr.mxu1 %v2878_v35  ;;  %3590 = vmatpush2.msra.mxu0 %v2589_v36  ;;  %v3049_v33 = vld [vmem:[%s10149_s11 + $0x1448] sm:$0xff]  ;;  %v3048_v35 = vld [vmem:[%s10149_s11 + $0x1440] sm:$0xff] }
 0x24e   : > { %3661 = vmatpush2.msra.mxu1 %v2877_v37  ;;  %3591 = vmatprep.subr.mxu0 %v2581_v38  ;;  %v3337_v34 = vld [vmem:[%s10149_s11 + $0x1d48] sm:$0xff]  ;;  %v3336_v36 = vld [vmem:[%s10149_s11 + $0x1d40] sm:$0xff] }
 0x24f   : > { %3662 = vmatprep.subr.mxu1 %v2869_v39  ;;  %3592 = vmatpush2.msra.mxu0 %v2580_v41  ;;  %v3040_v37 = vld [vmem:[%s10149_s11 + $0x1400] sm:$0xff]  ;;  %v3039_v39 = vld [vmem:[%s10149_s11 + $0x13f8] sm:$0xff] }
 0x250   : > { %3663 = vmatpush2.msra.mxu1 %v2868_v42  ;;  %3593 = vmatprep.subr.mxu0 %v2572_v43  ;;  %v3328_v38 = vld [vmem:[%s10149_s11 + $0x1d00] sm:$0xff]  ;;  %v3327_v41 = vld [vmem:[%s10149_s11 + $0x1cf8] sm:$0xff] }
 0x251   : > { %3664 = vmatprep.subr.mxu1 %v2860_v44  ;;  %3594 = vmatpush2.msra.mxu0 %v2571_v45  ;;  %v3031_v42 = vld [vmem:[%s10149_s11 + $0x13b8] sm:$0xff]  ;;  %v3030_v44 = vld [vmem:[%s10149_s11 + $0x13b0] sm:$0xff] }
 0x252   : > { %3665 = vmatpush2.msra.mxu1 %v2859_v46  ;;  %3595 = vmatprep.subr.mxu0 %v2563_v47  ;;  %v3319_v43 = vld [vmem:[%s10149_s11 + $0x1cb8] sm:$0xff]  ;;  %v3318_v45 = vld [vmem:[%s10149_s11 + $0x1cb0] sm:$0xff] }
 0x253   : > { %3666 = vmatprep.subr.mxu1 %v2851_v48  ;;  %3596 = vmatpush2.msra.mxu0 %v2562_v50  ;;  %v3022_v46 = vld [vmem:[%s10149_s11 + $0x1370] sm:$0xff]  ;;  %v3021_v48 = vld [vmem:[%s10149_s11 + $0x1368] sm:$0xff] }
 0x254   : > { %3667 = vmatpush2.msra.mxu1 %v2850_v51  ;;  %3597 = vmatprep.subr.mxu0 %v2554_v54  ;;  %v3310_v47 = vld [vmem:[%s10149_s11 + $0x1c70] sm:$0xff]  ;;  %v3309_v50 = vld [vmem:[%s10149_s11 + $0x1c68] sm:$0xff] }
 0x255   : > { %3668 = vmatprep.subr.mxu1 %v2842_v55  ;;  %3598 = vmatpush2.msra.mxu0 %v2553_v57  ;;  %v3013_v51 = vld [vmem:[%s10149_s11 + $0x1328] sm:$0xff]  ;;  %v3012_v55 = vld [vmem:[%s10149_s11 + $0x1320] sm:$0xff] }
 0x256   : > { %3669 = vmatpush2.msra.mxu1 %v2841_v58  ;;  %3599 = vmatprep.subr.mxu0 %v2545_v60  ;;  %v3301_v54 = vld [vmem:[%s10149_s11 + $0x1c28] sm:$0xff]  ;;  %v3300_v57 = vld [vmem:[%s10149_s11 + $0x1c20] sm:$0xff] }
 0x257   : > { %3670 = vmatprep.subr.mxu1 %v2833_v61  ;;  %3600 = vmatpush2.msra.mxu0 %v2544_v63  ;;  %v3004_v58 = vld [vmem:[%s10149_s11 + $0x12e0] sm:$0xff]  ;;  %v3003_v61 = vld [vmem:[%s10149_s11 + $0x12d8] sm:$0xff] }
 0x258   : > { %3601 = vmatprep.mubr.f32.mxu0 %v10292_v62  ;;  %3671 = vmatpush2.msra.mxu1 %v2832_v1  ;;  %v3292_v60 = vld [vmem:[%s10149_s11 + $0x1be0] sm:$0xff]  ;;  %v3291_v63 = vld [vmem:[%s10149_s11 + $0x1bd8] sm:$0xff] }
 0x259   : > { %3602 = vmatmul.mubr.f32.vlgmr.msra.gmra.mxu0 %v10298_v0  ;;  %3672 = vmatprep.mubr.f32.mxu1 %v10304_v2  ;;  %v2995_v1 = vld [vmem:[%s10149_s11 + $0x1298] sm:$0xff] }
 0x25a   : > { %3679 = vmatprep.subr.mxu0 %v3112_v3  ;;  %3750 = vmatprep.subr.mxu1 %v3400_v5  ;;  %v3283_v3 = vld [vmem:[%s10149_s11 + $0x1b98] sm:$0xff]  ;;  %v2994_v5 = vld [vmem:[%s10149_s11 + $0x1290] sm:$0xff] }
 0x25b   : > { %3673 = vmatmul.mubr.f32.vlgmr.msra.gmra.mxu1 %v10310_v4  ;;  %3680 = vmatpush1.msra.mxu0 %v3111_v6  ;;  %v3282_v6 = vld [vmem:[%s10149_s11 + $0x1b90] sm:$0xff] }
 0x25c   : > { %3751 = vmatpush1.msra.mxu1 %v3399_v7  ;;  %3681 = vmatprep.subr.mxu0 %v3103_v8  ;;  %v2986_v7 = vld [vmem:[%s10149_s11 + $0x1250] sm:$0xff] }
 0x25d   : > { %3752 = vmatprep.subr.mxu1 %v3391_v9  ;;  %3682 = vmatpush1.msra.mxu0 %v3102_v10  ;;  %v3274_v8 = vld [vmem:[%s10149_s11 + $0x1b50] sm:$0xff]  ;;  %v2985_v9 = vld [vmem:[%s10149_s11 + $0x1248] sm:$0xff] }
 0x25e   : > { %3753 = vmatpush1.msra.mxu1 %v3390_v11  ;;  %3683 = vmatprep.subr.mxu0 %v3094_v12  ;;  %v3273_v10 = vld [vmem:[%s10149_s11 + $0x1b48] sm:$0xff]  ;;  %v3450_v11 = vsub.s32 7, %v10262_v40 }
 0x25f   : > { %3754 = vmatprep.subr.mxu1 %v3382_v13  ;;  %3684 = vmatpush1.msra.mxu0 %v3093_v14  ;;  %v2977_v12 = vld [vmem:[%s10149_s11 + $0x1208] sm:$0xff]  ;;  %v2976_v14 = vld [vmem:[%s10149_s11 + $0x1200] sm:$0xff] }
 0x260   : > { %3755 = vmatpush1.msra.mxu1 %v3381_v15  ;;  %3685 = vmatprep.subr.mxu0 %v3085_v16  ;;  %v3265_v13 = vld [vmem:[%s10149_s11 + $0x1b08] sm:$0xff]  ;;  %v3264_v15 = vld [vmem:[%s10149_s11 + $0x1b00] sm:$0xff]  ;;  %v3446_v16 = vsub.s32 6, %v10262_v40 }
 0x261   : > { %3756 = vmatprep.subr.mxu1 %v3373_v17  ;;  %3686 = vmatpush1.msra.mxu0 %v3084_v18  ;;  %v3256_v17 = vld [vmem:[%s10149_s11 + $0x1ac0] sm:$0xff]  ;;  %v3409_v18 = vld [vmem:[%s10149_s11 + $0x1f88] sm:$0xf] }
 0x262   : > { %3757 = vmatpush1.msra.mxu1 %v3372_v19  ;;  %3687 = vmatprep.subr.mxu0 %v3076_v20  ;;  %v3255_v19 = vld [vmem:[%s10149_s11 + $0x1ab8] sm:$0xff]  ;;  %v3408_v20 = vld [vmem:[%s10149_s11 + $0x1f80] sm:$0xf] }
 0x263   : > { %3758 = vmatprep.subr.mxu1 %v3364_v21  ;;  %3688 = vmatpush1.msra.mxu0 %v3075_v22  ;;  %v10388_v21 = vrot.slane %v10278_v52, %v3450_v11  ;;  %v3247_v22 = vld [vmem:[%s10149_s11 + $0x1a78] sm:$0xff] }
 0x264   : > { %3759 = vmatpush1.msra.mxu1 %v3363_v23  ;;  %3689 = vmatprep.subr.mxu0 %v3067_v24  ;;  %v2538_v23 = vld [vmem:[%s10149_s11 + $0x450] sm:$0xff] }
 0x265   : > { %3760 = vmatprep.subr.mxu1 %v3355_v25  ;;  %3690 = vmatpush1.msra.mxu0 %v3066_v26  ;;  %v3246_v24 = vld [vmem:[%s10149_s11 + $0x1a70] sm:$0xff]  ;;  %v10397_v25 = vrot.slane %v10278_v52, %v3446_v16 }
 0x266   : > { %3761 = vmatpush1.msra.mxu1 %v3354_v27  ;;  %3691 = vmatprep.subr.mxu0 %v3058_v28  ;;  %v3238_v26 = vld [vmem:[%s10149_s11 + $0x1a30] sm:$0xff]  ;;  %v2537_v27 = vld [vmem:[%s10149_s11 + $0x448] sm:$0xff] }
 0x267   : > { %3762 = vmatprep.subr.mxu1 %v3346_v29  ;;  %3692 = vmatpush1.msra.mxu0 %v3057_v30  ;;  %v3237_v28 = vld [vmem:[%s10149_s11 + $0x1a28] sm:$0xff] }
 0x268   : > { %3763 = vmatpush1.msra.mxu1 %v3345_v32  ;;  %3693 = vmatprep.subr.mxu0 %v3049_v33  ;;  %v2529_v29 = vld [vmem:[%s10149_s11 + $0x408] sm:$0xff]  ;;  %v2528_v32 = vld [vmem:[%s10149_s11 + $0x400] sm:$0xff] }
 0x269   : > { %3764 = vmatprep.subr.mxu1 %v3337_v34  ;;  %3694 = vmatpush1.msra.mxu0 %v3048_v35  ;;  %v3229_v30 = vld [vmem:[%s10149_s11 + $0x19e8] sm:$0xff]  ;;  %v3228_v33 = vld [vmem:[%s10149_s11 + $0x19e0] sm:$0xff] }
 0x26a   : > { %3765 = vmatpush1.msra.mxu1 %v3336_v36  ;;  %3695 = vmatprep.subr.mxu0 %v3040_v37  ;;  %v2520_v34 = vld [vmem:[%s10149_s11 + $0x3c0] sm:$0xff]  ;;  %v2519_v36 = vld [vmem:[%s10149_s11 + $0x3b8] sm:$0xff] }
 0x26b   : > { %3766 = vmatprep.subr.mxu1 %v3328_v38  ;;  %3696 = vmatpush1.msra.mxu0 %v3039_v39  ;;  %v3220_v35 = vld [vmem:[%s10149_s11 + $0x19a0] sm:$0xff]  ;;  %v3219_v37 = vld [vmem:[%s10149_s11 + $0x1998] sm:$0xff] }
 0x26c   : > { %3767 = vmatpush1.msra.mxu1 %v3327_v41  ;;  %3697 = vmatprep.subr.mxu0 %v3031_v42  ;;  %v2511_v38 = vld [vmem:[%s10149_s11 + $0x378] sm:$0xff]  ;;  %v2510_v41 = vld [vmem:[%s10149_s11 + $0x370] sm:$0xff] }
 0x26d   : > { %3768 = vmatprep.subr.mxu1 %v3319_v43  ;;  %3698 = vmatpush1.msra.mxu0 %v3030_v44  ;;  %v3211_v39 = vld [vmem:[%s10149_s11 + $0x1958] sm:$0xff]  ;;  %v3210_v42 = vld [vmem:[%s10149_s11 + $0x1950] sm:$0xff] }
 0x26e   : > { %3769 = vmatpush1.msra.mxu1 %v3318_v45  ;;  %3699 = vmatprep.subr.mxu0 %v3022_v46  ;;  %v2502_v43 = vld [vmem:[%s10149_s11 + $0x330] sm:$0xff]  ;;  %v2501_v45 = vld [vmem:[%s10149_s11 + $0x328] sm:$0xff] }
 0x26f   : > { %3770 = vmatprep.subr.mxu1 %v3310_v47  ;;  %3700 = vmatpush1.msra.mxu0 %v3021_v48  ;;  %v3202_v44 = vld [vmem:[%s10149_s11 + $0x1910] sm:$0xff]  ;;  %v3201_v46 = vld [vmem:[%s10149_s11 + $0x1908] sm:$0xff] }
 0x270   : > { %3771 = vmatpush1.msra.mxu1 %v3309_v50  ;;  %3701 = vmatprep.subr.mxu0 %v3013_v51  ;;  %v2493_v47 = vld [vmem:[%s10149_s11 + $0x2e8] sm:$0xff]  ;;  %v2492_v50 = vld [vmem:[%s10149_s11 + $0x2e0] sm:$0xff] }
 0x271   : > { %3772 = vmatprep.subr.mxu1 %v3301_v54  ;;  %3702 = vmatpush1.msra.mxu0 %v3012_v55  ;;  %v3193_v48 = vld [vmem:[%s10149_s11 + $0x18c8] sm:$0xff]  ;;  %v3192_v51 = vld [vmem:[%s10149_s11 + $0x18c0] sm:$0xff] }
 0x272   : > { %3773 = vmatpush1.msra.mxu1 %v3300_v57  ;;  %3703 = vmatprep.subr.mxu0 %v3004_v58  ;;  %v2484_v54 = vld [vmem:[%s10149_s11 + $0x2a0] sm:$0xff]  ;;  %v2483_v57 = vld [vmem:[%s10149_s11 + $0x298] sm:$0xff] }
 0x273   : > { %3774 = vmatprep.subr.mxu1 %v3292_v60  ;;  %3704 = vmatpush1.msra.mxu0 %v3003_v61  ;;  %v3184_v55 = vld [vmem:[%s10149_s11 + $0x1880] sm:$0xff]  ;;  %v3183_v58 = vld [vmem:[%s10149_s11 + $0x1878] sm:$0xff] }
 0x274   : > { %3775 = vmatpush1.msra.mxu1 %v3291_v63  ;;  %3705 = vmatprep.subr.mxu0 %v2995_v1  ;;  %v2475_v60 = vld [vmem:[%s10149_s11 + $0x258] sm:$0xff]  ;;  %v2474_v63 = vld [vmem:[%s10149_s11 + $0x250] sm:$0xff] }
 0x275   : > { %3776 = vmatprep.subr.mxu1 %v3283_v3  ;;  %3706 = vmatpush1.msra.mxu0 %v2994_v5  ;;  %v3175_v61 = vld [vmem:[%s10149_s11 + $0x1838] sm:$0xff]  ;;  %v3174_v1 = vld [vmem:[%s10149_s11 + $0x1830] sm:$0xff] }
 0x276   : > { %3777 = vmatpush1.msra.mxu1 %v3282_v6  ;;  %3707 = vmatprep.subr.mxu0 %v2986_v7  ;;  %v2466_v3 = vld [vmem:[%s10149_s11 + $0x210] sm:$0xff]  ;;  %v2465_v6 = vld [vmem:[%s10149_s11 + $0x208] sm:$0xff] }
 0x277   : > { %3778 = vmatprep.subr.mxu1 %v3274_v8  ;;  %3708 = vmatpush1.msra.mxu0 %v2985_v9  ;;  %v3166_v5 = vld [vmem:[%s10149_s11 + $0x17f0] sm:$0xff]  ;;  %v3165_v7 = vld [vmem:[%s10149_s11 + $0x17e8] sm:$0xff] }
 0x278   : > { %3779 = vmatpush1.msra.mxu1 %v3273_v10  ;;  %3709 = vmatprep.subr.mxu0 %v2977_v12  ;;  %v2457_v8 = vld [vmem:[%s10149_s11 + $0x1c8] sm:$0xff]  ;;  %v2456_v10 = vld [vmem:[%s10149_s11 + $0x1c0] sm:$0xff] }
 0x279   : > { %3780 = vmatprep.subr.mxu1 %v3265_v13  ;;  %3710 = vmatpush1.msra.mxu0 %v2976_v14  ;;  %v3157_v9 = vld [vmem:[%s10149_s11 + $0x17a8] sm:$0xff]  ;;  %v3156_v12 = vld [vmem:[%s10149_s11 + $0x17a0] sm:$0xff] }
 0x27a   : > { %3781 = vmatpush1.msra.mxu1 %v3264_v15  ;;  %3711 = vmatprep.subr.mxu0 %v3256_v17  ;;  %v2448_v13 = vld [vmem:[%s10149_s11 + $0x180] sm:$0xff]  ;;  %v2447_v15 = vld [vmem:[%s10149_s11 + $0x178] sm:$0xff] }
 0x27b   : > { %7806 = vmatprep.subr.msk.mxu1 %vm3509_vm0, %v3409_v18  ;;  %3712 = vmatpush2.msra.mxu0 %v3255_v19  ;;  %v3148_v14 = vld [vmem:[%s10149_s11 + $0x1760] sm:$0xff]  ;;  %v3147_v17 = vld [vmem:[%s10149_s11 + $0x1758] sm:$0xff] }
 0x27c   : > { %7807 = vmatpush2.msk.msra.mxu1 %vm3509_vm0, %v3408_v20  ;;  %3713 = vmatprep.subr.mxu0 %v3247_v22  ;;  %v2439_v18 = vld [vmem:[%s10149_s11 + $0x138] sm:$0xff]  ;;  %v2438_v20 = vld [vmem:[%s10149_s11 + $0x130] sm:$0xff] }
 0x27d   : > { %7808 = vmatprep.mubr.msk.f32.mxu1 %vm3506_vm1, %v10388_v21  ;;  %3821 = vmatprep.subr.mxu1 %v2538_v23  ;;  %v3139_v19 = vld [vmem:[%s10149_s11 + $0x1718] sm:$0xff]  ;;  %v3138_v22 = vld [vmem:[%s10149_s11 + $0x1710] sm:$0xff]  ;;  %v3442_v23 = vsub.s32 5, %v10262_v40 }
 0x27e   : > { %3714 = vmatpush2.msra.mxu0 %v3246_v24  ;;  %3815 = vmatmul.mubr.f32.vlgmr.msra.gmra.mxu1 %v10397_v25  ;;  %v2430_v24 = vld [vmem:[%s10149_s11 + $0xf0] sm:$0xff] }
 0x27f   : > { %3715 = vmatprep.subr.mxu0 %v3238_v26  ;;  %3822 = vmatpush1.msra.mxu1 %v2537_v27  ;;  %v3130_v26 = vld [vmem:[%s10149_s11 + $0x16d0] sm:$0xff]  ;;  %v3438_v27 = vsub.s32 4, %v10262_v40 }
 0x280   : > { %3716 = vmatpush2.msra.mxu0 %v3237_v28  ;;  %3823 = vmatprep.subr.mxu1 %v2529_v29  ;;  %v2429_v28 = vld [vmem:[%s10149_s11 + $0xe8] sm:$0xff] }
 0x281   : > { %3717 = vmatprep.subr.mxu0 %v3229_v30  ;;  %3824 = vmatpush1.msra.mxu1 %v2528_v32  ;;  %v3129_v29 = vld [vmem:[%s10149_s11 + $0x16c8] sm:$0xff] }
 0x282   : > { %3718 = vmatpush2.msra.mxu0 %v3228_v33  ;;  %3825 = vmatprep.subr.mxu1 %v2520_v34  ;;  %v2421_v30 = vld [vmem:[%s10149_s11 + $0xa8] sm:$0xff]  ;;  %v2420_v33 = vld [vmem:[%s10149_s11 + $0xa0] sm:$0xff] }
 0x283   : > { %3719 = vmatprep.subr.mxu0 %v3220_v35  ;;  %3826 = vmatpush1.msra.mxu1 %v2519_v36  ;;  %v3121_v32 = vld [vmem:[%s10149_s11 + $0x1688] sm:$0xff]  ;;  %v3120_v34 = vld [vmem:[%s10149_s11 + $0x1680] sm:$0xff]  ;;  %v10463_v35 = vrot.slane %v10278_v52, %v3442_v23 }
 0x284   : > { %3720 = vmatpush2.msra.mxu0 %v3219_v37  ;;  %3827 = vmatprep.subr.mxu1 %v2511_v38  ;;  %v2412_v36 = vld [vmem:[%s10149_s11 + $0x60] sm:$0xff]  ;;  %v10469_v37 = vrot.slane %v10278_v52, %v3438_v27  ;;  %v2411_v38 = vld [vmem:[%s10149_s11 + $0x58] sm:$0xff]  ;;  %v2682_v52 = vld [vmem:[%s10149_s11 + $0x8d0] sm:$0xff] }
 0x285   : > { %3721 = vmatprep.subr.mxu0 %v3211_v39  ;;  %3828 = vmatpush1.msra.mxu1 %v2510_v41  ;;  %v2403_v39 = vld [vmem:[%s10149_s11 + $0x18] sm:$0xff]  ;;  %v2826_v41 = vld [vmem:[%s10149_s11 + $0xd50] sm:$0xff] }
 0x286   : > { %3722 = vmatpush2.msra.mxu0 %v3210_v42  ;;  %3829 = vmatprep.subr.mxu1 %v2502_v43  ;;  %v2402_v42 = vld [vmem:[%s10149_s11 + $0x10] sm:$0xff]  ;;  %v2825_v43 = vld [vmem:[%s10149_s11 + $0xd48] sm:$0xff] }
 0x287   : > { %3723 = vmatprep.subr.mxu0 %v3202_v44  ;;  %3830 = vmatpush1.msra.mxu1 %v2501_v45  ;;  %v2817_v44 = vld [vmem:[%s10149_s11 + $0xd08] sm:$0xff] }
 0x288   : > { %3724 = vmatpush2.msra.mxu0 %v3201_v46  ;;  %3831 = vmatprep.subr.mxu1 %v2493_v47  ;;  %v2681_v45 = vld [vmem:[%s10149_s11 + $0x8c8] sm:$0xff]  ;;  %v2816_v46 = vld [vmem:[%s10149_s11 + $0xd00] sm:$0xff] }
 0x289   : > { %3725 = vmatprep.subr.mxu0 %v3193_v48  ;;  %3832 = vmatpush1.msra.mxu1 %v2492_v50  ;;  %v2673_v47 = vld [vmem:[%s10149_s11 + $0x888] sm:$0xff]  ;;  %v2808_v48 = vld [vmem:[%s10149_s11 + $0xcc0] sm:$0xff] }
 0x28a   : > { %3726 = vmatpush2.msra.mxu0 %v3192_v51  ;;  %3833 = vmatprep.subr.mxu1 %v2484_v54  ;;  %v2672_v50 = vld [vmem:[%s10149_s11 + $0x880] sm:$0xff]  ;;  %v2807_v51 = vld [vmem:[%s10149_s11 + $0xcb8] sm:$0xff] }
 0x28b   : > { %3727 = vmatprep.subr.mxu0 %v3184_v55  ;;  %3834 = vmatpush1.msra.mxu1 %v2483_v57  ;;  %v2664_v54 = vld [vmem:[%s10149_s11 + $0x840] sm:$0xff]  ;;  %v2799_v55 = vld [vmem:[%s10149_s11 + $0xc78] sm:$0xff] }
 0x28c   : > { %3728 = vmatpush2.msra.mxu0 %v3183_v58  ;;  %3835 = vmatprep.subr.mxu1 %v2475_v60  ;;  %v2663_v57 = vld [vmem:[%s10149_s11 + $0x838] sm:$0xff]  ;;  %v2798_v58 = vld [vmem:[%s10149_s11 + $0xc70] sm:$0xff] }
 0x28d   : > { %3729 = vmatprep.subr.mxu0 %v3175_v61  ;;  %3836 = vmatpush1.msra.mxu1 %v2474_v63  ;;  %v2655_v60 = vld [vmem:[%s10149_s11 + $0x7f8] sm:$0xff]  ;;  %v2790_v61 = vld [vmem:[%s10149_s11 + $0xc30] sm:$0xff] }
 0x28e   : > { %3730 = vmatpush2.msra.mxu0 %v3174_v1  ;;  %3837 = vmatprep.subr.mxu1 %v2466_v3  ;;  %v2654_v63 = vld [vmem:[%s10149_s11 + $0x7f0] sm:$0xff]  ;;  %v2789_v1 = vld [vmem:[%s10149_s11 + $0xc28] sm:$0xff] }
 0x28f   : > { %3731 = vmatprep.subr.mxu0 %v3166_v5  ;;  %3838 = vmatpush1.msra.mxu1 %v2465_v6  ;;  %v2646_v3 = vld [vmem:[%s10149_s11 + $0x7b0] sm:$0xff]  ;;  %v2781_v5 = vld [vmem:[%s10149_s11 + $0xbe8] sm:$0xff] }
 0x290   : > { %3732 = vmatpush2.msra.mxu0 %v3165_v7  ;;  %3839 = vmatprep.subr.mxu1 %v2457_v8  ;;  %v2645_v6 = vld [vmem:[%s10149_s11 + $0x7a8] sm:$0xff]  ;;  %v2780_v7 = vld [vmem:[%s10149_s11 + $0xbe0] sm:$0xff] }
 0x291   : > { %3733 = vmatprep.subr.mxu0 %v3157_v9  ;;  %3840 = vmatpush1.msra.mxu1 %v2456_v10  ;;  %v2637_v8 = vld [vmem:[%s10149_s11 + $0x768] sm:$0xff]  ;;  %v2772_v9 = vld [vmem:[%s10149_s11 + $0xba0] sm:$0xff] }
 0x292   : > { %3734 = vmatpush2.msra.mxu0 %v3156_v12  ;;  %3841 = vmatprep.subr.mxu1 %v2448_v13  ;;  %v2636_v10 = vld [vmem:[%s10149_s11 + $0x760] sm:$0xff]  ;;  %v2771_v12 = vld [vmem:[%s10149_s11 + $0xb98] sm:$0xff] }
 0x293   : > { %3735 = vmatprep.subr.mxu0 %v3148_v14  ;;  %3842 = vmatpush1.msra.mxu1 %v2447_v15  ;;  %v2628_v13 = vld [vmem:[%s10149_s11 + $0x720] sm:$0xff]  ;;  %v2763_v14 = vld [vmem:[%s10149_s11 + $0xb58] sm:$0xff] }
 0x294   : > { %3736 = vmatpush2.msra.mxu0 %v3147_v17  ;;  %3843 = vmatprep.subr.mxu1 %v2439_v18  ;;  %v2627_v15 = vld [vmem:[%s10149_s11 + $0x718] sm:$0xff]  ;;  %v2762_v17 = vld [vmem:[%s10149_s11 + $0xb50] sm:$0xff] }
 0x295   : > { %3737 = vmatprep.subr.mxu0 %v3139_v19  ;;  %3844 = vmatpush1.msra.mxu1 %v2438_v20  ;;  %v2619_v18 = vld [vmem:[%s10149_s11 + $0x6d8] sm:$0xff]  ;;  %v2754_v19 = vld [vmem:[%s10149_s11 + $0xb10] sm:$0xff] }
 0x296   : > { %3738 = vmatpush2.msra.mxu0 %v3138_v22  ;;  %3845 = vmatprep.subr.mxu1 %v2430_v24  ;;  %v2618_v20 = vld [vmem:[%s10149_s11 + $0x6d0] sm:$0xff]  ;;  %v2753_v22 = vld [vmem:[%s10149_s11 + $0xb08] sm:$0xff] }
 0x297   : > { %3739 = vmatprep.subr.mxu0 %v3130_v26  ;;  %3846 = vmatpush1.msra.mxu1 %v2429_v28  ;;  %v2610_v24 = vld [vmem:[%s10149_s11 + $0x690] sm:$0xff]  ;;  %v2745_v26 = vld [vmem:[%s10149_s11 + $0xac8] sm:$0xff] }
 0x298   : > { %3740 = vmatpush2.msra.mxu0 %v3129_v29  ;;  %3847 = vmatprep.subr.mxu1 %v2421_v30  ;;  %v2609_v28 = vld [vmem:[%s10149_s11 + $0x688] sm:$0xff]  ;;  %v2744_v29 = vld [vmem:[%s10149_s11 + $0xac0] sm:$0xff] }
 0x299   : > { %3741 = vmatprep.subr.mxu0 %v3121_v32  ;;  %3848 = vmatpush1.msra.mxu1 %v2420_v33  ;;  %v2601_v30 = vld [vmem:[%s10149_s11 + $0x648] sm:$0xff]  ;;  %v2736_v32 = vld [vmem:[%s10149_s11 + $0xa80] sm:$0xff] }
 0x29a   : > { %3742 = vmatpush2.msra.mxu0 %v3120_v34  ;;  %3849 = vmatprep.subr.mxu1 %v2412_v36  ;;  %v2600_v33 = vld [vmem:[%s10149_s11 + $0x640] sm:$0xff]  ;;  %v2735_v34 = vld [vmem:[%s10149_s11 + $0xa78] sm:$0xff] }
 0x29b   : > { %3743 = vmatprep.mubr.f32.mxu0 %v10463_v35  ;;  %3850 = vmatpush1.msra.mxu1 %v2411_v38  ;;  %v2592_v36 = vld [vmem:[%s10149_s11 + $0x600] sm:$0xff]  ;;  %v2727_v38 = vld [vmem:[%s10149_s11 + $0xa38] sm:$0xff] }
 0x29c   : > { %3744 = vmatmul.mubr.f32.vlgmr.msra.gmra.mxu0 %v10469_v37  ;;  %3851 = vmatprep.subr.mxu1 %v2403_v39  ;;  %v2591_v39 = vld [vmem:[%s10149_s11 + $0x5f8] sm:$0xff] }
 0x29d   : > { %3892 = vmatprep.subr.mxu0 %v2826_v41  ;;  %3852 = vmatpush1.msra.mxu1 %v2402_v42  ;;  %v2726_v41 = vld [vmem:[%s10149_s11 + $0xa30] sm:$0xff]  ;;  %v2583_v42 = vld [vmem:[%s10149_s11 + $0x5b8] sm:$0xff] }
 0x29e   : > { %3893 = vmatpush1.msra.mxu0 %v2825_v43  ;;  %3853 = vmatprep.subr.mxu1 %v2682_v52  ;;  %v2718_v43 = vld [vmem:[%s10149_s11 + $0x9f0] sm:$0xff] }
 0x29f   : > { %3894 = vmatprep.subr.mxu0 %v2817_v44  ;;  %3854 = vmatpush2.msra.mxu1 %v2681_v45  ;;  %v2582_v52 = vld [vmem:[%s10149_s11 + $0x5b0] sm:$0xff]  ;;  %v2717_v44 = vld [vmem:[%s10149_s11 + $0x9e8] sm:$0xff] }
 0x2a0   : > { %3895 = vmatpush1.msra.mxu0 %v2816_v46  ;;  %3855 = vmatprep.subr.mxu1 %v2673_v47  ;;  %v2574_v45 = vld [vmem:[%s10149_s11 + $0x570] sm:$0xff]  ;;  %v2709_v46 = vld [vmem:[%s10149_s11 + $0x9a8] sm:$0xff] }
 0x2a1   : > { %3896 = vmatprep.subr.mxu0 %v2808_v48  ;;  %3856 = vmatpush2.msra.mxu1 %v2672_v50  ;;  %v2573_v47 = vld [vmem:[%s10149_s11 + $0x568] sm:$0xff]  ;;  %v2708_v48 = vld [vmem:[%s10149_s11 + $0x9a0] sm:$0xff] }
 0x2a2   : > { %3897 = vmatpush1.msra.mxu0 %v2807_v51  ;;  %3857 = vmatprep.subr.mxu1 %v2664_v54  ;;  %v2565_v50 = vld [vmem:[%s10149_s11 + $0x528] sm:$0xff]  ;;  %v2700_v51 = vld [vmem:[%s10149_s11 + $0x960] sm:$0xff] }
 0x2a3   : > { %3898 = vmatprep.subr.mxu0 %v2799_v55  ;;  %3858 = vmatpush2.msra.mxu1 %v2663_v57  ;;  %v2564_v54 = vld [vmem:[%s10149_s11 + $0x520] sm:$0xff]  ;;  %v2699_v55 = vld [vmem:[%s10149_s11 + $0x958] sm:$0xff] }
 0x2a4   : > { %3899 = vmatpush1.msra.mxu0 %v2798_v58  ;;  %3859 = vmatprep.subr.mxu1 %v2655_v60  ;;  %v2556_v57 = vld [vmem:[%s10149_s11 + $0x4e0] sm:$0xff]  ;;  %v2691_v58 = vld [vmem:[%s10149_s11 + $0x918] sm:$0xff] }
 0x2a5   : > { %3900 = vmatprep.subr.mxu0 %v2790_v61  ;;  %3860 = vmatpush2.msra.mxu1 %v2654_v63  ;;  %v2555_v60 = vld [vmem:[%s10149_s11 + $0x4d8] sm:$0xff]  ;;  %v2690_v61 = vld [vmem:[%s10149_s11 + $0x910] sm:$0xff] }
 0x2a6   : > { %3901 = vmatpush1.msra.mxu0 %v2789_v1  ;;  %3861 = vmatprep.subr.mxu1 %v2646_v3  ;;  %v2547_v63 = vld [vmem:[%s10149_s11 + $0x498] sm:$0xff]  ;;  %v2970_v1 = vld [vmem:[%s10149_s11 + $0x11d0] sm:$0xff] }
 0x2a7   : > { %3902 = vmatprep.subr.mxu0 %v2781_v5  ;;  %3862 = vmatpush2.msra.mxu1 %v2645_v6  ;;  %v2546_v3 = vld [vmem:[%s10149_s11 + $0x490] sm:$0xff]  ;;  %v2969_v5 = vld [vmem:[%s10149_s11 + $0x11c8] sm:$0xff] }
 0x2a8   : > { %3903 = vmatpush1.msra.mxu0 %v2780_v7  ;;  %3863 = vmatprep.subr.mxu1 %v2637_v8  ;;  %v2961_v6 = vld [vmem:[%s10149_s11 + $0x1188] sm:$0xff]  ;;  %v3114_v7 = vld [vmem:[%s10149_s11 + $0x1650] sm:$0xff]  ;;  %v2960_v8 = vld [vmem:[%s10149_s11 + $0x1180] sm:$0xff] }
 0x2a9   : > { %3904 = vmatprep.subr.mxu0 %v2772_v9  ;;  %3864 = vmatpush2.msra.mxu1 %v2636_v10  ;;  %v3113_v9 = vld [vmem:[%s10149_s11 + $0x1648] sm:$0xff]  ;;  %v2952_v10 = vld [vmem:[%s10149_s11 + $0x1140] sm:$0xff] }
 0x2aa   : > { %3905 = vmatpush1.msra.mxu0 %v2771_v12  ;;  %3865 = vmatprep.subr.mxu1 %v2628_v13  ;;  %v3105_v12 = vld [vmem:[%s10149_s11 + $0x1608] sm:$0xff]  ;;  %v2951_v13 = vld [vmem:[%s10149_s11 + $0x1138] sm:$0xff] }
 0x2ab   : > { %3906 = vmatprep.subr.mxu0 %v2763_v14  ;;  %3866 = vmatpush2.msra.mxu1 %v2627_v15  ;;  %v3104_v14 = vld [vmem:[%s10149_s11 + $0x1600] sm:$0xff]  ;;  %v2943_v15 = vld [vmem:[%s10149_s11 + $0x10f8] sm:$0xff] }
 0x2ac   : > { %3907 = vmatpush1.msra.mxu0 %v2762_v17  ;;  %3867 = vmatprep.subr.mxu1 %v2619_v18  ;;  %v3096_v17 = vld [vmem:[%s10149_s11 + $0x15c0] sm:$0xff]  ;;  %v2942_v18 = vld [vmem:[%s10149_s11 + $0x10f0] sm:$0xff] }
 0x2ad   : > { %3908 = vmatprep.subr.mxu0 %v2754_v19  ;;  %3868 = vmatpush2.msra.mxu1 %v2618_v20  ;;  %v3095_v19 = vld [vmem:[%s10149_s11 + $0x15b8] sm:$0xff]  ;;  %v2934_v20 = vld [vmem:[%s10149_s11 + $0x10b0] sm:$0xff] }
 0x2ae   : > { %3909 = vmatpush1.msra.mxu0 %v2753_v22  ;;  %3869 = vmatprep.subr.mxu1 %v2610_v24  ;;  %v3087_v22 = vld [vmem:[%s10149_s11 + $0x1578] sm:$0xff]  ;;  %v2933_v24 = vld [vmem:[%s10149_s11 + $0x10a8] sm:$0xff] }
 0x2af   : > { %3910 = vmatprep.subr.mxu0 %v2745_v26  ;;  %3870 = vmatpush2.msra.mxu1 %v2609_v28  ;;  %v3086_v26 = vld [vmem:[%s10149_s11 + $0x1570] sm:$0xff]  ;;  %v2925_v28 = vld [vmem:[%s10149_s11 + $0x1068] sm:$0xff] }
 0x2b0   : > { %3911 = vmatpush1.msra.mxu0 %v2744_v29  ;;  %3871 = vmatprep.subr.mxu1 %v2601_v30  ;;  %v3078_v29 = vld [vmem:[%s10149_s11 + $0x1530] sm:$0xff]  ;;  %v2924_v30 = vld [vmem:[%s10149_s11 + $0x1060] sm:$0xff] }
 0x2b1   : > { %3912 = vmatprep.subr.mxu0 %v2736_v32  ;;  %3872 = vmatpush2.msra.mxu1 %v2600_v33  ;;  %v3077_v32 = vld [vmem:[%s10149_s11 + $0x1528] sm:$0xff]  ;;  %v2916_v33 = vld [vmem:[%s10149_s11 + $0x1020] sm:$0xff] }
 0x2b2   : > { %3913 = vmatpush1.msra.mxu0 %v2735_v34  ;;  %3873 = vmatprep.subr.mxu1 %v2592_v36  ;;  %v3069_v34 = vld [vmem:[%s10149_s11 + $0x14e8] sm:$0xff]  ;;  %v2915_v36 = vld [vmem:[%s10149_s11 + $0x1018] sm:$0xff] }
 0x2b3   : > { %3914 = vmatprep.subr.mxu0 %v2727_v38  ;;  %3874 = vmatpush2.msra.mxu1 %v2591_v39  ;;  %v3068_v38 = vld [vmem:[%s10149_s11 + $0x14e0] sm:$0xff]  ;;  %v2907_v39 = vld [vmem:[%s10149_s11 + $0xfd8] sm:$0xff] }
 0x2b4   : > { %3915 = vmatpush1.msra.mxu0 %v2726_v41  ;;  %3875 = vmatprep.subr.mxu1 %v2583_v42  ;;  %v3060_v41 = vld [vmem:[%s10149_s11 + $0x14a0] sm:$0xff]  ;;  %v2906_v42 = vld [vmem:[%s10149_s11 + $0xfd0] sm:$0xff] }
 0x2b5   : > { %3916 = vmatprep.subr.mxu0 %v2718_v43  ;;  %3876 = vmatpush2.msra.mxu1 %v2582_v52  ;;  %v3059_v43 = vld [vmem:[%s10149_s11 + $0x1498] sm:$0xff]  ;;  %v2898_v52 = vld [vmem:[%s10149_s11 + $0xf90] sm:$0xff] }
 0x2b6   : > { %3917 = vmatpush1.msra.mxu0 %v2717_v44  ;;  %3877 = vmatprep.subr.mxu1 %v2574_v45  ;;  %v3051_v44 = vld [vmem:[%s10149_s11 + $0x1458] sm:$0xff]  ;;  %v2897_v45 = vld [vmem:[%s10149_s11 + $0xf88] sm:$0xff] }
 0x2b7   : > { %3918 = vmatprep.subr.mxu0 %v2709_v46  ;;  %3878 = vmatpush2.msra.mxu1 %v2573_v47  ;;  %v3050_v46 = vld [vmem:[%s10149_s11 + $0x1450] sm:$0xff]  ;;  %v2889_v47 = vld [vmem:[%s10149_s11 + $0xf48] sm:$0xff] }
 0x2b8   : > { %3919 = vmatpush1.msra.mxu0 %v2708_v48  ;;  %3879 = vmatprep.subr.mxu1 %v2565_v50  ;;  %v3042_v48 = vld [vmem:[%s10149_s11 + $0x1410] sm:$0xff]  ;;  %v2888_v50 = vld [vmem:[%s10149_s11 + $0xf40] sm:$0xff] }
 0x2b9   : > { %3920 = vmatprep.subr.mxu0 %v2700_v51  ;;  %3880 = vmatpush2.msra.mxu1 %v2564_v54  ;;  %v3041_v51 = vld [vmem:[%s10149_s11 + $0x1408] sm:$0xff]  ;;  %v2880_v54 = vld [vmem:[%s10149_s11 + $0xf00] sm:$0xff] }
 0x2ba   : > { %3921 = vmatpush1.msra.mxu0 %v2699_v55  ;;  %3881 = vmatprep.subr.mxu1 %v2556_v57  ;;  %v3033_v55 = vld [vmem:[%s10149_s11 + $0x13c8] sm:$0xff]  ;;  %v2879_v57 = vld [vmem:[%s10149_s11 + $0xef8] sm:$0xff] }
 0x2bb   : > { %3922 = vmatprep.subr.mxu0 %v2691_v58  ;;  %3882 = vmatpush2.msra.mxu1 %v2555_v60  ;;  %v3032_v58 = vld [vmem:[%s10149_s11 + $0x13c0] sm:$0xff]  ;;  %v2871_v60 = vld [vmem:[%s10149_s11 + $0xeb8] sm:$0xff] }
 0x2bc   : > { %3923 = vmatpush1.msra.mxu0 %v2690_v61  ;;  %3883 = vmatprep.subr.mxu1 %v2547_v63  ;;  %v3024_v61 = vld [vmem:[%s10149_s11 + $0x1380] sm:$0xff]  ;;  %v2870_v63 = vld [vmem:[%s10149_s11 + $0xeb0] sm:$0xff] }
 0x2bd   : > { %3924 = vmatprep.subr.mxu0 %v2970_v1  ;;  %3884 = vmatpush2.msra.mxu1 %v2546_v3  ;;  %v3023_v1 = vld [vmem:[%s10149_s11 + $0x1378] sm:$0xff]  ;;  %v2862_v3 = vld [vmem:[%s10149_s11 + $0xe70] sm:$0xff] }
 0x2be   : > { %3925 = vmatpush2.msra.mxu0 %v2969_v5  ;;  %3885 = vmatprep.mubr.f32.mxu1 %v10292_v62  ;;  %v3015_v5 = vld [vmem:[%s10149_s11 + $0x1338] sm:$0xff] }
 0x2bf   : > { %3926 = vmatprep.subr.mxu0 %v2961_v6  ;;  %3963 = vmatprep.subr.mxu1 %v3114_v7  ;;  %v2861_v6 = vld [vmem:[%s10149_s11 + $0xe68] sm:$0xff]  ;;  %v3014_v7 = vld [vmem:[%s10149_s11 + $0x1330] sm:$0xff] }
 0x2c0   : > { %3886 = vmatmul.mubr.f32.vlgmr.msra.gmra.mxu1 %v10298_v0  ;;  %3927 = vmatpush2.msra.mxu0 %v2960_v8  ;;  %v2853_v8 = vld [vmem:[%s10149_s11 + $0xe28] sm:$0xff] }
 0x2c1   : > { %3964 = vmatpush1.msra.mxu1 %v3113_v9  ;;  %3928 = vmatprep.subr.mxu0 %v2952_v10  ;;  %v3006_v9 = vld [vmem:[%s10149_s11 + $0x12f0] sm:$0xff]  ;;  %v2852_v10 = vld [vmem:[%s10149_s11 + $0xe20] sm:$0xff] }
 0x2c2   : > { %3965 = vmatprep.subr.mxu1 %v3105_v12  ;;  %3929 = vmatpush2.msra.mxu0 %v2951_v13  ;;  %v3005_v12 = vld [vmem:[%s10149_s11 + $0x12e8] sm:$0xff]  ;;  %v2844_v13 = vld [vmem:[%s10149_s11 + $0xde0] sm:$0xff] }
 0x2c3   : > { %3966 = vmatpush1.msra.mxu1 %v3104_v14  ;;  %3930 = vmatprep.subr.mxu0 %v2943_v15  ;;  %v2997_v14 = vld [vmem:[%s10149_s11 + $0x12a8] sm:$0xff]  ;;  %v2843_v15 = vld [vmem:[%s10149_s11 + $0xdd8] sm:$0xff] }
 0x2c4   : > { %3967 = vmatprep.subr.mxu1 %v3096_v17  ;;  %3931 = vmatpush2.msra.mxu0 %v2942_v18  ;;  %v2996_v17 = vld [vmem:[%s10149_s11 + $0x12a0] sm:$0xff]  ;;  %v2835_v18 = vld [vmem:[%s10149_s11 + $0xd98] sm:$0xff] }
 0x2c5   : > { %3968 = vmatpush1.msra.mxu1 %v3095_v19  ;;  %3932 = vmatprep.subr.mxu0 %v2934_v20  ;;  %v2988_v19 = vld [vmem:[%s10149_s11 + $0x1260] sm:$0xff]  ;;  %v2834_v20 = vld [vmem:[%s10149_s11 + $0xd90] sm:$0xff] }
 0x2c6   : > { %3969 = vmatprep.subr.mxu1 %v3087_v22  ;;  %3933 = vmatpush2.msra.mxu0 %v2933_v24  ;;  %v2987_v22 = vld [vmem:[%s10149_s11 + $0x1258] sm:$0xff] }
 0x2c7   : > { %3970 = vmatpush1.msra.mxu1 %v3086_v26  ;;  %3934 = vmatprep.subr.mxu0 %v2925_v28  ;;  %v2979_v24 = vld [vmem:[%s10149_s11 + $0x1218] sm:$0xff]  ;;  %v3402_v26 = vld [vmem:[%s10149_s11 + $0x1f50] sm:$0xff] }
 0x2c8   : > { %3971 = vmatprep.subr.mxu1 %v3078_v29  ;;  %3935 = vmatpush2.msra.mxu0 %v2924_v30  ;;  %v2978_v28 = vld [vmem:[%s10149_s11 + $0x1210] sm:$0xff]  ;;  %v3401_v29 = vld [vmem:[%s10149_s11 + $0x1f48] sm:$0xff] }
 0x2c9   : > { %3972 = vmatpush1.msra.mxu1 %v3077_v32  ;;  %3936 = vmatprep.subr.mxu0 %v2916_v33  ;;  %v3258_v30 = vld [vmem:[%s10149_s11 + $0x1ad0] sm:$0xff]  ;;  %v3393_v32 = vld [vmem:[%s10149_s11 + $0x1f08] sm:$0xff] }
 0x2ca   : > { %3973 = vmatprep.subr.mxu1 %v3069_v34  ;;  %3937 = vmatpush2.msra.mxu0 %v2915_v36  ;;  %v3257_v33 = vld [vmem:[%s10149_s11 + $0x1ac8] sm:$0xff]  ;;  %v3392_v34 = vld [vmem:[%s10149_s11 + $0x1f00] sm:$0xff] }
 0x2cb   : > { %3974 = vmatpush1.msra.mxu1 %v3068_v38  ;;  %3938 = vmatprep.subr.mxu0 %v2907_v39  ;;  %v3249_v36 = vld [vmem:[%s10149_s11 + $0x1a88] sm:$0xff]  ;;  %v3384_v38 = vld [vmem:[%s10149_s11 + $0x1ec0] sm:$0xff] }
 0x2cc   : > { %3975 = vmatprep.subr.mxu1 %v3060_v41  ;;  %3939 = vmatpush2.msra.mxu0 %v2906_v42  ;;  %v3248_v39 = vld [vmem:[%s10149_s11 + $0x1a80] sm:$0xff]  ;;  %v3383_v41 = vld [vmem:[%s10149_s11 + $0x1eb8] sm:$0xff] }
 0x2cd   : > { %3976 = vmatpush1.msra.mxu1 %v3059_v43  ;;  %3940 = vmatprep.subr.mxu0 %v2898_v52  ;;  %v3240_v42 = vld [vmem:[%s10149_s11 + $0x1a40] sm:$0xff]  ;;  %v3375_v43 = vld [vmem:[%s10149_s11 + $0x1e78] sm:$0xff] }
 0x2ce   : > { %3977 = vmatprep.subr.mxu1 %v3051_v44  ;;  %3941 = vmatpush2.msra.mxu0 %v2897_v45  ;;  %v3239_v52 = vld [vmem:[%s10149_s11 + $0x1a38] sm:$0xff]  ;;  %v3374_v44 = vld [vmem:[%s10149_s11 + $0x1e70] sm:$0xff] }
 0x2cf   : > { %3978 = vmatpush1.msra.mxu1 %v3050_v46  ;;  %3942 = vmatprep.subr.mxu0 %v2889_v47  ;;  %v3231_v45 = vld [vmem:[%s10149_s11 + $0x19f8] sm:$0xff]  ;;  %v3366_v46 = vld [vmem:[%s10149_s11 + $0x1e30] sm:$0xff] }
 0x2d0   : > { %3979 = vmatprep.subr.mxu1 %v3042_v48  ;;  %3943 = vmatpush2.msra.mxu0 %v2888_v50  ;;  %v3230_v47 = vld [vmem:[%s10149_s11 + $0x19f0] sm:$0xff]  ;;  %v3365_v48 = vld [vmem:[%s10149_s11 + $0x1e28] sm:$0xff] }
 0x2d1   : > { %3980 = vmatpush1.msra.mxu1 %v3041_v51  ;;  %3944 = vmatprep.subr.mxu0 %v2880_v54  ;;  %v3222_v50 = vld [vmem:[%s10149_s11 + $0x19b0] sm:$0xff]  ;;  %v3357_v51 = vld [vmem:[%s10149_s11 + $0x1de8] sm:$0xff] }
 0x2d2   : > { %3981 = vmatprep.subr.mxu1 %v3033_v55  ;;  %3945 = vmatpush2.msra.mxu0 %v2879_v57  ;;  %v3221_v54 = vld [vmem:[%s10149_s11 + $0x19a8] sm:$0xff]  ;;  %v3356_v55 = vld [vmem:[%s10149_s11 + $0x1de0] sm:$0xff] }
 0x2d3   : > { %3982 = vmatpush1.msra.mxu1 %v3032_v58  ;;  %3946 = vmatprep.subr.mxu0 %v2871_v60  ;;  %v3213_v57 = vld [vmem:[%s10149_s11 + $0x1968] sm:$0xff]  ;;  %v3348_v58 = vld [vmem:[%s10149_s11 + $0x1da0] sm:$0xff] }
 0x2d4   : > { %3983 = vmatprep.subr.mxu1 %v3024_v61  ;;  %3947 = vmatpush2.msra.mxu0 %v2870_v63  ;;  %v3212_v60 = vld [vmem:[%s10149_s11 + $0x1960] sm:$0xff]  ;;  %v3347_v61 = vld [vmem:[%s10149_s11 + $0x1d98] sm:$0xff] }
 0x2d5   : > { %3984 = vmatpush1.msra.mxu1 %v3023_v1  ;;  %3948 = vmatprep.subr.mxu0 %v2862_v3  ;;  %v3204_v63 = vld [vmem:[%s10149_s11 + $0x1920] sm:$0xff]  ;;  %v3339_v1 = vld [vmem:[%s10149_s11 + $0x1d58] sm:$0xff] }
 0x2d6   : > { %3985 = vmatprep.subr.mxu1 %v3015_v5  ;;  %3949 = vmatpush2.msra.mxu0 %v2861_v6  ;;  %v3203_v3 = vld [vmem:[%s10149_s11 + $0x1918] sm:$0xff]  ;;  %v3338_v5 = vld [vmem:[%s10149_s11 + $0x1d50] sm:$0xff] }
 0x2d7   : > { %3986 = vmatpush1.msra.mxu1 %v3014_v7  ;;  %3950 = vmatprep.subr.mxu0 %v2853_v8  ;;  %v3195_v6 = vld [vmem:[%s10149_s11 + $0x18d8] sm:$0xff]  ;;  %v3330_v7 = vld [vmem:[%s10149_s11 + $0x1d10] sm:$0xff] }
 0x2d8   : > { %3987 = vmatprep.subr.mxu1 %v3006_v9  ;;  %3951 = vmatpush2.msra.mxu0 %v2852_v10  ;;  %v3194_v8 = vld [vmem:[%s10149_s11 + $0x18d0] sm:$0xff]  ;;  %v3329_v9 = vld [vmem:[%s10149_s11 + $0x1d08] sm:$0xff] }
 0x2d9   : > { %3988 = vmatpush1.msra.mxu1 %v3005_v12  ;;  %3952 = vmatprep.subr.mxu0 %v2844_v13  ;;  %v3186_v10 = vld [vmem:[%s10149_s11 + $0x1890] sm:$0xff]  ;;  %v3321_v12 = vld [vmem:[%s10149_s11 + $0x1cc8] sm:$0xff] }
 0x2da   : > { %3989 = vmatprep.subr.mxu1 %v2997_v14  ;;  %3953 = vmatpush2.msra.mxu0 %v2843_v15  ;;  %v3185_v13 = vld [vmem:[%s10149_s11 + $0x1888] sm:$0xff]  ;;  %v3320_v14 = vld [vmem:[%s10149_s11 + $0x1cc0] sm:$0xff] }
 0x2db   : > { %3990 = vmatpush1.msra.mxu1 %v2996_v17  ;;  %3954 = vmatprep.subr.mxu0 %v2835_v18  ;;  %v3177_v15 = vld [vmem:[%s10149_s11 + $0x1848] sm:$0xff]  ;;  %v3312_v17 = vld [vmem:[%s10149_s11 + $0x1c80] sm:$0xff] }
 0x2dc   : > { %3991 = vmatprep.subr.mxu1 %v2988_v19  ;;  %3955 = vmatpush2.msra.mxu0 %v2834_v20  ;;  %v3176_v18 = vld [vmem:[%s10149_s11 + $0x1840] sm:$0xff]  ;;  %v3311_v19 = vld [vmem:[%s10149_s11 + $0x1c78] sm:$0xff] }
 0x2dd   : > { %3956 = vmatprep.mubr.f32.mxu0 %v10304_v2  ;;  %3992 = vmatpush1.msra.mxu1 %v2987_v22  ;;  %v3168_v20 = vld [vmem:[%s10149_s11 + $0x1800] sm:$0xff]  ;;  %v3303_v22 = vld [vmem:[%s10149_s11 + $0x1c38] sm:$0xff] }
 0x2de   : > { %3957 = vmatmul.mubr.f32.vlgmr.msra.gmra.mxu0 %v10310_v4  ;;  %3993 = vmatprep.subr.mxu1 %v2979_v24  ;;  %v3167_v24 = vld [vmem:[%s10149_s11 + $0x17f8] sm:$0xff] }
 0x2df   : > { %4034 = vmatprep.subr.mxu0 %v3402_v26  ;;  %3994 = vmatpush1.msra.mxu1 %v2978_v28  ;;  %v3302_v26 = vld [vmem:[%s10149_s11 + $0x1c30] sm:$0xff]  ;;  %v3159_v28 = vld [vmem:[%s10149_s11 + $0x17b8] sm:$0xff] }
 0x2e0   : > { %4035 = vmatpush1.msra.mxu0 %v3401_v29  ;;  %3995 = vmatprep.subr.mxu1 %v3258_v30  ;;  %v3294_v29 = vld [vmem:[%s10149_s11 + $0x1bf0] sm:$0xff] }
 0x2e1   : > { %4036 = vmatprep.subr.mxu0 %v3393_v32  ;;  %3996 = vmatpush2.msra.mxu1 %v3257_v33  ;;  %v3158_v30 = vld [vmem:[%s10149_s11 + $0x17b0] sm:$0xff]  ;;  %v3293_v32 = vld [vmem:[%s10149_s11 + $0x1be8] sm:$0xff] }
 0x2e2   : > { %4037 = vmatpush1.msra.mxu0 %v3392_v34  ;;  %3997 = vmatprep.subr.mxu1 %v3249_v36  ;;  %v3150_v33 = vld [vmem:[%s10149_s11 + $0x1770] sm:$0xff]  ;;  %v3285_v34 = vld [vmem:[%s10149_s11 + $0x1ba8] sm:$0xff] }
 0x2e3   : > { %4038 = vmatprep.subr.mxu0 %v3384_v38  ;;  %3998 = vmatpush2.msra.mxu1 %v3248_v39  ;;  %v3149_v36 = vld [vmem:[%s10149_s11 + $0x1768] sm:$0xff]  ;;  %v3284_v38 = vld [vmem:[%s10149_s11 + $0x1ba0] sm:$0xff] }
 0x2e4   : > { %4039 = vmatpush1.msra.mxu0 %v3383_v41  ;;  %3999 = vmatprep.subr.mxu1 %v3240_v42  ;;  %v3141_v39 = vld [vmem:[%s10149_s11 + $0x1728] sm:$0xff]  ;;  %v3276_v41 = vld [vmem:[%s10149_s11 + $0x1b60] sm:$0xff] }
 0x2e5   : > { %4040 = vmatprep.subr.mxu0 %v3375_v43  ;;  %4000 = vmatpush2.msra.mxu1 %v3239_v52  ;;  %v3140_v42 = vld [vmem:[%s10149_s11 + $0x1720] sm:$0xff]  ;;  %v3275_v43 = vld [vmem:[%s10149_s11 + $0x1b58] sm:$0xff] }
 0x2e6   : > { %4041 = vmatpush1.msra.mxu0 %v3374_v44  ;;  %4001 = vmatprep.subr.mxu1 %v3231_v45  ;;  %v3132_v52 = vld [vmem:[%s10149_s11 + $0x16e0] sm:$0xff]  ;;  %v3267_v44 = vld [vmem:[%s10149_s11 + $0x1b18] sm:$0xff] }
 0x2e7   : > { %4042 = vmatprep.subr.mxu0 %v3366_v46  ;;  %4002 = vmatpush2.msra.mxu1 %v3230_v47  ;;  %v3131_v45 = vld [vmem:[%s10149_s11 + $0x16d8] sm:$0xff]  ;;  %v3266_v46 = vld [vmem:[%s10149_s11 + $0x1b10] sm:$0xff] }
 0x2e8   : > { %4043 = vmatpush1.msra.mxu0 %v3365_v48  ;;  %4003 = vmatprep.subr.mxu1 %v3222_v50  ;;  %v3123_v47 = vld [vmem:[%s10149_s11 + $0x1698] sm:$0xff]  ;;  %v3122_v50 = vld [vmem:[%s10149_s11 + $0x1690] sm:$0xff] }
 0x2e9   : > { %4044 = vmatprep.subr.mxu0 %v3357_v51  ;;  %4004 = vmatpush2.msra.mxu1 %v3221_v54  ;;  %v3411_v48 = vld [vmem:[%s10149_s11 + $0x1f98] sm:$0xf]  ;;  %v3410_v51 = vld [vmem:[%s10149_s11 + $0x1f90] sm:$0xf]  ;;  %v2540_v54 = vld [vmem:[%s10149_s11 + $0x460] sm:$0xff] }
 0x2ea   : > { %4045 = vmatpush1.msra.mxu0 %v3356_v55  ;;  %4005 = vmatprep.subr.mxu1 %v3213_v57  ;;  %v2828_v55 = vld [vmem:[%s10149_s11 + $0xd60] sm:$0xff]  ;;  %v2539_v57 = vld [vmem:[%s10149_s11 + $0x458] sm:$0xff] }
 0x2eb   : > { %4046 = vmatprep.subr.mxu0 %v3348_v58  ;;  %4006 = vmatpush2.msra.mxu1 %v3212_v60  ;;  %v2827_v58 = vld [vmem:[%s10149_s11 + $0xd58] sm:$0xff] }
 0x2ec   : > { %4047 = vmatpush1.msra.mxu0 %v3347_v61  ;;  %4007 = vmatprep.subr.mxu1 %v3204_v63  ;;  %v2531_v60 = vld [vmem:[%s10149_s11 + $0x418] sm:$0xff]  ;;  %v2530_v63 = vld [vmem:[%s10149_s11 + $0x410] sm:$0xff] }
 0x2ed   : > { %4048 = vmatprep.subr.mxu0 %v3339_v1  ;;  %4008 = vmatpush2.msra.mxu1 %v3203_v3  ;;  %v2819_v61 = vld [vmem:[%s10149_s11 + $0xd18] sm:$0xff]  ;;  %v2818_v1 = vld [vmem:[%s10149_s11 + $0xd10] sm:$0xff] }
 0x2ee   : > { %4049 = vmatpush1.msra.mxu0 %v3338_v5  ;;  %4009 = vmatprep.subr.mxu1 %v3195_v6  ;;  %v2522_v3 = vld [vmem:[%s10149_s11 + $0x3d0] sm:$0xff]  ;;  %v2521_v6 = vld [vmem:[%s10149_s11 + $0x3c8] sm:$0xff] }
 0x2ef   : > { %4050 = vmatprep.subr.mxu0 %v3330_v7  ;;  %4010 = vmatpush2.msra.mxu1 %v3194_v8  ;;  %v2810_v5 = vld [vmem:[%s10149_s11 + $0xcd0] sm:$0xff]  ;;  %v2809_v7 = vld [vmem:[%s10149_s11 + $0xcc8] sm:$0xff] }
 0x2f0   : > { %4051 = vmatpush1.msra.mxu0 %v3329_v9  ;;  %4011 = vmatprep.subr.mxu1 %v3186_v10  ;;  %v2513_v8 = vld [vmem:[%s10149_s11 + $0x388] sm:$0xff]  ;;  %v2512_v10 = vld [vmem:[%s10149_s11 + $0x380] sm:$0xff] }
 0x2f1   : > { %4052 = vmatprep.subr.mxu0 %v3321_v12  ;;  %4012 = vmatpush2.msra.mxu1 %v3185_v13  ;;  %v2801_v9 = vld [vmem:[%s10149_s11 + $0xc88] sm:$0xff]  ;;  %v2800_v12 = vld [vmem:[%s10149_s11 + $0xc80] sm:$0xff] }
 0x2f2   : > { %4053 = vmatpush1.msra.mxu0 %v3320_v14  ;;  %4013 = vmatprep.subr.mxu1 %v3177_v15  ;;  %v2504_v13 = vld [vmem:[%s10149_s11 + $0x340] sm:$0xff]  ;;  %v2503_v15 = vld [vmem:[%s10149_s11 + $0x338] sm:$0xff] }
 0x2f3   : > { %4054 = vmatprep.subr.mxu0 %v3312_v17  ;;  %4014 = vmatpush2.msra.mxu1 %v3176_v18  ;;  %v2792_v14 = vld [vmem:[%s10149_s11 + $0xc40] sm:$0xff]  ;;  %v2791_v17 = vld [vmem:[%s10149_s11 + $0xc38] sm:$0xff] }
 0x2f4   : > { %4055 = vmatpush1.msra.mxu0 %v3311_v19  ;;  %4015 = vmatprep.subr.mxu1 %v3168_v20  ;;  %v2495_v18 = vld [vmem:[%s10149_s11 + $0x2f8] sm:$0xff]  ;;  %v2494_v20 = vld [vmem:[%s10149_s11 + $0x2f0] sm:$0xff] }
 0x2f5   : > { %4056 = vmatprep.subr.mxu0 %v3303_v22  ;;  %4016 = vmatpush2.msra.mxu1 %v3167_v24  ;;  %v2783_v19 = vld [vmem:[%s10149_s11 + $0xbf8] sm:$0xff]  ;;  %v2782_v22 = vld [vmem:[%s10149_s11 + $0xbf0] sm:$0xff] }
 0x2f6   : > { %4057 = vmatpush1.msra.mxu0 %v3302_v26  ;;  %4017 = vmatprep.subr.mxu1 %v3159_v28  ;;  %v2486_v24 = vld [vmem:[%s10149_s11 + $0x2b0] sm:$0xff]  ;;  %v2485_v28 = vld [vmem:[%s10149_s11 + $0x2a8] sm:$0xff] }
 0x2f7   : > { %4058 = vmatprep.subr.mxu0 %v3294_v29  ;;  %4018 = vmatpush2.msra.mxu1 %v3158_v30  ;;  %v2774_v26 = vld [vmem:[%s10149_s11 + $0xbb0] sm:$0xff]  ;;  %v2773_v29 = vld [vmem:[%s10149_s11 + $0xba8] sm:$0xff] }
 0x2f8   : > { %4059 = vmatpush1.msra.mxu0 %v3293_v32  ;;  %4019 = vmatprep.subr.mxu1 %v3150_v33  ;;  %v2477_v30 = vld [vmem:[%s10149_s11 + $0x268] sm:$0xff]  ;;  %v2476_v33 = vld [vmem:[%s10149_s11 + $0x260] sm:$0xff] }
 0x2f9   : > { %4060 = vmatprep.subr.mxu0 %v3285_v34  ;;  %4020 = vmatpush2.msra.mxu1 %v3149_v36  ;;  %v2765_v32 = vld [vmem:[%s10149_s11 + $0xb68] sm:$0xff]  ;;  %v2764_v34 = vld [vmem:[%s10149_s11 + $0xb60] sm:$0xff] }
 0x2fa   : > { %4061 = vmatpush1.msra.mxu0 %v3284_v38  ;;  %4021 = vmatprep.subr.mxu1 %v3141_v39  ;;  %v2468_v36 = vld [vmem:[%s10149_s11 + $0x220] sm:$0xff]  ;;  %v2467_v39 = vld [vmem:[%s10149_s11 + $0x218] sm:$0xff] }
 0x2fb   : > { %4062 = vmatprep.subr.mxu0 %v3276_v41  ;;  %4022 = vmatpush2.msra.mxu1 %v3140_v42  ;;  %v2756_v38 = vld [vmem:[%s10149_s11 + $0xb20] sm:$0xff]  ;;  %v2755_v41 = vld [vmem:[%s10149_s11 + $0xb18] sm:$0xff] }
 0x2fc   : > { %4063 = vmatpush1.msra.mxu0 %v3275_v43  ;;  %4023 = vmatprep.subr.mxu1 %v3132_v52  ;;  %v2459_v42 = vld [vmem:[%s10149_s11 + $0x1d8] sm:$0xff]  ;;  %v2458_v52 = vld [vmem:[%s10149_s11 + $0x1d0] sm:$0xff] }
 0x2fd   : > { %4064 = vmatprep.subr.mxu0 %v3267_v44  ;;  %4024 = vmatpush2.msra.mxu1 %v3131_v45  ;;  %v2747_v43 = vld [vmem:[%s10149_s11 + $0xad8] sm:$0xff]  ;;  %v2746_v44 = vld [vmem:[%s10149_s11 + $0xad0] sm:$0xff] }
 0x2fe   : > { %4065 = vmatpush1.msra.mxu0 %v3266_v46  ;;  %4025 = vmatprep.subr.mxu1 %v3123_v47  ;;  %v3417_v45 = vld [vmem:[%s10729_s18] sm:$0xff]  ;;  %v2450_v46 = vld [vmem:[%s10149_s11 + $0x190] sm:$0xff] }
 0x2ff   : > { %7809 = vmatprep.subr.msk.mxu0 %vm3509_vm0, %v3411_v48  ;;  %4026 = vmatpush2.msra.mxu1 %v3122_v50  ;;  %v2738_v47 = vld [vmem:[%s10149_s11 + $0xa90] sm:$0xff]  ;;  %v2449_v48 = vld [vmem:[%s10149_s11 + $0x188] sm:$0xff] }
 0x300   : > { %4027 = vmatprep.mubr.f32.mxu1 %v10463_v35  ;;  %7810 = vmatpush2.msk.msra.mxu0 %vm3509_vm0, %v3410_v51  ;;  %v2737_v50 = vld [vmem:[%s10149_s11 + $0xa88] sm:$0xff] }
 0x301   : > { %7811 = vmatprep.mubr.msk.f32.mxu0 %vm3506_vm1, %v10388_v21  ;;  %4028 = vmatmul.mubr.f32.vlgmr.msra.gmra.mxu1 %v10469_v37  ;;  %v2441_v51 = vld [vmem:[%s10149_s11 + $0x148] sm:$0xff] }
 0x302   : > { %4099 = vmatmul.mubr.f32.vlgmr.msra.gmra.mxu0 %v10397_v25  ;;  %4105 = vmatprep.subr.mxu0 %v2540_v54  ;;  %v2729_v54 = vld [vmem:[%s10149_s11 + $0xa48] sm:$0xff] }
 0x303   : > { %4176 = vmatprep.subr.mxu1 %v2828_v55  ;;  %4106 = vmatpush1.msra.mxu0 %v2539_v57  ;;  %v3464_v55 = vrot.slane %v3417_v45, %v3422_v53  ;;  %v2440_v57 = vld [vmem:[%s10149_s11 + $0x140] sm:$0xff]  ;;  %v2423_v53 = vld [vmem:[%s10149_s11 + $0xb8] sm:$0xff] }
 0x304   : > { %4177 = vmatpush1.msra.mxu1 %v2827_v58  ;;  %4107 = vmatprep.subr.mxu0 %v2531_v60  ;;  %v2728_v58 = vld [vmem:[%s10149_s11 + $0xa40] sm:$0xff] }
 0x305   : > { %4178 = vmatprep.subr.mxu1 %v2819_v61  ;;  %4108 = vmatpush1.msra.mxu0 %v2530_v63  ;;  %v2432_v60 = vld [vmem:[%s10149_s11 + $0x100] sm:$0xff]  ;;  %v2431_v63 = vld [vmem:[%s10149_s11 + $0xf8] sm:$0xff] }
 0x306   : > { %4179 = vmatpush1.msra.mxu1 %v2818_v1  ;;  %4109 = vmatprep.subr.mxu0 %v2522_v3  ;;  %v2720_v61 = vld [vmem:[%s10149_s11 + $0xa00] sm:$0xff]  ;;  %v2719_v1 = vld [vmem:[%s10149_s11 + $0x9f8] sm:$0xff] }
 0x307   : > { %4180 = vmatprep.subr.mxu1 %v2810_v5  ;;  %4110 = vmatpush1.msra.mxu0 %v2521_v6  ;;  %v2711_v5 = vld [vmem:[%s10149_s11 + $0x9b8] sm:$0xff]  ;;  %v2936_v45 = vld [vmem:[%s10149_s11 + $0x10c0] sm:$0xff] }
 0x308   : > { %4181 = vmatpush1.msra.mxu1 %v2809_v7  ;;  %4111 = vmatprep.subr.mxu0 %v2513_v8  ;;  %v2422_v7 = vld [vmem:[%s10149_s11 + $0xb0] sm:$0xff] }
 0x309   : > { %4182 = vmatprep.subr.mxu1 %v2801_v9  ;;  %4112 = vmatpush1.msra.mxu0 %v2512_v10  ;;  %v2710_v8 = vld [vmem:[%s10149_s11 + $0x9b0] sm:$0xff] }
 0x30a   : > { %4183 = vmatpush1.msra.mxu1 %v2800_v12  ;;  %4113 = vmatprep.subr.mxu0 %v2504_v13  ;;  %v2414_v10 = vld [vmem:[%s10149_s11 + $0x70] sm:$0xff] }
 0x30b   : > { %4184 = vmatprep.subr.mxu1 %v2792_v14  ;;  %4114 = vmatpush1.msra.mxu0 %v2503_v15  ;;  %v2702_v12 = vld [vmem:[%s10149_s11 + $0x970] sm:$0xff]  ;;  %v2413_v14 = vld [vmem:[%s10149_s11 + $0x68] sm:$0xff] }
 0x30c   : > { %4185 = vmatpush1.msra.mxu1 %v2791_v17  ;;  %4115 = vmatprep.subr.mxu0 %v2495_v18  ;;  %v2701_v15 = vld [vmem:[%s10149_s11 + $0x968] sm:$0xff] }
 0x30d   : > { %4186 = vmatprep.subr.mxu1 %v2783_v19  ;;  %4116 = vmatpush1.msra.mxu0 %v2494_v20  ;;  %v2405_v17 = vld [vmem:[%s10149_s11 + $0x28] sm:$0xff]  ;;  %v2404_v19 = vld [vmem:[%s10149_s11 + $0x20] sm:$0xff] }
 0x30e   : > { %4187 = vmatpush1.msra.mxu1 %v2782_v22  ;;  %4117 = vmatprep.subr.mxu0 %v2486_v24  ;;  %v2693_v18 = vld [vmem:[%s10149_s11 + $0x928] sm:$0xff]  ;;  %v2692_v20 = vld [vmem:[%s10149_s11 + $0x920] sm:$0xff] }
 0x30f   : > { %4188 = vmatprep.subr.mxu1 %v2774_v26  ;;  %4118 = vmatpush1.msra.mxu0 %v2485_v28  ;;  %v2684_v22 = vld [vmem:[%s10149_s11 + $0x8e0] sm:$0xff]  ;;  %v2683_v26 = vld [vmem:[%s10149_s11 + $0x8d8] sm:$0xff] }
 0x310   : > { %4189 = vmatpush1.msra.mxu1 %v2773_v29  ;;  %4119 = vmatprep.subr.mxu0 %v2477_v30  ;;  %v2972_v24 = vld [vmem:[%s10149_s11 + $0x11e0] sm:$0xff]  ;;  %v2971_v28 = vld [vmem:[%s10149_s11 + $0x11d8] sm:$0xff] }
 0x311   : > { %4190 = vmatprep.subr.mxu1 %v2765_v32  ;;  %4120 = vmatpush1.msra.mxu0 %v2476_v33  ;;  %v2675_v29 = vld [vmem:[%s10149_s11 + $0x898] sm:$0xff]  ;;  %v2674_v32 = vld [vmem:[%s10149_s11 + $0x890] sm:$0xff] }
 0x312   : > { %4191 = vmatpush1.msra.mxu1 %v2764_v34  ;;  %4121 = vmatprep.subr.mxu0 %v2468_v36  ;;  %v2963_v30 = vld [vmem:[%s10149_s11 + $0x1198] sm:$0xff]  ;;  %v2962_v33 = vld [vmem:[%s10149_s11 + $0x1190] sm:$0xff] }
 0x313   : > { %4192 = vmatprep.subr.mxu1 %v2756_v38  ;;  %4122 = vmatpush1.msra.mxu0 %v2467_v39  ;;  %v2666_v34 = vld [vmem:[%s10149_s11 + $0x850] sm:$0xff]  ;;  %v2665_v38 = vld [vmem:[%s10149_s11 + $0x848] sm:$0xff] }
 0x314   : > { %4193 = vmatpush1.msra.mxu1 %v2755_v41  ;;  %4123 = vmatprep.subr.mxu0 %v2459_v42  ;;  %v2954_v36 = vld [vmem:[%s10149_s11 + $0x1150] sm:$0xff]  ;;  %v2953_v39 = vld [vmem:[%s10149_s11 + $0x1148] sm:$0xff] }
 0x315   : > { %4194 = vmatprep.subr.mxu1 %v2747_v43  ;;  %4124 = vmatpush1.msra.mxu0 %v2458_v52  ;;  %v2657_v41 = vld [vmem:[%s10149_s11 + $0x808] sm:$0xff]  ;;  %v2656_v43 = vld [vmem:[%s10149_s11 + $0x800] sm:$0xff] }
 0x316   : > { %4195 = vmatpush1.msra.mxu1 %v2746_v44  ;;  %4125 = vmatprep.subr.mxu0 %v2450_v46  ;;  %v2945_v42 = vld [vmem:[%s10149_s11 + $0x1108] sm:$0xff]  ;;  %v2944_v52 = vld [vmem:[%s10149_s11 + $0x1100] sm:$0xff]  ;;  %v2647_v46 = vld [vmem:[%s10149_s11 + $0x7b8] sm:$0xff] }
 0x317   : > { %4196 = vmatprep.subr.mxu1 %v2738_v47  ;;  %4126 = vmatpush1.msra.mxu0 %v2449_v48  ;;  %v2648_v44 = vld [vmem:[%s10149_s11 + $0x7c0] sm:$0xff]  ;;  %v2935_v47 = vld [vmem:[%s10149_s11 + $0x10b8] sm:$0xff] }
 0x318   : > { %4197 = vmatpush1.msra.mxu1 %v2737_v50  ;;  %4127 = vmatprep.subr.mxu0 %v2441_v51  ;;  %v2639_v48 = vld [vmem:[%s10149_s11 + $0x778] sm:$0xff]  ;;  %v2638_v51 = vld [vmem:[%s10149_s11 + $0x770] sm:$0xff] }
 0x319   : > { %4198 = vmatprep.subr.mxu1 %v2729_v54  ;;  %v3603_v3 = vpop.f32.mrf.mxu0  ;;  %4128 = vmatpush1.msra.mxu0 %v2440_v57  ;;  %v2927_v50 = vld [vmem:[%s10149_s11 + $0x1078] sm:$0xff]  ;;  %v2926_v54 = vld [vmem:[%s10149_s11 + $0x1070] sm:$0xff] }
 0x31a   : > { %4199 = vmatpush1.msra.mxu1 %v2728_v58  ;;  %v3604_v6 = vadd.f32 %v3603_v3, %v3464_v55  ;;  %4129 = vmatprep.subr.mxu0 %v2432_v60  ;;  %v2630_v55 = vld [vmem:[%s10149_s11 + $0x730] sm:$0xff]  ;;  %v2629_v58 = vld [vmem:[%s10149_s11 + $0x728] sm:$0xff]  ;;  %v2908_v3 = vld [vmem:[%s10149_s11 + $0xfe0] sm:$0xff] }
 0x31b   : > { %4200 = vmatprep.subr.mxu1 %v2720_v61  ;;  %v3674_v9 = vpop.f32.mrf.mxu1  ;;  %4130 = vmatpush1.msra.mxu0 %v2431_v63  ;;  %v2918_v57 = vld [vmem:[%s10149_s11 + $0x1030] sm:$0xff]  ;;  %v2917_v60 = vld [vmem:[%s10149_s11 + $0x1028] sm:$0xff] }
 0x31c   : > { %4201 = vmatpush1.msra.mxu1 %v2719_v1  ;;  %v10758_v13 = vadd.f32 %v3674_v9, %v3604_v6  ;;  %4131 = vmatprep.subr.mxu0 %v2423_v53  ;;  %v2621_v61 = vld [vmem:[%s10149_s11 + $0x6e8] sm:$0xff]  ;;  %v2620_v1 = vld [vmem:[%s10149_s11 + $0x6e0] sm:$0xff]  ;;  %v2611_v6 = vld [vmem:[%s10149_s11 + $0x698] sm:$0xff] }
 0x31d   : > { %4202 = vmatprep.subr.mxu1 %v2711_v5  ;;  %4132 = vmatpush1.msra.mxu0 %v2422_v7  ;;  %v2909_v63 = vld [vmem:[%s10149_s11 + $0xfe8] sm:$0xff]  ;;  %v2612_v53 = vld [vmem:[%s10149_s11 + $0x6a0] sm:$0xff]  ;;  %v2899_v7 = vld [vmem:[%s10149_s11 + $0xf98] sm:$0xff] }
 0x31e   : > { %4203 = vmatpush1.msra.mxu1 %v2710_v8  ;;  %4133 = vmatprep.subr.mxu0 %v2414_v10  ;;  %v2900_v5 = vld [vmem:[%s10149_s11 + $0xfa0] sm:$0xff]  ;;  %v2603_v8 = vld [vmem:[%s10149_s11 + $0x658] sm:$0xff]  ;;  %v2602_v10 = vld [vmem:[%s10149_s11 + $0x650] sm:$0xff] }
 0x31f   : > { %4204 = vmatprep.subr.mxu1 %v2702_v12  ;;  %4134 = vmatpush1.msra.mxu0 %v2413_v14  ;;  %v2891_v9 = vld [vmem:[%s10149_s11 + $0xf58] sm:$0xff]  ;;  %v2890_v12 = vld [vmem:[%s10149_s11 + $0xf50] sm:$0xff] }
 0x320   : > { %4205 = vmatpush1.msra.mxu1 %v2701_v15  ;;  %4135 = vmatprep.subr.mxu0 %v2405_v17  ;;  %v2594_v14 = vld [vmem:[%s10149_s11 + $0x610] sm:$0xff]  ;;  %v2593_v17 = vld [vmem:[%s10149_s11 + $0x608] sm:$0xff] }
 0x321   : > { %4206 = vmatprep.subr.mxu1 %v2693_v18  ;;  %4136 = vmatpush1.msra.mxu0 %v2404_v19  ;;  %v2882_v15 = vld [vmem:[%s10149_s11 + $0xf10] sm:$0xff]  ;;  %v2881_v18 = vld [vmem:[%s10149_s11 + $0xf08] sm:$0xff] }
 0x322   : > { %4207 = vmatpush1.msra.mxu1 %v2692_v20  ;;  %4137 = vmatprep.subr.mxu0 %v2684_v22  ;;  %v2585_v19 = vld [vmem:[%s10149_s11 + $0x5c8] sm:$0xff]  ;;  %v2584_v22 = vld [vmem:[%s10149_s11 + $0x5c0] sm:$0xff] }
 0x323   : > { %4208 = vmatprep.subr.mxu1 %v2972_v24  ;;  %4138 = vmatpush2.msra.mxu0 %v2683_v26  ;;  %v2873_v20 = vld [vmem:[%s10149_s11 + $0xec8] sm:$0xff]  ;;  %v2872_v24 = vld [vmem:[%s10149_s11 + $0xec0] sm:$0xff] }
 0x324   : > { %4209 = vmatpush2.msra.mxu1 %v2971_v28  ;;  %4139 = vmatprep.subr.mxu0 %v2675_v29  ;;  %v2576_v26 = vld [vmem:[%s10149_s11 + $0x580] sm:$0xff]  ;;  %v2575_v29 = vld [vmem:[%s10149_s11 + $0x578] sm:$0xff] }
 0x325   : > { %4210 = vmatprep.subr.mxu1 %v2963_v30  ;;  %4140 = vmatpush2.msra.mxu0 %v2674_v32  ;;  %v2864_v28 = vld [vmem:[%s10149_s11 + $0xe80] sm:$0xff]  ;;  %v2863_v30 = vld [vmem:[%s10149_s11 + $0xe78] sm:$0xff] }
 0x326   : > { %4211 = vmatpush2.msra.mxu1 %v2962_v33  ;;  %4141 = vmatprep.subr.mxu0 %v2666_v34  ;;  %v2567_v32 = vld [vmem:[%s10149_s11 + $0x538] sm:$0xff]  ;;  %v2566_v34 = vld [vmem:[%s10149_s11 + $0x530] sm:$0xff] }
 0x327   : > { %4212 = vmatprep.subr.mxu1 %v2954_v36  ;;  %4142 = vmatpush2.msra.mxu0 %v2665_v38  ;;  %v2855_v33 = vld [vmem:[%s10149_s11 + $0xe38] sm:$0xff]  ;;  %v2854_v36 = vld [vmem:[%s10149_s11 + $0xe30] sm:$0xff] }
 0x328   : > { %4213 = vmatpush2.msra.mxu1 %v2953_v39  ;;  %4143 = vmatprep.subr.mxu0 %v2657_v41  ;;  %v2558_v38 = vld [vmem:[%s10149_s11 + $0x4f0] sm:$0xff]  ;;  %v2557_v41 = vld [vmem:[%s10149_s11 + $0x4e8] sm:$0xff] }
 0x329   : > { %4214 = vmatprep.subr.mxu1 %v2945_v42  ;;  %4144 = vmatpush2.msra.mxu0 %v2656_v43  ;;  %v2846_v39 = vld [vmem:[%s10149_s11 + $0xdf0] sm:$0xff]  ;;  %v2845_v42 = vld [vmem:[%s10149_s11 + $0xde8] sm:$0xff] }
 0x32a   : > { %4215 = vmatpush2.msra.mxu1 %v2944_v52  ;;  %4145 = vmatprep.subr.mxu0 %v2648_v44  ;;  %v2549_v43 = vld [vmem:[%s10149_s11 + $0x4a8] sm:$0xff]  ;;  %v2548_v44 = vld [vmem:[%s10149_s11 + $0x4a0] sm:$0xff] }
 0x32b   : > { %4216 = vmatprep.subr.mxu1 %v2936_v45  ;;  %4146 = vmatpush2.msra.mxu0 %v2647_v46  ;;  %v2837_v52 = vld [vmem:[%s10149_s11 + $0xda8] sm:$0xff]  ;;  %v2836_v45 = vld [vmem:[%s10149_s11 + $0xda0] sm:$0xff] }
 0x32c   : > { %4217 = vmatpush2.msra.mxu1 %v2935_v47  ;;  %4147 = vmatprep.subr.mxu0 %v2639_v48  ;;  %v3116_v46 = vld [vmem:[%s10149_s11 + $0x1660] sm:$0xff]  ;;  %v3115_v48 = vld [vmem:[%s10149_s11 + $0x1658] sm:$0xff] }
 0x32d   : > { %4218 = vmatprep.subr.mxu1 %v2927_v50  ;;  %4148 = vmatpush2.msra.mxu0 %v2638_v51  ;;  %v3404_v47 = vld [vmem:[%s10149_s11 + $0x1f60] sm:$0xff]  ;;  %v3403_v50 = vld [vmem:[%s10149_s11 + $0x1f58] sm:$0xff] }
 0x32e   : > { %4219 = vmatpush2.msra.mxu1 %v2926_v54  ;;  %4149 = vmatprep.subr.mxu0 %v2630_v55  ;;  %v3107_v51 = vld [vmem:[%s10149_s11 + $0x1618] sm:$0xff]  ;;  %v3106_v55 = vld [vmem:[%s10149_s11 + $0x1610] sm:$0xff] }
 0x32f   : > { %4220 = vmatprep.subr.mxu1 %v2918_v57  ;;  %4150 = vmatpush2.msra.mxu0 %v2629_v58  ;;  %v3395_v54 = vld [vmem:[%s10149_s11 + $0x1f18] sm:$0xff]  ;;  %v3394_v57 = vld [vmem:[%s10149_s11 + $0x1f10] sm:$0xff] }
 0x330   : > { %4221 = vmatpush2.msra.mxu1 %v2917_v60  ;;  %4151 = vmatprep.subr.mxu0 %v2621_v61  ;;  %v3098_v58 = vld [vmem:[%s10149_s11 + $0x15d0] sm:$0xff]  ;;  %v3097_v61 = vld [vmem:[%s10149_s11 + $0x15c8] sm:$0xff] }
 0x331   : > { %4222 = vmatprep.subr.mxu1 %v2909_v63  ;;  %4152 = vmatpush2.msra.mxu0 %v2620_v1  ;;  %v3386_v60 = vld [vmem:[%s10149_s11 + $0x1ed0] sm:$0xff]  ;;  %v3385_v63 = vld [vmem:[%s10149_s11 + $0x1ec8] sm:$0xff] }
 0x332   : > { %4223 = vmatpush2.msra.mxu1 %v2908_v3  ;;  %4153 = vmatprep.subr.mxu0 %v2612_v53  ;;  %v3089_v1 = vld [vmem:[%s10149_s11 + $0x1588] sm:$0xff]  ;;  %v3088_v53 = vld [vmem:[%s10149_s11 + $0x1580] sm:$0xff] }
 0x333   : > { %4224 = vmatprep.subr.mxu1 %v2900_v5  ;;  %4154 = vmatpush2.msra.mxu0 %v2611_v6  ;;  %v3377_v3 = vld [vmem:[%s10149_s11 + $0x1e88] sm:$0xff]  ;;  %v3376_v5 = vld [vmem:[%s10149_s11 + $0x1e80] sm:$0xff] }
 0x334   : > { %4225 = vmatpush2.msra.mxu1 %v2899_v7  ;;  %4155 = vmatprep.subr.mxu0 %v2603_v8  ;;  %v3080_v6 = vld [vmem:[%s10149_s11 + $0x1540] sm:$0xff]  ;;  %v3079_v8 = vld [vmem:[%s10149_s11 + $0x1538] sm:$0xff] }
 0x335   : > { %4226 = vmatprep.subr.mxu1 %v2891_v9  ;;  %4156 = vmatpush2.msra.mxu0 %v2602_v10  ;;  %v3368_v7 = vld [vmem:[%s10149_s11 + $0x1e40] sm:$0xff]  ;;  %v3367_v9 = vld [vmem:[%s10149_s11 + $0x1e38] sm:$0xff] }
 0x336   : > { %4227 = vmatpush2.msra.mxu1 %v2890_v12  ;;  %4157 = vmatprep.subr.mxu0 %v2594_v14  ;;  %v3071_v10 = vld [vmem:[%s10149_s11 + $0x14f8] sm:$0xff]  ;;  %v3070_v14 = vld [vmem:[%s10149_s11 + $0x14f0] sm:$0xff] }
 0x337   : > { %4228 = vmatprep.subr.mxu1 %v2882_v15  ;;  %4158 = vmatpush2.msra.mxu0 %v2593_v17  ;;  %v3359_v12 = vld [vmem:[%s10149_s11 + $0x1df8] sm:$0xff]  ;;  %v3358_v15 = vld [vmem:[%s10149_s11 + $0x1df0] sm:$0xff] }
 0x338   : > { %4229 = vmatpush2.msra.mxu1 %v2881_v18  ;;  %4159 = vmatprep.subr.mxu0 %v2585_v19  ;;  %v3062_v17 = vld [vmem:[%s10149_s11 + $0x14b0] sm:$0xff]  ;;  %v3061_v19 = vld [vmem:[%s10149_s11 + $0x14a8] sm:$0xff] }
 0x339   : > { %4230 = vmatprep.subr.mxu1 %v2873_v20  ;;  %4160 = vmatpush2.msra.mxu0 %v2584_v22  ;;  %v3350_v18 = vld [vmem:[%s10149_s11 + $0x1db0] sm:$0xff]  ;;  %v3349_v20 = vld [vmem:[%s10149_s11 + $0x1da8] sm:$0xff] }
 0x33a   : > { %4231 = vmatpush2.msra.mxu1 %v2872_v24  ;;  %4161 = vmatprep.subr.mxu0 %v2576_v26  ;;  %v3053_v22 = vld [vmem:[%s10149_s11 + $0x1468] sm:$0xff]  ;;  %v3052_v26 = vld [vmem:[%s10149_s11 + $0x1460] sm:$0xff] }
 0x33b   : > { %4232 = vmatprep.subr.mxu1 %v2864_v28  ;;  %4162 = vmatpush2.msra.mxu0 %v2575_v29  ;;  %v3341_v24 = vld [vmem:[%s10149_s11 + $0x1d68] sm:$0xff]  ;;  %v3340_v28 = vld [vmem:[%s10149_s11 + $0x1d60] sm:$0xff] }
 0x33c   : > { %4233 = vmatpush2.msra.mxu1 %v2863_v30  ;;  %4163 = vmatprep.subr.mxu0 %v2567_v32  ;;  %v3044_v29 = vld [vmem:[%s10149_s11 + $0x1420] sm:$0xff]  ;;  %v3043_v32 = vld [vmem:[%s10149_s11 + $0x1418] sm:$0xff] }
 0x33d   : > { %4234 = vmatprep.subr.mxu1 %v2855_v33  ;;  %4164 = vmatpush2.msra.mxu0 %v2566_v34  ;;  %v3332_v30 = vld [vmem:[%s10149_s11 + $0x1d20] sm:$0xff]  ;;  %v3331_v33 = vld [vmem:[%s10149_s11 + $0x1d18] sm:$0xff] }
 0x33e   : > { %4235 = vmatpush2.msra.mxu1 %v2854_v36  ;;  %4165 = vmatprep.subr.mxu0 %v2558_v38  ;;  %v3035_v34 = vld [vmem:[%s10149_s11 + $0x13d8] sm:$0xff]  ;;  %v3034_v38 = vld [vmem:[%s10149_s11 + $0x13d0] sm:$0xff] }
 0x33f   : > { %4236 = vmatprep.subr.mxu1 %v2846_v39  ;;  %4166 = vmatpush2.msra.mxu0 %v2557_v41  ;;  %v3323_v36 = vld [vmem:[%s10149_s11 + $0x1cd8] sm:$0xff]  ;;  %v3322_v39 = vld [vmem:[%s10149_s11 + $0x1cd0] sm:$0xff] }
 0x340   : > { %4237 = vmatpush2.msra.mxu1 %v2845_v42  ;;  %4167 = vmatprep.subr.mxu0 %v2549_v43  ;;  %v3026_v41 = vld [vmem:[%s10149_s11 + $0x1390] sm:$0xff]  ;;  %v3025_v43 = vld [vmem:[%s10149_s11 + $0x1388] sm:$0xff] }
 0x341   : > { %4238 = vmatprep.subr.mxu1 %v2837_v52  ;;  %4168 = vmatpush2.msra.mxu0 %v2548_v44  ;;  %v3314_v42 = vld [vmem:[%s10149_s11 + $0x1c90] sm:$0xff]  ;;  %v3313_v52 = vld [vmem:[%s10149_s11 + $0x1c88] sm:$0xff] }
 0x342   : > { %4169 = vmatprep.mubr.f32.mxu0 %v10292_v62  ;;  %4239 = vmatpush2.msra.mxu1 %v2836_v45  ;;  %v3017_v44 = vld [vmem:[%s10149_s11 + $0x1348] sm:$0xff] }
 0x343   : > { %4170 = vmatmul.mubr.f32.vlgmr.msra.gmra.mxu0 %v10298_v0  ;;  %4240 = vmatprep.mubr.f32.mxu1 %v10304_v2  ;;  %v3305_v45 = vld [vmem:[%s10149_s11 + $0x1c48] sm:$0xff] }
 0x344   : > { %4247 = vmatprep.subr.mxu0 %v3116_v46  ;;  %4318 = vmatprep.subr.mxu1 %v3404_v47  ;;  %v3016_v46 = vld [vmem:[%s10149_s11 + $0x1340] sm:$0xff] }
 0x345   : > { %4241 = vmatmul.mubr.f32.vlgmr.msra.gmra.mxu1 %v10310_v4  ;;  %4248 = vmatpush1.msra.mxu0 %v3115_v48  ;;  %v3304_v47 = vld [vmem:[%s10149_s11 + $0x1c40] sm:$0xff]  ;;  %v10882_v48 = vpop.f32.mrf.mxu0 }
 0x346   : > { %4319 = vmatpush1.msra.mxu1 %v3403_v50  ;;  %4249 = vmatprep.subr.mxu0 %v3107_v51  ;;  %v3008_v50 = vld [vmem:[%s10149_s11 + $0x1300] sm:$0xff] }
 0x347   : > { %4320 = vmatprep.subr.mxu1 %v3395_v54  ;;  %4250 = vmatpush1.msra.mxu0 %v3106_v55  ;;  %v3296_v51 = vld [vmem:[%s10149_s11 + $0x1c00] sm:$0xff]  ;;  %v3007_v54 = vld [vmem:[%s10149_s11 + $0x12f8] sm:$0xff] }
 0x348   : > { %4321 = vmatpush1.msra.mxu1 %v3394_v57  ;;  %4251 = vmatprep.subr.mxu0 %v3098_v58  ;;  %v3295_v55 = vld [vmem:[%s10149_s11 + $0x1bf8] sm:$0xff]  ;;  %v10888_v57 = vpop.f32.mrf.mxu1 }
 0x349   : > { %4322 = vmatprep.subr.mxu1 %v3386_v60  ;;  %4252 = vmatpush1.msra.mxu0 %v3097_v61  ;;  %v2999_v58 = vld [vmem:[%s10149_s11 + $0x12b8] sm:$0xff] }
 0x34a   : > { %4323 = vmatpush1.msra.mxu1 %v3385_v63  ;;  %4253 = vmatprep.subr.mxu0 %v3089_v1  ;;  %v3287_v60 = vld [vmem:[%s10149_s11 + $0x1bb8] sm:$0xff]  ;;  %v2998_v63 = vld [vmem:[%s10149_s11 + $0x12b0] sm:$0xff] }
 0x34b   : > { %4324 = vmatprep.subr.mxu1 %v3377_v3  ;;  %4254 = vmatpush1.msra.mxu0 %v3088_v53  ;;  %v3286_v1 = vld [vmem:[%s10149_s11 + $0x1bb0] sm:$0xff]  ;;  %v3816_v53 = vpop.f32.mrf.mxu1 }
 0x34c   : > { %4325 = vmatpush1.msra.mxu1 %v3376_v5  ;;  %4255 = vmatprep.subr.mxu0 %v3080_v6  ;;  %v2990_v5 = vld [vmem:[%s10149_s11 + $0x1270] sm:$0xff] }
 0x34d   : > { %4326 = vmatprep.subr.mxu1 %v3368_v7  ;;  %4256 = vmatpush1.msra.mxu0 %v3079_v8  ;;  %v3278_v6 = vld [vmem:[%s10149_s11 + $0x1b70] sm:$0xff]  ;;  %v2989_v7 = vld [vmem:[%s10149_s11 + $0x1268] sm:$0xff] }
 0x34e   : > { %4327 = vmatpush1.msra.mxu1 %v3367_v9  ;;  %4257 = vmatprep.subr.mxu0 %v3071_v10  ;;  %v3277_v8 = vld [vmem:[%s10149_s11 + $0x1b68] sm:$0xff] }
 0x34f   : > { %4328 = vmatprep.subr.mxu1 %v3359_v12  ;;  %4258 = vmatpush1.msra.mxu0 %v3070_v14  ;;  %v3269_v10 = vld [vmem:[%s10149_s11 + $0x1b28] sm:$0xff]  ;;  %v2980_v12 = vld [vmem:[%s10149_s11 + $0x1220] sm:$0xff] }
 0x350   : > { %4329 = vmatpush1.msra.mxu1 %v3358_v15  ;;  %4259 = vmatprep.subr.mxu0 %v3062_v17  ;;  %v3268_v14 = vld [vmem:[%s10149_s11 + $0x1b20] sm:$0xff]  ;;  %v3413_v17 = vld [vmem:[%s10149_s11 + $0x1fa8] sm:$0xf] }
 0x351   : > { %4330 = vmatprep.subr.mxu1 %v3350_v18  ;;  %4260 = vmatpush1.msra.mxu0 %v3061_v19  ;;  %v3260_v15 = vld [vmem:[%s10149_s11 + $0x1ae0] sm:$0xff]  ;;  %v3259_v18 = vld [vmem:[%s10149_s11 + $0x1ad8] sm:$0xff] }
 0x352   : > { %4331 = vmatpush1.msra.mxu1 %v3349_v20  ;;  %4261 = vmatprep.subr.mxu0 %v3053_v22  ;;  %v3412_v19 = vld [vmem:[%s10149_s11 + $0x1fa0] sm:$0xf]  ;;  %v3251_v20 = vld [vmem:[%s10149_s11 + $0x1a98] sm:$0xff]  ;;  %v2542_v22 = vld [vmem:[%s10149_s11 + $0x470] sm:$0xff] }
 0x353   : > { %4332 = vmatprep.subr.mxu1 %v3341_v24  ;;  %4262 = vmatpush1.msra.mxu0 %v3052_v26  ;;  %v3250_v24 = vld [vmem:[%s10149_s11 + $0x1a90] sm:$0xff] }
 0x354   : > { %4333 = vmatpush1.msra.mxu1 %v3340_v28  ;;  %4263 = vmatprep.subr.mxu0 %v3044_v29  ;;  %v3242_v26 = vld [vmem:[%s10149_s11 + $0x1a50] sm:$0xff]  ;;  %v2541_v28 = vld [vmem:[%s10149_s11 + $0x468] sm:$0xff] }
 0x355   : > { %4334 = vmatprep.subr.mxu1 %v3332_v30  ;;  %4264 = vmatpush1.msra.mxu0 %v3043_v32  ;;  %v3241_v29 = vld [vmem:[%s10149_s11 + $0x1a48] sm:$0xff] }
 0x356   : > { %4335 = vmatpush1.msra.mxu1 %v3331_v33  ;;  %4265 = vmatprep.subr.mxu0 %v3035_v34  ;;  %v2533_v30 = vld [vmem:[%s10149_s11 + $0x428] sm:$0xff]  ;;  %v2532_v33 = vld [vmem:[%s10149_s11 + $0x420] sm:$0xff] }
 0x357   : > { %4336 = vmatprep.subr.mxu1 %v3323_v36  ;;  %4266 = vmatpush1.msra.mxu0 %v3034_v38  ;;  %v3233_v32 = vld [vmem:[%s10149_s11 + $0x1a08] sm:$0xff]  ;;  %v3232_v34 = vld [vmem:[%s10149_s11 + $0x1a00] sm:$0xff] }
 0x358   : > { %4337 = vmatpush1.msra.mxu1 %v3322_v39  ;;  %4267 = vmatprep.subr.mxu0 %v3026_v41  ;;  %v2524_v36 = vld [vmem:[%s10149_s11 + $0x3e0] sm:$0xff]  ;;  %v2523_v39 = vld [vmem:[%s10149_s11 + $0x3d8] sm:$0xff] }
 0x359   : > { %4338 = vmatprep.subr.mxu1 %v3314_v42  ;;  %4268 = vmatpush1.msra.mxu0 %v3025_v43  ;;  %v3224_v38 = vld [vmem:[%s10149_s11 + $0x19c0] sm:$0xff]  ;;  %v3223_v41 = vld [vmem:[%s10149_s11 + $0x19b8] sm:$0xff] }
 0x35a   : > { %4339 = vmatpush1.msra.mxu1 %v3313_v52  ;;  %4269 = vmatprep.subr.mxu0 %v3017_v44  ;;  %v2515_v42 = vld [vmem:[%s10149_s11 + $0x398] sm:$0xff]  ;;  %v2514_v52 = vld [vmem:[%s10149_s11 + $0x390] sm:$0xff] }
 0x35b   : > { %4340 = vmatprep.subr.mxu1 %v3305_v45  ;;  %4270 = vmatpush1.msra.mxu0 %v3016_v46  ;;  %v3215_v43 = vld [vmem:[%s10149_s11 + $0x1978] sm:$0xff]  ;;  %v3214_v44 = vld [vmem:[%s10149_s11 + $0x1970] sm:$0xff] }
 0x35c   : > { %4341 = vmatpush1.msra.mxu1 %v3304_v47  ;;  %v3745_v61 = vpop.f32.mrf.mxu0  ;;  %4271 = vmatprep.subr.mxu0 %v3008_v50  ;;  %v2506_v45 = vld [vmem:[%s10149_s11 + $0x350] sm:$0xff]  ;;  %v2505_v47 = vld [vmem:[%s10149_s11 + $0x348] sm:$0xff] }
 0x35d   : > { %4342 = vmatprep.subr.mxu1 %v3296_v51  ;;  %v3746_v3 = vadd.f32 %v3745_v61, %v10758_v13  ;;  %4272 = vmatpush1.msra.mxu0 %v3007_v54  ;;  %v2981_v13 = vld [vmem:[%s10149_s11 + $0x1228] sm:$0xff]  ;;  %v3206_v46 = vld [vmem:[%s10149_s11 + $0x1930] sm:$0xff]  ;;  %v3188_v61 = vld [vmem:[%s10149_s11 + $0x18a0] sm:$0xff] }
 0x35e   : > { %4343 = vmatpush1.msra.mxu1 %v3295_v55  ;;  %4273 = vmatprep.subr.mxu0 %v2999_v58  ;;  %v3205_v50 = vld [vmem:[%s10149_s11 + $0x1928] sm:$0xff]  ;;  %v2496_v55 = vld [vmem:[%s10149_s11 + $0x300] sm:$0xff] }
 0x35f   : > { %4344 = vmatprep.subr.mxu1 %v3287_v60  ;;  %v10899_v9 = vadd.f32 %v3816_v53, %v3746_v3  ;;  %4274 = vmatpush1.msra.mxu0 %v2998_v63  ;;  %v2497_v51 = vld [vmem:[%s10149_s11 + $0x308] sm:$0xff]  ;;  %v3196_v58 = vld [vmem:[%s10149_s11 + $0x18e0] sm:$0xff]  ;;  %v2487_v63 = vld [vmem:[%s10149_s11 + $0x2b8] sm:$0xff] }
 0x360   : > { %4345 = vmatpush1.msra.mxu1 %v3286_v1  ;;  %4275 = vmatprep.subr.mxu0 %v2990_v5  ;;  %v3197_v54 = vld [vmem:[%s10149_s11 + $0x18e8] sm:$0xff]  ;;  %v2488_v60 = vld [vmem:[%s10149_s11 + $0x2c0] sm:$0xff]  ;;  %v3187_v1 = vld [vmem:[%s10149_s11 + $0x1898] sm:$0xff] }
 0x361   : > { %4346 = vmatprep.subr.mxu1 %v3278_v6  ;;  %4276 = vmatpush1.msra.mxu0 %v2989_v7  ;;  %v2479_v3 = vld [vmem:[%s10149_s11 + $0x278] sm:$0xff]  ;;  %v2478_v5 = vld [vmem:[%s10149_s11 + $0x270] sm:$0xff] }
 0x362   : > { %4347 = vmatpush1.msra.mxu1 %v3277_v8  ;;  %4277 = vmatprep.subr.mxu0 %v2981_v13  ;;  %v3179_v53 = vld [vmem:[%s10149_s11 + $0x1858] sm:$0xff]  ;;  %v3178_v6 = vld [vmem:[%s10149_s11 + $0x1850] sm:$0xff]  ;;  %v2469_v13 = vld [vmem:[%s10149_s11 + $0x228] sm:$0xff] }
 0x363   : > { %4348 = vmatprep.subr.mxu1 %v3269_v10  ;;  %4278 = vmatpush1.msra.mxu0 %v2980_v12  ;;  %v2470_v7 = vld [vmem:[%s10149_s11 + $0x230] sm:$0xff]  ;;  %v3169_v10 = vld [vmem:[%s10149_s11 + $0x1808] sm:$0xff] }
 0x364   : > { %4349 = vmatpush1.msra.mxu1 %v3268_v14  ;;  %4279 = vmatprep.subr.mxu0 %v3260_v15  ;;  %v3170_v8 = vld [vmem:[%s10149_s11 + $0x1810] sm:$0xff]  ;;  %v2461_v12 = vld [vmem:[%s10149_s11 + $0x1e8] sm:$0xff]  ;;  %v2460_v15 = vld [vmem:[%s10149_s11 + $0x1e0] sm:$0xff] }
 0x365   : > { %7812 = vmatprep.subr.msk.mxu1 %vm3509_vm0, %v3413_v17  ;;  %4280 = vmatpush2.msra.mxu0 %v3259_v18  ;;  %v3161_v14 = vld [vmem:[%s10149_s11 + $0x17c8] sm:$0xff]  ;;  %v3160_v17 = vld [vmem:[%s10149_s11 + $0x17c0] sm:$0xff] }
 0x366   : > { %7813 = vmatpush2.msk.msra.mxu1 %vm3509_vm0, %v3412_v19  ;;  %4281 = vmatprep.subr.mxu0 %v3251_v20  ;;  %v2452_v18 = vld [vmem:[%s10149_s11 + $0x1a0] sm:$0xff]  ;;  %v2451_v20 = vld [vmem:[%s10149_s11 + $0x198] sm:$0xff] }
 0x367   : > { %7814 = vmatprep.mubr.msk.f32.mxu1 %vm3506_vm1, %v10388_v21  ;;  %4389 = vmatprep.subr.mxu1 %v2542_v22  ;;  %v3152_v19 = vld [vmem:[%s10149_s11 + $0x1780] sm:$0xff]  ;;  %v3151_v22 = vld [vmem:[%s10149_s11 + $0x1778] sm:$0xff] }
 0x368   : > { %4282 = vmatpush2.msra.mxu0 %v3250_v24  ;;  %4383 = vmatmul.mubr.f32.vlgmr.msra.gmra.mxu1 %v10397_v25  ;;  %v2443_v24 = vld [vmem:[%s10149_s11 + $0x158] sm:$0xff] }
 0x369   : > { %4283 = vmatprep.subr.mxu0 %v3242_v26  ;;  %4390 = vmatpush1.msra.mxu1 %v2541_v28  ;;  %v3143_v26 = vld [vmem:[%s10149_s11 + $0x1738] sm:$0xff]  ;;  %v2442_v28 = vld [vmem:[%s10149_s11 + $0x150] sm:$0xff] }
 0x36a   : > { %4284 = vmatpush2.msra.mxu0 %v3241_v29  ;;  %4391 = vmatprep.subr.mxu1 %v2533_v30  ;;  %v3142_v29 = vld [vmem:[%s10149_s11 + $0x1730] sm:$0xff] }
 0x36b   : > { %4285 = vmatprep.subr.mxu0 %v3233_v32  ;;  %4392 = vmatpush1.msra.mxu1 %v2532_v33  ;;  %v2434_v30 = vld [vmem:[%s10149_s11 + $0x110] sm:$0xff]  ;;  %v2433_v33 = vld [vmem:[%s10149_s11 + $0x108] sm:$0xff] }
 0x36c   : > { %4286 = vmatpush2.msra.mxu0 %v3232_v34  ;;  %4393 = vmatprep.subr.mxu1 %v2524_v36  ;;  %v3134_v32 = vld [vmem:[%s10149_s11 + $0x16f0] sm:$0xff]  ;;  %v3133_v34 = vld [vmem:[%s10149_s11 + $0x16e8] sm:$0xff] }
 0x36d   : > { %4287 = vmatprep.subr.mxu0 %v3224_v38  ;;  %4394 = vmatpush1.msra.mxu1 %v2523_v39  ;;  %v2425_v36 = vld [vmem:[%s10149_s11 + $0xc8] sm:$0xff]  ;;  %v2424_v39 = vld [vmem:[%s10149_s11 + $0xc0] sm:$0xff] }
 0x36e   : > { %4288 = vmatpush2.msra.mxu0 %v3223_v41  ;;  %4395 = vmatprep.subr.mxu1 %v2515_v42  ;;  %v3125_v38 = vld [vmem:[%s10149_s11 + $0x16a8] sm:$0xff]  ;;  %v3124_v41 = vld [vmem:[%s10149_s11 + $0x16a0] sm:$0xff] }
 0x36f   : > { %4289 = vmatprep.subr.mxu0 %v3215_v43  ;;  %4396 = vmatpush1.msra.mxu1 %v2514_v52  ;;  %v2416_v42 = vld [vmem:[%s10149_s11 + $0x80] sm:$0xff]  ;;  %v2415_v43 = vld [vmem:[%s10149_s11 + $0x78] sm:$0xff] }
 0x370   : > { %4290 = vmatpush2.msra.mxu0 %v3214_v44  ;;  %4397 = vmatprep.subr.mxu1 %v2506_v45  ;;  %v2407_v52 = vld [vmem:[%s10149_s11 + $0x38] sm:$0xff]  ;;  %v2830_v44 = vld [vmem:[%s10149_s11 + $0xd70] sm:$0xff] }
 0x371   : > { %4291 = vmatprep.subr.mxu0 %v3206_v46  ;;  %4398 = vmatpush1.msra.mxu1 %v2505_v47  ;;  %v2406_v45 = vld [vmem:[%s10149_s11 + $0x30] sm:$0xff]  ;;  %v2829_v46 = vld [vmem:[%s10149_s11 + $0xd68] sm:$0xff] }
 0x372   : > { %4292 = vmatpush2.msra.mxu0 %v3205_v50  ;;  %4399 = vmatprep.subr.mxu1 %v2497_v51  ;;  %v2686_v47 = vld [vmem:[%s10149_s11 + $0x8f0] sm:$0xff]  ;;  %v2821_v50 = vld [vmem:[%s10149_s11 + $0xd28] sm:$0xff] }
 0x373   : > { %4293 = vmatprep.subr.mxu0 %v3197_v54  ;;  %4400 = vmatpush1.msra.mxu1 %v2496_v55  ;;  %v2685_v51 = vld [vmem:[%s10149_s11 + $0x8e8] sm:$0xff]  ;;  %v2820_v54 = vld [vmem:[%s10149_s11 + $0xd20] sm:$0xff] }
 0x374   : > { %4294 = vmatpush2.msra.mxu0 %v3196_v58  ;;  %4401 = vmatprep.subr.mxu1 %v2488_v60  ;;  %v2677_v55 = vld [vmem:[%s10149_s11 + $0x8a8] sm:$0xff]  ;;  %v2812_v58 = vld [vmem:[%s10149_s11 + $0xce0] sm:$0xff] }
 0x375   : > { %4295 = vmatprep.subr.mxu0 %v3188_v61  ;;  %4402 = vmatpush1.msra.mxu1 %v2487_v63  ;;  %v2676_v60 = vld [vmem:[%s10149_s11 + $0x8a0] sm:$0xff]  ;;  %v2811_v61 = vld [vmem:[%s10149_s11 + $0xcd8] sm:$0xff] }
 0x376   : > { %4296 = vmatpush2.msra.mxu0 %v3187_v1  ;;  %4403 = vmatprep.subr.mxu1 %v2479_v3  ;;  %v2668_v63 = vld [vmem:[%s10149_s11 + $0x860] sm:$0xff]  ;;  %v2803_v1 = vld [vmem:[%s10149_s11 + $0xc98] sm:$0xff] }
 0x377   : > { %4297 = vmatprep.subr.mxu0 %v3179_v53  ;;  %4404 = vmatpush1.msra.mxu1 %v2478_v5  ;;  %v2667_v3 = vld [vmem:[%s10149_s11 + $0x858] sm:$0xff]  ;;  %v2802_v53 = vld [vmem:[%s10149_s11 + $0xc90] sm:$0xff] }
 0x378   : > { %4298 = vmatpush2.msra.mxu0 %v3178_v6  ;;  %4405 = vmatprep.subr.mxu1 %v2470_v7  ;;  %v2659_v5 = vld [vmem:[%s10149_s11 + $0x818] sm:$0xff]  ;;  %v2794_v6 = vld [vmem:[%s10149_s11 + $0xc50] sm:$0xff] }
 0x379   : > { %4299 = vmatprep.subr.mxu0 %v3170_v8  ;;  %4406 = vmatpush1.msra.mxu1 %v2469_v13  ;;  %v2658_v7 = vld [vmem:[%s10149_s11 + $0x810] sm:$0xff]  ;;  %v2793_v8 = vld [vmem:[%s10149_s11 + $0xc48] sm:$0xff] }
 0x37a   : > { %4300 = vmatpush2.msra.mxu0 %v3169_v10  ;;  %4407 = vmatprep.subr.mxu1 %v2461_v12  ;;  %v2650_v13 = vld [vmem:[%s10149_s11 + $0x7d0] sm:$0xff]  ;;  %v2785_v10 = vld [vmem:[%s10149_s11 + $0xc08] sm:$0xff] }
 0x37b   : > { %4301 = vmatprep.subr.mxu0 %v3161_v14  ;;  %4408 = vmatpush1.msra.mxu1 %v2460_v15  ;;  %v2649_v12 = vld [vmem:[%s10149_s11 + $0x7c8] sm:$0xff]  ;;  %v2784_v14 = vld [vmem:[%s10149_s11 + $0xc00] sm:$0xff] }
 0x37c   : > { %4302 = vmatpush2.msra.mxu0 %v3160_v17  ;;  %4409 = vmatprep.subr.mxu1 %v2452_v18  ;;  %v2641_v15 = vld [vmem:[%s10149_s11 + $0x788] sm:$0xff]  ;;  %v2776_v17 = vld [vmem:[%s10149_s11 + $0xbc0] sm:$0xff] }
 0x37d   : > { %4303 = vmatprep.subr.mxu0 %v3152_v19  ;;  %4410 = vmatpush1.msra.mxu1 %v2451_v20  ;;  %v2640_v18 = vld [vmem:[%s10149_s11 + $0x780] sm:$0xff]  ;;  %v2775_v19 = vld [vmem:[%s10149_s11 + $0xbb8] sm:$0xff] }
 0x37e   : > { %4304 = vmatpush2.msra.mxu0 %v3151_v22  ;;  %4411 = vmatprep.subr.mxu1 %v2443_v24  ;;  %v2632_v20 = vld [vmem:[%s10149_s11 + $0x740] sm:$0xff]  ;;  %v2767_v22 = vld [vmem:[%s10149_s11 + $0xb78] sm:$0xff] }
 0x37f   : > { %4305 = vmatprep.subr.mxu0 %v3143_v26  ;;  %4412 = vmatpush1.msra.mxu1 %v2442_v28  ;;  %v2631_v24 = vld [vmem:[%s10149_s11 + $0x738] sm:$0xff]  ;;  %v2766_v26 = vld [vmem:[%s10149_s11 + $0xb70] sm:$0xff] }
 0x380   : > { %4306 = vmatpush2.msra.mxu0 %v3142_v29  ;;  %4413 = vmatprep.subr.mxu1 %v2434_v30  ;;  %v2623_v28 = vld [vmem:[%s10149_s11 + $0x6f8] sm:$0xff]  ;;  %v2758_v29 = vld [vmem:[%s10149_s11 + $0xb30] sm:$0xff] }
 0x381   : > { %4307 = vmatprep.subr.mxu0 %v3134_v32  ;;  %4414 = vmatpush1.msra.mxu1 %v2433_v33  ;;  %v2622_v30 = vld [vmem:[%s10149_s11 + $0x6f0] sm:$0xff]  ;;  %v2757_v32 = vld [vmem:[%s10149_s11 + $0xb28] sm:$0xff] }
 0x382   : > { %4308 = vmatpush2.msra.mxu0 %v3133_v34  ;;  %4415 = vmatprep.subr.mxu1 %v2425_v36  ;;  %v2614_v33 = vld [vmem:[%s10149_s11 + $0x6b0] sm:$0xff]  ;;  %v2749_v34 = vld [vmem:[%s10149_s11 + $0xae8] sm:$0xff] }
 0x383   : > { %4309 = vmatprep.subr.mxu0 %v3125_v38  ;;  %4416 = vmatpush1.msra.mxu1 %v2424_v39  ;;  %v2613_v36 = vld [vmem:[%s10149_s11 + $0x6a8] sm:$0xff]  ;;  %v2748_v38 = vld [vmem:[%s10149_s11 + $0xae0] sm:$0xff] }
 0x384   : > { %4310 = vmatpush2.msra.mxu0 %v3124_v41  ;;  %4417 = vmatprep.subr.mxu1 %v2416_v42  ;;  %v2605_v39 = vld [vmem:[%s10149_s11 + $0x668] sm:$0xff]  ;;  %v2740_v41 = vld [vmem:[%s10149_s11 + $0xaa0] sm:$0xff] }
 0x385   : > { %4311 = vmatprep.mubr.f32.mxu0 %v10463_v35  ;;  %4418 = vmatpush1.msra.mxu1 %v2415_v43  ;;  %v11019_v42 = vld [vmem:[%s10729_s18] sm:$0xff] }
 0x386   : > { %4312 = vmatmul.mubr.f32.vlgmr.msra.gmra.mxu0 %v10469_v37  ;;  %4419 = vmatprep.subr.mxu1 %v2407_v52  ;;  %v3472_v43 = vrot.slane %v11019_v42, %v3430_v59  ;;  %v2604_v52 = vld [vmem:[%s10149_s11 + $0x660] sm:$0xff]  ;;  %v2730_v59 = vld [vmem:[%s10149_s11 + $0xa50] sm:$0xff] }
 0x387   : > { %4460 = vmatprep.subr.mxu0 %v2830_v44  ;;  %4420 = vmatpush1.msra.mxu1 %v2406_v45  ;;  %v2739_v44 = vld [vmem:[%s10149_s11 + $0xa98] sm:$0xff]  ;;  %v11026_v45 = vpop.f32.mrf.mxu1 }
 0x388   : > { %4461 = vmatpush1.msra.mxu0 %v2829_v46  ;;  %4421 = vmatprep.subr.mxu1 %v2686_v47  ;;  %v2596_v46 = vld [vmem:[%s10149_s11 + $0x620] sm:$0xff]  ;;  %v2731_v47 = vld [vmem:[%s10149_s11 + $0xa58] sm:$0xff] }
 0x389   : > { %4462 = vmatprep.subr.mxu0 %v2821_v50  ;;  %4422 = vmatpush2.msra.mxu1 %v2685_v51  ;;  %v2595_v50 = vld [vmem:[%s10149_s11 + $0x618] sm:$0xff]  ;;  %v11032_v51 = vpop.f32.mrf.mxu0 }
 0x38a   : > { %4463 = vmatpush1.msra.mxu0 %v2820_v54  ;;  %4423 = vmatprep.subr.mxu1 %v2677_v55  ;;  %v3887_v54 = vpop.f32.mrf.mxu1  ;;  %v2587_v55 = vld [vmem:[%s10149_s11 + $0x5d8] sm:$0xff] }
 0x38b   : > { %4464 = vmatprep.subr.mxu0 %v2812_v58  ;;  %4424 = vmatpush2.msra.mxu1 %v2676_v60  ;;  %v2722_v58 = vld [vmem:[%s10149_s11 + $0xa10] sm:$0xff]  ;;  %v3888_v60 = vadd.f32 %v3887_v54, %v3472_v43  ;;  %v3099_v43 = vld [vmem:[%s10149_s11 + $0x15d8] sm:$0xff]  ;;  %v2928_v54 = vld [vmem:[%s10149_s11 + $0x1080] sm:$0xff] }
 0x38c   : > { %4465 = vmatpush1.msra.mxu0 %v2811_v61  ;;  %4425 = vmatprep.subr.mxu1 %v2668_v63  ;;  %v2586_v61 = vld [vmem:[%s10149_s11 + $0x5d0] sm:$0xff]  ;;  %v2721_v63 = vld [vmem:[%s10149_s11 + $0xa08] sm:$0xff] }
 0x38d   : > { %4466 = vmatprep.subr.mxu0 %v2803_v1  ;;  %4426 = vmatpush2.msra.mxu1 %v2667_v3  ;;  %v2578_v1 = vld [vmem:[%s10149_s11 + $0x590] sm:$0xff]  ;;  %v2713_v3 = vld [vmem:[%s10149_s11 + $0x9c8] sm:$0xff] }
 0x38e   : > { %4467 = vmatpush1.msra.mxu0 %v2802_v53  ;;  %4427 = vmatprep.subr.mxu1 %v2659_v5  ;;  %v2577_v5 = vld [vmem:[%s10149_s11 + $0x588] sm:$0xff] }
 0x38f   : > { %4468 = vmatprep.subr.mxu0 %v2794_v6  ;;  %4428 = vmatpush2.msra.mxu1 %v2658_v7  ;;  %v2712_v6 = vld [vmem:[%s10149_s11 + $0x9c0] sm:$0xff] }
 0x390   : > { %4469 = vmatpush1.msra.mxu0 %v2793_v8  ;;  %4429 = vmatprep.subr.mxu1 %v2650_v13  ;;  %v2569_v8 = vld [vmem:[%s10149_s11 + $0x548] sm:$0xff]  ;;  %v2704_v13 = vld [vmem:[%s10149_s11 + $0x980] sm:$0xff] }
 0x391   : > { %4470 = vmatprep.subr.mxu0 %v2785_v10  ;;  %4430 = vmatpush2.msra.mxu1 %v2649_v12  ;;  %v2568_v10 = vld [vmem:[%s10149_s11 + $0x540] sm:$0xff]  ;;  %v2703_v12 = vld [vmem:[%s10149_s11 + $0x978] sm:$0xff] }
 0x392   : > { %4471 = vmatpush1.msra.mxu0 %v2784_v14  ;;  %4431 = vmatprep.subr.mxu1 %v2641_v15  ;;  %v2560_v14 = vld [vmem:[%s10149_s11 + $0x500] sm:$0xff]  ;;  %v2695_v15 = vld [vmem:[%s10149_s11 + $0x938] sm:$0xff] }
 0x393   : > { %4472 = vmatprep.subr.mxu0 %v2776_v17  ;;  %4432 = vmatpush2.msra.mxu1 %v2640_v18  ;;  %v2559_v17 = vld [vmem:[%s10149_s11 + $0x4f8] sm:$0xff]  ;;  %v2694_v18 = vld [vmem:[%s10149_s11 + $0x930] sm:$0xff] }
 0x394   : > { %4473 = vmatpush1.msra.mxu0 %v2775_v19  ;;  %4433 = vmatprep.subr.mxu1 %v2632_v20  ;;  %v2551_v19 = vld [vmem:[%s10149_s11 + $0x4b8] sm:$0xff]  ;;  %v2974_v20 = vld [vmem:[%s10149_s11 + $0x11f0] sm:$0xff] }
 0x395   : > { %4474 = vmatprep.subr.mxu0 %v2767_v22  ;;  %4434 = vmatpush2.msra.mxu1 %v2631_v24  ;;  %v2550_v22 = vld [vmem:[%s10149_s11 + $0x4b0] sm:$0xff]  ;;  %v2973_v24 = vld [vmem:[%s10149_s11 + $0x11e8] sm:$0xff] }
 0x396   : > { %4475 = vmatpush1.msra.mxu0 %v2766_v26  ;;  %4435 = vmatprep.subr.mxu1 %v2623_v28  ;;  %v2965_v26 = vld [vmem:[%s10149_s11 + $0x11a8] sm:$0xff]  ;;  %v3118_v28 = vld [vmem:[%s10149_s11 + $0x1670] sm:$0xff] }
 0x397   : > { %4476 = vmatprep.subr.mxu0 %v2758_v29  ;;  %4436 = vmatpush2.msra.mxu1 %v2622_v30  ;;  %v2964_v29 = vld [vmem:[%s10149_s11 + $0x11a0] sm:$0xff]  ;;  %v3117_v30 = vld [vmem:[%s10149_s11 + $0x1668] sm:$0xff] }
 0x398   : > { %4477 = vmatpush1.msra.mxu0 %v2757_v32  ;;  %4437 = vmatprep.subr.mxu1 %v2614_v33  ;;  %v2956_v32 = vld [vmem:[%s10149_s11 + $0x1160] sm:$0xff]  ;;  %v3109_v33 = vld [vmem:[%s10149_s11 + $0x1628] sm:$0xff] }
 0x399   : > { %4478 = vmatprep.subr.mxu0 %v2749_v34  ;;  %4438 = vmatpush2.msra.mxu1 %v2613_v36  ;;  %v2955_v34 = vld [vmem:[%s10149_s11 + $0x1158] sm:$0xff]  ;;  %v3108_v36 = vld [vmem:[%s10149_s11 + $0x1620] sm:$0xff] }
 0x39a   : > { %4479 = vmatpush1.msra.mxu0 %v2748_v38  ;;  %4439 = vmatprep.subr.mxu1 %v2605_v39  ;;  %v2947_v38 = vld [vmem:[%s10149_s11 + $0x1118] sm:$0xff]  ;;  %v3100_v39 = vld [vmem:[%s10149_s11 + $0x15e0] sm:$0xff] }
 0x39b   : > { %4480 = vmatprep.subr.mxu0 %v2740_v41  ;;  %4440 = vmatpush2.msra.mxu1 %v2604_v52  ;;  %v2946_v41 = vld [vmem:[%s10149_s11 + $0x1110] sm:$0xff] }
 0x39c   : > { %4481 = vmatpush1.msra.mxu0 %v2739_v44  ;;  %4441 = vmatprep.subr.mxu1 %v2596_v46  ;;  %v2938_v52 = vld [vmem:[%s10149_s11 + $0x10d0] sm:$0xff]  ;;  %v3091_v44 = vld [vmem:[%s10149_s11 + $0x1598] sm:$0xff]  ;;  %v2937_v46 = vld [vmem:[%s10149_s11 + $0x10c8] sm:$0xff] }
 0x39d   : > { %4482 = vmatprep.subr.mxu0 %v2731_v47  ;;  %4442 = vmatpush2.msra.mxu1 %v2595_v50  ;;  %v3090_v47 = vld [vmem:[%s10149_s11 + $0x1590] sm:$0xff]  ;;  %v2929_v50 = vld [vmem:[%s10149_s11 + $0x1088] sm:$0xff] }
 0x39e   : > { %4483 = vmatpush1.msra.mxu0 %v2730_v59  ;;  %v3958_v53 = vpop.f32.mrf.mxu0  ;;  %4443 = vmatprep.subr.mxu1 %v2587_v55  ;;  %v3082_v59 = vld [vmem:[%s10149_s11 + $0x1550] sm:$0xff]  ;;  %v3081_v55 = vld [vmem:[%s10149_s11 + $0x1548] sm:$0xff] }
 0x39f   : > { %4484 = vmatprep.subr.mxu0 %v2722_v58  ;;  %v11042_v7 = vadd.f32 %v3958_v53, %v3888_v60  ;;  %4444 = vmatpush2.msra.mxu1 %v2586_v61  ;;  %v2920_v58 = vld [vmem:[%s10149_s11 + $0x1040] sm:$0xff]  ;;  %v3073_v60 = vld [vmem:[%s10149_s11 + $0x1508] sm:$0xff]  ;;  %v2919_v61 = vld [vmem:[%s10149_s11 + $0x1038] sm:$0xff] }
 0x3a0   : > { %4485 = vmatpush1.msra.mxu0 %v2721_v63  ;;  %4445 = vmatprep.subr.mxu1 %v2578_v1  ;;  %v3072_v63 = vld [vmem:[%s10149_s11 + $0x1500] sm:$0xff]  ;;  %v2911_v1 = vld [vmem:[%s10149_s11 + $0xff8] sm:$0xff]  ;;  %v2910_v53 = vld [vmem:[%s10149_s11 + $0xff0] sm:$0xff] }
 0x3a1   : > { %4486 = vmatprep.subr.mxu0 %v2713_v3  ;;  %4446 = vmatpush2.msra.mxu1 %v2577_v5  ;;  %v3064_v3 = vld [vmem:[%s10149_s11 + $0x14c0] sm:$0xff]  ;;  %v3063_v5 = vld [vmem:[%s10149_s11 + $0x14b8] sm:$0xff] }
 0x3a2   : > { %4487 = vmatpush1.msra.mxu0 %v2712_v6  ;;  %4447 = vmatprep.subr.mxu1 %v2569_v8  ;;  %v2902_v6 = vld [vmem:[%s10149_s11 + $0xfb0] sm:$0xff]  ;;  %v3055_v8 = vld [vmem:[%s10149_s11 + $0x1478] sm:$0xff] }
 0x3a3   : > { %4488 = vmatprep.subr.mxu0 %v2704_v13  ;;  %4448 = vmatpush2.msra.mxu1 %v2568_v10  ;;  %v2901_v13 = vld [vmem:[%s10149_s11 + $0xfa8] sm:$0xff]  ;;  %v3054_v10 = vld [vmem:[%s10149_s11 + $0x1470] sm:$0xff] }
 0x3a4   : > { %4489 = vmatpush1.msra.mxu0 %v2703_v12  ;;  %4449 = vmatprep.subr.mxu1 %v2560_v14  ;;  %v2893_v12 = vld [vmem:[%s10149_s11 + $0xf68] sm:$0xff]  ;;  %v3046_v14 = vld [vmem:[%s10149_s11 + $0x1430] sm:$0xff] }
 0x3a5   : > { %4490 = vmatprep.subr.mxu0 %v2695_v15  ;;  %4450 = vmatpush2.msra.mxu1 %v2559_v17  ;;  %v2892_v15 = vld [vmem:[%s10149_s11 + $0xf60] sm:$0xff]  ;;  %v3045_v17 = vld [vmem:[%s10149_s11 + $0x1428] sm:$0xff] }
 0x3a6   : > { %4491 = vmatpush1.msra.mxu0 %v2694_v18  ;;  %4451 = vmatprep.subr.mxu1 %v2551_v19  ;;  %v2884_v18 = vld [vmem:[%s10149_s11 + $0xf20] sm:$0xff]  ;;  %v3037_v19 = vld [vmem:[%s10149_s11 + $0x13e8] sm:$0xff] }
 0x3a7   : > { %4492 = vmatprep.subr.mxu0 %v2974_v20  ;;  %4452 = vmatpush2.msra.mxu1 %v2550_v22  ;;  %v2883_v20 = vld [vmem:[%s10149_s11 + $0xf18] sm:$0xff]  ;;  %v3036_v22 = vld [vmem:[%s10149_s11 + $0x13e0] sm:$0xff] }
 0x3a8   : > { %4493 = vmatpush2.msra.mxu0 %v2973_v24  ;;  %4453 = vmatprep.mubr.f32.mxu1 %v10292_v62  ;;  %v2875_v24 = vld [vmem:[%s10149_s11 + $0xed8] sm:$0xff] }
 0x3a9   : > { %4494 = vmatprep.subr.mxu0 %v2965_v26  ;;  %4531 = vmatprep.subr.mxu1 %v3118_v28  ;;  %v3028_v26 = vld [vmem:[%s10149_s11 + $0x13a0] sm:$0xff]  ;;  %v2874_v28 = vld [vmem:[%s10149_s11 + $0xed0] sm:$0xff] }
 0x3aa   : > { %4454 = vmatmul.mubr.f32.vlgmr.msra.gmra.mxu1 %v10298_v0  ;;  %4495 = vmatpush2.msra.mxu0 %v2964_v29  ;;  %v3027_v29 = vld [vmem:[%s10149_s11 + $0x1398] sm:$0xff] }
 0x3ab   : > { %4532 = vmatpush1.msra.mxu1 %v3117_v30  ;;  %4496 = vmatprep.subr.mxu0 %v2956_v32  ;;  %v2866_v30 = vld [vmem:[%s10149_s11 + $0xe90] sm:$0xff]  ;;  %v3019_v32 = vld [vmem:[%s10149_s11 + $0x1358] sm:$0xff] }
 0x3ac   : > { %4533 = vmatprep.subr.mxu1 %v3109_v33  ;;  %4497 = vmatpush2.msra.mxu0 %v2955_v34  ;;  %v2865_v33 = vld [vmem:[%s10149_s11 + $0xe88] sm:$0xff]  ;;  %v3018_v34 = vld [vmem:[%s10149_s11 + $0x1350] sm:$0xff] }
 0x3ad   : > { %4534 = vmatpush1.msra.mxu1 %v3108_v36  ;;  %4498 = vmatprep.subr.mxu0 %v2947_v38  ;;  %v2857_v36 = vld [vmem:[%s10149_s11 + $0xe48] sm:$0xff]  ;;  %v3010_v38 = vld [vmem:[%s10149_s11 + $0x1310] sm:$0xff] }
 0x3ae   : > { %4535 = vmatprep.subr.mxu1 %v3100_v39  ;;  %4499 = vmatpush2.msra.mxu0 %v2946_v41  ;;  %v11108_v39 = vpop.f32.mrf.mxu1  ;;  %v2856_v41 = vld [vmem:[%s10149_s11 + $0xe40] sm:$0xff] }
 0x3af   : > { %4536 = vmatpush1.msra.mxu1 %v3099_v43  ;;  %4500 = vmatprep.subr.mxu0 %v2938_v52  ;;  %v3009_v43 = vld [vmem:[%s10149_s11 + $0x1308] sm:$0xff]  ;;  %v2848_v52 = vld [vmem:[%s10149_s11 + $0xe00] sm:$0xff] }
 0x3b0   : > { %4537 = vmatprep.subr.mxu1 %v3091_v44  ;;  %4501 = vmatpush2.msra.mxu0 %v2937_v46  ;;  %v3001_v44 = vld [vmem:[%s10149_s11 + $0x12c8] sm:$0xff]  ;;  %v11114_v46 = vpop.f32.mrf.mxu0 }
 0x3b1   : > { %4538 = vmatpush1.msra.mxu1 %v3090_v47  ;;  %4502 = vmatprep.subr.mxu0 %v2929_v50  ;;  %v2847_v47 = vld [vmem:[%s10149_s11 + $0xdf8] sm:$0xff]  ;;  %v3000_v50 = vld [vmem:[%s10149_s11 + $0x12c0] sm:$0xff] }
 0x3b2   : > { %4539 = vmatprep.subr.mxu1 %v3082_v59  ;;  %4503 = vmatpush2.msra.mxu0 %v2928_v54  ;;  %v2839_v54 = vld [vmem:[%s10149_s11 + $0xdb8] sm:$0xff] }
 0x3b3   : > { %4540 = vmatpush1.msra.mxu1 %v3081_v55  ;;  %4504 = vmatprep.subr.mxu0 %v2920_v58  ;;  %v2992_v55 = vld [vmem:[%s10149_s11 + $0x1280] sm:$0xff] }
 0x3b4   : > { %4541 = vmatprep.subr.mxu1 %v3073_v60  ;;  %4505 = vmatpush2.msra.mxu0 %v2919_v61  ;;  %v2838_v60 = vld [vmem:[%s10149_s11 + $0xdb0] sm:$0xff] }
 0x3b5   : > { %4542 = vmatpush1.msra.mxu1 %v3072_v63  ;;  %4506 = vmatprep.subr.mxu0 %v2911_v1  ;;  %v2991_v63 = vld [vmem:[%s10149_s11 + $0x1278] sm:$0xff] }
 0x3b6   : > { %4543 = vmatprep.subr.mxu1 %v3064_v3  ;;  %4507 = vmatpush2.msra.mxu0 %v2910_v53  ;;  %v2983_v3 = vld [vmem:[%s10149_s11 + $0x1238] sm:$0xff]  ;;  %v3406_v53 = vld [vmem:[%s10149_s11 + $0x1f70] sm:$0xff] }
 0x3b7   : > { %4544 = vmatpush1.msra.mxu1 %v3063_v5  ;;  %4508 = vmatprep.subr.mxu0 %v2902_v6  ;;  %v3405_v5 = vld [vmem:[%s10149_s11 + $0x1f68] sm:$0xff]  ;;  %v3262_v6 = vld [vmem:[%s10149_s11 + $0x1af0] sm:$0xff] }
 0x3b8   : > { %4545 = vmatprep.subr.mxu1 %v3055_v8  ;;  %4509 = vmatpush2.msra.mxu0 %v2901_v13  ;;  %v3397_v8 = vld [vmem:[%s10149_s11 + $0x1f28] sm:$0xff] }
 0x3b9   : > { %4546 = vmatpush1.msra.mxu1 %v3054_v10  ;;  %4510 = vmatprep.subr.mxu0 %v2893_v12  ;;  %v3261_v13 = vld [vmem:[%s10149_s11 + $0x1ae8] sm:$0xff]  ;;  %v3396_v10 = vld [vmem:[%s10149_s11 + $0x1f20] sm:$0xff] }
 0x3ba   : > { %4547 = vmatprep.subr.mxu1 %v3046_v14  ;;  %4511 = vmatpush2.msra.mxu0 %v2892_v15  ;;  %v3253_v12 = vld [vmem:[%s10149_s11 + $0x1aa8] sm:$0xff]  ;;  %v3388_v14 = vld [vmem:[%s10149_s11 + $0x1ee0] sm:$0xff] }
 0x3bb   : > { %4548 = vmatpush1.msra.mxu1 %v3045_v17  ;;  %4512 = vmatprep.subr.mxu0 %v2884_v18  ;;  %v3252_v15 = vld [vmem:[%s10149_s11 + $0x1aa0] sm:$0xff]  ;;  %v3387_v17 = vld [vmem:[%s10149_s11 + $0x1ed8] sm:$0xff] }
 0x3bc   : > { %4549 = vmatprep.subr.mxu1 %v3037_v19  ;;  %4513 = vmatpush2.msra.mxu0 %v2883_v20  ;;  %v3244_v18 = vld [vmem:[%s10149_s11 + $0x1a60] sm:$0xff]  ;;  %v3379_v19 = vld [vmem:[%s10149_s11 + $0x1e98] sm:$0xff] }
 0x3bd   : > { %4550 = vmatpush1.msra.mxu1 %v3036_v22  ;;  %4514 = vmatprep.subr.mxu0 %v2875_v24  ;;  %v3243_v20 = vld [vmem:[%s10149_s11 + $0x1a58] sm:$0xff]  ;;  %v3378_v22 = vld [vmem:[%s10149_s11 + $0x1e90] sm:$0xff] }
 0x3be   : > { %4551 = vmatprep.subr.mxu1 %v3028_v26  ;;  %4515 = vmatpush2.msra.mxu0 %v2874_v28  ;;  %v3235_v24 = vld [vmem:[%s10149_s11 + $0x1a18] sm:$0xff]  ;;  %v3370_v26 = vld [vmem:[%s10149_s11 + $0x1e50] sm:$0xff] }
 0x3bf   : > { %4552 = vmatpush1.msra.mxu1 %v3027_v29  ;;  %4516 = vmatprep.subr.mxu0 %v2866_v30  ;;  %v3234_v28 = vld [vmem:[%s10149_s11 + $0x1a10] sm:$0xff]  ;;  %v3369_v29 = vld [vmem:[%s10149_s11 + $0x1e48] sm:$0xff] }
 0x3c0   : > { %4553 = vmatprep.subr.mxu1 %v3019_v32  ;;  %4517 = vmatpush2.msra.mxu0 %v2865_v33  ;;  %v3226_v30 = vld [vmem:[%s10149_s11 + $0x19d0] sm:$0xff]  ;;  %v3361_v32 = vld [vmem:[%s10149_s11 + $0x1e08] sm:$0xff] }
 0x3c1   : > { %4554 = vmatpush1.msra.mxu1 %v3018_v34  ;;  %4518 = vmatprep.subr.mxu0 %v2857_v36  ;;  %v4029_v59 = vpop.f32.mrf.mxu1  ;;  %v3225_v33 = vld [vmem:[%s10149_s11 + $0x19c8] sm:$0xff]  ;;  %v3360_v34 = vld [vmem:[%s10149_s11 + $0x1e00] sm:$0xff] }
 0x3c2   : > { %4555 = vmatprep.subr.mxu1 %v3010_v38  ;;  %4519 = vmatpush2.msra.mxu0 %v2856_v41  ;;  %v4030_v58 = vadd.f32 %v4029_v59, %v11042_v7  ;;  %v4100_v61 = vpop.f32.mrf.mxu0  ;;  %v2982_v7 = vld [vmem:[%s10149_s11 + $0x1230] sm:$0xff]  ;;  %v3217_v36 = vld [vmem:[%s10149_s11 + $0x1988] sm:$0xff]  ;;  %v3352_v38 = vld [vmem:[%s10149_s11 + $0x1dc0] sm:$0xff] }
 0x3c3   : > { %4556 = vmatpush1.msra.mxu1 %v3009_v43  ;;  %4520 = vmatprep.subr.mxu0 %v2848_v52  ;;  %v3216_v41 = vld [vmem:[%s10149_s11 + $0x1980] sm:$0xff]  ;;  %v3351_v43 = vld [vmem:[%s10149_s11 + $0x1db8] sm:$0xff] }
 0x3c4   : > { %4557 = vmatprep.subr.mxu1 %v3001_v44  ;;  %4521 = vmatpush2.msra.mxu0 %v2847_v47  ;;  %v11123_v1 = vadd.f32 %v4100_v61, %v4030_v58  ;;  %v3208_v52 = vld [vmem:[%s10149_s11 + $0x1940] sm:$0xff]  ;;  %v3343_v44 = vld [vmem:[%s10149_s11 + $0x1d78] sm:$0xff]  ;;  %v3333_v58 = vld [vmem:[%s10149_s11 + $0x1d28] sm:$0xff] }
 0x3c5   : > { %4558 = vmatpush1.msra.mxu1 %v3000_v50  ;;  %4522 = vmatprep.subr.mxu0 %v2839_v54  ;;  %v3207_v47 = vld [vmem:[%s10149_s11 + $0x1938] sm:$0xff]  ;;  %v3342_v50 = vld [vmem:[%s10149_s11 + $0x1d70] sm:$0xff]  ;;  %v3325_v61 = vld [vmem:[%s10149_s11 + $0x1ce8] sm:$0xff] }
 0x3c6   : > { %4559 = vmatprep.subr.mxu1 %v2992_v55  ;;  %4523 = vmatpush2.msra.mxu0 %v2838_v60  ;;  %v3199_v59 = vld [vmem:[%s10149_s11 + $0x18f8] sm:$0xff]  ;;  %v3334_v54 = vld [vmem:[%s10149_s11 + $0x1d30] sm:$0xff] }
 0x3c7   : > { %4524 = vmatprep.mubr.f32.mxu0 %v10304_v2  ;;  %4560 = vmatpush1.msra.mxu1 %v2991_v63  ;;  %v3198_v55 = vld [vmem:[%s10149_s11 + $0x18f0] sm:$0xff]  ;;  %v3189_v63 = vld [vmem:[%s10149_s11 + $0x18a8] sm:$0xff] }
 0x3c8   : > { %4525 = vmatmul.mubr.f32.vlgmr.msra.gmra.mxu0 %v10310_v4  ;;  %4561 = vmatprep.subr.mxu1 %v2983_v3  ;;  %v3190_v60 = vld [vmem:[%s10149_s11 + $0x18b0] sm:$0xff]  ;;  %v3324_v3 = vld [vmem:[%s10149_s11 + $0x1ce0] sm:$0xff] }
 0x3c9   : > { %4602 = vmatprep.subr.mxu0 %v3406_v53  ;;  %4562 = vmatpush1.msra.mxu1 %v2982_v7  ;;  %v3181_v53 = vld [vmem:[%s10149_s11 + $0x1868] sm:$0xff]  ;;  %v3316_v7 = vld [vmem:[%s10149_s11 + $0x1ca0] sm:$0xff] }
 0x3ca   : > { %4603 = vmatpush1.msra.mxu0 %v3405_v5  ;;  %4563 = vmatprep.subr.mxu1 %v3262_v6  ;;  %v3180_v5 = vld [vmem:[%s10149_s11 + $0x1860] sm:$0xff]  ;;  %v3315_v6 = vld [vmem:[%s10149_s11 + $0x1c98] sm:$0xff] }
 0x3cb   : > { %4604 = vmatprep.subr.mxu0 %v3397_v8  ;;  %4564 = vmatpush2.msra.mxu1 %v3261_v13  ;;  %v3172_v8 = vld [vmem:[%s10149_s11 + $0x1820] sm:$0xff]  ;;  %v3307_v13 = vld [vmem:[%s10149_s11 + $0x1c58] sm:$0xff] }
 0x3cc   : > { %4605 = vmatpush1.msra.mxu0 %v3396_v10  ;;  %4565 = vmatprep.subr.mxu1 %v3253_v12  ;;  %v3171_v10 = vld [vmem:[%s10149_s11 + $0x1818] sm:$0xff]  ;;  %v3306_v12 = vld [vmem:[%s10149_s11 + $0x1c50] sm:$0xff] }
 0x3cd   : > { %4606 = vmatprep.subr.mxu0 %v3388_v14  ;;  %4566 = vmatpush2.msra.mxu1 %v3252_v15  ;;  %v3163_v14 = vld [vmem:[%s10149_s11 + $0x17d8] sm:$0xff]  ;;  %v3298_v15 = vld [vmem:[%s10149_s11 + $0x1c10] sm:$0xff] }
 0x3ce   : > { %4607 = vmatpush1.msra.mxu0 %v3387_v17  ;;  %4567 = vmatprep.subr.mxu1 %v3244_v18  ;;  %v3162_v17 = vld [vmem:[%s10149_s11 + $0x17d0] sm:$0xff]  ;;  %v3297_v18 = vld [vmem:[%s10149_s11 + $0x1c08] sm:$0xff] }
 0x3cf   : > { %4608 = vmatprep.subr.mxu0 %v3379_v19  ;;  %4568 = vmatpush2.msra.mxu1 %v3243_v20  ;;  %v3154_v19 = vld [vmem:[%s10149_s11 + $0x1790] sm:$0xff]  ;;  %v3289_v20 = vld [vmem:[%s10149_s11 + $0x1bc8] sm:$0xff] }
 0x3d0   : > { %4609 = vmatpush1.msra.mxu0 %v3378_v22  ;;  %4569 = vmatprep.subr.mxu1 %v3235_v24  ;;  %v3153_v22 = vld [vmem:[%s10149_s11 + $0x1788] sm:$0xff]  ;;  %v3288_v24 = vld [vmem:[%s10149_s11 + $0x1bc0] sm:$0xff] }
 0x3d1   : > { %4610 = vmatprep.subr.mxu0 %v3370_v26  ;;  %4570 = vmatpush2.msra.mxu1 %v3234_v28  ;;  %v3145_v26 = vld [vmem:[%s10149_s11 + $0x1748] sm:$0xff]  ;;  %v3280_v28 = vld [vmem:[%s10149_s11 + $0x1b80] sm:$0xff] }
 0x3d2   : > { %4611 = vmatpush1.msra.mxu0 %v3369_v29  ;;  %4571 = vmatprep.subr.mxu1 %v3226_v30  ;;  %v3144_v29 = vld [vmem:[%s10149_s11 + $0x1740] sm:$0xff]  ;;  %v3279_v30 = vld [vmem:[%s10149_s11 + $0x1b78] sm:$0xff] }
 0x3d3   : > { %4612 = vmatprep.subr.mxu0 %v3361_v32  ;;  %4572 = vmatpush2.msra.mxu1 %v3225_v33  ;;  %v3136_v32 = vld [vmem:[%s10149_s11 + $0x1700] sm:$0xff]  ;;  %v3271_v33 = vld [vmem:[%s10149_s11 + $0x1b38] sm:$0xff] }
 0x3d4   : > { %4613 = vmatpush1.msra.mxu0 %v3360_v34  ;;  %4573 = vmatprep.subr.mxu1 %v3217_v36  ;;  %v3135_v34 = vld [vmem:[%s10149_s11 + $0x16f8] sm:$0xff]  ;;  %v3270_v36 = vld [vmem:[%s10149_s11 + $0x1b30] sm:$0xff] }
 0x3d5   : > { %4614 = vmatprep.subr.mxu0 %v3352_v38  ;;  %4574 = vmatpush2.msra.mxu1 %v3216_v41  ;;  %v3127_v38 = vld [vmem:[%s10149_s11 + $0x16b8] sm:$0xff] }
 0x3d6   : > { %4615 = vmatpush1.msra.mxu0 %v3351_v43  ;;  %4575 = vmatprep.subr.mxu1 %v3208_v52  ;;  %v3415_v41 = vld [vmem:[%s10149_s11 + $0x1fb8] sm:$0xf]  ;;  %v3126_v43 = vld [vmem:[%s10149_s11 + $0x16b0] sm:$0xff] }
 0x3d7   : > { %4616 = vmatprep.subr.mxu0 %v3343_v44  ;;  %4576 = vmatpush2.msra.mxu1 %v3207_v47  ;;  %v3414_v52 = vld [vmem:[%s10149_s11 + $0x1fb0] sm:$0xf]  ;;  %v2687_v44 = vld [vmem:[%s10149_s11 + $0x8f8] sm:$0xff] }
 0x3d8   : > { %4617 = vmatpush1.msra.mxu0 %v3342_v50  ;;  %4577 = vmatprep.subr.mxu1 %v3199_v59  ;;  %v2975_v47 = vld [vmem:[%s10149_s11 + $0x11f8] sm:$0xff] }
 0x3d9   : > { %4618 = vmatprep.subr.mxu0 %v3334_v54  ;;  %4578 = vmatpush2.msra.mxu1 %v3198_v55  ;;  %v2543_v50 = vld [vmem:[%s10149_s11 + $0x478] sm:$0xff]  ;;  %v2678_v54 = vld [vmem:[%s10149_s11 + $0x8b0] sm:$0xff] }
 0x3da   : > { %4619 = vmatpush1.msra.mxu0 %v3333_v58  ;;  %4579 = vmatprep.subr.mxu1 %v3190_v60  ;;  %v2831_v59 = vld [vmem:[%s10149_s11 + $0xd78] sm:$0xff]  ;;  %v2966_v55 = vld [vmem:[%s10149_s11 + $0x11b0] sm:$0xff] }
 0x3db   : > { %4620 = vmatprep.subr.mxu0 %v3325_v61  ;;  %4580 = vmatpush2.msra.mxu1 %v3189_v63  ;;  %v2534_v58 = vld [vmem:[%s10149_s11 + $0x430] sm:$0xff]  ;;  %v2669_v61 = vld [vmem:[%s10149_s11 + $0x868] sm:$0xff] }
 0x3dc   : > { %4621 = vmatpush1.msra.mxu0 %v3324_v3  ;;  %4581 = vmatprep.subr.mxu1 %v3181_v53  ;;  %v2822_v60 = vld [vmem:[%s10149_s11 + $0xd30] sm:$0xff]  ;;  %v2957_v63 = vld [vmem:[%s10149_s11 + $0x1168] sm:$0xff] }
 0x3dd   : > { %4622 = vmatprep.subr.mxu0 %v3316_v7  ;;  %4582 = vmatpush2.msra.mxu1 %v3180_v5  ;;  %v2525_v3 = vld [vmem:[%s10149_s11 + $0x3e8] sm:$0xff]  ;;  %v2660_v7 = vld [vmem:[%s10149_s11 + $0x820] sm:$0xff] }
 0x3de   : > { %4623 = vmatpush1.msra.mxu0 %v3315_v6  ;;  %4583 = vmatprep.subr.mxu1 %v3172_v8  ;;  %v2813_v53 = vld [vmem:[%s10149_s11 + $0xce8] sm:$0xff]  ;;  %v2948_v5 = vld [vmem:[%s10149_s11 + $0x1120] sm:$0xff] }
 0x3df   : > { %4624 = vmatprep.subr.mxu0 %v3307_v13  ;;  %4584 = vmatpush2.msra.mxu1 %v3171_v10  ;;  %v2516_v6 = vld [vmem:[%s10149_s11 + $0x3a0] sm:$0xff]  ;;  %v2651_v13 = vld [vmem:[%s10149_s11 + $0x7d8] sm:$0xff] }
 0x3e0   : > { %4625 = vmatpush1.msra.mxu0 %v3306_v12  ;;  %4585 = vmatprep.subr.mxu1 %v3163_v14  ;;  %v2804_v8 = vld [vmem:[%s10149_s11 + $0xca0] sm:$0xff]  ;;  %v2939_v10 = vld [vmem:[%s10149_s11 + $0x10d8] sm:$0xff] }
 0x3e1   : > { %4626 = vmatprep.subr.mxu0 %v3298_v15  ;;  %4586 = vmatpush2.msra.mxu1 %v3162_v17  ;;  %v2507_v12 = vld [vmem:[%s10149_s11 + $0x358] sm:$0xff]  ;;  %v2642_v15 = vld [vmem:[%s10149_s11 + $0x790] sm:$0xff] }
 0x3e2   : > { %4627 = vmatpush1.msra.mxu0 %v3297_v18  ;;  %4587 = vmatprep.subr.mxu1 %v3154_v19  ;;  %v2795_v14 = vld [vmem:[%s10149_s11 + $0xc58] sm:$0xff]  ;;  %v2930_v17 = vld [vmem:[%s10149_s11 + $0x1090] sm:$0xff] }
 0x3e3   : > { %4628 = vmatprep.subr.mxu0 %v3289_v20  ;;  %4588 = vmatpush2.msra.mxu1 %v3153_v22  ;;  %v2498_v18 = vld [vmem:[%s10149_s11 + $0x310] sm:$0xff]  ;;  %v3468_v20 = vrot.slane %v11019_v42, %v3426_v49  ;;  %v2633_v22 = vld [vmem:[%s10149_s11 + $0x748] sm:$0xff]  ;;  %v2480_v49 = vld [vmem:[%s10149_s11 + $0x280] sm:$0xff] }
 0x3e4   : > { %4629 = vmatpush1.msra.mxu0 %v3288_v24  ;;  %4589 = vmatprep.subr.mxu1 %v3145_v26  ;;  %v2786_v19 = vld [vmem:[%s10149_s11 + $0xc10] sm:$0xff]  ;;  %v2921_v24 = vld [vmem:[%s10149_s11 + $0x1048] sm:$0xff] }
 0x3e5   : > { %4630 = vmatprep.subr.mxu0 %v3280_v28  ;;  %4590 = vmatpush2.msra.mxu1 %v3144_v29  ;;  %v2489_v26 = vld [vmem:[%s10149_s11 + $0x2c8] sm:$0xff]  ;;  %v2624_v29 = vld [vmem:[%s10149_s11 + $0x700] sm:$0xff] }
 0x3e6   : > { %4631 = vmatpush1.msra.mxu0 %v3279_v30  ;;  %4591 = vmatprep.subr.mxu1 %v3136_v32  ;;  %v2777_v28 = vld [vmem:[%s10149_s11 + $0xbc8] sm:$0xff]  ;;  %v2912_v30 = vld [vmem:[%s10149_s11 + $0x1000] sm:$0xff] }
 0x3e7   : > { %4632 = vmatprep.subr.mxu0 %v3271_v33  ;;  %4592 = vmatpush2.msra.mxu1 %v3135_v34  ;;  %v2768_v32 = vld [vmem:[%s10149_s11 + $0xb80] sm:$0xff]  ;;  %v3606_v33 = vadd.f32 %v10882_v48, %v3468_v20  ;;  %v2615_v34 = vld [vmem:[%s10149_s11 + $0x6b8] sm:$0xff]  ;;  %v2606_v48 = vld [vmem:[%s10149_s11 + $0x670] sm:$0xff] }
 0x3e8   : > { %4633 = vmatpush1.msra.mxu0 %v3270_v36  ;;  %4593 = vmatprep.subr.mxu1 %v3127_v38  ;;  %v2903_v36 = vld [vmem:[%s10149_s11 + $0xfb8] sm:$0xff]  ;;  %v3476_v38 = vrot.slane %v11019_v42, %v3434_v56 }
 0x3e9   : > { %7815 = vmatprep.subr.msk.mxu0 %vm3509_vm0, %v3415_v41  ;;  %4594 = vmatpush2.msra.mxu1 %v3126_v43  ;;  %v2471_v41 = vld [vmem:[%s10149_s11 + $0x238] sm:$0xff]  ;;  %v3677_v56 = vadd.f32 %v10888_v57, %v3606_v33  ;;  %v2588_v57 = vld [vmem:[%s10149_s11 + $0x5e0] sm:$0xff] }
 0x3ea   : > { %4595 = vmatprep.mubr.f32.mxu1 %v10463_v35  ;;  %7816 = vmatpush2.msk.msra.mxu0 %vm3509_vm0, %v3414_v52  ;;  %v2759_v43 = vld [vmem:[%s10149_s11 + $0xb38] sm:$0xff]  ;;  %v2894_v52 = vld [vmem:[%s10149_s11 + $0xf70] sm:$0xff] }
 0x3eb   : > { %7817 = vmatprep.mubr.msk.f32.mxu0 %vm3506_vm1, %v10388_v21  ;;  %4596 = vmatmul.mubr.f32.vlgmr.msra.gmra.mxu1 %v10469_v37 }
 0x3ec   : > { %4667 = vmatmul.mubr.f32.vlgmr.msra.gmra.mxu0 %v10397_v25  ;;  %7824 = vmatprep.subr.mxu0 %v2687_v44  ;;  %v2462_v44 = vld [vmem:[%s10149_s11 + $0x1f0] sm:$0xff] }
 0x3ed   : > { %7859 = vmatprep.subr.mxu1 %v2975_v47  ;;  %7825 = vmatpush3.msra.mxu0 %v2543_v50  ;;  %v2750_v47 = vld [vmem:[%s10149_s11 + $0xaf0] sm:$0xff]  ;;  %v2597_v50 = vld [vmem:[%s10149_s11 + $0x628] sm:$0xff] }
 0x3ee   : > { %7860 = vmatpush3.msra.mxu1 %v2831_v59  ;;  %7826 = vmatprep.subr.mxu0 %v2678_v54  ;;  %v2885_v59 = vld [vmem:[%s10149_s11 + $0xf28] sm:$0xff]  ;;  %v3890_v54 = vadd.f32 %v11108_v39, %v3476_v38  ;;  %v3480_v39 = vrot.slane %v11019_v42, %v3438_v27  ;;  %v2723_v27 = vld [vmem:[%s10149_s11 + $0xa18] sm:$0xff] }
 0x3ef   : > { %7861 = vmatprep.subr.mxu1 %v2966_v55  ;;  %7827 = vmatpush3.msra.mxu0 %v2534_v58  ;;  %v2453_v55 = vld [vmem:[%s10149_s11 + $0x1a8] sm:$0xff]  ;;  %v3119_v38 = vld [vmem:[%s10149_s11 + $0x1678] sm:$0xff] }
 0x3f0   : > { %7862 = vmatpush3.msra.mxu1 %v2822_v60  ;;  %7828 = vmatprep.subr.mxu0 %v2669_v61  ;;  %v2741_v58 = vld [vmem:[%s10149_s11 + $0xaa8] sm:$0xff]  ;;  %v3748_v60 = vadd.f32 %v11032_v51, %v3677_v56  ;;  %v4031_v61 = vpop.f32.mrf.mxu1  ;;  %v2732_v51 = vld [vmem:[%s10149_s11 + $0xa60] sm:$0xff] }
 0x3f1   : > { %7863 = vmatprep.subr.mxu1 %v2957_v63  ;;  %7829 = vmatpush3.msra.mxu0 %v2525_v3  ;;  %v2876_v63 = vld [vmem:[%s10149_s11 + $0xee0] sm:$0xff]  ;;  %v3961_v3 = vadd.f32 %v11114_v46, %v3890_v54  ;;  %v3389_v56 = vld [vmem:[%s10149_s11 + $0x1ee8] sm:$0xff] }
 0x3f2   : > { %7864 = vmatpush3.msra.mxu1 %v2813_v53  ;;  %7830 = vmatprep.subr.mxu0 %v2660_v7  ;;  %v4102_v53 = vpop.f32.mrf.mxu0  ;;  %v2444_v7 = vld [vmem:[%s10149_s11 + $0x160] sm:$0xff]  ;;  %v11269_v46 = vadd.f32 %v11026_v45, %v3748_v60  ;;  %v2849_v45 = vld [vmem:[%s10149_s11 + $0xe08] sm:$0xff]  ;;  %v3083_v60 = vld [vmem:[%s10149_s11 + $0x1558] sm:$0xff] }
 0x3f3   : > { %7865 = vmatprep.subr.mxu1 %v2948_v5  ;;  %7831 = vmatpush3.msra.mxu0 %v2516_v6  ;;  %v2579_v5 = vld [vmem:[%s10149_s11 + $0x598] sm:$0xff]  ;;  %v3380_v54 = vld [vmem:[%s10149_s11 + $0x1ea0] sm:$0xff] }
 0x3f4   : > { %7866 = vmatpush3.msra.mxu1 %v2804_v8  ;;  %7832 = vmatprep.subr.mxu0 %v2651_v13  ;;  %v2867_v6 = vld [vmem:[%s10149_s11 + $0xe98] sm:$0xff]  ;;  %v4032_v8 = vadd.f32 %v4031_v61, %v3961_v3  ;;  %v3362_v3 = vld [vmem:[%s10149_s11 + $0x1e10] sm:$0xff] }
 0x3f5   : > { %7867 = vmatprep.subr.mxu1 %v2939_v10  ;;  %7833 = vmatpush3.msra.mxu0 %v2507_v12  ;;  %v2435_v13 = vld [vmem:[%s10149_s11 + $0x118] sm:$0xff]  ;;  %v2570_v10 = vld [vmem:[%s10149_s11 + $0x550] sm:$0xff] }
 0x3f6   : > { %7868 = vmatpush3.msra.mxu1 %v2795_v14  ;;  %7834 = vmatprep.subr.mxu0 %v2642_v15  ;;  %v2858_v12 = vld [vmem:[%s10149_s11 + $0xe50] sm:$0xff]  ;;  %v3371_v61 = vld [vmem:[%s10149_s11 + $0x1e58] sm:$0xff] }
 0x3f7   : > { %7869 = vmatprep.subr.mxu1 %v2930_v17  ;;  %7835 = vmatpush3.msra.mxu0 %v2498_v18  ;;  %v2426_v15 = vld [vmem:[%s10149_s11 + $0xd0] sm:$0xff] }
 0x3f8   : > { %7870 = vmatpush3.msra.mxu1 %v2786_v19  ;;  %7836 = vmatprep.subr.mxu0 %v2633_v22  ;;  %v2714_v17 = vld [vmem:[%s10149_s11 + $0x9d0] sm:$0xff]  ;;  %v2561_v19 = vld [vmem:[%s10149_s11 + $0x508] sm:$0xff]  ;;  %v11279_v22 = vadd.f32 %v4102_v53, %v4032_v8 }
 0x3f9   : > { %7871 = vmatprep.subr.mxu1 %v2921_v24  ;;  %7837 = vmatpush3.msra.mxu0 %v2489_v26  ;;  %v2417_v24 = vld [vmem:[%s10149_s11 + $0x88] sm:$0xff] }
 0x3fa   : > { %7872 = vmatpush3.msra.mxu1 %v2777_v28  ;;  %7838 = vmatprep.subr.mxu0 %v2624_v29  ;;  %v2705_v26 = vld [vmem:[%s10149_s11 + $0x988] sm:$0xff]  ;;  %v4963_v28 = vmul.f32 %v11269_v46, %v11269_v46  ;;  %v2552_v29 = vld [vmem:[%s10149_s11 + $0x4c0] sm:$0xff]  ;;  %v4965_v33 = vmul.f32 %v11279_v22, %v11279_v22 }
 0x3fb   : > { %7873 = vmatprep.subr.mxu1 %v2912_v30  ;;  %7839 = vmatpush3.msra.mxu0 %v2480_v49  ;;  %v2840_v30 = vld [vmem:[%s10149_s11 + $0xdc0] sm:$0xff] }
 0x3fc   : > { %7874 = vmatpush3.msra.mxu1 %v2768_v32  ;;  %7840 = vmatprep.subr.mxu0 %v2615_v34  ;;  %v2408_v49 = vld [vmem:[%s10149_s11 + $0x40] sm:$0xff]  ;;  %v3263_v34 = vld [vmem:[%s10149_s11 + $0x1af8] sm:$0xff] }
 0x3fd   : > { %7875 = vmatprep.subr.mxu1 %v2903_v36  ;;  %7841 = vmatpush3.msra.mxu0 %v2471_v41  ;;  %v2696_v32 = vld [vmem:[%s10149_s11 + $0x940] sm:$0xff]  ;;  %v4972_v36 = vmul.f32 %v4963_v28, %v11269_v46  ;;  %v3407_v41 = vld [vmem:[%s10149_s11 + $0x1f78] sm:$0xff] }
 0x3fe   : > { %7876 = vmatpush3.msra.mxu1 %v2759_v43  ;;  %7842 = vmatprep.subr.mxu0 %v2606_v48  ;;  %v3254_v43 = vld [vmem:[%s10149_s11 + $0x1ab0] sm:$0xff]  ;;  %v4974_v48 = vmul.f32 %v4965_v33, %v11279_v22  ;;  %v3308_v28 = vld [vmem:[%s10149_s11 + $0x1c60] sm:$0xff] }
 0x3ff   : > { %7877 = vmatprep.subr.mxu1 %v2894_v52  ;;  %7843 = vmatpush3.msra.mxu0 %v2462_v44  ;;  %v8033_v52 = vmov 0.0   ;;  %v3398_v44 = vld [vmem:[%s10149_s11 + $0x1f30] sm:$0xff] }
 0x400   : > { %7878 = vmatpush3.msra.mxu1 %v2750_v47  ;;  %7844 = vmatprep.subr.mxu0 %v2597_v50  ;;  %v3245_v47 = vld [vmem:[%s10149_s11 + $0x1a68] sm:$0xff]  ;;  %v3236_v50 = vld [vmem:[%s10149_s11 + $0x1a20] sm:$0xff]  ;;  %v3002_v33 = vld [vmem:[%s10149_s11 + $0x12d0] sm:$0xff] }
 0x401   : > { %7879 = vmatprep.subr.mxu1 %v2885_v59  ;;  %7845 = vmatpush3.msra.mxu0 %v2453_v55  ;;  %v3092_v59 = vld [vmem:[%s10149_s11 + $0x15a0] sm:$0xff] }
 0x402   : > { %7880 = vmatpush3.msra.mxu1 %v2741_v58  ;;  %7846 = vmatprep.subr.mxu0 %v2588_v57  ;;  %v3227_v58 = vld [vmem:[%s10149_s11 + $0x19d8] sm:$0xff]  ;;  %v3218_v57 = vld [vmem:[%s10149_s11 + $0x1990] sm:$0xff] }
 0x403   : > { %7881 = vmatprep.subr.mxu1 %v2876_v63  ;;  %v4171_v42 = vpop.f32.mrf.mxu0  ;;  %7847 = vmatpush3.msra.mxu0 %v2444_v7  ;;  %v3209_v7 = vld [vmem:[%s10149_s11 + $0x1948] sm:$0xff] }
 0x404   : > { %7882 = vmatpush3.msra.mxu1 %v2732_v51  ;;  %v4172_v14 = vadd.f32 %v4171_v42, %v3480_v39  ;;  %7848 = vmatprep.subr.mxu0 %v2579_v5  ;;  %v3074_v39 = vld [vmem:[%s10149_s11 + $0x1510] sm:$0xff]  ;;  %v3065_v51 = vld [vmem:[%s10149_s11 + $0x14c8] sm:$0xff]  ;;  %v3191_v42 = vld [vmem:[%s10149_s11 + $0x18b8] sm:$0xff] }
 0x405   : > { %7883 = vmatprep.subr.mxu1 %v2867_v6  ;;  %v4242_v18 = vpop.f32.mrf.mxu1  ;;  %7849 = vmatpush3.msra.mxu0 %v2435_v13  ;;  %v3353_v5 = vld [vmem:[%s10149_s11 + $0x1dc8] sm:$0xff]  ;;  %v3200_v6 = vld [vmem:[%s10149_s11 + $0x1900] sm:$0xff] }
 0x406   : > { %7884 = vmatpush3.msra.mxu1 %v2723_v27  ;;  %v11277_v20 = vadd.f32 %v4242_v18, %v4172_v14  ;;  %7850 = vmatprep.subr.mxu0 %v2570_v10  ;;  %v3056_v13 = vld [vmem:[%s10149_s11 + $0x1480] sm:$0xff]  ;;  %v3047_v10 = vld [vmem:[%s10149_s11 + $0x1438] sm:$0xff]  ;;  %v3182_v14 = vld [vmem:[%s10149_s11 + $0x1870] sm:$0xff] }
 0x407   : > { %7885 = vmatprep.subr.mxu1 %v2858_v12  ;;  %7851 = vmatpush3.msra.mxu0 %v2426_v15  ;;  %v3344_v27 = vld [vmem:[%s10149_s11 + $0x1d80] sm:$0xff]  ;;  %v3335_v12 = vld [vmem:[%s10149_s11 + $0x1d38] sm:$0xff]  ;;  %v3038_v15 = vld [vmem:[%s10149_s11 + $0x13f0] sm:$0xff] }
 0x408   : > { %7886 = vmatpush3.msra.mxu1 %v2714_v17  ;;  %7852 = vmatprep.subr.mxu0 %v2561_v19  ;;  %v3326_v17 = vld [vmem:[%s10149_s11 + $0x1cf0] sm:$0xff]  ;;  %v3173_v18 = vld [vmem:[%s10149_s11 + $0x1828] sm:$0xff] }
 0x409   : > { %7887 = vmatprep.subr.mxu1 %v2849_v45  ;;  %7853 = vmatpush3.msra.mxu0 %v2417_v24  ;;  %v3029_v19 = vld [vmem:[%s10149_s11 + $0x13a8] sm:$0xff]  ;;  %v3164_v24 = vld [vmem:[%s10149_s11 + $0x17e0] sm:$0xff] }
 0x40a   : > { %7888 = vmatpush3.msra.mxu1 %v2705_v26  ;;  %7854 = vmatprep.subr.mxu0 %v2552_v29  ;;  %v3317_v45 = vld [vmem:[%s10149_s11 + $0x1ca8] sm:$0xff]  ;;  %v3020_v26 = vld [vmem:[%s10149_s11 + $0x1360] sm:$0xff]  ;;  %v3155_v29 = vld [vmem:[%s10149_s11 + $0x1798] sm:$0xff] }
 0x40b   : > { %7889 = vmatprep.subr.mxu1 %v2840_v30  ;;  %7855 = vmatpush3.msra.mxu0 %v2408_v49  ;;  %v3011_v30 = vld [vmem:[%s10149_s11 + $0x1318] sm:$0xff] }
 0x40c   : > { %4737 = vmatprep.mubr.f32.mxu0 %v10292_v62  ;;  %7890 = vmatpush3.msra.mxu1 %v2696_v32  ;;  %v3110_v62 = vld [vmem:[%s10149_s11 + $0x1630] sm:$0xff]  ;;  %v3299_v49 = vld [vmem:[%s10149_s11 + $0x1c18] sm:$0xff] }
 0x40d   : > { %4738 = vmatmul.mubr.f32.vlgmr.msra.gmra.mxu0 %v10298_v0  ;;  %4807 = vmatprep.mubr.f32.mxu1 %v10304_v2  ;;  %v4981_v0 = vmul.f32 0.044715, %v4972_v36  ;;  %v3101_v2 = vld [vmem:[%s10149_s11 + $0x15e8] sm:$0xff]  ;;  %v3146_v32 = vld [vmem:[%s10149_s11 + $0x1750] sm:$0xff] }
 0x40e   : > { %7894 = vmatprep.subr.mxu0 %v3263_v34  ;;  %4883 = vmatprep.subr.mxu1 %v8033_v52  ;;  %v3290_v34 = vld [vmem:[%s10149_s11 + $0x1bd0] sm:$0xff]  ;;  %v3137_v36 = vld [vmem:[%s10149_s11 + $0x1708] sm:$0xff] }
 0x40f   : > { %4808 = vmatmul.mubr.f32.vlgmr.msra.gmra.mxu1 %v10310_v4  ;;  %7895 = vmatpush3.msra.mxu0 %v3119_v38  ;;  %v4983_v4 = vmul.f32 0.044715, %v4974_v48  ;;  %v4990_v55 = vadd.f32 %v4981_v0, %v11269_v46  ;;  %v3128_v48 = vld [vmem:[%s10149_s11 + $0x16c0] sm:$0xff] }
 0x410   : > { %4884 = vmatpush1.msra.mxu1 %v3407_v41  ;;  %7896 = vmatprep.subr.mxu0 %v3254_v43  ;;  %v2993_v41 = vld [vmem:[%s10149_s11 + $0x1288] sm:$0xff]  ;;  %v3272_v0 = vld [vmem:[%s10149_s11 + $0x1b40] sm:$0xff] }
 0x411   : > { %4885 = vmatprep.subr.mxu1 %v8033_v52  ;;  %7897 = vmatpush3.msra.mxu0 %v3110_v62  ;;  %v4992_v63 = vadd.f32 %v4983_v4, %v11279_v22  ;;  %v4999_v53 = vmul.f32 0.7978846, %v4990_v55  ;;  %v3281_v43 = vld [vmem:[%s10149_s11 + $0x1b88] sm:$0xff]  ;;  %v2984_v62 = vld [vmem:[%s10149_s11 + $0x1240] sm:$0xff] }
 0x412   : > { %4886 = vmatpush1.msra.mxu1 %v3398_v44  ;;  %7898 = vmatprep.subr.mxu0 %v3245_v47  ;;  %v5155_v4 = vld [vmem:[%s11373_s30 + $0x3c0] sm:$0xff]  ;;  %v5148_v55 = vld [vmem:[%s11373_s30 + $0x388] sm:$0xff] }
 0x413   : > { %4887 = vmatprep.subr.mxu1 %v8033_v52  ;;  %7899 = vmatpush3.msra.mxu0 %v3101_v2  ;;  %v5001_v8 = vmul.f32 0.7978846, %v4992_v63  ;;  %7973 = vtanh.f32 %v4999_v53  ;;  %v5156_v2 = vld [vmem:[%s11373_s30 + $0x3c8] sm:$0xff] }
 0x414   : > { %4888 = vmatpush1.msra.mxu1 %v3389_v56  ;;  %7900 = vmatprep.subr.mxu0 %v3236_v50  ;;  %v3416_v56 = vld [vmem:[%s10149_s11 + $0x1fc0] sm:$0xf]  ;;  %v4954_v50 = vmul.f32 0.5, %v11269_v46 }
 0x415   : > { %4889 = vmatprep.subr.mxu1 %v8033_v52  ;;  %7901 = vmatpush3.msra.mxu0 %v3092_v59  ;;  %7975 = vtanh.f32 %v5001_v8  ;;  %v5147_v46 = vld [vmem:[%s11373_s30 + $0x380] sm:$0xff]  ;;  %v5132_v63 = vld [vmem:[%s11373_s30 + $0x308] sm:$0xff] }
 0x416   : > { %4890 = vmatpush1.msra.mxu1 %v3380_v54  ;;  %7902 = vmatprep.subr.mxu0 %v3227_v58  ;;  %v5411_v58 = vld [vmem:[%s11373_s30 + $0xbc0] sm:$0xff]  ;;  %v5124_v53 = vld [vmem:[%s11373_s30 + $0x2c8] sm:$0xff] }
 0x417   : > { %4891 = vmatprep.subr.mxu1 %v8033_v52  ;;  %7903 = vmatpush3.msra.mxu0 %v3083_v60  ;;  %v5140_v60 = vld [vmem:[%s11373_s30 + $0x348] sm:$0xff] }
 0x418   : > { %4892 = vmatpush1.msra.mxu1 %v3371_v61  ;;  %7904 = vmatprep.subr.mxu0 %v3218_v57  ;;  %v5404_v61 = vld [vmem:[%s11373_s30 + $0xb88] sm:$0xff]  ;;  %v5403_v57 = vld [vmem:[%s11373_s30 + $0xb80] sm:$0xff] }
 0x419   : > { %4893 = vmatprep.subr.mxu1 %v8033_v52  ;;  %7905 = vmatpush3.msra.mxu0 %v3074_v39  ;;  %v5131_v39 = vld [vmem:[%s11373_s30 + $0x300] sm:$0xff]  ;;  %v5380_v8 = vld [vmem:[%s11373_s30 + $0xac8] sm:$0xff] }
 0x41a   : > { %4894 = vmatpush1.msra.mxu1 %v3362_v3  ;;  %7906 = vmatprep.subr.mxu0 %v3209_v7  ;;  %v5395_v3 = vld [vmem:[%s11373_s30 + $0xb40] sm:$0xff]  ;;  %v5388_v7 = vld [vmem:[%s11373_s30 + $0xb08] sm:$0xff] }
 0x41b   : > { %4895 = vmatprep.subr.mxu1 %v8033_v52  ;;  %7907 = vmatpush3.msra.mxu0 %v3065_v51  ;;  %v5123_v51 = vld [vmem:[%s11373_s30 + $0x2c0] sm:$0xff] }
 0x41c   : > { %4896 = vmatpush1.msra.mxu1 %v3353_v5  ;;  %7908 = vmatprep.subr.mxu0 %v3200_v6  ;;  %v5387_v5 = vld [vmem:[%s11373_s30 + $0xb00] sm:$0xff]  ;;  %v5116_v6 = vld [vmem:[%s11373_s30 + $0x288] sm:$0xff] }
 0x41d   : > { %4897 = vmatprep.subr.mxu1 %v8033_v52  ;;  %7909 = vmatpush3.msra.mxu0 %v3056_v13  ;;  %v5115_v13 = vld [vmem:[%s11373_s30 + $0x280] sm:$0xff] }
 0x41e   : > { %4898 = vmatpush1.msra.mxu1 %v3344_v27  ;;  %7910 = vmatprep.subr.mxu0 %v3191_v42  ;;  %v5379_v27 = vld [vmem:[%s11373_s30 + $0xac0] sm:$0xff]  ;;  %v5108_v42 = vld [vmem:[%s11373_s30 + $0x248] sm:$0xff] }
 0x41f   : > { %4899 = vmatprep.subr.mxu1 %v8033_v52  ;;  %7911 = vmatpush3.msra.mxu0 %v3047_v10  ;;  %v5372_v10 = vld [vmem:[%s11373_s30 + $0xa88] sm:$0xff] }
 0x420   : > { %4900 = vmatpush1.msra.mxu1 %v3335_v12  ;;  %7912 = vmatprep.subr.mxu0 %v3182_v14  ;;  %v7974_v38 = vpop.eup %7973  ;;  %v5107_v12 = vld [vmem:[%s11373_s30 + $0x240] sm:$0xff] }
 0x421   : > { %4901 = vmatprep.subr.mxu1 %v8033_v52  ;;  %7913 = vmatpush3.msra.mxu0 %v3038_v15  ;;  %v5017_v47 = vadd.f32 1.0, %v7974_v38  ;;  %v5371_v14 = vld [vmem:[%s11373_s30 + $0xa80] sm:$0xff]  ;;  %v5100_v15 = vld [vmem:[%s11373_s30 + $0x208] sm:$0xff] }
 0x422   : > { %4902 = vmatpush1.msra.mxu1 %v3326_v17  ;;  %7914 = vmatprep.subr.mxu0 %v3173_v18  ;;  %v7976_v44 = vpop.eup %7975  ;;  %v5364_v17 = vld [vmem:[%s11373_s30 + $0xa48] sm:$0xff]  ;;  %v5099_v18 = vld [vmem:[%s11373_s30 + $0x200] sm:$0xff] }
 0x423   : > { %4903 = vmatprep.subr.mxu1 %v8033_v52  ;;  %7915 = vmatpush3.msra.mxu0 %v3029_v19  ;;  %v5019_v59 = vadd.f32 1.0, %v7976_v44  ;;  %v11386_v54 = vmul.f32 %v5017_v47, %v4954_v50  ;;  %v5363_v19 = vld [vmem:[%s11373_s30 + $0xa40] sm:$0xff]  ;;  %v5076_v38 = vld [vmem:[%s11373_s30 + $0x148] sm:$0xff] }
 0x424   : > { %4904 = vmatpush1.msra.mxu1 %v3317_v45  ;;  %7916 = vmatprep.subr.mxu0 %v3164_v24  ;;  %v11426_v45 = vld [vmem:[%s10729_s18] sm:$0xff]  ;;  %v5068_v44 = vld [vmem:[%s11373_s30 + $0x108] sm:$0xff] }
 0x425   : > { %4905 = vmatprep.subr.mxu1 %v8033_v52  ;;  %7917 = vmatpush3.msra.mxu0 %v3020_v26  ;;  %v3484_v24 = vrot.slane %v11426_v45, %v3442_v23  ;;  %v5092_v26 = vld [vmem:[%s11373_s30 + $0x1c8] sm:$0xff]  ;;  %v5083_v23 = vld [vmem:[%s11373_s30 + $0x180] sm:$0xff] }
 0x426   : > { %4906 = vmatpush1.msra.mxu1 %v3308_v28  ;;  %7918 = vmatprep.subr.mxu0 %v3155_v29  ;;  %v5356_v28 = vld [vmem:[%s11373_s30 + $0xa08] sm:$0xff]  ;;  %v4173_v29 = vpop.f32.mrf.mxu0 }
 0x427   : > { %4907 = vmatprep.subr.mxu1 %v8033_v52  ;;  %7919 = vmatpush3.msra.mxu0 %v3011_v30  ;;  %v5091_v30 = vld [vmem:[%s11373_s30 + $0x1c0] sm:$0xff] }
 0x428   : > { %4908 = vmatpush1.msra.mxu1 %v3299_v49  ;;  %7920 = vmatprep.subr.mxu0 %v3146_v32  ;;  %v5355_v49 = vld [vmem:[%s11373_s30 + $0xa00] sm:$0xff]  ;;  %v5084_v32 = vld [vmem:[%s11373_s30 + $0x188] sm:$0xff] }
 0x429   : > { %4909 = vmatprep.subr.mxu1 %v8033_v52  ;;  %7921 = vmatpush3.msra.mxu0 %v3002_v33  ;;  %v5348_v33 = vld [vmem:[%s11373_s30 + $0x9c8] sm:$0xff] }
 0x42a   : > { %4910 = vmatpush1.msra.mxu1 %v3290_v34  ;;  %7922 = vmatprep.subr.mxu0 %v3137_v36  ;;  %v5347_v34 = vld [vmem:[%s11373_s30 + $0x9c0] sm:$0xff]  ;;  %v4174_v36 = vadd.f32 %v4173_v29, %v3484_v24  ;;  %v5276_v29 = vld [vmem:[%s11373_s30 + $0x788] sm:$0xff] }
 0x42b   : > { %4911 = vmatprep.subr.mxu1 %v8033_v52  ;;  %7923 = vmatpush3.msra.mxu0 %v2993_v41  ;;  %v5340_v41 = vld [vmem:[%s11373_s30 + $0x988] sm:$0xff]  ;;  %v5283_v24 = vld [vmem:[%s11373_s30 + $0x7c0] sm:$0xff] }
 0x42c   : > { %4912 = vmatpush1.msra.mxu1 %v3281_v43  ;;  %7924 = vmatprep.subr.mxu0 %v3128_v48  ;;  %v4244_v43 = vpop.f32.mrf.mxu1  ;;  %v5075_v48 = vld [vmem:[%s11373_s30 + $0x140] sm:$0xff] }
 0x42d   : > { %4913 = vmatprep.subr.mxu1 %v8033_v52  ;;  %7925 = vmatpush3.msra.mxu0 %v2984_v62  ;;  %v5339_v62 = vld [vmem:[%s11373_s30 + $0x980] sm:$0xff] }
 0x42e   : > { %4877 = vmatprep.mubr.f32.mxu0 %v10463_v35  ;;  %4914 = vmatpush1.msra.mxu1 %v3272_v0  ;;  %v4956_v35 = vmul.f32 0.5, %v11279_v22  ;;  %v5332_v0 = vld [vmem:[%s11373_s30 + $0x948] sm:$0xff]  ;;  %v4384_v47 = vpop.f32.mrf.mxu1 }
 0x42f   : > { %4878 = vmatmul.mubr.f32.vlgmr.msra.gmra.mxu0 %v10469_v37  ;;  %4945 = vmatprep.subr.mxu1 %v8033_v52  ;;  %v5412_v37 = vld [vmem:[%s11373_s30 + $0xbc8] sm:$0xff] }
 0x430   : > { %6187 = vmatprep.subr.mxu0 %v5156_v2  ;;  %7818 = vmatpush2.msk.msra.mxu1 %vm3509_vm0, %v3416_v56  ;;  %v11398_v22 = vmul.f32 %v5019_v59, %v4956_v35  ;;  %v5067_v2 = vld [vmem:[%s11373_s30 + $0x100] sm:$0xff]  ;;  %v4245_v59 = vadd.f32 %v4244_v43, %v4174_v36  ;;  %v5324_v35 = vld [vmem:[%s11373_s30 + $0x908] sm:$0xff] }
 0x431   : > { %7819 = vmatprep.mubr.msk.f32.mxu1 %vm3506_vm1, %v10388_v21  ;;  %6188 = vmatpush1.msra.mxu0 %v5155_v4  ;;  %v5139_v21 = vld [vmem:[%s11373_s30 + $0x340] sm:$0xff]  ;;  %v4962_v4 = vmul.f32 %v10899_v9, %v10899_v9  ;;  %v5532_v36 = vld [vmem:[%s11373_s30 + $0xf88] sm:$0xff] }
 0x432   : > { %6251 = vmatprep.mubr.f32.mxu0 %v11386_v54  ;;  %4948 = vmatmul.mubr.f32.vlgmr.msra.gmra.mxu1 %v10397_v25  ;;  %v5396_v25 = vld [vmem:[%s11373_s30 + $0xb48] sm:$0xff]  ;;  %v5331_v56 = vld [vmem:[%s11373_s30 + $0x940] sm:$0xff] }
 0x433   : > { %6189 = vmatprep.subr.mxu0 %v5148_v55  ;;  %6258 = vmatprep.subr.mxu1 %v5412_v37  ;;  %v5060_v55 = vld [vmem:[%s11373_s30 + $0xc8] sm:$0xff]  ;;  %v5531_v43 = vld [vmem:[%s11373_s30 + $0xf80] sm:$0xff] }
 0x434   : > { %6190 = vmatpush1.msra.mxu0 %v5147_v46  ;;  %6259 = vmatpush1.msra.mxu1 %v5411_v58  ;;  %v5059_v46 = vld [vmem:[%s11373_s30 + $0xc0] sm:$0xff] }
 0x435   : > { %6322 = vmatprep.mubr.f32.mxu1 %v11398_v22  ;;  %6191 = vmatprep.subr.mxu0 %v5140_v60  ;;  %v5323_v58 = vld [vmem:[%s11373_s30 + $0x900] sm:$0xff] }
 0x436   : > { %6260 = vmatprep.subr.mxu1 %v5404_v61  ;;  %6192 = vmatpush1.msra.mxu0 %v5139_v21  ;;  %v5052_v61 = vld [vmem:[%s11373_s30 + $0x88] sm:$0xff] }
 0x437   : > { %6261 = vmatpush1.msra.mxu1 %v5403_v57  ;;  %6193 = vmatprep.subr.mxu0 %v5132_v63  ;;  %v5316_v21 = vld [vmem:[%s11373_s30 + $0x8c8] sm:$0xff] }
 0x438   : > { %6262 = vmatprep.subr.mxu1 %v5396_v25  ;;  %6194 = vmatpush1.msra.mxu0 %v5131_v39  ;;  %v4386_v25 = vpop.f32.mrf.mxu1  ;;  %v5315_v39 = vld [vmem:[%s11373_s30 + $0x8c0] sm:$0xff] }
 0x439   : > { %6263 = vmatpush1.msra.mxu1 %v5395_v3  ;;  %6195 = vmatprep.subr.mxu0 %v5124_v53  ;;  %v4971_v3 = vmul.f32 %v4962_v4, %v10899_v9  ;;  %v4964_v53 = vmul.f32 %v11123_v1, %v11123_v1 }
 0x43a   : > { %6264 = vmatprep.subr.mxu1 %v5388_v7  ;;  %6196 = vmatpush1.msra.mxu0 %v5123_v51  ;;  %v5044_v7 = vld [vmem:[%s11373_s30 + $0x48] sm:$0xff] }
 0x43b   : > { %6265 = vmatpush1.msra.mxu1 %v5387_v5  ;;  %6197 = vmatprep.subr.mxu0 %v5116_v6  ;;  %v5308_v51 = vld [vmem:[%s11373_s30 + $0x888] sm:$0xff]  ;;  %v5043_v6 = vld [vmem:[%s11373_s30 + $0x40] sm:$0xff] }
 0x43c   : > { %6266 = vmatprep.subr.mxu1 %v5380_v8  ;;  %6198 = vmatpush1.msra.mxu0 %v5115_v13  ;;  %v5307_v8 = vld [vmem:[%s11373_s30 + $0x880] sm:$0xff]  ;;  %v5036_v13 = vld [vmem:[%s11373_s30 + $0x8] sm:$0xff] }
 0x43d   : > { %6267 = vmatpush1.msra.mxu1 %v5379_v27  ;;  %6199 = vmatprep.subr.mxu0 %v5108_v42  ;;  %v5300_v27 = vld [vmem:[%s11373_s30 + $0x848] sm:$0xff] }
 0x43e   : > { %6268 = vmatprep.subr.mxu1 %v5372_v10  ;;  %6200 = vmatpush1.msra.mxu0 %v5107_v12  ;;  %v5035_v10 = vld [vmem:[%s11373_s30] sm:$0xff] }
 0x43f   : > { %6269 = vmatpush1.msra.mxu1 %v5371_v14  ;;  %6201 = vmatprep.subr.mxu0 %v5100_v15  ;;  %v5299_v12 = vld [vmem:[%s11373_s30 + $0x840] sm:$0xff]  ;;  %v4980_v14 = vmul.f32 0.044715, %v4971_v3  ;;  %v4973_v15 = vmul.f32 %v4964_v53, %v11123_v1 }
 0x440   : > { %6270 = vmatprep.subr.mxu1 %v5364_v17  ;;  %6202 = vmatpush1.msra.mxu0 %v5099_v18  ;;  %v5284_v18 = vld [vmem:[%s11373_s30 + $0x7c8] sm:$0xff]  ;;  %v5227_v3 = vld [vmem:[%s11373_s30 + $0x600] sm:$0xff] }
 0x441   : > { %6271 = vmatpush1.msra.mxu1 %v5363_v19  ;;  %6203 = vmatprep.subr.mxu0 %v5092_v26  ;;  %v5292_v19 = vld [vmem:[%s11373_s30 + $0x808] sm:$0xff]  ;;  %v5291_v26 = vld [vmem:[%s11373_s30 + $0x800] sm:$0xff] }
 0x442   : > { %6272 = vmatprep.subr.mxu1 %v5356_v28  ;;  %6204 = vmatpush1.msra.mxu0 %v5091_v30  ;;  %v5540_v30 = vld [vmem:[%s11373_s30 + $0xfc8] sm:$0xff]  ;;  %v5491_v53 = vld [vmem:[%s11373_s30 + $0xe40] sm:$0xff] }
 0x443   : > { %6273 = vmatpush1.msra.mxu1 %v5355_v49  ;;  %6205 = vmatprep.subr.mxu0 %v5084_v32  ;;  %v5275_v49 = vld [vmem:[%s11373_s30 + $0x780] sm:$0xff] }
 0x444   : > { %6274 = vmatprep.subr.mxu1 %v5348_v33  ;;  %6206 = vmatpush1.msra.mxu0 %v5083_v23  ;;  %v5539_v32 = vld [vmem:[%s11373_s30 + $0xfc0] sm:$0xff]  ;;  %v4989_v33 = vadd.f32 %v4980_v14, %v10899_v9  ;;  %v4982_v23 = vmul.f32 0.044715, %v4973_v15  ;;  %v5468_v14 = vld [vmem:[%s11373_s30 + $0xd88] sm:$0xff] }
 0x445   : > { %6275 = vmatpush1.msra.mxu1 %v5347_v34  ;;  %6207 = vmatprep.subr.mxu0 %v5076_v38  ;;  %v5268_v34 = vld [vmem:[%s11373_s30 + $0x748] sm:$0xff]  ;;  %v5203_v15 = vld [vmem:[%s11373_s30 + $0x540] sm:$0xff] }
 0x446   : > { %6276 = vmatprep.subr.mxu1 %v5340_v41  ;;  %v4313_v50 = vpop.f32.mrf.mxu0  ;;  %6208 = vmatpush1.msra.mxu0 %v5075_v48  ;;  %v5267_v41 = vld [vmem:[%s11373_s30 + $0x740] sm:$0xff]  ;;  %v5260_v48 = vld [vmem:[%s11373_s30 + $0x708] sm:$0xff] }
 0x447   : > { %6277 = vmatpush1.msra.mxu1 %v5339_v62  ;;  %v4314_v37 = vadd.f32 %v4313_v50, %v11277_v20  ;;  %6209 = vmatprep.subr.mxu0 %v5068_v44  ;;  %v5051_v20 = vld [vmem:[%s11373_s30 + $0x80] sm:$0xff]  ;;  %v5524_v62 = vld [vmem:[%s11373_s30 + $0xf48] sm:$0xff] }
 0x448   : > { %6278 = vmatprep.subr.mxu1 %v5332_v0  ;;  %v4315_v60 = vpop.f32.mrf.mxu0  ;;  %6210 = vmatpush1.msra.mxu0 %v5067_v2  ;;  %v5259_v44 = vld [vmem:[%s11373_s30 + $0x700] sm:$0xff]  ;;  %v4991_v2 = vadd.f32 %v4982_v23, %v11123_v1  ;;  %v5516_v50 = vld [vmem:[%s11373_s30 + $0xf08] sm:$0xff] }
 0x449   : > { %6279 = vmatpush1.msra.mxu1 %v5331_v56  ;;  %v11456_v57 = vadd.f32 %v4384_v47, %v4314_v37  ;;  %v4316_v63 = vadd.f32 %v4315_v60, %v4245_v59  ;;  %6211 = vmatprep.subr.mxu0 %v5060_v55  ;;  %v5523_v0 = vld [vmem:[%s11373_s30 + $0xf40] sm:$0xff]  ;;  %v4998_v47 = vmul.f32 0.7978846, %v4989_v33  ;;  %v5252_v56 = vld [vmem:[%s11373_s30 + $0x6c8] sm:$0xff] }
 0x44a   : > { %6280 = vmatprep.subr.mxu1 %v5324_v35  ;;  %6212 = vmatpush1.msra.mxu0 %v5059_v46  ;;  %v5251_v59 = vld [vmem:[%s11373_s30 + $0x6c0] sm:$0xff]  ;;  %v5244_v35 = vld [vmem:[%s11373_s30 + $0x688] sm:$0xff]  ;;  %v5000_v60 = vmul.f32 0.7978846, %v4991_v2 }
 0x44b   : > { %6281 = vmatpush1.msra.mxu1 %v5323_v58  ;;  %v11465_v5 = vadd.f32 %v4386_v25, %v4316_v63  ;;  %6213 = vmatprep.subr.mxu0 %v5052_v61  ;;  %v5515_v55 = vld [vmem:[%s11373_s30 + $0xf00] sm:$0xff]  ;;  %v5508_v37 = vld [vmem:[%s11373_s30 + $0xec8] sm:$0xff]  ;;  %7977 = vtanh.f32 %v4998_v47 }
 0x44c   : > { %6282 = vmatprep.subr.mxu1 %v5316_v21  ;;  %6214 = vmatpush1.msra.mxu0 %v5051_v20  ;;  %v5243_v46 = vld [vmem:[%s11373_s30 + $0x680] sm:$0xff]  ;;  %v5236_v61 = vld [vmem:[%s11373_s30 + $0x648] sm:$0xff] }
 0x44d   : > { %6283 = vmatpush1.msra.mxu1 %v5315_v39  ;;  %v4967_v42 = vmul.f32 %v11465_v5, %v11465_v5  ;;  %6215 = vmatprep.subr.mxu0 %v5044_v7  ;;  %v5507_v58 = vld [vmem:[%s11373_s30 + $0xec0] sm:$0xff]  ;;  %v5500_v21 = vld [vmem:[%s11373_s30 + $0xe88] sm:$0xff] }
 0x44e   : > { %6284 = vmatprep.subr.mxu1 %v5308_v51  ;;  %6216 = vmatpush1.msra.mxu0 %v5043_v6  ;;  %v5235_v63 = vld [vmem:[%s11373_s30 + $0x640] sm:$0xff]  ;;  %v5228_v20 = vld [vmem:[%s11373_s30 + $0x608] sm:$0xff] }
 0x44f   : > { %6285 = vmatpush1.msra.mxu1 %v5307_v8  ;;  %v4976_v17 = vmul.f32 %v4967_v42, %v11465_v5  ;;  %6217 = vmatprep.subr.mxu0 %v5036_v13  ;;  %v5499_v25 = vld [vmem:[%s11373_s30 + $0xe80] sm:$0xff]  ;;  %v5492_v39 = vld [vmem:[%s11373_s30 + $0xe48] sm:$0xff] }
 0x450   : > { %6286 = vmatprep.subr.mxu1 %v5300_v27  ;;  %6218 = vmatpush1.msra.mxu0 %v5035_v10  ;;  %v5220_v7 = vld [vmem:[%s11373_s30 + $0x5c8] sm:$0xff]  ;;  %v5219_v6 = vld [vmem:[%s11373_s30 + $0x5c0] sm:$0xff] }
 0x451   : > { %6287 = vmatpush1.msra.mxu1 %v5299_v12  ;;  %v4985_v28 = vmul.f32 0.044715, %v4976_v17  ;;  %6219 = vmatprep.subr.mxu0 %v5284_v18  ;;  %v5484_v51 = vld [vmem:[%s11373_s30 + $0xe08] sm:$0xff]  ;;  %v5483_v8 = vld [vmem:[%s11373_s30 + $0xe00] sm:$0xff] }
 0x452   : > { %6288 = vmatprep.subr.mxu1 %v5292_v19  ;;  %6220 = vmatpush2.msra.mxu0 %v5283_v24  ;;  %v5212_v13 = vld [vmem:[%s11373_s30 + $0x588] sm:$0xff]  ;;  %v5211_v42 = vld [vmem:[%s11373_s30 + $0x580] sm:$0xff] }
 0x453   : > { %6289 = vmatpush1.msra.mxu1 %v5291_v26  ;;  %v4994_v38 = vadd.f32 %v4985_v28, %v11465_v5  ;;  %6221 = vmatprep.subr.mxu0 %v5276_v29  ;;  %v5476_v27 = vld [vmem:[%s11373_s30 + $0xdc8] sm:$0xff]  ;;  %v5475_v10 = vld [vmem:[%s11373_s30 + $0xdc0] sm:$0xff] }
 0x454   : > { %6290 = vmatprep.subr.mxu1 %v5540_v30  ;;  %6222 = vmatpush2.msra.mxu0 %v5275_v49  ;;  %v5204_v12 = vld [vmem:[%s11373_s30 + $0x548] sm:$0xff]  ;;  %v5467_v17 = vld [vmem:[%s11373_s30 + $0xd80] sm:$0xff] }
 0x455   : > { %6291 = vmatpush2.msra.mxu1 %v5539_v32  ;;  %6223 = vmatprep.subr.mxu0 %v5268_v34  ;;  %v5003_v4 = vmul.f32 0.7978846, %v4994_v38  ;;  %v5196_v18 = vld [vmem:[%s11373_s30 + $0x508] sm:$0xff]  ;;  %v5195_v24 = vld [vmem:[%s11373_s30 + $0x500] sm:$0xff] }
 0x456   : > { %6292 = vmatprep.subr.mxu1 %v5532_v36  ;;  %6224 = vmatpush2.msra.mxu0 %v5267_v41  ;;  %v5460_v19 = vld [vmem:[%s11373_s30 + $0xd48] sm:$0xff]  ;;  %v5459_v26 = vld [vmem:[%s11373_s30 + $0xd40] sm:$0xff] }
 0x457   : > { %6293 = vmatpush2.msra.mxu1 %v5531_v43  ;;  %6225 = vmatprep.subr.mxu0 %v5260_v48  ;;  %7979 = vtanh.f32 %v5003_v4  ;;  %v5188_v28 = vld [vmem:[%s11373_s30 + $0x4c8] sm:$0xff]  ;;  %v5187_v49 = vld [vmem:[%s11373_s30 + $0x4c0] sm:$0xff] }
 0x458   : > { %6294 = vmatprep.subr.mxu1 %v5524_v62  ;;  %6226 = vmatpush2.msra.mxu0 %v5259_v44  ;;  %7981 = vtanh.f32 %v5000_v60  ;;  %v5452_v29 = vld [vmem:[%s11373_s30 + $0xd08] sm:$0xff]  ;;  %v7978_v30 = vpop.eup %7977  ;;  %v5451_v32 = vld [vmem:[%s11373_s30 + $0xd00] sm:$0xff] }
 0x459   : > { %6295 = vmatpush2.msra.mxu1 %v5523_v0  ;;  %6227 = vmatprep.subr.mxu0 %v5252_v56  ;;  %v5180_v23 = vld [vmem:[%s11373_s30 + $0x488] sm:$0xff]  ;;  %v5179_v36 = vld [vmem:[%s11373_s30 + $0x480] sm:$0xff]  ;;  %v5016_v0 = vadd.f32 1.0, %v7978_v30 }
 0x45a   : > { %6296 = vmatprep.subr.mxu1 %v5516_v50  ;;  %6228 = vmatpush2.msra.mxu0 %v5251_v59  ;;  %v5444_v34 = vld [vmem:[%s11373_s30 + $0xcc8] sm:$0xff]  ;;  %v5443_v38 = vld [vmem:[%s11373_s30 + $0xcc0] sm:$0xff]  ;;  %v4953_v59 = vmul.f32 0.5, %v10899_v9  ;;  %v4955_v9 = vmul.f32 0.5, %v11123_v1 }
 0x45b   : > { %6297 = vmatpush2.msra.mxu1 %v5515_v55  ;;  %6229 = vmatprep.subr.mxu0 %v5244_v35  ;;  %v5172_v41 = vld [vmem:[%s11373_s30 + $0x448] sm:$0xff]  ;;  %v5171_v62 = vld [vmem:[%s11373_s30 + $0x440] sm:$0xff]  ;;  %v4958_v55 = vmul.f32 0.5, %v11465_v5 }
 0x45c   : > { %6298 = vmatprep.subr.mxu1 %v5508_v37  ;;  %6230 = vmatpush2.msra.mxu0 %v5243_v46  ;;  %v5436_v43 = vld [vmem:[%s11373_s30 + $0xc88] sm:$0xff]  ;;  %v5435_v44 = vld [vmem:[%s11373_s30 + $0xc80] sm:$0xff]  ;;  %v11547_v46 = vmul.f32 %v5016_v0, %v4953_v59 }
 0x45d   : > { %6299 = vmatpush2.msra.mxu1 %v5507_v58  ;;  %6231 = vmatprep.subr.mxu0 %v5236_v61  ;;  %v5164_v2 = vld [vmem:[%s11373_s30 + $0x408] sm:$0xff]  ;;  %v5163_v50 = vld [vmem:[%s11373_s30 + $0x400] sm:$0xff] }
 0x45e   : > { %6300 = vmatprep.subr.mxu1 %v5500_v21  ;;  %6232 = vmatpush2.msra.mxu0 %v5235_v63  ;;  %v5428_v56 = vld [vmem:[%s11373_s30 + $0xc48] sm:$0xff]  ;;  %v5427_v4 = vld [vmem:[%s11373_s30 + $0xc40] sm:$0xff] }
 0x45f   : > { %6301 = vmatpush2.msra.mxu1 %v5499_v25  ;;  %6233 = vmatprep.subr.mxu0 %v5228_v20  ;;  %v5420_v35 = vld [vmem:[%s11373_s30 + $0xc08] sm:$0xff]  ;;  %v5419_v60 = vld [vmem:[%s11373_s30 + $0xc00] sm:$0xff] }
 0x460   : > { %6302 = vmatprep.subr.mxu1 %v5492_v39  ;;  %6234 = vmatpush2.msra.mxu0 %v5227_v3  ;;  %v5668_v58 = vld [vmem:[%s11373_s30 + $0x13c8] sm:$0xff]  ;;  %v5667_v5 = vld [vmem:[%s11373_s30 + $0x13c0] sm:$0xff] }
 0x461   : > { %6303 = vmatpush2.msra.mxu1 %v5491_v53  ;;  %6235 = vmatprep.subr.mxu0 %v5220_v7  ;;  %v5660_v21 = vld [vmem:[%s11373_s30 + $0x1388] sm:$0xff]  ;;  %v5659_v25 = vld [vmem:[%s11373_s30 + $0x1380] sm:$0xff] }
 0x462   : > { %6304 = vmatprep.subr.mxu1 %v5484_v51  ;;  %6236 = vmatpush2.msra.mxu0 %v5219_v6  ;;  %v5924_v20 = vld [vmem:[%s11373_s30 + $0x1bc8] sm:$0xff]  ;;  %v5923_v39 = vld [vmem:[%s11373_s30 + $0x1bc0] sm:$0xff] }
 0x463   : > { %6305 = vmatpush2.msra.mxu1 %v5483_v8  ;;  %6237 = vmatprep.subr.mxu0 %v5212_v13  ;;  %v5652_v1 = vld [vmem:[%s11373_s30 + $0x1348] sm:$0xff]  ;;  %v5651_v3 = vld [vmem:[%s11373_s30 + $0x1340] sm:$0xff] }
 0x464   : > { %6306 = vmatprep.subr.mxu1 %v5476_v27  ;;  %6238 = vmatpush2.msra.mxu0 %v5211_v42  ;;  %v7980_v33 = vpop.eup %7979  ;;  %v5916_v53 = vld [vmem:[%s11373_s30 + $0x1b88] sm:$0xff]  ;;  %v5915_v51 = vld [vmem:[%s11373_s30 + $0x1b80] sm:$0xff] }
 0x465   : > { %6307 = vmatpush2.msra.mxu1 %v5475_v10  ;;  %6239 = vmatprep.subr.mxu0 %v5204_v12  ;;  %v7982_v48 = vpop.eup %7981  ;;  %v5021_v47 = vadd.f32 1.0, %v7980_v33  ;;  %v5644_v7 = vld [vmem:[%s11373_s30 + $0x1308] sm:$0xff]  ;;  %v5643_v6 = vld [vmem:[%s11373_s30 + $0x1300] sm:$0xff] }
 0x466   : > { %6308 = vmatprep.subr.mxu1 %v5468_v14  ;;  %6240 = vmatpush2.msra.mxu0 %v5203_v15  ;;  %v5018_v37 = vadd.f32 1.0, %v7982_v48  ;;  %v5908_v8 = vld [vmem:[%s11373_s30 + $0x1b48] sm:$0xff]  ;;  %v5907_v27 = vld [vmem:[%s11373_s30 + $0x1b40] sm:$0xff] }
 0x467   : > { %6309 = vmatpush2.msra.mxu1 %v5467_v17  ;;  %6241 = vmatprep.subr.mxu0 %v5196_v18  ;;  %v11551_v61 = vmul.f32 %v5021_v47, %v4958_v55  ;;  %v5636_v13 = vld [vmem:[%s11373_s30 + $0x12c8] sm:$0xff]  ;;  %v5635_v42 = vld [vmem:[%s11373_s30 + $0x12c0] sm:$0xff]  ;;  %v4966_v55 = vmul.f32 %v11456_v57, %v11456_v57 }
 0x468   : > { %6310 = vmatprep.subr.mxu1 %v5460_v19  ;;  %6242 = vmatpush2.msra.mxu0 %v5195_v24  ;;  %v11557_v63 = vmul.f32 %v5018_v37, %v4955_v9  ;;  %v5900_v10 = vld [vmem:[%s11373_s30 + $0x1b08] sm:$0xff]  ;;  %v5899_v14 = vld [vmem:[%s11373_s30 + $0x1b00] sm:$0xff] }
 0x469   : > { %6311 = vmatpush2.msra.mxu1 %v5459_v26  ;;  %6243 = vmatprep.subr.mxu0 %v5188_v28  ;;  %v5628_v12 = vld [vmem:[%s11373_s30 + $0x1288] sm:$0xff]  ;;  %v5627_v15 = vld [vmem:[%s11373_s30 + $0x1280] sm:$0xff] }
 0x46a   : > { %6312 = vmatprep.subr.mxu1 %v5452_v29  ;;  %6244 = vmatpush2.msra.mxu0 %v5187_v49  ;;  %v5892_v17 = vld [vmem:[%s11373_s30 + $0x1ac8] sm:$0xff]  ;;  %v5891_v19 = vld [vmem:[%s11373_s30 + $0x1ac0] sm:$0xff] }
 0x46b   : > { %6313 = vmatpush2.msra.mxu1 %v5451_v32  ;;  %6245 = vmatprep.subr.mxu0 %v5180_v23  ;;  %v5620_v18 = vld [vmem:[%s11373_s30 + $0x1248] sm:$0xff]  ;;  %v5619_v24 = vld [vmem:[%s11373_s30 + $0x1240] sm:$0xff] }
 0x46c   : > { %6314 = vmatprep.subr.mxu1 %v5444_v34  ;;  %6246 = vmatpush2.msra.mxu0 %v5179_v36  ;;  %v5884_v26 = vld [vmem:[%s11373_s30 + $0x1a88] sm:$0xff]  ;;  %v5883_v29 = vld [vmem:[%s11373_s30 + $0x1a80] sm:$0xff] }
 0x46d   : > { %6315 = vmatpush2.msra.mxu1 %v5443_v38  ;;  %6247 = vmatprep.subr.mxu0 %v5172_v41  ;;  %v5612_v28 = vld [vmem:[%s11373_s30 + $0x1208] sm:$0xff]  ;;  %v5611_v30 = vld [vmem:[%s11373_s30 + $0x1200] sm:$0xff] }
 0x46e   : > { %6316 = vmatprep.subr.mxu1 %v5436_v43  ;;  %6248 = vmatpush2.msra.mxu0 %v5171_v62  ;;  %v5876_v49 = vld [vmem:[%s11373_s30 + $0x1a48] sm:$0xff]  ;;  %v5875_v33 = vld [vmem:[%s11373_s30 + $0x1a40] sm:$0xff] }
 0x46f   : > { %6317 = vmatpush2.msra.mxu1 %v5435_v44  ;;  %6249 = vmatprep.subr.mxu0 %v5164_v2  ;;  %v5604_v32 = vld [vmem:[%s11373_s30 + $0x11c8] sm:$0xff]  ;;  %v5603_v23 = vld [vmem:[%s11373_s30 + $0x11c0] sm:$0xff] }
 0x470   : > { %6318 = vmatprep.subr.mxu1 %v5428_v56  ;;  %6250 = vmatpush2.msra.mxu0 %v5163_v50  ;;  %v5868_v34 = vld [vmem:[%s11373_s30 + $0x1a08] sm:$0xff]  ;;  %v5867_v38 = vld [vmem:[%s11373_s30 + $0x1a00] sm:$0xff] }
 0x471   : > { %6319 = vmatpush2.msra.mxu1 %v5427_v4  ;;  %6252 = vmatmul.mubr.f32.vlgmr.msra.gmra.mxu0 %v11547_v46  ;;  %v5596_v36 = vld [vmem:[%s11373_s30 + $0x1188] sm:$0xff]  ;;  %v5595_v41 = vld [vmem:[%s11373_s30 + $0x1180] sm:$0xff] }
 0x472   : > { %6320 = vmatprep.subr.mxu1 %v5420_v35  ;;  %6329 = vmatprep.subr.mxu0 %v5668_v58  ;;  %v5860_v43 = vld [vmem:[%s11373_s30 + $0x19c8] sm:$0xff]  ;;  %v5859_v62 = vld [vmem:[%s11373_s30 + $0x19c0] sm:$0xff] }
 0x473   : > { %6321 = vmatpush2.msra.mxu1 %v5419_v60  ;;  %6330 = vmatpush1.msra.mxu0 %v5667_v5  ;;  %v5588_v48 = vld [vmem:[%s11373_s30 + $0x1148] sm:$0xff]  ;;  %v5587_v44 = vld [vmem:[%s11373_s30 + $0x1140] sm:$0xff] }
 0x474   : > { %6393 = vmatprep.mubr.f32.mxu0 %v11551_v61  ;;  %6323 = vmatmul.mubr.f32.vlgmr.msra.gmra.mxu1 %v11557_v63  ;;  %v5852_v0 = vld [vmem:[%s11373_s30 + $0x1988] sm:$0xff]  ;;  %v5851_v2 = vld [vmem:[%s11373_s30 + $0x1980] sm:$0xff] }
 0x475   : > { %6331 = vmatprep.subr.mxu0 %v5660_v21  ;;  %6400 = vmatprep.subr.mxu1 %v5924_v20  ;;  %v5580_v47 = vld [vmem:[%s11373_s30 + $0x1108] sm:$0xff]  ;;  %v5579_v56 = vld [vmem:[%s11373_s30 + $0x1100] sm:$0xff]  ;;  %v4975_v20 = vmul.f32 %v4966_v55, %v11456_v57 }
 0x476   : > { %6332 = vmatpush1.msra.mxu0 %v5659_v25  ;;  %6401 = vmatpush1.msra.mxu1 %v5923_v39  ;;  %v5844_v50 = vld [vmem:[%s11373_s30 + $0x1948] sm:$0xff]  ;;  %v5843_v59 = vld [vmem:[%s11373_s30 + $0x1940] sm:$0xff] }
 0x477   : > { %6333 = vmatprep.subr.mxu0 %v5652_v1  ;;  %6402 = vmatprep.subr.mxu1 %v5916_v53  ;;  %v5572_v4 = vld [vmem:[%s11373_s30 + $0x10c8] sm:$0xff]  ;;  %v5571_v35 = vld [vmem:[%s11373_s30 + $0x10c0] sm:$0xff] }
 0x478   : > { %6334 = vmatpush1.msra.mxu0 %v5651_v3  ;;  %6403 = vmatpush1.msra.mxu1 %v5915_v51  ;;  %v5836_v37 = vld [vmem:[%s11373_s30 + $0x1908] sm:$0xff]  ;;  %v5835_v60 = vld [vmem:[%s11373_s30 + $0x1900] sm:$0xff] }
 0x479   : > { %6335 = vmatprep.subr.mxu0 %v5644_v7  ;;  %6404 = vmatprep.subr.mxu1 %v5908_v8  ;;  %v5564_v58 = vld [vmem:[%s11373_s30 + $0x1088] sm:$0xff]  ;;  %v5563_v9 = vld [vmem:[%s11373_s30 + $0x1080] sm:$0xff] }
 0x47a   : > { %6336 = vmatpush1.msra.mxu0 %v5643_v6  ;;  %6405 = vmatpush1.msra.mxu1 %v5907_v27  ;;  %v5828_v5 = vld [vmem:[%s11373_s30 + $0x18c8] sm:$0xff]  ;;  %v5827_v25 = vld [vmem:[%s11373_s30 + $0x18c0] sm:$0xff] }
 0x47b   : > { %6337 = vmatprep.subr.mxu0 %v5636_v13  ;;  %6406 = vmatprep.subr.mxu1 %v5900_v10  ;;  %v5556_v21 = vld [vmem:[%s11373_s30 + $0x1048] sm:$0xff]  ;;  %v5555_v1 = vld [vmem:[%s11373_s30 + $0x1040] sm:$0xff]  ;;  %v4984_v13 = vmul.f32 0.044715, %v4975_v20 }
 0x47c   : > { %6338 = vmatpush1.msra.mxu0 %v5635_v42  ;;  %6407 = vmatpush1.msra.mxu1 %v5899_v14  ;;  %v5820_v39 = vld [vmem:[%s11373_s30 + $0x1888] sm:$0xff]  ;;  %v5819_v53 = vld [vmem:[%s11373_s30 + $0x1880] sm:$0xff] }
 0x47d   : > { %6339 = vmatprep.subr.mxu0 %v5628_v12  ;;  %6408 = vmatprep.subr.mxu1 %v5892_v17  ;;  %v5548_v3 = vld [vmem:[%s11373_s30 + $0x1008] sm:$0xff]  ;;  %v5547_v7 = vld [vmem:[%s11373_s30 + $0x1000] sm:$0xff] }
 0x47e   : > { %6340 = vmatpush1.msra.mxu0 %v5627_v15  ;;  %6409 = vmatpush1.msra.mxu1 %v5891_v19  ;;  %v5812_v51 = vld [vmem:[%s11373_s30 + $0x1848] sm:$0xff]  ;;  %v5811_v8 = vld [vmem:[%s11373_s30 + $0x1840] sm:$0xff]  ;;  %v4993_v19 = vadd.f32 %v4984_v13, %v11456_v57 }
 0x47f   : > { %6341 = vmatprep.subr.mxu0 %v5620_v18  ;;  %6410 = vmatprep.subr.mxu1 %v5884_v26  ;;  %v5796_v6 = vld [vmem:[%s11373_s30 + $0x17c8] sm:$0xff]  ;;  %v5795_v27 = vld [vmem:[%s11373_s30 + $0x17c0] sm:$0xff] }
 0x480   : > { %6342 = vmatpush1.msra.mxu0 %v5619_v24  ;;  %6411 = vmatpush1.msra.mxu1 %v5883_v29  ;;  %v5804_v42 = vld [vmem:[%s11373_s30 + $0x1808] sm:$0xff]  ;;  %v5803_v12 = vld [vmem:[%s11373_s30 + $0x1800] sm:$0xff] }
 0x481   : > { %6343 = vmatprep.subr.mxu0 %v5612_v28  ;;  %6412 = vmatprep.subr.mxu1 %v5876_v49  ;;  %v5788_v10 = vld [vmem:[%s11373_s30 + $0x1788] sm:$0xff]  ;;  %v5787_v14 = vld [vmem:[%s11373_s30 + $0x1780] sm:$0xff] }
 0x482   : > { %6344 = vmatpush1.msra.mxu0 %v5611_v30  ;;  %6413 = vmatpush1.msra.mxu1 %v5875_v33  ;;  %v6052_v15 = vld [vmem:[%s11373_s30 + $0x1fc8] sm:$0xff]  ;;  %v6051_v18 = vld [vmem:[%s11373_s30 + $0x1fc0] sm:$0xff] }
 0x483   : > { %6345 = vmatprep.subr.mxu0 %v5604_v32  ;;  %6414 = vmatprep.subr.mxu1 %v5868_v34  ;;  %v5780_v17 = vld [vmem:[%s11373_s30 + $0x1748] sm:$0xff]  ;;  %v5779_v24 = vld [vmem:[%s11373_s30 + $0x1740] sm:$0xff] }
 0x484   : > { %6346 = vmatpush1.msra.mxu0 %v5603_v23  ;;  %6415 = vmatpush1.msra.mxu1 %v5867_v38  ;;  %v6044_v26 = vld [vmem:[%s11373_s30 + $0x1f88] sm:$0xff]  ;;  %v6043_v29 = vld [vmem:[%s11373_s30 + $0x1f80] sm:$0xff]  ;;  %v5002_v23 = vmul.f32 0.7978846, %v4993_v19 }
 0x485   : > { %6347 = vmatprep.subr.mxu0 %v5596_v36  ;;  %6416 = vmatprep.subr.mxu1 %v5860_v43  ;;  %v5772_v28 = vld [vmem:[%s11373_s30 + $0x1708] sm:$0xff]  ;;  %v5771_v30 = vld [vmem:[%s11373_s30 + $0x1700] sm:$0xff] }
 0x486   : > { %6348 = vmatpush1.msra.mxu0 %v5595_v41  ;;  %6417 = vmatpush1.msra.mxu1 %v5859_v62  ;;  %v6036_v49 = vld [vmem:[%s11373_s30 + $0x1f48] sm:$0xff]  ;;  %v6035_v33 = vld [vmem:[%s11373_s30 + $0x1f40] sm:$0xff]  ;;  %7983 = vtanh.f32 %v5002_v23 }
 0x487   : > { %6349 = vmatprep.subr.mxu0 %v5588_v48  ;;  %6418 = vmatprep.subr.mxu1 %v5852_v0  ;;  %v5764_v32 = vld [vmem:[%s11373_s30 + $0x16c8] sm:$0xff]  ;;  %v5763_v34 = vld [vmem:[%s11373_s30 + $0x16c0] sm:$0xff] }
 0x488   : > { %6350 = vmatpush1.msra.mxu0 %v5587_v44  ;;  %6419 = vmatpush1.msra.mxu1 %v5851_v2  ;;  %v6028_v36 = vld [vmem:[%s11373_s30 + $0x1f08] sm:$0xff]  ;;  %v6027_v41 = vld [vmem:[%s11373_s30 + $0x1f00] sm:$0xff] }
 0x489   : > { %6351 = vmatprep.subr.mxu0 %v5580_v47  ;;  %6420 = vmatprep.subr.mxu1 %v5844_v50  ;;  %v5756_v38 = vld [vmem:[%s11373_s30 + $0x1688] sm:$0xff]  ;;  %v5755_v43 = vld [vmem:[%s11373_s30 + $0x1680] sm:$0xff] }
 0x48a   : > { %6352 = vmatpush1.msra.mxu0 %v5579_v56  ;;  %6421 = vmatpush1.msra.mxu1 %v5843_v59  ;;  %v6020_v48 = vld [vmem:[%s11373_s30 + $0x1ec8] sm:$0xff]  ;;  %v6019_v44 = vld [vmem:[%s11373_s30 + $0x1ec0] sm:$0xff] }
 0x48b   : > { %6353 = vmatprep.subr.mxu0 %v5572_v4  ;;  %6422 = vmatprep.subr.mxu1 %v5836_v37  ;;  %v5748_v62 = vld [vmem:[%s11373_s30 + $0x1648] sm:$0xff]  ;;  %v5747_v0 = vld [vmem:[%s11373_s30 + $0x1640] sm:$0xff] }
 0x48c   : > { %6354 = vmatpush1.msra.mxu0 %v5571_v35  ;;  %6423 = vmatpush1.msra.mxu1 %v5835_v60  ;;  %v6012_v47 = vld [vmem:[%s11373_s30 + $0x1e88] sm:$0xff]  ;;  %v6011_v56 = vld [vmem:[%s11373_s30 + $0x1e80] sm:$0xff] }
 0x48d   : > { %6355 = vmatprep.subr.mxu0 %v5564_v58  ;;  %6424 = vmatprep.subr.mxu1 %v5828_v5  ;;  %v5740_v2 = vld [vmem:[%s11373_s30 + $0x1608] sm:$0xff]  ;;  %v5739_v50 = vld [vmem:[%s11373_s30 + $0x1600] sm:$0xff] }
 0x48e   : > { %6356 = vmatpush1.msra.mxu0 %v5563_v9  ;;  %6425 = vmatpush1.msra.mxu1 %v5827_v25  ;;  %v6004_v4 = vld [vmem:[%s11373_s30 + $0x1e48] sm:$0xff]  ;;  %v6003_v55 = vld [vmem:[%s11373_s30 + $0x1e40] sm:$0xff] }
 0x48f   : > { %6357 = vmatprep.subr.mxu0 %v5556_v21  ;;  %6426 = vmatprep.subr.mxu1 %v5820_v39  ;;  %v5732_v59 = vld [vmem:[%s11373_s30 + $0x15c8] sm:$0xff]  ;;  %v5731_v35 = vld [vmem:[%s11373_s30 + $0x15c0] sm:$0xff]  ;;  %v4455_v21 = vpop.f32.mrf.mxu1 }
 0x490   : > { %6358 = vmatpush1.msra.mxu0 %v5555_v1  ;;  %6427 = vmatpush1.msra.mxu1 %v5819_v53  ;;  %v5996_v37 = vld [vmem:[%s11373_s30 + $0x1e08] sm:$0xff]  ;;  %v5995_v60 = vld [vmem:[%s11373_s30 + $0x1e00] sm:$0xff]  ;;  %v3488_v1 = vrot.slane %v11426_v45, %v3446_v16  ;;  %v4526_v53 = vpop.f32.mrf.mxu0 }
 0x491   : > { %6359 = vmatprep.subr.mxu0 %v5548_v3  ;;  %6428 = vmatprep.subr.mxu1 %v5812_v51  ;;  %v5724_v58 = vld [vmem:[%s11373_s30 + $0x1588] sm:$0xff]  ;;  %v5723_v9 = vld [vmem:[%s11373_s30 + $0x1580] sm:$0xff]  ;;  %v4457_v13 = vpop.f32.mrf.mxu1 }
 0x492   : > { %6360 = vmatpush1.msra.mxu0 %v5547_v7  ;;  %6429 = vmatpush1.msra.mxu1 %v5811_v8  ;;  %v5988_v5 = vld [vmem:[%s11373_s30 + $0x1dc8] sm:$0xff]  ;;  %v5987_v20 = vld [vmem:[%s11373_s30 + $0x1dc0] sm:$0xff] }
 0x493   : > { %6361 = vmatprep.subr.mxu0 %v5796_v6  ;;  %6430 = vmatprep.subr.mxu1 %v5804_v42  ;;  %v5716_v25 = vld [vmem:[%s11373_s30 + $0x1548] sm:$0xff]  ;;  %v5715_v39 = vld [vmem:[%s11373_s30 + $0x1540] sm:$0xff]  ;;  %v3492_v6 = vrot.slane %v11426_v45, %v3450_v11  ;;  %v7984_v11 = vpop.eup %7983  ;;  %v4528_v45 = vpop.f32.mrf.mxu0 }
 0x494   : > { %6362 = vmatpush2.msra.mxu0 %v5795_v27  ;;  %6431 = vmatpush1.msra.mxu1 %v5803_v12  ;;  %v5980_v3 = vld [vmem:[%s11373_s30 + $0x1d88] sm:$0xff]  ;;  %v5979_v51 = vld [vmem:[%s11373_s30 + $0x1d80] sm:$0xff] }
 0x495   : > { %6363 = vmatprep.subr.mxu0 %v5788_v10  ;;  %6432 = vmatprep.subr.mxu1 %v6052_v15  ;;  %v5708_v7 = vld [vmem:[%s11373_s30 + $0x1508] sm:$0xff]  ;;  %v5707_v8 = vld [vmem:[%s11373_s30 + $0x1500] sm:$0xff]  ;;  %v4456_v10 = vadd.f32 %v4455_v21, %v3488_v1 }
 0x496   : > { %6364 = vmatpush2.msra.mxu0 %v5787_v14  ;;  %6433 = vmatpush2.msra.mxu1 %v6051_v18  ;;  %v5972_v16 = vld [vmem:[%s11373_s30 + $0x1d48] sm:$0xff]  ;;  %v5971_v42 = vld [vmem:[%s11373_s30 + $0x1d40] sm:$0xff]  ;;  %v4458_v18 = vadd.f32 %v4457_v13, %v3492_v6 }
 0x497   : > { %6365 = vmatprep.subr.mxu0 %v5780_v17  ;;  %6434 = vmatprep.subr.mxu1 %v6044_v26  ;;  %v5700_v27 = vld [vmem:[%s11373_s30 + $0x14c8] sm:$0xff]  ;;  %v5699_v12 = vld [vmem:[%s11373_s30 + $0x14c0] sm:$0xff]  ;;  %v4527_v19 = vadd.f32 %v4526_v53, %v4456_v10 }
 0x498   : > { %6366 = vmatpush2.msra.mxu0 %v5779_v24  ;;  %6435 = vmatpush2.msra.mxu1 %v6043_v29  ;;  %v5964_v14 = vld [vmem:[%s11373_s30 + $0x1d08] sm:$0xff]  ;;  %v5963_v17 = vld [vmem:[%s11373_s30 + $0x1d00] sm:$0xff] }
 0x499   : > { %6367 = vmatprep.subr.mxu0 %v5772_v28  ;;  %6436 = vmatprep.subr.mxu1 %v6036_v49  ;;  %v5692_v15 = vld [vmem:[%s11373_s30 + $0x1488] sm:$0xff]  ;;  %v5691_v24 = vld [vmem:[%s11373_s30 + $0x1480] sm:$0xff] }
 0x49a   : > { %6368 = vmatpush2.msra.mxu0 %v5771_v30  ;;  %6437 = vmatpush2.msra.mxu1 %v6035_v33  ;;  %v5956_v26 = vld [vmem:[%s11373_s30 + $0x1cc8] sm:$0xff]  ;;  %v5955_v49 = vld [vmem:[%s11373_s30 + $0x1cc0] sm:$0xff] }
 0x49b   : > { %6369 = vmatprep.subr.mxu0 %v5764_v32  ;;  %6438 = vmatprep.subr.mxu1 %v6028_v36  ;;  %v5684_v28 = vld [vmem:[%s11373_s30 + $0x1448] sm:$0xff]  ;;  %v4529_v32 = vadd.f32 %v4528_v45, %v4458_v18  ;;  %v5683_v33 = vld [vmem:[%s11373_s30 + $0x1440] sm:$0xff] }
 0x49c   : > { %6370 = vmatpush2.msra.mxu0 %v5763_v34  ;;  %6439 = vmatpush2.msra.mxu1 %v6027_v41  ;;  %v5020_v34 = vadd.f32 1.0, %v7984_v11  ;;  %v5948_v36 = vld [vmem:[%s11373_s30 + $0x1c88] sm:$0xff]  ;;  %v6171_v21 = vld [vmem:[%s11373_s30 + $0x2380] sm:$0xff] }
 0x49d   : > { %6371 = vmatprep.subr.mxu0 %v5756_v38  ;;  %6440 = vmatprep.subr.mxu1 %v6020_v48  ;;  %v5676_v38 = vld [vmem:[%s11373_s30 + $0x1408] sm:$0xff]  ;;  %v5675_v48 = vld [vmem:[%s11373_s30 + $0x1400] sm:$0xff] }
 0x49e   : > { %6372 = vmatpush2.msra.mxu0 %v5755_v43  ;;  %6441 = vmatpush2.msra.mxu1 %v6019_v44  ;;  %v5947_v43 = vld [vmem:[%s11373_s30 + $0x1c80] sm:$0xff]  ;;  %v4957_v44 = vmul.f32 0.5, %v11456_v57  ;;  %v5932_v57 = vld [vmem:[%s11373_s30 + $0x1c08] sm:$0xff] }
 0x49f   : > { %6373 = vmatprep.subr.mxu0 %v5748_v62  ;;  %6442 = vmatprep.subr.mxu1 %v6012_v47  ;;  %v5940_v47 = vld [vmem:[%s11373_s30 + $0x1c48] sm:$0xff]  ;;  %v6147_v13 = vld [vmem:[%s11373_s30 + $0x22c0] sm:$0xff] }
 0x4a0   : > { %6374 = vmatpush2.msra.mxu0 %v5747_v0  ;;  %6443 = vmatpush2.msra.mxu1 %v6011_v56  ;;  %v5939_v56 = vld [vmem:[%s11373_s30 + $0x1c40] sm:$0xff]  ;;  %v6164_v1 = vld [vmem:[%s11373_s30 + $0x2348] sm:$0xff] }
 0x4a1   : > { %6375 = vmatprep.subr.mxu0 %v5740_v2  ;;  %6444 = vmatprep.subr.mxu1 %v6004_v4  ;;  %v11699_v4 = vmul.f32 %v5020_v34, %v4957_v44  ;;  %v6139_v10 = vld [vmem:[%s11373_s30 + $0x2280] sm:$0xff]  ;;  %v6124_v11 = vld [vmem:[%s11373_s30 + $0x2208] sm:$0xff] }
 0x4a2   : > { %6376 = vmatpush2.msra.mxu0 %v5739_v50  ;;  %6445 = vmatpush2.msra.mxu1 %v6003_v55  ;;  %v6180_v55 = vld [vmem:[%s11373_s30 + $0x23c8] sm:$0xff]  ;;  %v6123_v45 = vld [vmem:[%s11373_s30 + $0x2200] sm:$0xff] }
 0x4a3   : > { %6377 = vmatprep.subr.mxu0 %v5732_v59  ;;  %6446 = vmatprep.subr.mxu1 %v5996_v37  ;;  %v6179_v37 = vld [vmem:[%s11373_s30 + $0x23c0] sm:$0xff]  ;;  %v6108_v18 = vld [vmem:[%s11373_s30 + $0x2188] sm:$0xff] }
 0x4a4   : > { %6378 = vmatpush2.msra.mxu0 %v5731_v35  ;;  %6447 = vmatpush2.msra.mxu1 %v5995_v60  ;;  %v5931_v35 = vld [vmem:[%s11373_s30 + $0x1c00] sm:$0xff]  ;;  %v6068_v44 = vld [vmem:[%s11373_s30 + $0x2048] sm:$0xff] }
 0x4a5   : > { %6379 = vmatprep.subr.mxu0 %v5724_v58  ;;  %6448 = vmatprep.subr.mxu1 %v5988_v5  ;;  %v6172_v5 = vld [vmem:[%s11373_s30 + $0x2388] sm:$0xff] }
 0x4a6   : > { %6380 = vmatpush2.msra.mxu0 %v5723_v9  ;;  %6449 = vmatpush2.msra.mxu1 %v5987_v20  ;;  %v5158_v9 = vld [vmem:[%s11373_s30 + $0x3d8] sm:$0xff] }
 0x4a7   : > { %6381 = vmatprep.subr.mxu0 %v5716_v25  ;;  %6450 = vmatprep.subr.mxu1 %v5980_v3 }
 0x4a8   : > { %6382 = vmatpush2.msra.mxu0 %v5715_v39  ;;  %6451 = vmatpush2.msra.mxu1 %v5979_v51  ;;  %v6163_v39 = vld [vmem:[%s11373_s30 + $0x2340] sm:$0xff] }
 0x4a9   : > { %6383 = vmatprep.subr.mxu0 %v5708_v7  ;;  %6452 = vmatprep.subr.mxu1 %v5972_v16  ;;  %v6156_v7 = vld [vmem:[%s11373_s30 + $0x2308] sm:$0xff]  ;;  %v6155_v51 = vld [vmem:[%s11373_s30 + $0x2300] sm:$0xff] }
 0x4aa   : > { %6384 = vmatpush2.msra.mxu0 %v5707_v8  ;;  %6453 = vmatpush2.msra.mxu1 %v5971_v42  ;;  %v6148_v16 = vld [vmem:[%s11373_s30 + $0x22c8] sm:$0xff] }
 0x4ab   : > { %6385 = vmatprep.subr.mxu0 %v5700_v27  ;;  %v4597_v29 = vpop.f32.mrf.mxu1  ;;  %6454 = vmatprep.subr.mxu1 %v5964_v14  ;;  %v6140_v42 = vld [vmem:[%s11373_s30 + $0x2288] sm:$0xff]  ;;  %v6131_v14 = vld [vmem:[%s11373_s30 + $0x2240] sm:$0xff] }
 0x4ac   : > { %6386 = vmatpush2.msra.mxu0 %v5699_v12  ;;  %v4668_v30 = vpop.f32.mrf.mxu0  ;;  %v4598_v23 = vadd.f32 %v4597_v29, %v4527_v19  ;;  %6455 = vmatpush2.msra.mxu1 %v5963_v17  ;;  %v6132_v12 = vld [vmem:[%s11373_s30 + $0x2248] sm:$0xff]  ;;  %v6115_v17 = vld [vmem:[%s11373_s30 + $0x21c0] sm:$0xff] }
 0x4ad   : > { %6387 = vmatprep.subr.mxu0 %v5692_v15  ;;  %v4599_v41 = vpop.f32.mrf.mxu1  ;;  %6456 = vmatprep.subr.mxu1 %v5956_v26  ;;  %v6116_v15 = vld [vmem:[%s11373_s30 + $0x21c8] sm:$0xff]  ;;  %v6107_v19 = vld [vmem:[%s11373_s30 + $0x2180] sm:$0xff] }
 0x4ae   : > { %6388 = vmatpush2.msra.mxu0 %v5691_v24  ;;  %v11692_v62 = vadd.f32 %v4668_v30, %v4598_v23  ;;  %v4600_v0 = vadd.f32 %v4599_v41, %v4529_v32  ;;  %6457 = vmatpush2.msra.mxu1 %v5955_v49  ;;  %v4670_v2 = vpop.f32.mrf.mxu0  ;;  %v6100_v24 = vld [vmem:[%s11373_s30 + $0x2148] sm:$0xff]  ;;  %v6099_v26 = vld [vmem:[%s11373_s30 + $0x2140] sm:$0xff] }
 0x4af   : > { %6389 = vmatprep.subr.mxu0 %v5684_v28  ;;  %6458 = vmatprep.subr.mxu1 %v5948_v36  ;;  %v6092_v28 = vld [vmem:[%s11373_s30 + $0x2108] sm:$0xff]  ;;  %v6091_v30 = vld [vmem:[%s11373_s30 + $0x2100] sm:$0xff] }
 0x4b0   : > { %6390 = vmatpush2.msra.mxu0 %v5683_v33  ;;  %v4968_v50 = vmul.f32 %v11692_v62, %v11692_v62  ;;  %v11701_v59 = vadd.f32 %v4670_v2, %v4600_v0  ;;  %6459 = vmatpush2.msra.mxu1 %v5947_v43  ;;  %v6084_v49 = vld [vmem:[%s11373_s30 + $0x20c8] sm:$0xff]  ;;  %v6083_v23 = vld [vmem:[%s11373_s30 + $0x20c0] sm:$0xff]  ;;  %v4959_v41 = vmul.f32 0.5, %v11692_v62  ;;  %v5150_v2 = vld [vmem:[%s11373_s30 + $0x398] sm:$0xff] }
 0x4b1   : > { %6391 = vmatprep.subr.mxu0 %v5676_v38  ;;  %6460 = vmatprep.subr.mxu1 %v5940_v47  ;;  %v6076_v38 = vld [vmem:[%s11373_s30 + $0x2088] sm:$0xff]  ;;  %v6075_v43 = vld [vmem:[%s11373_s30 + $0x2080] sm:$0xff]  ;;  %v5157_v47 = vld [vmem:[%s11373_s30 + $0x3d0] sm:$0xff] }
 0x4b2   : > { %6392 = vmatpush2.msra.mxu0 %v5675_v48  ;;  %v4977_v58 = vmul.f32 %v4968_v50, %v11692_v62  ;;  %v4969_v60 = vmul.f32 %v11701_v59, %v11701_v59  ;;  %6461 = vmatpush2.msra.mxu1 %v5939_v56  ;;  %v4960_v34 = vmul.f32 0.5, %v11701_v59  ;;  %v5149_v56 = vld [vmem:[%s11373_s30 + $0x390] sm:$0xff]  ;;  %v6060_v50 = vld [vmem:[%s11373_s30 + $0x2008] sm:$0xff] }
 0x4b3   : > { %6394 = vmatmul.mubr.f32.vlgmr.msra.gmra.mxu0 %v11699_v4  ;;  %6462 = vmatprep.subr.mxu1 %v5932_v57  ;;  %v6059_v57 = vld [vmem:[%s11373_s30 + $0x2000] sm:$0xff] }
 0x4b4   : > { %6471 = vmatprep.subr.mxu0 %v6180_v55  ;;  %v4986_v25 = vmul.f32 0.044715, %v4977_v58  ;;  %v4978_v20 = vmul.f32 %v4969_v60, %v11701_v59  ;;  %6463 = vmatpush2.msra.mxu1 %v5931_v35  ;;  %v5141_v55 = vld [vmem:[%s11373_s30 + $0x350] sm:$0xff]  ;;  %v5414_v35 = vld [vmem:[%s11373_s30 + $0xbd8] sm:$0xff] }
 0x4b5   : > { %6472 = vmatpush1.msra.mxu0 %v6179_v37  ;;  %6542 = vmatprep.subr.mxu1 %v5158_v9  ;;  %v5134_v37 = vld [vmem:[%s11373_s30 + $0x318] sm:$0xff]  ;;  %v5133_v58 = vld [vmem:[%s11373_s30 + $0x310] sm:$0xff] }
 0x4b6   : > { %6473 = vmatprep.subr.mxu0 %v6172_v5  ;;  %v4995_v3 = vadd.f32 %v4986_v25, %v11692_v62  ;;  %v4987_v53 = vmul.f32 0.044715, %v4978_v20  ;;  %6535 = vmatprep.mubr.f32.mxu0 %v8033_v52  ;;  %v6067_v62 = vld [vmem:[%s11373_s30 + $0x2040] sm:$0xff]  ;;  %v5126_v60 = vld [vmem:[%s11373_s30 + $0x2d8] sm:$0xff]  ;;  %v5125_v9 = vld [vmem:[%s11373_s30 + $0x2d0] sm:$0xff] }
 0x4b7   : > { %6474 = vmatpush1.msra.mxu0 %v6171_v21  ;;  %v5118_v5 = vld [vmem:[%s11373_s30 + $0x298] sm:$0xff]  ;;  %v5117_v21 = vld [vmem:[%s11373_s30 + $0x290] sm:$0xff] }
 0x4b8   : > { %6475 = vmatprep.subr.mxu0 %v6164_v1  ;;  %v5004_v6 = vmul.f32 0.7978846, %v4995_v3  ;;  %v4996_v8 = vadd.f32 %v4987_v53, %v11701_v59  ;;  %v5142_v59 = vld [vmem:[%s11373_s30 + $0x358] sm:$0xff]  ;;  %v5109_v20 = vld [vmem:[%s11373_s30 + $0x250] sm:$0xff] }
 0x4b9   : > { %6476 = vmatpush1.msra.mxu0 %v6163_v39  ;;  %v5110_v25 = vld [vmem:[%s11373_s30 + $0x258] sm:$0xff]  ;;  %v5101_v39 = vld [vmem:[%s11373_s30 + $0x210] sm:$0xff] }
 0x4ba   : > { %6477 = vmatprep.subr.mxu0 %v6156_v7  ;;  %7985 = vtanh.f32 %v5004_v6  ;;  %v5005_v27 = vmul.f32 0.7978846, %v4996_v8  ;;  %v5102_v1 = vld [vmem:[%s11373_s30 + $0x218] sm:$0xff]  ;;  %v5093_v53 = vld [vmem:[%s11373_s30 + $0x1d0] sm:$0xff] }
 0x4bb   : > { %6478 = vmatpush1.msra.mxu0 %v6155_v51  ;;  %v5094_v3 = vld [vmem:[%s11373_s30 + $0x1d8] sm:$0xff]  ;;  %v5085_v51 = vld [vmem:[%s11373_s30 + $0x190] sm:$0xff] }
 0x4bc   : > { %6479 = vmatprep.subr.mxu0 %v6148_v16  ;;  %7987 = vtanh.f32 %v5005_v27  ;;  %v5086_v7 = vld [vmem:[%s11373_s30 + $0x198] sm:$0xff]  ;;  %v5077_v8 = vld [vmem:[%s11373_s30 + $0x150] sm:$0xff] }
 0x4bd   : > { %6480 = vmatpush1.msra.mxu0 %v6147_v13  ;;  %v5078_v6 = vld [vmem:[%s11373_s30 + $0x158] sm:$0xff]  ;;  %v5069_v27 = vld [vmem:[%s11373_s30 + $0x110] sm:$0xff] }
 0x4be   : > { %6481 = vmatprep.subr.mxu0 %v6140_v42  ;;  %v5070_v13 = vld [vmem:[%s11373_s30 + $0x118] sm:$0xff] }
 0x4bf   : > { %6482 = vmatpush1.msra.mxu0 %v6139_v10  ;;  %v5062_v42 = vld [vmem:[%s11373_s30 + $0xd8] sm:$0xff]  ;;  %v5061_v10 = vld [vmem:[%s11373_s30 + $0xd0] sm:$0xff] }
 0x4c0   : > { %6483 = vmatprep.subr.mxu0 %v6132_v12 }
 0x4c1   : > { %6484 = vmatpush1.msra.mxu0 %v6131_v14 }
 0x4c2   : > { %6485 = vmatprep.subr.mxu0 %v6124_v11  ;;  %v5054_v11 = vld [vmem:[%s11373_s30 + $0x98] sm:$0xff] }
 0x4c3   : > { %6486 = vmatpush1.msra.mxu0 %v6123_v45  ;;  %v5053_v45 = vld [vmem:[%s11373_s30 + $0x90] sm:$0xff] }
 0x4c4   : > { %6487 = vmatprep.subr.mxu0 %v6116_v15  ;;  %v5046_v15 = vld [vmem:[%s11373_s30 + $0x58] sm:$0xff] }
 0x4c5   : > { %6488 = vmatpush1.msra.mxu0 %v6115_v17 }
 0x4c6   : > { %6489 = vmatprep.subr.mxu0 %v6108_v18  ;;  %v5045_v18 = vld [vmem:[%s11373_s30 + $0x50] sm:$0xff] }
 0x4c7   : > { %6490 = vmatpush1.msra.mxu0 %v6107_v19  ;;  %v7986_v29 = vpop.eup %7985  ;;  %v7805_v19 = vld [vmem:[%s10729_s18 + $0x8] ss:$0 sm:$0xff] }
 0x4c8   : > { %6491 = vmatprep.subr.mxu0 %v6100_v24  ;;  %v5022_v33 = vadd.f32 1.0, %v7986_v29  ;;  %v5286_v29 = vld [vmem:[%s11373_s30 + $0x7d8] sm:$0xff] }
 0x4c9   : > { %6492 = vmatpush1.msra.mxu0 %v6099_v26  ;;  %v7988_v32 = vpop.eup %7987  ;;  %v5038_v26 = vld [vmem:[%s11373_s30 + $0x18] sm:$0xff] }
 0x4ca   : > { %6493 = vmatprep.subr.mxu0 %v6092_v28  ;;  %v5023_v36 = vadd.f32 1.0, %v7988_v32  ;;  %v11747_v0 = vmul.f32 %v5022_v33, %v4959_v41  ;;  %v5037_v28 = vld [vmem:[%s11373_s30 + $0x10] sm:$0xff] }
 0x4cb   : > { %6494 = vmatpush1.msra.mxu0 %v6091_v30  ;;  %v5285_v32 = vld [vmem:[%s11373_s30 + $0x7d0] sm:$0xff] }
 0x4cc   : > { %6495 = vmatprep.subr.mxu0 %v6084_v49  ;;  %v11744_v48 = vmul.f32 %v5023_v36, %v4960_v34  ;;  %v5277_v34 = vld [vmem:[%s11373_s30 + $0x790] sm:$0xff] }
 0x4cd   : > { %6496 = vmatpush1.msra.mxu0 %v6083_v23  ;;  %v7856_v16 = vpop.f32.mrf.mxu0  ;;  %v5278_v23 = vld [vmem:[%s11373_s30 + $0x798] sm:$0xff] }
 0x4ce   : > { %6497 = vmatprep.subr.mxu0 %v6076_v38  ;;  %6464 = vmatprep.mubr.f32.mxu1 %v11744_v48  ;;  %v5270_v38 = vld [vmem:[%s11373_s30 + $0x758] sm:$0xff] }
 0x4cf   : > { %6498 = vmatpush1.msra.mxu0 %v6075_v43  ;;  %6465 = vmatmul.mubr.f32.vlgmr.msra.gmra.mxu1 %v11747_v0  ;;  %v7857_v12 = vpop.f32.mrf.mxu0  ;;  %v7891_v14 = vpop.f32.mrf.mxu1 }
 0x4d0   : > { %6499 = vmatprep.subr.mxu0 %v6068_v44  ;;  %6543 = vmatpush1.msra.mxu1 %v5157_v47  ;;  %v7858_v17 = vadd.f32 %v7857_v12, %v7856_v16  ;;  %v5269_v44 = vld [vmem:[%s11373_s30 + $0x750] sm:$0xff]  ;;  %v5198_v16 = vld [vmem:[%s11373_s30 + $0x518] sm:$0xff] }
 0x4d1   : > { %6606 = vmatprep.mubr.f32.mxu1 %v11386_v54  ;;  %6544 = vmatprep.subr.mxu1 %v5150_v2  ;;  %v7892_v24 = vpop.f32.mrf.mxu1  ;;  %v5262_v2 = vld [vmem:[%s11373_s30 + $0x718] sm:$0xff]  ;;  %v5181_v12 = vld [vmem:[%s11373_s30 + $0x490] sm:$0xff] }
 0x4d2   : > { %6500 = vmatpush1.msra.mxu0 %v6067_v62  ;;  %6545 = vmatpush1.msra.mxu1 %v5149_v56  ;;  %v4740_v30 = vadd.f32 %v7858_v17, %v7805_v19  ;;  %v7893_v49 = vadd.f32 %v7892_v24, %v7891_v14  ;;  %v5261_v56 = vld [vmem:[%s11373_s30 + $0x710] sm:$0xff]  ;;  %v5174_v14 = vld [vmem:[%s11373_s30 + $0x458] sm:$0xff] }
 0x4d3   : > { %6501 = vmatprep.subr.mxu0 %v6060_v50  ;;  %6546 = vmatprep.subr.mxu1 %v5142_v59  ;;  %v5254_v59 = vld [vmem:[%s11373_s30 + $0x6d8] sm:$0xff] }
 0x4d4   : > { %6502 = vmatpush1.msra.mxu0 %v6059_v57  ;;  %6547 = vmatpush1.msra.mxu1 %v5141_v55  ;;  %v4810_v41 = vadd.f32 %v7893_v49, %v4740_v30  ;;  %v5253_v55 = vld [vmem:[%s11373_s30 + $0x6d0] sm:$0xff]  ;;  %v5670_v17 = vld [vmem:[%s11373_s30 + $0x13d8] sm:$0xff] }
 0x4d5   : > { %6613 = vmatprep.subr.mxu0 %v5414_v35  ;;  %6548 = vmatprep.subr.mxu1 %v5134_v37  ;;  %v5246_v35 = vld [vmem:[%s11373_s30 + $0x698] sm:$0xff] }
 0x4d6   : > { %6549 = vmatpush1.msra.mxu1 %v5133_v58  ;;  %v5245_v58 = vld [vmem:[%s11373_s30 + $0x690] sm:$0xff]  ;;  %v5662_v24 = vld [vmem:[%s11373_s30 + $0x1398] sm:$0xff] }
 0x4d7   : > { %6550 = vmatprep.subr.mxu1 %v5126_v60  ;;  %v5238_v60 = vld [vmem:[%s11373_s30 + $0x658] sm:$0xff] }
 0x4d8   : > { %6551 = vmatpush1.msra.mxu1 %v5125_v9  ;;  %v5654_v30 = vld [vmem:[%s11373_s30 + $0x1358] sm:$0xff] }
 0x4d9   : > { %6552 = vmatprep.subr.mxu1 %v5118_v5  ;;  %v5237_v5 = vld [vmem:[%s11373_s30 + $0x650] sm:$0xff] }
 0x4da   : > { %6553 = vmatpush1.msra.mxu1 %v5117_v21  ;;  %v5230_v21 = vld [vmem:[%s11373_s30 + $0x618] sm:$0xff] }
 0x4db   : > { %6554 = vmatprep.subr.mxu1 %v5110_v25 }
 0x4dc   : > { %6555 = vmatpush1.msra.mxu1 %v5109_v20  ;;  %v5229_v20 = vld [vmem:[%s11373_s30 + $0x610] sm:$0xff] }
 0x4dd   : > { %6556 = vmatprep.subr.mxu1 %v5102_v1  ;;  %v5222_v1 = vld [vmem:[%s11373_s30 + $0x5d8] sm:$0xff] }
 0x4de   : > { %6557 = vmatpush1.msra.mxu1 %v5101_v39 }
 0x4df   : > { %6558 = vmatprep.subr.mxu1 %v5094_v3  ;;  %v5221_v3 = vld [vmem:[%s11373_s30 + $0x5d0] sm:$0xff] }
 0x4e0   : > { %6559 = vmatpush1.msra.mxu1 %v5093_v53  ;;  %v5214_v53 = vld [vmem:[%s11373_s30 + $0x598] sm:$0xff] }
 0x4e1   : > { %6560 = vmatprep.subr.mxu1 %v5086_v7 }
 0x4e2   : > { %6561 = vmatpush1.msra.mxu1 %v5085_v51  ;;  %v5213_v51 = vld [vmem:[%s11373_s30 + $0x590] sm:$0xff] }
 0x4e3   : > { %6562 = vmatprep.subr.mxu1 %v5078_v6  ;;  %v5206_v6 = vld [vmem:[%s11373_s30 + $0x558] sm:$0xff] }
 0x4e4   : > { %6563 = vmatpush1.msra.mxu1 %v5077_v8  ;;  %v5205_v8 = vld [vmem:[%s11373_s30 + $0x550] sm:$0xff] }
 0x4e5   : > { %6564 = vmatprep.subr.mxu1 %v5070_v13  ;;  %v5197_v13 = vld [vmem:[%s11373_s30 + $0x510] sm:$0xff] }
 0x4e6   : > { %6565 = vmatpush1.msra.mxu1 %v5069_v27  ;;  %v5190_v27 = vld [vmem:[%s11373_s30 + $0x4d8] sm:$0xff] }
 0x4e7   : > { %6566 = vmatprep.subr.mxu1 %v5062_v42  ;;  %v5189_v42 = vld [vmem:[%s11373_s30 + $0x4d0] sm:$0xff] }
 0x4e8   : > { %6567 = vmatpush1.msra.mxu1 %v5061_v10  ;;  %v5182_v10 = vld [vmem:[%s11373_s30 + $0x498] sm:$0xff] }
 0x4e9   : > { %6568 = vmatprep.subr.mxu1 %v5054_v11  ;;  %v5173_v11 = vld [vmem:[%s11373_s30 + $0x450] sm:$0xff] }
 0x4ea   : > { %6569 = vmatpush1.msra.mxu1 %v5053_v45  ;;  %v5166_v45 = vld [vmem:[%s11373_s30 + $0x418] sm:$0xff] }
 0x4eb   : > { %6570 = vmatprep.subr.mxu1 %v5046_v15  ;;  %v5165_v15 = vld [vmem:[%s11373_s30 + $0x410] sm:$0xff] }
 0x4ec   : > { %6571 = vmatpush1.msra.mxu1 %v5045_v18  ;;  %v5669_v18 = vld [vmem:[%s11373_s30 + $0x13d0] sm:$0xff] }
 0x4ed   : > { %6572 = vmatprep.subr.mxu1 %v5038_v26 }
 0x4ee   : > { %6573 = vmatpush1.msra.mxu1 %v5037_v28 }
 0x4ef   : > { %v7926_v33 = vpop.f32.mrf.mxu0  ;;  %6574 = vmatprep.subr.mxu1 %v5286_v29  ;;  %v5661_v29 = vld [vmem:[%s11373_s30 + $0x1390] sm:$0xff] }
 0x4f0   : > { %6575 = vmatpush2.msra.mxu1 %v5285_v32  ;;  %v5413_v32 = vld [vmem:[%s11373_s30 + $0xbd0] sm:$0xff] }
 0x4f1   : > { %v7927_v36 = vpop.f32.mrf.mxu0  ;;  %6576 = vmatprep.subr.mxu1 %v5278_v23  ;;  %v5653_v23 = vld [vmem:[%s11373_s30 + $0x1350] sm:$0xff] }
 0x4f2   : > { %v7928_v43 = vadd.f32 %v7927_v36, %v7926_v33  ;;  %v4949_v47 = vpop.f32.mrf.mxu1  ;;  %6577 = vmatpush2.msra.mxu1 %v5277_v34  ;;  %v5406_v33 = vld [vmem:[%s11373_s30 + $0xb98] sm:$0xff]  ;;  %v5405_v34 = vld [vmem:[%s11373_s30 + $0xb90] sm:$0xff] }
 0x4f3   : > { %6578 = vmatprep.subr.mxu1 %v5270_v38  ;;  %v5646_v36 = vld [vmem:[%s11373_s30 + $0x1318] sm:$0xff] }
 0x4f4   : > { %v4880_v62 = vadd.f32 %v7928_v43, %v4810_v41  ;;  %v4951_v50 = vpop.f32.mrf.mxu1  ;;  %6579 = vmatpush2.msra.mxu1 %v5269_v44  ;;  %v5398_v38 = vld [vmem:[%s11373_s30 + $0xb58] sm:$0xff]  ;;  %v5645_v41 = vld [vmem:[%s11373_s30 + $0x1310] sm:$0xff] }
 0x4f5   : > { %6580 = vmatprep.subr.mxu1 %v5262_v2  ;;  %v5397_v43 = vld [vmem:[%s11373_s30 + $0xb50] sm:$0xff]  ;;  %v5638_v44 = vld [vmem:[%s11373_s30 + $0x12d8] sm:$0xff] }
 0x4f6   : > { %v4950_v57 = vadd.f32 %v4949_v47, %v4880_v62  ;;  %6581 = vmatpush2.msra.mxu1 %v5261_v56  ;;  %v5390_v47 = vld [vmem:[%s11373_s30 + $0xb18] sm:$0xff]  ;;  %v5637_v2 = vld [vmem:[%s11373_s30 + $0x12d0] sm:$0xff] }
 0x4f7   : > { %6582 = vmatprep.subr.mxu1 %v5254_v59  ;;  %v5389_v62 = vld [vmem:[%s11373_s30 + $0xb10] sm:$0xff]  ;;  %v5630_v56 = vld [vmem:[%s11373_s30 + $0x1298] sm:$0xff] }
 0x4f8   : > { %v4970_v37 = vmul.f32 %v4950_v57, %v4950_v57  ;;  %6583 = vmatpush2.msra.mxu1 %v5253_v55  ;;  %v4961_v26 = vmul.f32 0.5, %v4950_v57  ;;  %v5382_v50 = vld [vmem:[%s11373_s30 + $0xad8] sm:$0xff]  ;;  %v5629_v59 = vld [vmem:[%s11373_s30 + $0x1290] sm:$0xff] }
 0x4f9   : > { %6584 = vmatprep.subr.mxu1 %v5246_v35  ;;  %v5622_v55 = vld [vmem:[%s11373_s30 + $0x1258] sm:$0xff] }
 0x4fa   : > { %v4979_v9 = vmul.f32 %v4970_v37, %v4950_v57  ;;  %6585 = vmatpush2.msra.mxu1 %v5245_v58  ;;  %v5374_v35 = vld [vmem:[%s11373_s30 + $0xa98] sm:$0xff]  ;;  %v5621_v37 = vld [vmem:[%s11373_s30 + $0x1250] sm:$0xff] }
 0x4fb   : > { %6586 = vmatprep.subr.mxu1 %v5238_v60  ;;  %v5373_v58 = vld [vmem:[%s11373_s30 + $0xa90] sm:$0xff]  ;;  %v5614_v60 = vld [vmem:[%s11373_s30 + $0x1218] sm:$0xff] }
 0x4fc   : > { %v4988_v25 = vmul.f32 0.044715, %v4979_v9  ;;  %6587 = vmatpush2.msra.mxu1 %v5237_v5  ;;  %v5366_v9 = vld [vmem:[%s11373_s30 + $0xa58] sm:$0xff]  ;;  %v5613_v5 = vld [vmem:[%s11373_s30 + $0x1210] sm:$0xff] }
 0x4fd   : > { %6588 = vmatprep.subr.mxu1 %v5230_v21  ;;  %v5365_v21 = vld [vmem:[%s11373_s30 + $0xa50] sm:$0xff] }
 0x4fe   : > { %v4997_v39 = vadd.f32 %v4988_v25, %v4950_v57  ;;  %6589 = vmatpush2.msra.mxu1 %v5229_v20  ;;  %v5381_v57 = vld [vmem:[%s11373_s30 + $0xad0] sm:$0xff]  ;;  %v5606_v25 = vld [vmem:[%s11373_s30 + $0x11d8] sm:$0xff] }
 0x4ff   : > { %6590 = vmatprep.subr.mxu1 %v5222_v1  ;;  %v5358_v20 = vld [vmem:[%s11373_s30 + $0xa18] sm:$0xff]  ;;  %v5605_v1 = vld [vmem:[%s11373_s30 + $0x11d0] sm:$0xff] }
 0x500   : > { %v5006_v7 = vmul.f32 0.7978846, %v4997_v39  ;;  %6591 = vmatpush2.msra.mxu1 %v5221_v3  ;;  %v5357_v39 = vld [vmem:[%s11373_s30 + $0xa10] sm:$0xff]  ;;  %v5598_v3 = vld [vmem:[%s11373_s30 + $0x1198] sm:$0xff] }
 0x501   : > { %6592 = vmatprep.subr.mxu1 %v5214_v53  ;;  %v5350_v53 = vld [vmem:[%s11373_s30 + $0x9d8] sm:$0xff] }
 0x502   : > { %7989 = vtanh.f32 %v5006_v7  ;;  %6593 = vmatpush2.msra.mxu1 %v5213_v51  ;;  %v5597_v7 = vld [vmem:[%s11373_s30 + $0x1190] sm:$0xff] }
 0x503   : > { %6594 = vmatprep.subr.mxu1 %v5206_v6  ;;  %v5349_v51 = vld [vmem:[%s11373_s30 + $0x9d0] sm:$0xff]  ;;  %v5590_v6 = vld [vmem:[%s11373_s30 + $0x1158] sm:$0xff] }
 0x504   : > { %6595 = vmatpush2.msra.mxu1 %v5205_v8  ;;  %v5342_v8 = vld [vmem:[%s11373_s30 + $0x998] sm:$0xff] }
 0x505   : > { %6596 = vmatprep.subr.mxu1 %v5198_v16  ;;  %v5589_v16 = vld [vmem:[%s11373_s30 + $0x1150] sm:$0xff] }
 0x506   : > { %6597 = vmatpush2.msra.mxu1 %v5197_v13  ;;  %v5341_v13 = vld [vmem:[%s11373_s30 + $0x990] sm:$0xff] }
 0x507   : > { %6598 = vmatprep.subr.mxu1 %v5190_v27  ;;  %v5582_v27 = vld [vmem:[%s11373_s30 + $0x1118] sm:$0xff] }
 0x508   : > { %6599 = vmatpush2.msra.mxu1 %v5189_v42  ;;  %v5334_v42 = vld [vmem:[%s11373_s30 + $0x958] sm:$0xff] }
 0x509   : > { %6600 = vmatprep.subr.mxu1 %v5182_v10  ;;  %v5581_v10 = vld [vmem:[%s11373_s30 + $0x1110] sm:$0xff] }
 0x50a   : > { %6601 = vmatpush2.msra.mxu1 %v5181_v12  ;;  %v5333_v12 = vld [vmem:[%s11373_s30 + $0x950] sm:$0xff] }
 0x50b   : > { %6602 = vmatprep.subr.mxu1 %v5174_v14  ;;  %v5574_v14 = vld [vmem:[%s11373_s30 + $0x10d8] sm:$0xff] }
 0x50c   : > { %6603 = vmatpush2.msra.mxu1 %v5173_v11  ;;  %v5326_v11 = vld [vmem:[%s11373_s30 + $0x918] sm:$0xff] }
 0x50d   : > { %6604 = vmatprep.subr.mxu1 %v5166_v45  ;;  %v5573_v45 = vld [vmem:[%s11373_s30 + $0x10d0] sm:$0xff] }
 0x50e   : > { %6605 = vmatpush2.msra.mxu1 %v5165_v15  ;;  %v5325_v15 = vld [vmem:[%s11373_s30 + $0x910] sm:$0xff] }
 0x50f   : > { %v7990_v19 = vpop.eup %7989  ;;  %6607 = vmatmul.mubr.f32.vlgmr.msra.gmra.mxu1 %v11547_v46  ;;  %6684 = vmatprep.subr.mxu1 %v5670_v17  ;;  %v5566_v17 = vld [vmem:[%s11373_s30 + $0x1098] sm:$0xff] }
 0x510   : > { %v5024_v28 = vadd.f32 1.0, %v7990_v19  ;;  %6685 = vmatpush1.msra.mxu1 %v5669_v18  ;;  %6748 = vmatprep.mubr.f32.mxu1 %v11551_v61  ;;  %v5318_v18 = vld [vmem:[%s11373_s30 + $0x8d8] sm:$0xff]  ;;  %v5565_v19 = vld [vmem:[%s11373_s30 + $0x1090] sm:$0xff] }
 0x511   : > { %6686 = vmatprep.subr.mxu1 %v5662_v24  ;;  %v5317_v24 = vld [vmem:[%s11373_s30 + $0x8d0] sm:$0xff] }
 0x512   : > { %v11827_v49 = vmul.f32 %v5024_v28, %v4961_v26  ;;  %6687 = vmatpush1.msra.mxu1 %v5661_v29  ;;  %v5558_v26 = vld [vmem:[%s11373_s30 + $0x1058] sm:$0xff]  ;;  %v5557_v29 = vld [vmem:[%s11373_s30 + $0x1050] sm:$0xff] }
 0x513   : > { %6688 = vmatprep.subr.mxu1 %v5654_v30  ;;  %v5310_v28 = vld [vmem:[%s11373_s30 + $0x898] sm:$0xff]  ;;  %v5309_v30 = vld [vmem:[%s11373_s30 + $0x890] sm:$0xff] }
 0x514   : > { %6536 = vmatmul.mubr.f32.vlgmr.msra.gmra.mxu0 %v11827_v49  ;;  %6689 = vmatpush1.msra.mxu1 %v5653_v23  ;;  %v5549_v23 = vld [vmem:[%s11373_s30 + $0x1010] sm:$0xff] }
 0x515   : > { %6614 = vmatpush1.msra.mxu0 %v5413_v32  ;;  %6677 = vmatprep.mubr.f32.mxu0 %v11398_v22  ;;  %v5550_v32 = vld [vmem:[%s11373_s30 + $0x1018] sm:$0xff] }
 0x516   : > { %6615 = vmatprep.subr.mxu0 %v5406_v33  ;;  %6690 = vmatprep.subr.mxu1 %v5646_v36  ;;  %v5302_v33 = vld [vmem:[%s11373_s30 + $0x858] sm:$0xff] }
 0x517   : > { %6616 = vmatpush1.msra.mxu0 %v5405_v34  ;;  %6691 = vmatpush1.msra.mxu1 %v5645_v41  ;;  %v5301_v34 = vld [vmem:[%s11373_s30 + $0x850] sm:$0xff]  ;;  %v5798_v36 = vld [vmem:[%s11373_s30 + $0x17d8] sm:$0xff] }
 0x518   : > { %6617 = vmatprep.subr.mxu0 %v5398_v38  ;;  %6692 = vmatprep.subr.mxu1 %v5638_v44  ;;  %v5294_v38 = vld [vmem:[%s11373_s30 + $0x818] sm:$0xff]  ;;  %v5797_v41 = vld [vmem:[%s11373_s30 + $0x17d0] sm:$0xff] }
 0x519   : > { %6618 = vmatpush1.msra.mxu0 %v5397_v43  ;;  %6693 = vmatpush1.msra.mxu1 %v5637_v2  ;;  %v5293_v43 = vld [vmem:[%s11373_s30 + $0x810] sm:$0xff]  ;;  %v5790_v44 = vld [vmem:[%s11373_s30 + $0x1798] sm:$0xff] }
 0x51a   : > { %6619 = vmatprep.subr.mxu0 %v5390_v47  ;;  %6694 = vmatprep.subr.mxu1 %v5630_v56  ;;  %v5542_v47 = vld [vmem:[%s11373_s30 + $0xfd8] sm:$0xff]  ;;  %v5789_v2 = vld [vmem:[%s11373_s30 + $0x1790] sm:$0xff] }
 0x51b   : > { %6620 = vmatpush1.msra.mxu0 %v5389_v62  ;;  %6695 = vmatpush1.msra.mxu1 %v5629_v59  ;;  %v5541_v62 = vld [vmem:[%s11373_s30 + $0xfd0] sm:$0xff]  ;;  %v5782_v56 = vld [vmem:[%s11373_s30 + $0x1758] sm:$0xff] }
 0x51c   : > { %6621 = vmatprep.subr.mxu0 %v5382_v50  ;;  %6696 = vmatprep.subr.mxu1 %v5622_v55  ;;  %v5534_v50 = vld [vmem:[%s11373_s30 + $0xf98] sm:$0xff]  ;;  %v5781_v59 = vld [vmem:[%s11373_s30 + $0x1750] sm:$0xff] }
 0x51d   : > { %6622 = vmatpush1.msra.mxu0 %v5381_v57  ;;  %6697 = vmatpush1.msra.mxu1 %v5621_v37  ;;  %v5533_v57 = vld [vmem:[%s11373_s30 + $0xf90] sm:$0xff]  ;;  %v5774_v55 = vld [vmem:[%s11373_s30 + $0x1718] sm:$0xff] }
 0x51e   : > { %6623 = vmatprep.subr.mxu0 %v5374_v35  ;;  %6698 = vmatprep.subr.mxu1 %v5614_v60  ;;  %v5526_v35 = vld [vmem:[%s11373_s30 + $0xf58] sm:$0xff]  ;;  %v5773_v37 = vld [vmem:[%s11373_s30 + $0x1710] sm:$0xff] }
 0x51f   : > { %6624 = vmatpush1.msra.mxu0 %v5373_v58  ;;  %6699 = vmatpush1.msra.mxu1 %v5613_v5  ;;  %v5525_v58 = vld [vmem:[%s11373_s30 + $0xf50] sm:$0xff]  ;;  %v5766_v60 = vld [vmem:[%s11373_s30 + $0x16d8] sm:$0xff] }
 0x520   : > { %6625 = vmatprep.subr.mxu0 %v5366_v9  ;;  %6700 = vmatprep.subr.mxu1 %v5606_v25  ;;  %v5518_v9 = vld [vmem:[%s11373_s30 + $0xf18] sm:$0xff]  ;;  %v5765_v5 = vld [vmem:[%s11373_s30 + $0x16d0] sm:$0xff] }
 0x521   : > { %6626 = vmatpush1.msra.mxu0 %v5365_v21  ;;  %6701 = vmatpush1.msra.mxu1 %v5605_v1  ;;  %v5517_v21 = vld [vmem:[%s11373_s30 + $0xf10] sm:$0xff]  ;;  %v5758_v25 = vld [vmem:[%s11373_s30 + $0x1698] sm:$0xff] }
 0x522   : > { %6627 = vmatprep.subr.mxu0 %v5358_v20  ;;  %6702 = vmatprep.subr.mxu1 %v5598_v3  ;;  %v5510_v20 = vld [vmem:[%s11373_s30 + $0xed8] sm:$0xff]  ;;  %v5757_v1 = vld [vmem:[%s11373_s30 + $0x1690] sm:$0xff] }
 0x523   : > { %6628 = vmatpush1.msra.mxu0 %v5357_v39  ;;  %6703 = vmatpush1.msra.mxu1 %v5597_v7  ;;  %v5509_v39 = vld [vmem:[%s11373_s30 + $0xed0] sm:$0xff]  ;;  %v5750_v3 = vld [vmem:[%s11373_s30 + $0x1658] sm:$0xff] }
 0x524   : > { %6629 = vmatprep.subr.mxu0 %v5350_v53  ;;  %6704 = vmatprep.subr.mxu1 %v5590_v6  ;;  %v5502_v53 = vld [vmem:[%s11373_s30 + $0xe98] sm:$0xff]  ;;  %v5749_v7 = vld [vmem:[%s11373_s30 + $0x1650] sm:$0xff] }
 0x525   : > { %6630 = vmatpush1.msra.mxu0 %v5349_v51  ;;  %6705 = vmatpush1.msra.mxu1 %v5589_v16  ;;  %v5501_v51 = vld [vmem:[%s11373_s30 + $0xe90] sm:$0xff]  ;;  %v5742_v6 = vld [vmem:[%s11373_s30 + $0x1618] sm:$0xff] }
 0x526   : > { %6631 = vmatprep.subr.mxu0 %v5342_v8  ;;  %6706 = vmatprep.subr.mxu1 %v5582_v27  ;;  %v5494_v8 = vld [vmem:[%s11373_s30 + $0xe58] sm:$0xff]  ;;  %v5741_v16 = vld [vmem:[%s11373_s30 + $0x1610] sm:$0xff] }
 0x527   : > { %6632 = vmatpush1.msra.mxu0 %v5341_v13  ;;  %6707 = vmatpush1.msra.mxu1 %v5581_v10  ;;  %v5493_v13 = vld [vmem:[%s11373_s30 + $0xe50] sm:$0xff]  ;;  %v5734_v27 = vld [vmem:[%s11373_s30 + $0x15d8] sm:$0xff] }
 0x528   : > { %6633 = vmatprep.subr.mxu0 %v5334_v42  ;;  %6708 = vmatprep.subr.mxu1 %v5574_v14  ;;  %v5486_v42 = vld [vmem:[%s11373_s30 + $0xe18] sm:$0xff]  ;;  %v5733_v10 = vld [vmem:[%s11373_s30 + $0x15d0] sm:$0xff] }
 0x529   : > { %6634 = vmatpush1.msra.mxu0 %v5333_v12  ;;  %6709 = vmatpush1.msra.mxu1 %v5573_v45  ;;  %v5485_v12 = vld [vmem:[%s11373_s30 + $0xe10] sm:$0xff]  ;;  %v5726_v14 = vld [vmem:[%s11373_s30 + $0x1598] sm:$0xff] }
 0x52a   : > { %6635 = vmatprep.subr.mxu0 %v5326_v11  ;;  %6710 = vmatprep.subr.mxu1 %v5566_v17  ;;  %v5478_v11 = vld [vmem:[%s11373_s30 + $0xdd8] sm:$0xff]  ;;  %v5725_v45 = vld [vmem:[%s11373_s30 + $0x1590] sm:$0xff] }
 0x52b   : > { %6636 = vmatpush1.msra.mxu0 %v5325_v15  ;;  %6711 = vmatpush1.msra.mxu1 %v5565_v19  ;;  %v5477_v15 = vld [vmem:[%s11373_s30 + $0xdd0] sm:$0xff]  ;;  %v5718_v17 = vld [vmem:[%s11373_s30 + $0x1558] sm:$0xff] }
 0x52c   : > { %6637 = vmatprep.subr.mxu0 %v5318_v18  ;;  %6712 = vmatprep.subr.mxu1 %v5558_v26  ;;  %v5470_v18 = vld [vmem:[%s11373_s30 + $0xd98] sm:$0xff]  ;;  %v5717_v19 = vld [vmem:[%s11373_s30 + $0x1550] sm:$0xff] }
 0x52d   : > { %6638 = vmatpush1.msra.mxu0 %v5317_v24  ;;  %6713 = vmatpush1.msra.mxu1 %v5557_v29  ;;  %v5469_v24 = vld [vmem:[%s11373_s30 + $0xd90] sm:$0xff]  ;;  %v5710_v26 = vld [vmem:[%s11373_s30 + $0x1518] sm:$0xff] }
 0x52e   : > { %6639 = vmatprep.subr.mxu0 %v5310_v28  ;;  %6714 = vmatprep.subr.mxu1 %v5550_v32  ;;  %v5462_v28 = vld [vmem:[%s11373_s30 + $0xd58] sm:$0xff]  ;;  %v5709_v29 = vld [vmem:[%s11373_s30 + $0x1510] sm:$0xff] }
 0x52f   : > { %6640 = vmatpush1.msra.mxu0 %v5309_v30  ;;  %6715 = vmatpush1.msra.mxu1 %v5549_v23  ;;  %v5461_v30 = vld [vmem:[%s11373_s30 + $0xd50] sm:$0xff]  ;;  %v5702_v32 = vld [vmem:[%s11373_s30 + $0x14d8] sm:$0xff] }
 0x530   : > { %6641 = vmatprep.subr.mxu0 %v5302_v33  ;;  %6716 = vmatprep.subr.mxu1 %v5798_v36  ;;  %v5454_v33 = vld [vmem:[%s11373_s30 + $0xd18] sm:$0xff]  ;;  %v5701_v23 = vld [vmem:[%s11373_s30 + $0x14d0] sm:$0xff] }
 0x531   : > { %6642 = vmatpush1.msra.mxu0 %v5301_v34  ;;  %6717 = vmatpush2.msra.mxu1 %v5797_v41  ;;  %v5453_v34 = vld [vmem:[%s11373_s30 + $0xd10] sm:$0xff]  ;;  %v5694_v36 = vld [vmem:[%s11373_s30 + $0x1498] sm:$0xff] }
 0x532   : > { %6643 = vmatprep.subr.mxu0 %v5294_v38  ;;  %6718 = vmatprep.subr.mxu1 %v5790_v44  ;;  %v5446_v38 = vld [vmem:[%s11373_s30 + $0xcd8] sm:$0xff]  ;;  %v5693_v41 = vld [vmem:[%s11373_s30 + $0x1490] sm:$0xff] }
 0x533   : > { %6644 = vmatpush1.msra.mxu0 %v5293_v43  ;;  %6719 = vmatpush2.msra.mxu1 %v5789_v2  ;;  %v5445_v43 = vld [vmem:[%s11373_s30 + $0xcd0] sm:$0xff]  ;;  %v5686_v44 = vld [vmem:[%s11373_s30 + $0x1458] sm:$0xff] }
 0x534   : > { %6645 = vmatprep.subr.mxu0 %v5542_v47  ;;  %6720 = vmatprep.subr.mxu1 %v5782_v56  ;;  %v5438_v47 = vld [vmem:[%s11373_s30 + $0xc98] sm:$0xff]  ;;  %v5685_v2 = vld [vmem:[%s11373_s30 + $0x1450] sm:$0xff] }
 0x535   : > { %6646 = vmatpush2.msra.mxu0 %v5541_v62  ;;  %6721 = vmatpush2.msra.mxu1 %v5781_v59  ;;  %v5437_v62 = vld [vmem:[%s11373_s30 + $0xc90] sm:$0xff]  ;;  %v5678_v56 = vld [vmem:[%s11373_s30 + $0x1418] sm:$0xff] }
 0x536   : > { %6647 = vmatprep.subr.mxu0 %v5534_v50  ;;  %6722 = vmatprep.subr.mxu1 %v5774_v55  ;;  %v5430_v50 = vld [vmem:[%s11373_s30 + $0xc58] sm:$0xff]  ;;  %v5677_v59 = vld [vmem:[%s11373_s30 + $0x1410] sm:$0xff] }
 0x537   : > { %6648 = vmatpush2.msra.mxu0 %v5533_v57  ;;  %6723 = vmatpush2.msra.mxu1 %v5773_v37  ;;  %v5429_v57 = vld [vmem:[%s11373_s30 + $0xc50] sm:$0xff]  ;;  %v5422_v55 = vld [vmem:[%s11373_s30 + $0xc18] sm:$0xff] }
 0x538   : > { %6649 = vmatprep.subr.mxu0 %v5526_v35  ;;  %6724 = vmatprep.subr.mxu1 %v5766_v60  ;;  %v6182_v35 = vld [vmem:[%s11373_s30 + $0x23d8] sm:$0xff]  ;;  %v5421_v37 = vld [vmem:[%s11373_s30 + $0xc10] sm:$0xff] }
 0x539   : > { %6650 = vmatpush2.msra.mxu0 %v5525_v58  ;;  %6725 = vmatpush2.msra.mxu1 %v5765_v5  ;;  %v6181_v58 = vld [vmem:[%s11373_s30 + $0x23d0] sm:$0xff]  ;;  %v5926_v60 = vld [vmem:[%s11373_s30 + $0x1bd8] sm:$0xff] }
 0x53a   : > { %6651 = vmatprep.subr.mxu0 %v5518_v9  ;;  %6726 = vmatprep.subr.mxu1 %v5758_v25  ;;  %v5925_v9 = vld [vmem:[%s11373_s30 + $0x1bd0] sm:$0xff]  ;;  %v6174_v5 = vld [vmem:[%s11373_s30 + $0x2398] sm:$0xff] }
 0x53b   : > { %6652 = vmatpush2.msra.mxu0 %v5517_v21  ;;  %6727 = vmatpush2.msra.mxu1 %v5757_v1  ;;  %v5918_v21 = vld [vmem:[%s11373_s30 + $0x1b98] sm:$0xff]  ;;  %v6173_v25 = vld [vmem:[%s11373_s30 + $0x2390] sm:$0xff] }
 0x53c   : > { %6653 = vmatprep.subr.mxu0 %v5510_v20  ;;  %6728 = vmatprep.subr.mxu1 %v5750_v3  ;;  %v5917_v20 = vld [vmem:[%s11373_s30 + $0x1b90] sm:$0xff]  ;;  %v6166_v1 = vld [vmem:[%s11373_s30 + $0x2358] sm:$0xff] }
 0x53d   : > { %6654 = vmatpush2.msra.mxu0 %v5509_v39  ;;  %6729 = vmatpush2.msra.mxu1 %v5749_v7  ;;  %v5910_v39 = vld [vmem:[%s11373_s30 + $0x1b58] sm:$0xff]  ;;  %v6165_v3 = vld [vmem:[%s11373_s30 + $0x2350] sm:$0xff] }
 0x53e   : > { %6655 = vmatprep.subr.mxu0 %v5502_v53  ;;  %6730 = vmatprep.subr.mxu1 %v5742_v6  ;;  %v5909_v53 = vld [vmem:[%s11373_s30 + $0x1b50] sm:$0xff]  ;;  %v6158_v7 = vld [vmem:[%s11373_s30 + $0x2318] sm:$0xff] }
 0x53f   : > { %6656 = vmatpush2.msra.mxu0 %v5501_v51  ;;  %6731 = vmatpush2.msra.mxu1 %v5741_v16  ;;  %v5902_v51 = vld [vmem:[%s11373_s30 + $0x1b18] sm:$0xff]  ;;  %v6157_v6 = vld [vmem:[%s11373_s30 + $0x2310] sm:$0xff] }
 0x540   : > { %6657 = vmatprep.subr.mxu0 %v5494_v8  ;;  %6732 = vmatprep.subr.mxu1 %v5734_v27  ;;  %v5901_v8 = vld [vmem:[%s11373_s30 + $0x1b10] sm:$0xff]  ;;  %v6150_v16 = vld [vmem:[%s11373_s30 + $0x22d8] sm:$0xff] }
 0x541   : > { %6658 = vmatpush2.msra.mxu0 %v5493_v13  ;;  %6733 = vmatpush2.msra.mxu1 %v5733_v10  ;;  %v5894_v13 = vld [vmem:[%s11373_s30 + $0x1ad8] sm:$0xff]  ;;  %v6149_v27 = vld [vmem:[%s11373_s30 + $0x22d0] sm:$0xff] }
 0x542   : > { %6659 = vmatprep.subr.mxu0 %v5486_v42  ;;  %6734 = vmatprep.subr.mxu1 %v5726_v14  ;;  %v5893_v42 = vld [vmem:[%s11373_s30 + $0x1ad0] sm:$0xff]  ;;  %v6142_v10 = vld [vmem:[%s11373_s30 + $0x2298] sm:$0xff] }
 0x543   : > { %6660 = vmatpush2.msra.mxu0 %v5485_v12  ;;  %6735 = vmatpush2.msra.mxu1 %v5725_v45  ;;  %v5886_v12 = vld [vmem:[%s11373_s30 + $0x1a98] sm:$0xff]  ;;  %v6141_v14 = vld [vmem:[%s11373_s30 + $0x2290] sm:$0xff] }
 0x544   : > { %6661 = vmatprep.subr.mxu0 %v5478_v11  ;;  %6736 = vmatprep.subr.mxu1 %v5718_v17  ;;  %v5885_v11 = vld [vmem:[%s11373_s30 + $0x1a90] sm:$0xff]  ;;  %v6134_v45 = vld [vmem:[%s11373_s30 + $0x2258] sm:$0xff] }
 0x545   : > { %6662 = vmatpush2.msra.mxu0 %v5477_v15  ;;  %6737 = vmatpush2.msra.mxu1 %v5717_v19  ;;  %v5878_v15 = vld [vmem:[%s11373_s30 + $0x1a58] sm:$0xff]  ;;  %v6133_v17 = vld [vmem:[%s11373_s30 + $0x2250] sm:$0xff] }
 0x546   : > { %6663 = vmatprep.subr.mxu0 %v5470_v18  ;;  %6738 = vmatprep.subr.mxu1 %v5710_v26  ;;  %v5877_v18 = vld [vmem:[%s11373_s30 + $0x1a50] sm:$0xff]  ;;  %v6126_v19 = vld [vmem:[%s11373_s30 + $0x2218] sm:$0xff] }
 0x547   : > { %6664 = vmatpush2.msra.mxu0 %v5469_v24  ;;  %6739 = vmatpush2.msra.mxu1 %v5709_v29  ;;  %v5870_v24 = vld [vmem:[%s11373_s30 + $0x1a18] sm:$0xff]  ;;  %v6125_v26 = vld [vmem:[%s11373_s30 + $0x2210] sm:$0xff] }
 0x548   : > { %6665 = vmatprep.subr.mxu0 %v5462_v28  ;;  %6740 = vmatprep.subr.mxu1 %v5702_v32  ;;  %v5869_v28 = vld [vmem:[%s11373_s30 + $0x1a10] sm:$0xff]  ;;  %v6118_v29 = vld [vmem:[%s11373_s30 + $0x21d8] sm:$0xff] }
 0x549   : > { %6666 = vmatpush2.msra.mxu0 %v5461_v30  ;;  %6741 = vmatpush2.msra.mxu1 %v5701_v23  ;;  %v5862_v30 = vld [vmem:[%s11373_s30 + $0x19d8] sm:$0xff]  ;;  %v6117_v32 = vld [vmem:[%s11373_s30 + $0x21d0] sm:$0xff] }
 0x54a   : > { %6667 = vmatprep.subr.mxu0 %v5454_v33  ;;  %6742 = vmatprep.subr.mxu1 %v5694_v36  ;;  %v5861_v33 = vld [vmem:[%s11373_s30 + $0x19d0] sm:$0xff]  ;;  %v6110_v23 = vld [vmem:[%s11373_s30 + $0x2198] sm:$0xff] }
 0x54b   : > { %6668 = vmatpush2.msra.mxu0 %v5453_v34  ;;  %6743 = vmatpush2.msra.mxu1 %v5693_v41  ;;  %v5854_v34 = vld [vmem:[%s11373_s30 + $0x1998] sm:$0xff]  ;;  %v6109_v36 = vld [vmem:[%s11373_s30 + $0x2190] sm:$0xff] }
 0x54c   : > { %6669 = vmatprep.subr.mxu0 %v5446_v38  ;;  %6744 = vmatprep.subr.mxu1 %v5686_v44  ;;  %v5853_v38 = vld [vmem:[%s11373_s30 + $0x1990] sm:$0xff]  ;;  %v6102_v41 = vld [vmem:[%s11373_s30 + $0x2158] sm:$0xff] }
 0x54d   : > { %6670 = vmatpush2.msra.mxu0 %v5445_v43  ;;  %6745 = vmatpush2.msra.mxu1 %v5685_v2  ;;  %v5846_v43 = vld [vmem:[%s11373_s30 + $0x1958] sm:$0xff]  ;;  %v6101_v44 = vld [vmem:[%s11373_s30 + $0x2150] sm:$0xff] }
 0x54e   : > { %6671 = vmatprep.subr.mxu0 %v5438_v47  ;;  %6746 = vmatprep.subr.mxu1 %v5678_v56  ;;  %v5845_v47 = vld [vmem:[%s11373_s30 + $0x1950] sm:$0xff]  ;;  %v6094_v2 = vld [vmem:[%s11373_s30 + $0x2118] sm:$0xff] }
 0x54f   : > { %6672 = vmatpush2.msra.mxu0 %v5437_v62  ;;  %6747 = vmatpush2.msra.mxu1 %v5677_v59  ;;  %v5838_v62 = vld [vmem:[%s11373_s30 + $0x1918] sm:$0xff]  ;;  %v6093_v56 = vld [vmem:[%s11373_s30 + $0x2110] sm:$0xff] }
 0x550   : > { %6673 = vmatprep.subr.mxu0 %v5430_v50  ;;  %6749 = vmatmul.mubr.f32.vlgmr.msra.gmra.mxu1 %v11699_v4  ;;  %v5837_v50 = vld [vmem:[%s11373_s30 + $0x1910] sm:$0xff]  ;;  %v6086_v59 = vld [vmem:[%s11373_s30 + $0x20d8] sm:$0xff] }
 0x551   : > { %6674 = vmatpush2.msra.mxu0 %v5429_v57  ;;  %6826 = vmatprep.subr.mxu1 %v6182_v35  ;;  %v5830_v57 = vld [vmem:[%s11373_s30 + $0x18d8] sm:$0xff]  ;;  %v5829_v35 = vld [vmem:[%s11373_s30 + $0x18d0] sm:$0xff] }
 0x552   : > { %6675 = vmatprep.subr.mxu0 %v5422_v55  ;;  %6827 = vmatpush1.msra.mxu1 %v6181_v58  ;;  %v6085_v55 = vld [vmem:[%s11373_s30 + $0x20d0] sm:$0xff]  ;;  %v5822_v58 = vld [vmem:[%s11373_s30 + $0x1898] sm:$0xff] }
 0x553   : > { %6676 = vmatpush2.msra.mxu0 %v5421_v37  ;;  %6828 = vmatprep.subr.mxu1 %v6174_v5  ;;  %v6078_v37 = vld [vmem:[%s11373_s30 + $0x2098] sm:$0xff] }
 0x554   : > { %6678 = vmatmul.mubr.f32.vlgmr.msra.gmra.mxu0 %v11557_v63  ;;  %6755 = vmatprep.subr.mxu0 %v5926_v60  ;;  %v6077_v60 = vld [vmem:[%s11373_s30 + $0x2090] sm:$0xff]  ;;  %v6070_v5 = vld [vmem:[%s11373_s30 + $0x2058] sm:$0xff] }
 0x555   : > { %6756 = vmatpush1.msra.mxu0 %v5925_v9  ;;  %6819 = vmatprep.mubr.f32.mxu0 %v11744_v48  ;;  %v5821_v9 = vld [vmem:[%s11373_s30 + $0x1890] sm:$0xff] }
 0x556   : > { %6757 = vmatprep.subr.mxu0 %v5918_v21  ;;  %6829 = vmatpush1.msra.mxu1 %v6173_v25  ;;  %v5814_v21 = vld [vmem:[%s11373_s30 + $0x1858] sm:$0xff]  ;;  %v6069_v25 = vld [vmem:[%s11373_s30 + $0x2050] sm:$0xff] }
 0x557   : > { %6758 = vmatpush1.msra.mxu0 %v5917_v20  ;;  %6830 = vmatprep.subr.mxu1 %v6166_v1  ;;  %v5813_v20 = vld [vmem:[%s11373_s30 + $0x1850] sm:$0xff]  ;;  %v6062_v1 = vld [vmem:[%s11373_s30 + $0x2018] sm:$0xff] }
 0x558   : > { %6759 = vmatprep.subr.mxu0 %v5910_v39  ;;  %6831 = vmatpush1.msra.mxu1 %v6165_v3  ;;  %v5806_v39 = vld [vmem:[%s11373_s30 + $0x1818] sm:$0xff]  ;;  %v6061_v3 = vld [vmem:[%s11373_s30 + $0x2010] sm:$0xff] }
 0x559   : > { %6760 = vmatpush1.msra.mxu0 %v5909_v53  ;;  %6832 = vmatprep.subr.mxu1 %v6158_v7  ;;  %v5805_v53 = vld [vmem:[%s11373_s30 + $0x1810] sm:$0xff]  ;;  %v5416_v7 = vld [vmem:[%s11373_s30 + $0xbe8] sm:$0xff] }
 0x55a   : > { %6761 = vmatprep.subr.mxu0 %v5902_v51  ;;  %6833 = vmatpush1.msra.mxu1 %v6157_v6  ;;  %v6054_v51 = vld [vmem:[%s11373_s30 + $0x1fd8] sm:$0xff]  ;;  %v5415_v6 = vld [vmem:[%s11373_s30 + $0xbe0] sm:$0xff] }
 0x55b   : > { %6762 = vmatpush1.msra.mxu0 %v5901_v8  ;;  %6834 = vmatprep.subr.mxu1 %v6150_v16  ;;  %v6053_v8 = vld [vmem:[%s11373_s30 + $0x1fd0] sm:$0xff]  ;;  %v5408_v16 = vld [vmem:[%s11373_s30 + $0xba8] sm:$0xff] }
 0x55c   : > { %6763 = vmatprep.subr.mxu0 %v5894_v13  ;;  %6835 = vmatpush1.msra.mxu1 %v6149_v27  ;;  %v6046_v13 = vld [vmem:[%s11373_s30 + $0x1f98] sm:$0xff]  ;;  %v5407_v27 = vld [vmem:[%s11373_s30 + $0xba0] sm:$0xff] }
 0x55d   : > { %6764 = vmatpush1.msra.mxu0 %v5893_v42  ;;  %6836 = vmatprep.subr.mxu1 %v6142_v10  ;;  %v6045_v42 = vld [vmem:[%s11373_s30 + $0x1f90] sm:$0xff]  ;;  %v5400_v10 = vld [vmem:[%s11373_s30 + $0xb68] sm:$0xff] }
 0x55e   : > { %6765 = vmatprep.subr.mxu0 %v5886_v12  ;;  %6837 = vmatpush1.msra.mxu1 %v6141_v14  ;;  %v6038_v12 = vld [vmem:[%s11373_s30 + $0x1f58] sm:$0xff]  ;;  %v5399_v14 = vld [vmem:[%s11373_s30 + $0xb60] sm:$0xff] }
 0x55f   : > { %6766 = vmatpush1.msra.mxu0 %v5885_v11  ;;  %6838 = vmatprep.subr.mxu1 %v6134_v45  ;;  %v6037_v11 = vld [vmem:[%s11373_s30 + $0x1f50] sm:$0xff]  ;;  %v5392_v45 = vld [vmem:[%s11373_s30 + $0xb28] sm:$0xff] }
 0x560   : > { %6767 = vmatprep.subr.mxu0 %v5878_v15  ;;  %6839 = vmatpush1.msra.mxu1 %v6133_v17  ;;  %v6030_v15 = vld [vmem:[%s11373_s30 + $0x1f18] sm:$0xff]  ;;  %v5391_v17 = vld [vmem:[%s11373_s30 + $0xb20] sm:$0xff] }
 0x561   : > { %6768 = vmatpush1.msra.mxu0 %v5877_v18  ;;  %6840 = vmatprep.subr.mxu1 %v6126_v19  ;;  %v6029_v18 = vld [vmem:[%s11373_s30 + $0x1f10] sm:$0xff]  ;;  %v5384_v19 = vld [vmem:[%s11373_s30 + $0xae8] sm:$0xff] }
 0x562   : > { %6769 = vmatprep.subr.mxu0 %v5870_v24  ;;  %6841 = vmatpush1.msra.mxu1 %v6125_v26  ;;  %v6022_v24 = vld [vmem:[%s11373_s30 + $0x1ed8] sm:$0xff]  ;;  %v5383_v26 = vld [vmem:[%s11373_s30 + $0xae0] sm:$0xff] }
 0x563   : > { %6770 = vmatpush1.msra.mxu0 %v5869_v28  ;;  %6842 = vmatprep.subr.mxu1 %v6118_v29  ;;  %v6021_v28 = vld [vmem:[%s11373_s30 + $0x1ed0] sm:$0xff]  ;;  %v5376_v29 = vld [vmem:[%s11373_s30 + $0xaa8] sm:$0xff] }
 0x564   : > { %6771 = vmatprep.subr.mxu0 %v5862_v30  ;;  %6843 = vmatpush1.msra.mxu1 %v6117_v32  ;;  %v6014_v30 = vld [vmem:[%s11373_s30 + $0x1e98] sm:$0xff]  ;;  %v5375_v32 = vld [vmem:[%s11373_s30 + $0xaa0] sm:$0xff] }
 0x565   : > { %6772 = vmatpush1.msra.mxu0 %v5861_v33  ;;  %6844 = vmatprep.subr.mxu1 %v6110_v23  ;;  %v6013_v33 = vld [vmem:[%s11373_s30 + $0x1e90] sm:$0xff]  ;;  %v5368_v23 = vld [vmem:[%s11373_s30 + $0xa68] sm:$0xff] }
 0x566   : > { %6773 = vmatprep.subr.mxu0 %v5854_v34  ;;  %6845 = vmatpush1.msra.mxu1 %v6109_v36  ;;  %v6006_v34 = vld [vmem:[%s11373_s30 + $0x1e58] sm:$0xff]  ;;  %v5367_v36 = vld [vmem:[%s11373_s30 + $0xa60] sm:$0xff] }
 0x567   : > { %6774 = vmatpush1.msra.mxu0 %v5853_v38  ;;  %6846 = vmatprep.subr.mxu1 %v6102_v41  ;;  %v6005_v38 = vld [vmem:[%s11373_s30 + $0x1e50] sm:$0xff]  ;;  %v5360_v41 = vld [vmem:[%s11373_s30 + $0xa28] sm:$0xff] }
 0x568   : > { %6775 = vmatprep.subr.mxu0 %v5846_v43  ;;  %6847 = vmatpush1.msra.mxu1 %v6101_v44  ;;  %v5998_v43 = vld [vmem:[%s11373_s30 + $0x1e18] sm:$0xff]  ;;  %v5359_v44 = vld [vmem:[%s11373_s30 + $0xa20] sm:$0xff] }
 0x569   : > { %6776 = vmatpush1.msra.mxu0 %v5845_v47  ;;  %6848 = vmatprep.subr.mxu1 %v6094_v2  ;;  %v5997_v47 = vld [vmem:[%s11373_s30 + $0x1e10] sm:$0xff]  ;;  %v5352_v2 = vld [vmem:[%s11373_s30 + $0x9e8] sm:$0xff] }
 0x56a   : > { %6777 = vmatprep.subr.mxu0 %v5838_v62  ;;  %6849 = vmatpush1.msra.mxu1 %v6093_v56  ;;  %v5990_v62 = vld [vmem:[%s11373_s30 + $0x1dd8] sm:$0xff]  ;;  %v5351_v56 = vld [vmem:[%s11373_s30 + $0x9e0] sm:$0xff] }
 0x56b   : > { %6778 = vmatpush1.msra.mxu0 %v5837_v50  ;;  %6850 = vmatprep.subr.mxu1 %v6086_v59  ;;  %v5989_v50 = vld [vmem:[%s11373_s30 + $0x1dd0] sm:$0xff]  ;;  %v5344_v59 = vld [vmem:[%s11373_s30 + $0x9a8] sm:$0xff] }
 0x56c   : > { %6779 = vmatprep.subr.mxu0 %v5830_v57  ;;  %6851 = vmatpush1.msra.mxu1 %v6085_v55  ;;  %v5982_v57 = vld [vmem:[%s11373_s30 + $0x1d98] sm:$0xff]  ;;  %v5343_v55 = vld [vmem:[%s11373_s30 + $0x9a0] sm:$0xff] }
 0x56d   : > { %6780 = vmatpush1.msra.mxu0 %v5829_v35  ;;  %6852 = vmatprep.subr.mxu1 %v6078_v37  ;;  %v5981_v35 = vld [vmem:[%s11373_s30 + $0x1d90] sm:$0xff]  ;;  %v5336_v37 = vld [vmem:[%s11373_s30 + $0x968] sm:$0xff] }
 0x56e   : > { %6781 = vmatprep.subr.mxu0 %v5822_v58  ;;  %6853 = vmatpush1.msra.mxu1 %v6077_v60  ;;  %v5974_v58 = vld [vmem:[%s11373_s30 + $0x1d58] sm:$0xff]  ;;  %v5335_v60 = vld [vmem:[%s11373_s30 + $0x960] sm:$0xff] }
 0x56f   : > { %6782 = vmatpush1.msra.mxu0 %v5821_v9  ;;  %6854 = vmatprep.subr.mxu1 %v6070_v5  ;;  %v5973_v9 = vld [vmem:[%s11373_s30 + $0x1d50] sm:$0xff]  ;;  %v5328_v5 = vld [vmem:[%s11373_s30 + $0x928] sm:$0xff] }
 0x570   : > { %6783 = vmatprep.subr.mxu0 %v5814_v21  ;;  %6855 = vmatpush1.msra.mxu1 %v6069_v25  ;;  %v5966_v21 = vld [vmem:[%s11373_s30 + $0x1d18] sm:$0xff]  ;;  %v5327_v25 = vld [vmem:[%s11373_s30 + $0x920] sm:$0xff] }
 0x571   : > { %6784 = vmatpush1.msra.mxu0 %v5813_v20  ;;  %6856 = vmatprep.subr.mxu1 %v6062_v1  ;;  %v5965_v20 = vld [vmem:[%s11373_s30 + $0x1d10] sm:$0xff]  ;;  %v5320_v1 = vld [vmem:[%s11373_s30 + $0x8e8] sm:$0xff] }
 0x572   : > { %6785 = vmatprep.subr.mxu0 %v5806_v39  ;;  %6857 = vmatpush1.msra.mxu1 %v6061_v3  ;;  %v5958_v39 = vld [vmem:[%s11373_s30 + $0x1cd8] sm:$0xff]  ;;  %v5319_v3 = vld [vmem:[%s11373_s30 + $0x8e0] sm:$0xff] }
 0x573   : > { %6890 = vmatprep.mubr.f32.mxu1 %v8033_v52  ;;  %6786 = vmatpush1.msra.mxu0 %v5805_v53  ;;  %v5957_v53 = vld [vmem:[%s11373_s30 + $0x1cd0] sm:$0xff] }
 0x574   : > { %6891 = vmatmul.mubr.f32.vlgmr.msra.gmra.mxu1 %v11827_v49  ;;  %6968 = vmatprep.subr.mxu1 %v5416_v7  ;;  %v5312_v7 = vld [vmem:[%s11373_s30 + $0x8a8] sm:$0xff] }
 0x575   : > { %6787 = vmatprep.subr.mxu0 %v6054_v51  ;;  %6969 = vmatpush1.msra.mxu1 %v5415_v6  ;;  %v5950_v51 = vld [vmem:[%s11373_s30 + $0x1c98] sm:$0xff]  ;;  %v5311_v6 = vld [vmem:[%s11373_s30 + $0x8a0] sm:$0xff] }
 0x576   : > { %7032 = vmatprep.mubr.f32.mxu1 %v11398_v22  ;;  %6788 = vmatpush2.msra.mxu0 %v6053_v8  ;;  %v5949_v8 = vld [vmem:[%s11373_s30 + $0x1c90] sm:$0xff] }
 0x577   : > { %6970 = vmatprep.subr.mxu1 %v5408_v16  ;;  %6789 = vmatprep.subr.mxu0 %v6046_v13  ;;  %v5304_v16 = vld [vmem:[%s11373_s30 + $0x868] sm:$0xff]  ;;  %v5942_v13 = vld [vmem:[%s11373_s30 + $0x1c58] sm:$0xff] }
 0x578   : > { %6971 = vmatpush1.msra.mxu1 %v5407_v27  ;;  %6790 = vmatpush2.msra.mxu0 %v6045_v42  ;;  %v5303_v27 = vld [vmem:[%s11373_s30 + $0x860] sm:$0xff]  ;;  %v5941_v42 = vld [vmem:[%s11373_s30 + $0x1c50] sm:$0xff] }
 0x579   : > { %6972 = vmatprep.subr.mxu1 %v5400_v10  ;;  %6791 = vmatprep.subr.mxu0 %v6038_v12  ;;  %v5296_v10 = vld [vmem:[%s11373_s30 + $0x828] sm:$0xff]  ;;  %v5934_v12 = vld [vmem:[%s11373_s30 + $0x1c18] sm:$0xff] }
 0x57a   : > { %6973 = vmatpush1.msra.mxu1 %v5399_v14  ;;  %6792 = vmatpush2.msra.mxu0 %v6037_v11  ;;  %v5295_v14 = vld [vmem:[%s11373_s30 + $0x820] sm:$0xff]  ;;  %v5933_v11 = vld [vmem:[%s11373_s30 + $0x1c10] sm:$0xff] }
 0x57b   : > { %6974 = vmatprep.subr.mxu1 %v5392_v45  ;;  %6793 = vmatprep.subr.mxu0 %v6030_v15  ;;  %v5544_v45 = vld [vmem:[%s11373_s30 + $0xfe8] sm:$0xff] }
 0x57c   : > { %6975 = vmatpush1.msra.mxu1 %v5391_v17  ;;  %6794 = vmatpush2.msra.mxu0 %v6029_v18  ;;  %v5160_v15 = vld [vmem:[%s11373_s30 + $0x3e8] sm:$0xff]  ;;  %v5543_v17 = vld [vmem:[%s11373_s30 + $0xfe0] sm:$0xff] }
 0x57d   : > { %6976 = vmatprep.subr.mxu1 %v5384_v19  ;;  %6795 = vmatprep.subr.mxu0 %v6022_v24  ;;  %v5159_v18 = vld [vmem:[%s11373_s30 + $0x3e0] sm:$0xff]  ;;  %v5536_v19 = vld [vmem:[%s11373_s30 + $0xfa8] sm:$0xff] }
 0x57e   : > { %6977 = vmatpush1.msra.mxu1 %v5383_v26  ;;  %6796 = vmatpush2.msra.mxu0 %v6021_v28  ;;  %v5152_v24 = vld [vmem:[%s11373_s30 + $0x3a8] sm:$0xff]  ;;  %v5535_v26 = vld [vmem:[%s11373_s30 + $0xfa0] sm:$0xff] }
 0x57f   : > { %6978 = vmatprep.subr.mxu1 %v5376_v29  ;;  %6797 = vmatprep.subr.mxu0 %v6014_v30  ;;  %v5151_v28 = vld [vmem:[%s11373_s30 + $0x3a0] sm:$0xff]  ;;  %v5528_v29 = vld [vmem:[%s11373_s30 + $0xf68] sm:$0xff] }
 0x580   : > { %6979 = vmatpush1.msra.mxu1 %v5375_v32  ;;  %6798 = vmatpush2.msra.mxu0 %v6013_v33  ;;  %v5144_v30 = vld [vmem:[%s11373_s30 + $0x368] sm:$0xff]  ;;  %v5527_v32 = vld [vmem:[%s11373_s30 + $0xf60] sm:$0xff] }
 0x581   : > { %6980 = vmatprep.subr.mxu1 %v5368_v23  ;;  %6799 = vmatprep.subr.mxu0 %v6006_v34  ;;  %v5143_v33 = vld [vmem:[%s11373_s30 + $0x360] sm:$0xff]  ;;  %v5520_v23 = vld [vmem:[%s11373_s30 + $0xf28] sm:$0xff] }
 0x582   : > { %6981 = vmatpush1.msra.mxu1 %v5367_v36  ;;  %6800 = vmatpush2.msra.mxu0 %v6005_v38  ;;  %v5136_v34 = vld [vmem:[%s11373_s30 + $0x328] sm:$0xff]  ;;  %v5519_v36 = vld [vmem:[%s11373_s30 + $0xf20] sm:$0xff] }
 0x583   : > { %6982 = vmatprep.subr.mxu1 %v5360_v41  ;;  %6801 = vmatprep.subr.mxu0 %v5998_v43  ;;  %v5135_v38 = vld [vmem:[%s11373_s30 + $0x320] sm:$0xff]  ;;  %v5512_v41 = vld [vmem:[%s11373_s30 + $0xee8] sm:$0xff] }
 0x584   : > { %6983 = vmatpush1.msra.mxu1 %v5359_v44  ;;  %6802 = vmatpush2.msra.mxu0 %v5997_v47  ;;  %v5128_v43 = vld [vmem:[%s11373_s30 + $0x2e8] sm:$0xff]  ;;  %v5511_v44 = vld [vmem:[%s11373_s30 + $0xee0] sm:$0xff] }
 0x585   : > { %6984 = vmatprep.subr.mxu1 %v5352_v2  ;;  %6803 = vmatprep.subr.mxu0 %v5990_v62  ;;  %v5127_v47 = vld [vmem:[%s11373_s30 + $0x2e0] sm:$0xff]  ;;  %v5504_v2 = vld [vmem:[%s11373_s30 + $0xea8] sm:$0xff] }
 0x586   : > { %6985 = vmatpush1.msra.mxu1 %v5351_v56  ;;  %6804 = vmatpush2.msra.mxu0 %v5989_v50  ;;  %v5120_v62 = vld [vmem:[%s11373_s30 + $0x2a8] sm:$0xff]  ;;  %v5503_v56 = vld [vmem:[%s11373_s30 + $0xea0] sm:$0xff] }
 0x587   : > { %6986 = vmatprep.subr.mxu1 %v5344_v59  ;;  %6805 = vmatprep.subr.mxu0 %v5982_v57  ;;  %v5119_v50 = vld [vmem:[%s11373_s30 + $0x2a0] sm:$0xff]  ;;  %v5496_v59 = vld [vmem:[%s11373_s30 + $0xe68] sm:$0xff] }
 0x588   : > { %6987 = vmatpush1.msra.mxu1 %v5343_v55  ;;  %6806 = vmatpush2.msra.mxu0 %v5981_v35  ;;  %v5112_v57 = vld [vmem:[%s11373_s30 + $0x268] sm:$0xff]  ;;  %v5495_v55 = vld [vmem:[%s11373_s30 + $0xe60] sm:$0xff] }
 0x589   : > { %6988 = vmatprep.subr.mxu1 %v5336_v37  ;;  %6807 = vmatprep.subr.mxu0 %v5974_v58  ;;  %v5111_v35 = vld [vmem:[%s11373_s30 + $0x260] sm:$0xff]  ;;  %v5488_v37 = vld [vmem:[%s11373_s30 + $0xe28] sm:$0xff] }
 0x58a   : > { %6989 = vmatpush1.msra.mxu1 %v5335_v60  ;;  %6808 = vmatpush2.msra.mxu0 %v5973_v9  ;;  %v5104_v58 = vld [vmem:[%s11373_s30 + $0x228] sm:$0xff]  ;;  %v5487_v60 = vld [vmem:[%s11373_s30 + $0xe20] sm:$0xff] }
 0x58b   : > { %6990 = vmatprep.subr.mxu1 %v5328_v5  ;;  %6809 = vmatprep.subr.mxu0 %v5966_v21  ;;  %v5103_v9 = vld [vmem:[%s11373_s30 + $0x220] sm:$0xff]  ;;  %v5480_v5 = vld [vmem:[%s11373_s30 + $0xde8] sm:$0xff] }
 0x58c   : > { %6991 = vmatpush1.msra.mxu1 %v5327_v25  ;;  %6810 = vmatpush2.msra.mxu0 %v5965_v20  ;;  %v5096_v21 = vld [vmem:[%s11373_s30 + $0x1e8] sm:$0xff]  ;;  %v5479_v25 = vld [vmem:[%s11373_s30 + $0xde0] sm:$0xff] }
 0x58d   : > { %6992 = vmatprep.subr.mxu1 %v5320_v1  ;;  %6811 = vmatprep.subr.mxu0 %v5958_v39  ;;  %v5095_v20 = vld [vmem:[%s11373_s30 + $0x1e0] sm:$0xff]  ;;  %v5472_v1 = vld [vmem:[%s11373_s30 + $0xda8] sm:$0xff] }
 0x58e   : > { %6993 = vmatpush1.msra.mxu1 %v5319_v3  ;;  %6812 = vmatpush2.msra.mxu0 %v5957_v53  ;;  %v5088_v39 = vld [vmem:[%s11373_s30 + $0x1a8] sm:$0xff]  ;;  %v5471_v3 = vld [vmem:[%s11373_s30 + $0xda0] sm:$0xff] }
 0x58f   : > { %6994 = vmatprep.subr.mxu1 %v5312_v7  ;;  %6813 = vmatprep.subr.mxu0 %v5950_v51  ;;  %v5087_v53 = vld [vmem:[%s11373_s30 + $0x1a0] sm:$0xff]  ;;  %v5464_v7 = vld [vmem:[%s11373_s30 + $0xd68] sm:$0xff] }
 0x590   : > { %6995 = vmatpush1.msra.mxu1 %v5311_v6  ;;  %6814 = vmatpush2.msra.mxu0 %v5949_v8  ;;  %v5080_v51 = vld [vmem:[%s11373_s30 + $0x168] sm:$0xff]  ;;  %v5463_v6 = vld [vmem:[%s11373_s30 + $0xd60] sm:$0xff] }
 0x591   : > { %6996 = vmatprep.subr.mxu1 %v5304_v16  ;;  %6815 = vmatprep.subr.mxu0 %v5942_v13  ;;  %v5079_v8 = vld [vmem:[%s11373_s30 + $0x160] sm:$0xff]  ;;  %v5456_v16 = vld [vmem:[%s11373_s30 + $0xd28] sm:$0xff] }
 0x592   : > { %6997 = vmatpush1.msra.mxu1 %v5303_v27  ;;  %6816 = vmatpush2.msra.mxu0 %v5941_v42  ;;  %v5072_v13 = vld [vmem:[%s11373_s30 + $0x128] sm:$0xff]  ;;  %v5455_v27 = vld [vmem:[%s11373_s30 + $0xd20] sm:$0xff] }
 0x593   : > { %6998 = vmatprep.subr.mxu1 %v5296_v10  ;;  %6817 = vmatprep.subr.mxu0 %v5934_v12  ;;  %v5071_v42 = vld [vmem:[%s11373_s30 + $0x120] sm:$0xff]  ;;  %v5448_v10 = vld [vmem:[%s11373_s30 + $0xce8] sm:$0xff] }
 0x594   : > { %6999 = vmatpush1.msra.mxu1 %v5295_v14  ;;  %6818 = vmatpush2.msra.mxu0 %v5933_v11  ;;  %v5064_v12 = vld [vmem:[%s11373_s30 + $0xe8] sm:$0xff]  ;;  %v5447_v14 = vld [vmem:[%s11373_s30 + $0xce0] sm:$0xff] }
 0x595   : > { %7000 = vmatprep.subr.mxu1 %v5544_v45  ;;  %6820 = vmatmul.mubr.f32.vlgmr.msra.gmra.mxu0 %v11747_v0  ;;  %v5063_v11 = vld [vmem:[%s11373_s30 + $0xe0] sm:$0xff]  ;;  %v5440_v45 = vld [vmem:[%s11373_s30 + $0xca8] sm:$0xff] }
 0x596   : > { %6897 = vmatprep.subr.mxu0 %v5160_v15  ;;  %7001 = vmatpush2.msra.mxu1 %v5543_v17  ;;  %v5056_v15 = vld [vmem:[%s11373_s30 + $0xa8] sm:$0xff]  ;;  %v5439_v17 = vld [vmem:[%s11373_s30 + $0xca0] sm:$0xff] }
 0x597   : > { %6898 = vmatpush1.msra.mxu0 %v5159_v18  ;;  %6961 = vmatprep.mubr.f32.mxu0 %v11386_v54  ;;  %v5055_v18 = vld [vmem:[%s11373_s30 + $0xa0] sm:$0xff] }
 0x598   : > { %7002 = vmatprep.subr.mxu1 %v5536_v19  ;;  %6899 = vmatprep.subr.mxu0 %v5152_v24  ;;  %v5432_v19 = vld [vmem:[%s11373_s30 + $0xc68] sm:$0xff] }
 0x599   : > { %7003 = vmatpush2.msra.mxu1 %v5535_v26  ;;  %6900 = vmatpush1.msra.mxu0 %v5151_v28  ;;  %v5048_v24 = vld [vmem:[%s11373_s30 + $0x68] sm:$0xff]  ;;  %v5431_v26 = vld [vmem:[%s11373_s30 + $0xc60] sm:$0xff] }
 0x59a   : > { %7004 = vmatprep.subr.mxu1 %v5528_v29  ;;  %6901 = vmatprep.subr.mxu0 %v5144_v30  ;;  %v5047_v28 = vld [vmem:[%s11373_s30 + $0x60] sm:$0xff]  ;;  %v5424_v29 = vld [vmem:[%s11373_s30 + $0xc28] sm:$0xff] }
 0x59b   : > { %7005 = vmatpush2.msra.mxu1 %v5527_v32  ;;  %6902 = vmatpush1.msra.mxu0 %v5143_v33  ;;  %v5040_v30 = vld [vmem:[%s11373_s30 + $0x28] sm:$0xff]  ;;  %v5423_v32 = vld [vmem:[%s11373_s30 + $0xc20] sm:$0xff] }
 0x59c   : > { %7006 = vmatprep.subr.mxu1 %v5520_v23  ;;  %6903 = vmatprep.subr.mxu0 %v5136_v34  ;;  %v5039_v33 = vld [vmem:[%s11373_s30 + $0x20] sm:$0xff]  ;;  %v5928_v23 = vld [vmem:[%s11373_s30 + $0x1be8] sm:$0xff] }
 0x59d   : > { %7007 = vmatpush2.msra.mxu1 %v5519_v36  ;;  %6904 = vmatpush1.msra.mxu0 %v5135_v38  ;;  %v5288_v34 = vld [vmem:[%s11373_s30 + $0x7e8] sm:$0xff]  ;;  %v5927_v36 = vld [vmem:[%s11373_s30 + $0x1be0] sm:$0xff] }
 0x59e   : > { %7008 = vmatprep.subr.mxu1 %v5512_v41  ;;  %6905 = vmatprep.subr.mxu0 %v5128_v43  ;;  %v5287_v38 = vld [vmem:[%s11373_s30 + $0x7e0] sm:$0xff]  ;;  %v5920_v41 = vld [vmem:[%s11373_s30 + $0x1ba8] sm:$0xff] }
 0x59f   : > { %7009 = vmatpush2.msra.mxu1 %v5511_v44  ;;  %6906 = vmatpush1.msra.mxu0 %v5127_v47  ;;  %v5280_v43 = vld [vmem:[%s11373_s30 + $0x7a8] sm:$0xff]  ;;  %v5919_v44 = vld [vmem:[%s11373_s30 + $0x1ba0] sm:$0xff] }
 0x5a0   : > { %7010 = vmatprep.subr.mxu1 %v5504_v2  ;;  %6907 = vmatprep.subr.mxu0 %v5120_v62  ;;  %v5279_v47 = vld [vmem:[%s11373_s30 + $0x7a0] sm:$0xff]  ;;  %v5912_v2 = vld [vmem:[%s11373_s30 + $0x1b68] sm:$0xff] }
 0x5a1   : > { %7011 = vmatpush2.msra.mxu1 %v5503_v56  ;;  %6908 = vmatpush1.msra.mxu0 %v5119_v50  ;;  %v5272_v62 = vld [vmem:[%s11373_s30 + $0x768] sm:$0xff]  ;;  %v5911_v56 = vld [vmem:[%s11373_s30 + $0x1b60] sm:$0xff] }
 0x5a2   : > { %7012 = vmatprep.subr.mxu1 %v5496_v59  ;;  %6909 = vmatprep.subr.mxu0 %v5112_v57  ;;  %v5271_v50 = vld [vmem:[%s11373_s30 + $0x760] sm:$0xff]  ;;  %v5904_v59 = vld [vmem:[%s11373_s30 + $0x1b28] sm:$0xff] }
 0x5a3   : > { %7013 = vmatpush2.msra.mxu1 %v5495_v55  ;;  %6910 = vmatpush1.msra.mxu0 %v5111_v35  ;;  %v5264_v57 = vld [vmem:[%s11373_s30 + $0x728] sm:$0xff]  ;;  %v5903_v55 = vld [vmem:[%s11373_s30 + $0x1b20] sm:$0xff] }
 0x5a4   : > { %7014 = vmatprep.subr.mxu1 %v5488_v37  ;;  %6911 = vmatprep.subr.mxu0 %v5104_v58  ;;  %v5263_v35 = vld [vmem:[%s11373_s30 + $0x720] sm:$0xff]  ;;  %v5896_v37 = vld [vmem:[%s11373_s30 + $0x1ae8] sm:$0xff] }
 0x5a5   : > { %7015 = vmatpush2.msra.mxu1 %v5487_v60  ;;  %6912 = vmatpush1.msra.mxu0 %v5103_v9  ;;  %v5256_v58 = vld [vmem:[%s11373_s30 + $0x6e8] sm:$0xff]  ;;  %v5895_v60 = vld [vmem:[%s11373_s30 + $0x1ae0] sm:$0xff] }
 0x5a6   : > { %7016 = vmatprep.subr.mxu1 %v5480_v5  ;;  %6913 = vmatprep.subr.mxu0 %v5096_v21  ;;  %v5255_v9 = vld [vmem:[%s11373_s30 + $0x6e0] sm:$0xff]  ;;  %v5888_v5 = vld [vmem:[%s11373_s30 + $0x1aa8] sm:$0xff] }
 0x5a7   : > { %7017 = vmatpush2.msra.mxu1 %v5479_v25  ;;  %6914 = vmatpush1.msra.mxu0 %v5095_v20  ;;  %v5248_v21 = vld [vmem:[%s11373_s30 + $0x6a8] sm:$0xff]  ;;  %v5887_v25 = vld [vmem:[%s11373_s30 + $0x1aa0] sm:$0xff] }
 0x5a8   : > { %7018 = vmatprep.subr.mxu1 %v5472_v1  ;;  %6915 = vmatprep.subr.mxu0 %v5088_v39  ;;  %v5247_v20 = vld [vmem:[%s11373_s30 + $0x6a0] sm:$0xff]  ;;  %v5880_v1 = vld [vmem:[%s11373_s30 + $0x1a68] sm:$0xff] }
 0x5a9   : > { %7019 = vmatpush2.msra.mxu1 %v5471_v3  ;;  %6916 = vmatpush1.msra.mxu0 %v5087_v53  ;;  %v5240_v39 = vld [vmem:[%s11373_s30 + $0x668] sm:$0xff]  ;;  %v5879_v3 = vld [vmem:[%s11373_s30 + $0x1a60] sm:$0xff] }
 0x5aa   : > { %7020 = vmatprep.subr.mxu1 %v5464_v7  ;;  %6917 = vmatprep.subr.mxu0 %v5080_v51  ;;  %v5239_v53 = vld [vmem:[%s11373_s30 + $0x660] sm:$0xff]  ;;  %v5872_v7 = vld [vmem:[%s11373_s30 + $0x1a28] sm:$0xff] }
 0x5ab   : > { %7021 = vmatpush2.msra.mxu1 %v5463_v6  ;;  %6918 = vmatpush1.msra.mxu0 %v5079_v8  ;;  %v5232_v51 = vld [vmem:[%s11373_s30 + $0x628] sm:$0xff]  ;;  %v5871_v6 = vld [vmem:[%s11373_s30 + $0x1a20] sm:$0xff] }
 0x5ac   : > { %7022 = vmatprep.subr.mxu1 %v5456_v16  ;;  %6919 = vmatprep.subr.mxu0 %v5072_v13  ;;  %v5231_v8 = vld [vmem:[%s11373_s30 + $0x620] sm:$0xff]  ;;  %v5864_v16 = vld [vmem:[%s11373_s30 + $0x19e8] sm:$0xff] }
 0x5ad   : > { %7023 = vmatpush2.msra.mxu1 %v5455_v27  ;;  %6920 = vmatpush1.msra.mxu0 %v5071_v42  ;;  %v5224_v13 = vld [vmem:[%s11373_s30 + $0x5e8] sm:$0xff]  ;;  %v5863_v27 = vld [vmem:[%s11373_s30 + $0x19e0] sm:$0xff] }
 0x5ae   : > { %7024 = vmatprep.subr.mxu1 %v5448_v10  ;;  %6921 = vmatprep.subr.mxu0 %v5064_v12  ;;  %v5223_v42 = vld [vmem:[%s11373_s30 + $0x5e0] sm:$0xff]  ;;  %v5856_v10 = vld [vmem:[%s11373_s30 + $0x19a8] sm:$0xff] }
 0x5af   : > { %7025 = vmatpush2.msra.mxu1 %v5447_v14  ;;  %6922 = vmatpush1.msra.mxu0 %v5063_v11  ;;  %v5216_v12 = vld [vmem:[%s11373_s30 + $0x5a8] sm:$0xff]  ;;  %v5855_v14 = vld [vmem:[%s11373_s30 + $0x19a0] sm:$0xff] }
 0x5b0   : > { %7026 = vmatprep.subr.mxu1 %v5440_v45  ;;  %6923 = vmatprep.subr.mxu0 %v5056_v15  ;;  %v5215_v11 = vld [vmem:[%s11373_s30 + $0x5a0] sm:$0xff]  ;;  %v5848_v45 = vld [vmem:[%s11373_s30 + $0x1968] sm:$0xff] }
 0x5b1   : > { %7027 = vmatpush2.msra.mxu1 %v5439_v17  ;;  %6924 = vmatpush1.msra.mxu0 %v5055_v18  ;;  %v5208_v15 = vld [vmem:[%s11373_s30 + $0x568] sm:$0xff]  ;;  %v5847_v17 = vld [vmem:[%s11373_s30 + $0x1960] sm:$0xff] }
 0x5b2   : > { %7028 = vmatprep.subr.mxu1 %v5432_v19  ;;  %6925 = vmatprep.subr.mxu0 %v5048_v24  ;;  %v5207_v18 = vld [vmem:[%s11373_s30 + $0x560] sm:$0xff]  ;;  %v5840_v19 = vld [vmem:[%s11373_s30 + $0x1928] sm:$0xff] }
 0x5b3   : > { %7029 = vmatpush2.msra.mxu1 %v5431_v26  ;;  %6926 = vmatpush1.msra.mxu0 %v5047_v28  ;;  %v5200_v24 = vld [vmem:[%s11373_s30 + $0x528] sm:$0xff]  ;;  %v5839_v26 = vld [vmem:[%s11373_s30 + $0x1920] sm:$0xff] }
 0x5b4   : > { %7030 = vmatprep.subr.mxu1 %v5424_v29  ;;  %6927 = vmatprep.subr.mxu0 %v5040_v30  ;;  %v5199_v28 = vld [vmem:[%s11373_s30 + $0x520] sm:$0xff]  ;;  %v5832_v29 = vld [vmem:[%s11373_s30 + $0x18e8] sm:$0xff] }
 0x5b5   : > { %7031 = vmatpush2.msra.mxu1 %v5423_v32  ;;  %6928 = vmatpush1.msra.mxu0 %v5039_v33  ;;  %v5192_v30 = vld [vmem:[%s11373_s30 + $0x4e8] sm:$0xff]  ;;  %v5831_v32 = vld [vmem:[%s11373_s30 + $0x18e0] sm:$0xff] }
 0x5b6   : > { %7033 = vmatmul.mubr.f32.vlgmr.msra.gmra.mxu1 %v11557_v63  ;;  %7110 = vmatprep.subr.mxu1 %v5928_v23  ;;  %v5191_v33 = vld [vmem:[%s11373_s30 + $0x4e0] sm:$0xff]  ;;  %v5824_v23 = vld [vmem:[%s11373_s30 + $0x18a8] sm:$0xff] }
 0x5b7   : > { %6929 = vmatprep.subr.mxu0 %v5288_v34  ;;  %7111 = vmatpush1.msra.mxu1 %v5927_v36  ;;  %v5184_v34 = vld [vmem:[%s11373_s30 + $0x4a8] sm:$0xff]  ;;  %v5823_v36 = vld [vmem:[%s11373_s30 + $0x18a0] sm:$0xff] }
 0x5b8   : > { %7174 = vmatprep.mubr.f32.mxu1 %v11744_v48  ;;  %6930 = vmatpush2.msra.mxu0 %v5287_v38  ;;  %v5183_v38 = vld [vmem:[%s11373_s30 + $0x4a0] sm:$0xff] }
 0x5b9   : > { %7112 = vmatprep.subr.mxu1 %v5920_v41  ;;  %6931 = vmatprep.subr.mxu0 %v5280_v43  ;;  %v5816_v41 = vld [vmem:[%s11373_s30 + $0x1868] sm:$0xff] }
 0x5ba   : > { %7113 = vmatpush1.msra.mxu1 %v5919_v44  ;;  %6932 = vmatpush2.msra.mxu0 %v5279_v47  ;;  %v5176_v43 = vld [vmem:[%s11373_s30 + $0x468] sm:$0xff]  ;;  %v5815_v44 = vld [vmem:[%s11373_s30 + $0x1860] sm:$0xff] }
 0x5bb   : > { %7114 = vmatprep.subr.mxu1 %v5912_v2  ;;  %6933 = vmatprep.subr.mxu0 %v5272_v62  ;;  %v5175_v47 = vld [vmem:[%s11373_s30 + $0x460] sm:$0xff]  ;;  %v5808_v2 = vld [vmem:[%s11373_s30 + $0x1828] sm:$0xff] }
 0x5bc   : > { %7115 = vmatpush1.msra.mxu1 %v5911_v56  ;;  %6934 = vmatpush2.msra.mxu0 %v5271_v50  ;;  %v5168_v62 = vld [vmem:[%s11373_s30 + $0x428] sm:$0xff]  ;;  %v5807_v56 = vld [vmem:[%s11373_s30 + $0x1820] sm:$0xff] }
 0x5bd   : > { %7116 = vmatprep.subr.mxu1 %v5904_v59  ;;  %6935 = vmatprep.subr.mxu0 %v5264_v57  ;;  %v5167_v50 = vld [vmem:[%s11373_s30 + $0x420] sm:$0xff]  ;;  %v6056_v59 = vld [vmem:[%s11373_s30 + $0x1fe8] sm:$0xff] }
 0x5be   : > { %7117 = vmatpush1.msra.mxu1 %v5903_v55  ;;  %6936 = vmatpush2.msra.mxu0 %v5263_v35  ;;  %v5672_v57 = vld [vmem:[%s11373_s30 + $0x13e8] sm:$0xff]  ;;  %v6055_v55 = vld [vmem:[%s11373_s30 + $0x1fe0] sm:$0xff] }
 0x5bf   : > { %7118 = vmatprep.subr.mxu1 %v5896_v37  ;;  %6937 = vmatprep.subr.mxu0 %v5256_v58  ;;  %v5671_v35 = vld [vmem:[%s11373_s30 + $0x13e0] sm:$0xff]  ;;  %v6048_v37 = vld [vmem:[%s11373_s30 + $0x1fa8] sm:$0xff] }
 0x5c0   : > { %7119 = vmatpush1.msra.mxu1 %v5895_v60  ;;  %6938 = vmatpush2.msra.mxu0 %v5255_v9  ;;  %v5664_v58 = vld [vmem:[%s11373_s30 + $0x13a8] sm:$0xff]  ;;  %v6047_v60 = vld [vmem:[%s11373_s30 + $0x1fa0] sm:$0xff] }
 0x5c1   : > { %7120 = vmatprep.subr.mxu1 %v5888_v5  ;;  %6939 = vmatprep.subr.mxu0 %v5248_v21  ;;  %v5663_v9 = vld [vmem:[%s11373_s30 + $0x13a0] sm:$0xff]  ;;  %v6040_v5 = vld [vmem:[%s11373_s30 + $0x1f68] sm:$0xff] }
 0x5c2   : > { %7121 = vmatpush1.msra.mxu1 %v5887_v25  ;;  %6940 = vmatpush2.msra.mxu0 %v5247_v20  ;;  %v5656_v21 = vld [vmem:[%s11373_s30 + $0x1368] sm:$0xff]  ;;  %v6039_v25 = vld [vmem:[%s11373_s30 + $0x1f60] sm:$0xff] }
 0x5c3   : > { %7122 = vmatprep.subr.mxu1 %v5880_v1  ;;  %6941 = vmatprep.subr.mxu0 %v5240_v39  ;;  %v5655_v20 = vld [vmem:[%s11373_s30 + $0x1360] sm:$0xff]  ;;  %v6032_v1 = vld [vmem:[%s11373_s30 + $0x1f28] sm:$0xff] }
 0x5c4   : > { %7123 = vmatpush1.msra.mxu1 %v5879_v3  ;;  %6942 = vmatpush2.msra.mxu0 %v5239_v53  ;;  %v5648_v39 = vld [vmem:[%s11373_s30 + $0x1328] sm:$0xff]  ;;  %v6031_v3 = vld [vmem:[%s11373_s30 + $0x1f20] sm:$0xff] }
 0x5c5   : > { %7124 = vmatprep.subr.mxu1 %v5872_v7  ;;  %6943 = vmatprep.subr.mxu0 %v5232_v51  ;;  %v5647_v53 = vld [vmem:[%s11373_s30 + $0x1320] sm:$0xff]  ;;  %v6024_v7 = vld [vmem:[%s11373_s30 + $0x1ee8] sm:$0xff] }
 0x5c6   : > { %7125 = vmatpush1.msra.mxu1 %v5871_v6  ;;  %6944 = vmatpush2.msra.mxu0 %v5231_v8  ;;  %v5640_v51 = vld [vmem:[%s11373_s30 + $0x12e8] sm:$0xff]  ;;  %v6023_v6 = vld [vmem:[%s11373_s30 + $0x1ee0] sm:$0xff] }
 0x5c7   : > { %7126 = vmatprep.subr.mxu1 %v5864_v16  ;;  %6945 = vmatprep.subr.mxu0 %v5224_v13  ;;  %v5639_v8 = vld [vmem:[%s11373_s30 + $0x12e0] sm:$0xff]  ;;  %v6016_v16 = vld [vmem:[%s11373_s30 + $0x1ea8] sm:$0xff] }
 0x5c8   : > { %7127 = vmatpush1.msra.mxu1 %v5863_v27  ;;  %6946 = vmatpush2.msra.mxu0 %v5223_v42  ;;  %v5632_v13 = vld [vmem:[%s11373_s30 + $0x12a8] sm:$0xff]  ;;  %v6015_v27 = vld [vmem:[%s11373_s30 + $0x1ea0] sm:$0xff] }
 0x5c9   : > { %7128 = vmatprep.subr.mxu1 %v5856_v10  ;;  %6947 = vmatprep.subr.mxu0 %v5216_v12  ;;  %v5631_v42 = vld [vmem:[%s11373_s30 + $0x12a0] sm:$0xff]  ;;  %v6008_v10 = vld [vmem:[%s11373_s30 + $0x1e68] sm:$0xff] }
 0x5ca   : > { %7129 = vmatpush1.msra.mxu1 %v5855_v14  ;;  %6948 = vmatpush2.msra.mxu0 %v5215_v11  ;;  %v5624_v12 = vld [vmem:[%s11373_s30 + $0x1268] sm:$0xff]  ;;  %v6007_v14 = vld [vmem:[%s11373_s30 + $0x1e60] sm:$0xff] }
 0x5cb   : > { %7130 = vmatprep.subr.mxu1 %v5848_v45  ;;  %6949 = vmatprep.subr.mxu0 %v5208_v15  ;;  %v5623_v11 = vld [vmem:[%s11373_s30 + $0x1260] sm:$0xff]  ;;  %v6000_v45 = vld [vmem:[%s11373_s30 + $0x1e28] sm:$0xff] }
 0x5cc   : > { %7131 = vmatpush1.msra.mxu1 %v5847_v17  ;;  %6950 = vmatpush2.msra.mxu0 %v5207_v18  ;;  %v5616_v15 = vld [vmem:[%s11373_s30 + $0x1228] sm:$0xff]  ;;  %v5999_v17 = vld [vmem:[%s11373_s30 + $0x1e20] sm:$0xff] }
 0x5cd   : > { %7132 = vmatprep.subr.mxu1 %v5840_v19  ;;  %6951 = vmatprep.subr.mxu0 %v5200_v24  ;;  %v5615_v18 = vld [vmem:[%s11373_s30 + $0x1220] sm:$0xff]  ;;  %v5992_v19 = vld [vmem:[%s11373_s30 + $0x1de8] sm:$0xff] }
 0x5ce   : > { %7133 = vmatpush1.msra.mxu1 %v5839_v26  ;;  %6952 = vmatpush2.msra.mxu0 %v5199_v28  ;;  %v5608_v24 = vld [vmem:[%s11373_s30 + $0x11e8] sm:$0xff]  ;;  %v5991_v26 = vld [vmem:[%s11373_s30 + $0x1de0] sm:$0xff] }
 0x5cf   : > { %7134 = vmatprep.subr.mxu1 %v5832_v29  ;;  %6953 = vmatprep.subr.mxu0 %v5192_v30  ;;  %v5607_v28 = vld [vmem:[%s11373_s30 + $0x11e0] sm:$0xff]  ;;  %v5984_v29 = vld [vmem:[%s11373_s30 + $0x1da8] sm:$0xff] }
 0x5d0   : > { %7135 = vmatpush1.msra.mxu1 %v5831_v32  ;;  %6954 = vmatpush2.msra.mxu0 %v5191_v33  ;;  %v5600_v30 = vld [vmem:[%s11373_s30 + $0x11a8] sm:$0xff]  ;;  %v5983_v32 = vld [vmem:[%s11373_s30 + $0x1da0] sm:$0xff] }
 0x5d1   : > { %7136 = vmatprep.subr.mxu1 %v5824_v23  ;;  %6955 = vmatprep.subr.mxu0 %v5184_v34  ;;  %v5599_v33 = vld [vmem:[%s11373_s30 + $0x11a0] sm:$0xff]  ;;  %v5976_v23 = vld [vmem:[%s11373_s30 + $0x1d68] sm:$0xff] }
 0x5d2   : > { %7137 = vmatpush1.msra.mxu1 %v5823_v36  ;;  %6956 = vmatpush2.msra.mxu0 %v5183_v38  ;;  %v5592_v34 = vld [vmem:[%s11373_s30 + $0x1168] sm:$0xff]  ;;  %v5975_v36 = vld [vmem:[%s11373_s30 + $0x1d60] sm:$0xff] }
 0x5d3   : > { %7138 = vmatprep.subr.mxu1 %v5816_v41  ;;  %6957 = vmatprep.subr.mxu0 %v5176_v43  ;;  %v5591_v38 = vld [vmem:[%s11373_s30 + $0x1160] sm:$0xff]  ;;  %v5968_v41 = vld [vmem:[%s11373_s30 + $0x1d28] sm:$0xff] }
 0x5d4   : > { %7139 = vmatpush1.msra.mxu1 %v5815_v44  ;;  %6958 = vmatpush2.msra.mxu0 %v5175_v47  ;;  %v5584_v43 = vld [vmem:[%s11373_s30 + $0x1128] sm:$0xff]  ;;  %v5967_v44 = vld [vmem:[%s11373_s30 + $0x1d20] sm:$0xff] }
 0x5d5   : > { %7140 = vmatprep.subr.mxu1 %v5808_v2  ;;  %6959 = vmatprep.subr.mxu0 %v5168_v62  ;;  %v5583_v47 = vld [vmem:[%s11373_s30 + $0x1120] sm:$0xff]  ;;  %v5960_v2 = vld [vmem:[%s11373_s30 + $0x1ce8] sm:$0xff] }
 0x5d6   : > { %7141 = vmatpush1.msra.mxu1 %v5807_v56  ;;  %6960 = vmatpush2.msra.mxu0 %v5167_v50  ;;  %v5576_v62 = vld [vmem:[%s11373_s30 + $0x10e8] sm:$0xff]  ;;  %v5959_v56 = vld [vmem:[%s11373_s30 + $0x1ce0] sm:$0xff] }
 0x5d7   : > { %7142 = vmatprep.subr.mxu1 %v6056_v59  ;;  %6962 = vmatmul.mubr.f32.vlgmr.msra.gmra.mxu0 %v11547_v46  ;;  %v5575_v50 = vld [vmem:[%s11373_s30 + $0x10e0] sm:$0xff]  ;;  %v5952_v59 = vld [vmem:[%s11373_s30 + $0x1ca8] sm:$0xff] }
 0x5d8   : > { %7039 = vmatprep.subr.mxu0 %v5672_v57  ;;  %7143 = vmatpush2.msra.mxu1 %v6055_v55  ;;  %v5568_v57 = vld [vmem:[%s11373_s30 + $0x10a8] sm:$0xff]  ;;  %v5951_v55 = vld [vmem:[%s11373_s30 + $0x1ca0] sm:$0xff] }
 0x5d9   : > { %7040 = vmatpush1.msra.mxu0 %v5671_v35  ;;  %7103 = vmatprep.mubr.f32.mxu0 %v11551_v61  ;;  %v5567_v35 = vld [vmem:[%s11373_s30 + $0x10a0] sm:$0xff] }
 0x5da   : > { %7144 = vmatprep.subr.mxu1 %v6048_v37  ;;  %7041 = vmatprep.subr.mxu0 %v5664_v58  ;;  %v5944_v37 = vld [vmem:[%s11373_s30 + $0x1c68] sm:$0xff] }
 0x5db   : > { %7145 = vmatpush2.msra.mxu1 %v6047_v60  ;;  %7042 = vmatpush1.msra.mxu0 %v5663_v9  ;;  %v5560_v58 = vld [vmem:[%s11373_s30 + $0x1068] sm:$0xff]  ;;  %v5943_v60 = vld [vmem:[%s11373_s30 + $0x1c60] sm:$0xff] }
 0x5dc   : > { %7146 = vmatprep.subr.mxu1 %v6040_v5  ;;  %7043 = vmatprep.subr.mxu0 %v5656_v21  ;;  %v5559_v9 = vld [vmem:[%s11373_s30 + $0x1060] sm:$0xff]  ;;  %v5936_v5 = vld [vmem:[%s11373_s30 + $0x1c28] sm:$0xff] }
 0x5dd   : > { %7147 = vmatpush2.msra.mxu1 %v6039_v25  ;;  %7044 = vmatpush1.msra.mxu0 %v5655_v20  ;;  %v5552_v21 = vld [vmem:[%s11373_s30 + $0x1028] sm:$0xff]  ;;  %v5935_v25 = vld [vmem:[%s11373_s30 + $0x1c20] sm:$0xff] }
 0x5de   : > { %7148 = vmatprep.subr.mxu1 %v6032_v1  ;;  %7045 = vmatprep.subr.mxu0 %v5648_v39  ;;  %v5551_v20 = vld [vmem:[%s11373_s30 + $0x1020] sm:$0xff]  ;;  %v5162_v1 = vld [vmem:[%s11373_s30 + $0x3f8] sm:$0xff]  ;;  %v5800_v39 = vld [vmem:[%s11373_s30 + $0x17e8] sm:$0xff] }
 0x5df   : > { %7149 = vmatpush2.msra.mxu1 %v6031_v3  ;;  %7046 = vmatpush1.msra.mxu0 %v5647_v53  ;;  %v5161_v3 = vld [vmem:[%s11373_s30 + $0x3f0] sm:$0xff]  ;;  %v5799_v53 = vld [vmem:[%s11373_s30 + $0x17e0] sm:$0xff] }
 0x5e0   : > { %7150 = vmatprep.subr.mxu1 %v6024_v7  ;;  %7047 = vmatprep.subr.mxu0 %v5640_v51  ;;  %v5154_v7 = vld [vmem:[%s11373_s30 + $0x3b8] sm:$0xff]  ;;  %v5792_v51 = vld [vmem:[%s11373_s30 + $0x17a8] sm:$0xff] }
 0x5e1   : > { %7151 = vmatpush2.msra.mxu1 %v6023_v6  ;;  %7048 = vmatpush1.msra.mxu0 %v5639_v8  ;;  %v5153_v6 = vld [vmem:[%s11373_s30 + $0x3b0] sm:$0xff]  ;;  %v5791_v8 = vld [vmem:[%s11373_s30 + $0x17a0] sm:$0xff] }
 0x5e2   : > { %7152 = vmatprep.subr.mxu1 %v6016_v16  ;;  %7049 = vmatprep.subr.mxu0 %v5632_v13  ;;  %v5146_v16 = vld [vmem:[%s11373_s30 + $0x378] sm:$0xff]  ;;  %v5784_v13 = vld [vmem:[%s11373_s30 + $0x1768] sm:$0xff] }
 0x5e3   : > { %7153 = vmatpush2.msra.mxu1 %v6015_v27  ;;  %7050 = vmatpush1.msra.mxu0 %v5631_v42  ;;  %v5145_v27 = vld [vmem:[%s11373_s30 + $0x370] sm:$0xff]  ;;  %v5783_v42 = vld [vmem:[%s11373_s30 + $0x1760] sm:$0xff] }
 0x5e4   : > { %7154 = vmatprep.subr.mxu1 %v6008_v10  ;;  %7051 = vmatprep.subr.mxu0 %v5624_v12  ;;  %v5138_v10 = vld [vmem:[%s11373_s30 + $0x338] sm:$0xff]  ;;  %v5776_v12 = vld [vmem:[%s11373_s30 + $0x1728] sm:$0xff] }
 0x5e5   : > { %7155 = vmatpush2.msra.mxu1 %v6007_v14  ;;  %7052 = vmatpush1.msra.mxu0 %v5623_v11  ;;  %v5775_v14 = vld [vmem:[%s11373_s30 + $0x1720] sm:$0xff]  ;;  %v5130_v11 = vld [vmem:[%s11373_s30 + $0x2f8] sm:$0xff] }
 0x5e6   : > { %7156 = vmatprep.subr.mxu1 %v6000_v45  ;;  %7053 = vmatprep.subr.mxu0 %v5616_v15  ;;  %v5768_v45 = vld [vmem:[%s11373_s30 + $0x16e8] sm:$0xff]  ;;  %v5129_v15 = vld [vmem:[%s11373_s30 + $0x2f0] sm:$0xff] }
 0x5e7   : > { %7157 = vmatpush2.msra.mxu1 %v5999_v17  ;;  %7054 = vmatpush1.msra.mxu0 %v5615_v18  ;;  %v5767_v17 = vld [vmem:[%s11373_s30 + $0x16e0] sm:$0xff]  ;;  %v5122_v18 = vld [vmem:[%s11373_s30 + $0x2b8] sm:$0xff] }
 0x5e8   : > { %7158 = vmatprep.subr.mxu1 %v5992_v19  ;;  %7055 = vmatprep.subr.mxu0 %v5608_v24  ;;  %v5760_v19 = vld [vmem:[%s11373_s30 + $0x16a8] sm:$0xff]  ;;  %v5121_v24 = vld [vmem:[%s11373_s30 + $0x2b0] sm:$0xff] }
 0x5e9   : > { %7159 = vmatpush2.msra.mxu1 %v5991_v26  ;;  %7056 = vmatpush1.msra.mxu0 %v5607_v28  ;;  %v5759_v26 = vld [vmem:[%s11373_s30 + $0x16a0] sm:$0xff]  ;;  %v5114_v28 = vld [vmem:[%s11373_s30 + $0x278] sm:$0xff] }
 0x5ea   : > { %7160 = vmatprep.subr.mxu1 %v5984_v29  ;;  %7057 = vmatprep.subr.mxu0 %v5600_v30  ;;  %v5752_v29 = vld [vmem:[%s11373_s30 + $0x1668] sm:$0xff]  ;;  %v5113_v30 = vld [vmem:[%s11373_s30 + $0x270] sm:$0xff] }
 0x5eb   : > { %7161 = vmatpush2.msra.mxu1 %v5983_v32  ;;  %7058 = vmatpush1.msra.mxu0 %v5599_v33  ;;  %v5751_v32 = vld [vmem:[%s11373_s30 + $0x1660] sm:$0xff]  ;;  %v5106_v33 = vld [vmem:[%s11373_s30 + $0x238] sm:$0xff] }
 0x5ec   : > { %7162 = vmatprep.subr.mxu1 %v5976_v23  ;;  %7059 = vmatprep.subr.mxu0 %v5592_v34  ;;  %v5744_v23 = vld [vmem:[%s11373_s30 + $0x1628] sm:$0xff]  ;;  %v5105_v34 = vld [vmem:[%s11373_s30 + $0x230] sm:$0xff] }
 0x5ed   : > { %7163 = vmatpush2.msra.mxu1 %v5975_v36  ;;  %7060 = vmatpush1.msra.mxu0 %v5591_v38  ;;  %v5743_v36 = vld [vmem:[%s11373_s30 + $0x1620] sm:$0xff]  ;;  %v5098_v38 = vld [vmem:[%s11373_s30 + $0x1f8] sm:$0xff] }
 0x5ee   : > { %7164 = vmatprep.subr.mxu1 %v5968_v41  ;;  %7061 = vmatprep.subr.mxu0 %v5584_v43  ;;  %v5736_v41 = vld [vmem:[%s11373_s30 + $0x15e8] sm:$0xff]  ;;  %v5097_v43 = vld [vmem:[%s11373_s30 + $0x1f0] sm:$0xff] }
 0x5ef   : > { %7165 = vmatpush2.msra.mxu1 %v5967_v44  ;;  %7062 = vmatpush1.msra.mxu0 %v5583_v47  ;;  %v5735_v44 = vld [vmem:[%s11373_s30 + $0x15e0] sm:$0xff]  ;;  %v5090_v47 = vld [vmem:[%s11373_s30 + $0x1b8] sm:$0xff] }
 0x5f0   : > { %7166 = vmatprep.subr.mxu1 %v5960_v2  ;;  %7063 = vmatprep.subr.mxu0 %v5576_v62  ;;  %v5728_v2 = vld [vmem:[%s11373_s30 + $0x15a8] sm:$0xff]  ;;  %v5089_v62 = vld [vmem:[%s11373_s30 + $0x1b0] sm:$0xff] }
 0x5f1   : > { %7167 = vmatpush2.msra.mxu1 %v5959_v56  ;;  %7064 = vmatpush1.msra.mxu0 %v5575_v50  ;;  %v5727_v56 = vld [vmem:[%s11373_s30 + $0x15a0] sm:$0xff]  ;;  %v5082_v50 = vld [vmem:[%s11373_s30 + $0x178] sm:$0xff] }
 0x5f2   : > { %7168 = vmatprep.subr.mxu1 %v5952_v59  ;;  %7065 = vmatprep.subr.mxu0 %v5568_v57  ;;  %v5720_v59 = vld [vmem:[%s11373_s30 + $0x1568] sm:$0xff]  ;;  %v5081_v57 = vld [vmem:[%s11373_s30 + $0x170] sm:$0xff] }
 0x5f3   : > { %7169 = vmatpush2.msra.mxu1 %v5951_v55  ;;  %7066 = vmatpush1.msra.mxu0 %v5567_v35  ;;  %v5719_v55 = vld [vmem:[%s11373_s30 + $0x1560] sm:$0xff]  ;;  %v5074_v35 = vld [vmem:[%s11373_s30 + $0x138] sm:$0xff] }
 0x5f4   : > { %7170 = vmatprep.subr.mxu1 %v5944_v37  ;;  %7067 = vmatprep.subr.mxu0 %v5560_v58  ;;  %v5712_v37 = vld [vmem:[%s11373_s30 + $0x1528] sm:$0xff]  ;;  %v5073_v58 = vld [vmem:[%s11373_s30 + $0x130] sm:$0xff] }
 0x5f5   : > { %7171 = vmatpush2.msra.mxu1 %v5943_v60  ;;  %7068 = vmatpush1.msra.mxu0 %v5559_v9  ;;  %v5711_v60 = vld [vmem:[%s11373_s30 + $0x1520] sm:$0xff]  ;;  %v5066_v9 = vld [vmem:[%s11373_s30 + $0xf8] sm:$0xff] }
 0x5f6   : > { %7172 = vmatprep.subr.mxu1 %v5936_v5  ;;  %7069 = vmatprep.subr.mxu0 %v5552_v21  ;;  %v5704_v5 = vld [vmem:[%s11373_s30 + $0x14e8] sm:$0xff]  ;;  %v5065_v21 = vld [vmem:[%s11373_s30 + $0xf0] sm:$0xff] }
 0x5f7   : > { %7173 = vmatpush2.msra.mxu1 %v5935_v25  ;;  %7070 = vmatpush1.msra.mxu0 %v5551_v20  ;;  %v5703_v25 = vld [vmem:[%s11373_s30 + $0x14e0] sm:$0xff]  ;;  %v5058_v20 = vld [vmem:[%s11373_s30 + $0xb8] sm:$0xff] }
 0x5f8   : > { %7175 = vmatmul.mubr.f32.vlgmr.msra.gmra.mxu1 %v11747_v0  ;;  %7252 = vmatprep.subr.mxu1 %v5162_v1  ;;  %v5696_v1 = vld [vmem:[%s11373_s30 + $0x14a8] sm:$0xff] }
 0x5f9   : > { %7071 = vmatprep.subr.mxu0 %v5800_v39  ;;  %7253 = vmatpush1.msra.mxu1 %v5161_v3  ;;  %v5057_v39 = vld [vmem:[%s11373_s30 + $0xb0] sm:$0xff]  ;;  %v5695_v3 = vld [vmem:[%s11373_s30 + $0x14a0] sm:$0xff] }
 0x5fa   : > { %7316 = vmatprep.mubr.f32.mxu1 %v11386_v54  ;;  %7072 = vmatpush2.msra.mxu0 %v5799_v53  ;;  %v5137_v54 = vld [vmem:[%s11373_s30 + $0x330] sm:$0xff]  ;;  %v5050_v53 = vld [vmem:[%s11373_s30 + $0x78] sm:$0xff] }
 0x5fb   : > { %7254 = vmatprep.subr.mxu1 %v5154_v7  ;;  %7073 = vmatprep.subr.mxu0 %v5792_v51  ;;  %v5688_v7 = vld [vmem:[%s11373_s30 + $0x1468] sm:$0xff]  ;;  %v5049_v51 = vld [vmem:[%s11373_s30 + $0x70] sm:$0xff] }
 0x5fc   : > { %7255 = vmatpush1.msra.mxu1 %v5153_v6  ;;  %7074 = vmatpush2.msra.mxu0 %v5791_v8  ;;  %v5687_v6 = vld [vmem:[%s11373_s30 + $0x1460] sm:$0xff]  ;;  %v5042_v8 = vld [vmem:[%s11373_s30 + $0x38] sm:$0xff] }
 0x5fd   : > { %7256 = vmatprep.subr.mxu1 %v5146_v16  ;;  %7075 = vmatprep.subr.mxu0 %v5784_v13  ;;  %v5680_v16 = vld [vmem:[%s11373_s30 + $0x1428] sm:$0xff]  ;;  %v5041_v13 = vld [vmem:[%s11373_s30 + $0x30] sm:$0xff] }
 0x5fe   : > { %7257 = vmatpush1.msra.mxu1 %v5145_v27  ;;  %7076 = vmatpush2.msra.mxu0 %v5783_v42  ;;  %v5679_v27 = vld [vmem:[%s11373_s30 + $0x1420] sm:$0xff]  ;;  %v5290_v42 = vld [vmem:[%s11373_s30 + $0x7f8] sm:$0xff] }
 0x5ff   : > { %7258 = vmatprep.subr.mxu1 %v5138_v10  ;;  %7077 = vmatprep.subr.mxu0 %v5776_v12  ;;  %v6184_v10 = vld [vmem:[%s11373_s30 + $0x23e8] sm:$0xff]  ;;  %v5289_v12 = vld [vmem:[%s11373_s30 + $0x7f0] sm:$0xff] }
 0x600   : > { %7259 = vmatpush1.msra.mxu1 %v5137_v54  ;;  %7078 = vmatpush2.msra.mxu0 %v5775_v14  ;;  %v6183_v54 = vld [vmem:[%s11373_s30 + $0x23e0] sm:$0xff]  ;;  %v5282_v14 = vld [vmem:[%s11373_s30 + $0x7b8] sm:$0xff] }
 0x601   : > { %7260 = vmatprep.subr.mxu1 %v5130_v11  ;;  %7079 = vmatprep.subr.mxu0 %v5768_v45  ;;  %v6176_v11 = vld [vmem:[%s11373_s30 + $0x23a8] sm:$0xff]  ;;  %v5281_v45 = vld [vmem:[%s11373_s30 + $0x7b0] sm:$0xff] }
 0x602   : > { %7261 = vmatpush1.msra.mxu1 %v5129_v15  ;;  %7080 = vmatpush2.msra.mxu0 %v5767_v17  ;;  %v6175_v15 = vld [vmem:[%s11373_s30 + $0x23a0] sm:$0xff]  ;;  %v5274_v17 = vld [vmem:[%s11373_s30 + $0x778] sm:$0xff] }
 0x603   : > { %7262 = vmatprep.subr.mxu1 %v5122_v18  ;;  %7081 = vmatprep.subr.mxu0 %v5760_v19  ;;  %v6168_v18 = vld [vmem:[%s11373_s30 + $0x2368] sm:$0xff]  ;;  %v5273_v19 = vld [vmem:[%s11373_s30 + $0x770] sm:$0xff] }
 0x604   : > { %7263 = vmatpush1.msra.mxu1 %v5121_v24  ;;  %7082 = vmatpush2.msra.mxu0 %v5759_v26  ;;  %v6167_v24 = vld [vmem:[%s11373_s30 + $0x2360] sm:$0xff]  ;;  %v5266_v26 = vld [vmem:[%s11373_s30 + $0x738] sm:$0xff] }
 0x605   : > { %7264 = vmatprep.subr.mxu1 %v5114_v28  ;;  %7083 = vmatprep.subr.mxu0 %v5752_v29  ;;  %v6160_v28 = vld [vmem:[%s11373_s30 + $0x2328] sm:$0xff]  ;;  %v5265_v29 = vld [vmem:[%s11373_s30 + $0x730] sm:$0xff] }
 0x606   : > { %7265 = vmatpush1.msra.mxu1 %v5113_v30  ;;  %7084 = vmatpush2.msra.mxu0 %v5751_v32  ;;  %v6159_v30 = vld [vmem:[%s11373_s30 + $0x2320] sm:$0xff]  ;;  %v5258_v32 = vld [vmem:[%s11373_s30 + $0x6f8] sm:$0xff] }
 0x607   : > { %7266 = vmatprep.subr.mxu1 %v5106_v33  ;;  %7085 = vmatprep.subr.mxu0 %v5744_v23  ;;  %v6152_v33 = vld [vmem:[%s11373_s30 + $0x22e8] sm:$0xff]  ;;  %v5257_v23 = vld [vmem:[%s11373_s30 + $0x6f0] sm:$0xff] }
 0x608   : > { %7267 = vmatpush1.msra.mxu1 %v5105_v34  ;;  %7086 = vmatpush2.msra.mxu0 %v5743_v36  ;;  %v6151_v34 = vld [vmem:[%s11373_s30 + $0x22e0] sm:$0xff]  ;;  %v5250_v36 = vld [vmem:[%s11373_s30 + $0x6b8] sm:$0xff] }
 0x609   : > { %7268 = vmatprep.subr.mxu1 %v5098_v38  ;;  %7087 = vmatprep.subr.mxu0 %v5736_v41  ;;  %v6144_v38 = vld [vmem:[%s11373_s30 + $0x22a8] sm:$0xff]  ;;  %v5249_v41 = vld [vmem:[%s11373_s30 + $0x6b0] sm:$0xff] }
 0x60a   : > { %7269 = vmatpush1.msra.mxu1 %v5097_v43  ;;  %7088 = vmatpush2.msra.mxu0 %v5735_v44  ;;  %v6143_v43 = vld [vmem:[%s11373_s30 + $0x22a0] sm:$0xff]  ;;  %v5242_v44 = vld [vmem:[%s11373_s30 + $0x678] sm:$0xff] }
 0x60b   : > { %7270 = vmatprep.subr.mxu1 %v5090_v47  ;;  %7089 = vmatprep.subr.mxu0 %v5728_v2  ;;  %v6136_v47 = vld [vmem:[%s11373_s30 + $0x2268] sm:$0xff]  ;;  %v5241_v2 = vld [vmem:[%s11373_s30 + $0x670] sm:$0xff] }
 0x60c   : > { %7271 = vmatpush1.msra.mxu1 %v5089_v62  ;;  %7090 = vmatpush2.msra.mxu0 %v5727_v56  ;;  %v6135_v62 = vld [vmem:[%s11373_s30 + $0x2260] sm:$0xff]  ;;  %v5234_v56 = vld [vmem:[%s11373_s30 + $0x638] sm:$0xff] }
 0x60d   : > { %7272 = vmatprep.subr.mxu1 %v5082_v50  ;;  %7091 = vmatprep.subr.mxu0 %v5720_v59  ;;  %v6128_v50 = vld [vmem:[%s11373_s30 + $0x2228] sm:$0xff]  ;;  %v5233_v59 = vld [vmem:[%s11373_s30 + $0x630] sm:$0xff] }
 0x60e   : > { %7273 = vmatpush1.msra.mxu1 %v5081_v57  ;;  %7092 = vmatpush2.msra.mxu0 %v5719_v55  ;;  %v6127_v57 = vld [vmem:[%s11373_s30 + $0x2220] sm:$0xff]  ;;  %v5226_v55 = vld [vmem:[%s11373_s30 + $0x5f8] sm:$0xff] }
 0x60f   : > { %7274 = vmatprep.subr.mxu1 %v5074_v35  ;;  %7093 = vmatprep.subr.mxu0 %v5712_v37  ;;  %v6120_v35 = vld [vmem:[%s11373_s30 + $0x21e8] sm:$0xff]  ;;  %v5225_v37 = vld [vmem:[%s11373_s30 + $0x5f0] sm:$0xff] }
 0x610   : > { %7275 = vmatpush1.msra.mxu1 %v5073_v58  ;;  %7094 = vmatpush2.msra.mxu0 %v5711_v60  ;;  %v6119_v58 = vld [vmem:[%s11373_s30 + $0x21e0] sm:$0xff]  ;;  %v5218_v60 = vld [vmem:[%s11373_s30 + $0x5b8] sm:$0xff] }
 0x611   : > { %7276 = vmatprep.subr.mxu1 %v5066_v9  ;;  %7095 = vmatprep.subr.mxu0 %v5704_v5  ;;  %v6112_v9 = vld [vmem:[%s11373_s30 + $0x21a8] sm:$0xff]  ;;  %v5217_v5 = vld [vmem:[%s11373_s30 + $0x5b0] sm:$0xff] }
 0x612   : > { %7277 = vmatpush1.msra.mxu1 %v5065_v21  ;;  %7096 = vmatpush2.msra.mxu0 %v5703_v25  ;;  %v6111_v21 = vld [vmem:[%s11373_s30 + $0x21a0] sm:$0xff]  ;;  %v5210_v25 = vld [vmem:[%s11373_s30 + $0x578] sm:$0xff] }
 0x613   : > { %7278 = vmatprep.subr.mxu1 %v5058_v20  ;;  %7097 = vmatprep.subr.mxu0 %v5696_v1  ;;  %v6104_v20 = vld [vmem:[%s11373_s30 + $0x2168] sm:$0xff]  ;;  %v5209_v1 = vld [vmem:[%s11373_s30 + $0x570] sm:$0xff] }
 0x614   : > { %7279 = vmatpush1.msra.mxu1 %v5057_v39  ;;  %7098 = vmatpush2.msra.mxu0 %v5695_v3  ;;  %v6103_v39 = vld [vmem:[%s11373_s30 + $0x2160] sm:$0xff]  ;;  %v5202_v3 = vld [vmem:[%s11373_s30 + $0x538] sm:$0xff] }
 0x615   : > { %7280 = vmatprep.subr.mxu1 %v5050_v53  ;;  %7099 = vmatprep.subr.mxu0 %v5688_v7  ;;  %v6096_v53 = vld [vmem:[%s11373_s30 + $0x2128] sm:$0xff]  ;;  %v5201_v7 = vld [vmem:[%s11373_s30 + $0x530] sm:$0xff] }
 0x616   : > { %7281 = vmatpush1.msra.mxu1 %v5049_v51  ;;  %7100 = vmatpush2.msra.mxu0 %v5687_v6  ;;  %v6095_v51 = vld [vmem:[%s11373_s30 + $0x2120] sm:$0xff]  ;;  %v5194_v6 = vld [vmem:[%s11373_s30 + $0x4f8] sm:$0xff] }
 0x617   : > { %7282 = vmatprep.subr.mxu1 %v5042_v8  ;;  %7101 = vmatprep.subr.mxu0 %v5680_v16  ;;  %v6088_v8 = vld [vmem:[%s11373_s30 + $0x20e8] sm:$0xff]  ;;  %v5193_v16 = vld [vmem:[%s11373_s30 + $0x4f0] sm:$0xff] }
 0x618   : > { %7283 = vmatpush1.msra.mxu1 %v5041_v13  ;;  %7102 = vmatpush2.msra.mxu0 %v5679_v27  ;;  %v6087_v13 = vld [vmem:[%s11373_s30 + $0x20e0] sm:$0xff]  ;;  %v5186_v27 = vld [vmem:[%s11373_s30 + $0x4b8] sm:$0xff] }
 0x619   : > { %7284 = vmatprep.subr.mxu1 %v5290_v42  ;;  %7104 = vmatmul.mubr.f32.vlgmr.msra.gmra.mxu0 %v11699_v4  ;;  %v6080_v42 = vld [vmem:[%s11373_s30 + $0x20a8] sm:$0xff] }
 0x61a   : > { %7181 = vmatprep.subr.mxu0 %v6184_v10  ;;  %7285 = vmatpush2.msra.mxu1 %v5289_v12  ;;  %v5185_v10 = vld [vmem:[%s11373_s30 + $0x4b0] sm:$0xff]  ;;  %v6079_v12 = vld [vmem:[%s11373_s30 + $0x20a0] sm:$0xff] }
 0x61b   : > { %7182 = vmatpush1.msra.mxu0 %v6183_v54  ;;  %7286 = vmatprep.subr.mxu1 %v5282_v14  ;;  %v5178_v54 = vld [vmem:[%s11373_s30 + $0x478] sm:$0xff]  ;;  %v6072_v14 = vld [vmem:[%s11373_s30 + $0x2068] sm:$0xff] }
 0x61c   : > { %7183 = vmatprep.subr.mxu0 %v6176_v11  ;;  %7287 = vmatpush2.msra.mxu1 %v5281_v45  ;;  %v5177_v11 = vld [vmem:[%s11373_s30 + $0x470] sm:$0xff]  ;;  %v6071_v45 = vld [vmem:[%s11373_s30 + $0x2060] sm:$0xff] }
 0x61d   : > { %7184 = vmatpush1.msra.mxu0 %v6175_v15  ;;  %7288 = vmatprep.subr.mxu1 %v5274_v17  ;;  %v5170_v15 = vld [vmem:[%s11373_s30 + $0x438] sm:$0xff]  ;;  %v6064_v17 = vld [vmem:[%s11373_s30 + $0x2028] sm:$0xff] }
 0x61e   : > { %7185 = vmatprep.subr.mxu0 %v6168_v18  ;;  %7289 = vmatpush2.msra.mxu1 %v5273_v19  ;;  %v5169_v18 = vld [vmem:[%s11373_s30 + $0x430] sm:$0xff]  ;;  %v6063_v19 = vld [vmem:[%s11373_s30 + $0x2020] sm:$0xff] }
 0x61f   : > { %7186 = vmatpush1.msra.mxu0 %v6167_v24  ;;  %7290 = vmatprep.subr.mxu1 %v5266_v26  ;;  %v5674_v24 = vld [vmem:[%s11373_s30 + $0x13f8] sm:$0xff] }
 0x620   : > { %7187 = vmatprep.subr.mxu0 %v6160_v28  ;;  %7291 = vmatpush2.msra.mxu1 %v5265_v29  ;;  %v5418_v26 = vld [vmem:[%s11373_s30 + $0xbf8] sm:$0xff]  ;;  %v5673_v28 = vld [vmem:[%s11373_s30 + $0x13f0] sm:$0xff] }
 0x621   : > { %7188 = vmatpush1.msra.mxu0 %v6159_v30  ;;  %7292 = vmatprep.subr.mxu1 %v5258_v32  ;;  %v5417_v29 = vld [vmem:[%s11373_s30 + $0xbf0] sm:$0xff]  ;;  %v5666_v30 = vld [vmem:[%s11373_s30 + $0x13b8] sm:$0xff] }
 0x622   : > { %7189 = vmatprep.subr.mxu0 %v6152_v33  ;;  %7293 = vmatpush2.msra.mxu1 %v5257_v23  ;;  %v5410_v32 = vld [vmem:[%s11373_s30 + $0xbb8] sm:$0xff]  ;;  %v5665_v33 = vld [vmem:[%s11373_s30 + $0x13b0] sm:$0xff] }
 0x623   : > { %7190 = vmatpush1.msra.mxu0 %v6151_v34  ;;  %7294 = vmatprep.subr.mxu1 %v5250_v36  ;;  %v5409_v23 = vld [vmem:[%s11373_s30 + $0xbb0] sm:$0xff]  ;;  %v5402_v34 = vld [vmem:[%s11373_s30 + $0xb78] sm:$0xff] }
 0x624   : > { %7191 = vmatprep.subr.mxu0 %v6144_v38  ;;  %7295 = vmatpush2.msra.mxu1 %v5249_v41  ;;  %v5657_v36 = vld [vmem:[%s11373_s30 + $0x1370] sm:$0xff]  ;;  %v5650_v41 = vld [vmem:[%s11373_s30 + $0x1338] sm:$0xff] }
 0x625   : > { %7192 = vmatpush1.msra.mxu0 %v6143_v43  ;;  %7296 = vmatprep.subr.mxu1 %v5242_v44  ;;  %v5401_v38 = vld [vmem:[%s11373_s30 + $0xb70] sm:$0xff]  ;;  %v5642_v44 = vld [vmem:[%s11373_s30 + $0x12f8] sm:$0xff] }
 0x626   : > { %7193 = vmatprep.subr.mxu0 %v6136_v47  ;;  %7297 = vmatpush2.msra.mxu1 %v5241_v2  ;;  %v5649_v43 = vld [vmem:[%s11373_s30 + $0x1330] sm:$0xff]  ;;  %v5386_v47 = vld [vmem:[%s11373_s30 + $0xaf8] sm:$0xff] }
 0x627   : > { %7194 = vmatpush1.msra.mxu0 %v6135_v62  ;;  %7298 = vmatprep.subr.mxu1 %v5234_v56  ;;  %v5641_v2 = vld [vmem:[%s11373_s30 + $0x12f0] sm:$0xff]  ;;  %v5634_v56 = vld [vmem:[%s11373_s30 + $0x12b8] sm:$0xff] }
 0x628   : > { %7195 = vmatprep.subr.mxu0 %v6128_v50  ;;  %7299 = vmatpush2.msra.mxu1 %v5233_v59  ;;  %v5385_v62 = vld [vmem:[%s11373_s30 + $0xaf0] sm:$0xff]  ;;  %v5378_v50 = vld [vmem:[%s11373_s30 + $0xab8] sm:$0xff] }
 0x629   : > { %7196 = vmatpush1.msra.mxu0 %v6127_v57  ;;  %7300 = vmatprep.subr.mxu1 %v5226_v55  ;;  %v5633_v59 = vld [vmem:[%s11373_s30 + $0x12b0] sm:$0xff]  ;;  %v5626_v55 = vld [vmem:[%s11373_s30 + $0x1278] sm:$0xff] }
 0x62a   : > { %7197 = vmatprep.subr.mxu0 %v6120_v35  ;;  %7301 = vmatpush2.msra.mxu1 %v5225_v37  ;;  %v5377_v57 = vld [vmem:[%s11373_s30 + $0xab0] sm:$0xff]  ;;  %v5370_v35 = vld [vmem:[%s11373_s30 + $0xa78] sm:$0xff] }
 0x62b   : > { %7198 = vmatpush1.msra.mxu0 %v6119_v58  ;;  %7302 = vmatprep.subr.mxu1 %v5218_v60  ;;  %v5625_v37 = vld [vmem:[%s11373_s30 + $0x1270] sm:$0xff]  ;;  %v5618_v60 = vld [vmem:[%s11373_s30 + $0x1238] sm:$0xff] }
 0x62c   : > { %7199 = vmatprep.subr.mxu0 %v6112_v9  ;;  %7303 = vmatpush2.msra.mxu1 %v5217_v5  ;;  %v5369_v58 = vld [vmem:[%s11373_s30 + $0xa70] sm:$0xff]  ;;  %v5362_v9 = vld [vmem:[%s11373_s30 + $0xa38] sm:$0xff] }
 0x62d   : > { %7200 = vmatpush1.msra.mxu0 %v6111_v21  ;;  %7304 = vmatprep.subr.mxu1 %v5210_v25  ;;  %v5617_v5 = vld [vmem:[%s11373_s30 + $0x1230] sm:$0xff]  ;;  %v5610_v25 = vld [vmem:[%s11373_s30 + $0x11f8] sm:$0xff] }
 0x62e   : > { %7201 = vmatprep.subr.mxu0 %v6104_v20  ;;  %7305 = vmatpush2.msra.mxu1 %v5209_v1  ;;  %v5361_v21 = vld [vmem:[%s11373_s30 + $0xa30] sm:$0xff]  ;;  %v5354_v20 = vld [vmem:[%s11373_s30 + $0x9f8] sm:$0xff] }
 0x62f   : > { %7202 = vmatpush1.msra.mxu0 %v6103_v39  ;;  %7306 = vmatprep.subr.mxu1 %v5202_v3  ;;  %v5609_v1 = vld [vmem:[%s11373_s30 + $0x11f0] sm:$0xff]  ;;  %v5602_v3 = vld [vmem:[%s11373_s30 + $0x11b8] sm:$0xff] }
 0x630   : > { %7203 = vmatprep.subr.mxu0 %v6096_v53  ;;  %7307 = vmatpush2.msra.mxu1 %v5201_v7  ;;  %v5353_v39 = vld [vmem:[%s11373_s30 + $0x9f0] sm:$0xff]  ;;  %v5346_v53 = vld [vmem:[%s11373_s30 + $0x9b8] sm:$0xff] }
 0x631   : > { %7204 = vmatpush1.msra.mxu0 %v6095_v51  ;;  %7308 = vmatprep.subr.mxu1 %v5194_v6  ;;  %v5601_v7 = vld [vmem:[%s11373_s30 + $0x11b0] sm:$0xff]  ;;  %v5594_v6 = vld [vmem:[%s11373_s30 + $0x1178] sm:$0xff] }
 0x632   : > { %7205 = vmatprep.subr.mxu0 %v6088_v8  ;;  %7309 = vmatpush2.msra.mxu1 %v5193_v16  ;;  %v5345_v51 = vld [vmem:[%s11373_s30 + $0x9b0] sm:$0xff]  ;;  %v5338_v8 = vld [vmem:[%s11373_s30 + $0x978] sm:$0xff] }
 0x633   : > { %7206 = vmatpush1.msra.mxu0 %v6087_v13  ;;  %7310 = vmatprep.subr.mxu1 %v5186_v27  ;;  %v5593_v16 = vld [vmem:[%s11373_s30 + $0x1170] sm:$0xff]  ;;  %v5586_v27 = vld [vmem:[%s11373_s30 + $0x1138] sm:$0xff] }
 0x634   : > { %7207 = vmatprep.subr.mxu0 %v6080_v42  ;;  %7311 = vmatpush2.msra.mxu1 %v5185_v10  ;;  %v5337_v13 = vld [vmem:[%s11373_s30 + $0x970] sm:$0xff]  ;;  %v5330_v42 = vld [vmem:[%s11373_s30 + $0x938] sm:$0xff] }
 0x635   : > { %7208 = vmatpush1.msra.mxu0 %v6079_v12  ;;  %7312 = vmatprep.subr.mxu1 %v5178_v54  ;;  %v5585_v10 = vld [vmem:[%s11373_s30 + $0x1130] sm:$0xff]  ;;  %v5578_v54 = vld [vmem:[%s11373_s30 + $0x10f8] sm:$0xff] }
 0x636   : > { %7209 = vmatprep.subr.mxu0 %v6072_v14  ;;  %7313 = vmatpush2.msra.mxu1 %v5177_v11  ;;  %v5329_v12 = vld [vmem:[%s11373_s30 + $0x930] sm:$0xff]  ;;  %v5322_v14 = vld [vmem:[%s11373_s30 + $0x8f8] sm:$0xff] }
 0x637   : > { %7210 = vmatpush1.msra.mxu0 %v6071_v45  ;;  %7314 = vmatprep.subr.mxu1 %v5170_v15  ;;  %v5577_v11 = vld [vmem:[%s11373_s30 + $0x10f0] sm:$0xff]  ;;  %v5570_v15 = vld [vmem:[%s11373_s30 + $0x10b8] sm:$0xff] }
 0x638   : > { %7211 = vmatprep.subr.mxu0 %v6064_v17  ;;  %7315 = vmatpush2.msra.mxu1 %v5169_v18  ;;  %v5321_v45 = vld [vmem:[%s11373_s30 + $0x8f0] sm:$0xff]  ;;  %v5314_v17 = vld [vmem:[%s11373_s30 + $0x8b8] sm:$0xff] }
 0x639   : > { %7212 = vmatpush1.msra.mxu0 %v6063_v19  ;;  %7245 = vmatprep.mubr.f32.mxu0 %v8033_v52  ;;  %v5569_v18 = vld [vmem:[%s11373_s30 + $0x10b0] sm:$0xff] }
 0x63a   : > { %7317 = vmatmul.mubr.f32.vlgmr.msra.gmra.mxu1 %v11547_v46  ;;  %7394 = vmatprep.subr.mxu1 %v5674_v24  ;;  %v5658_v46 = vld [vmem:[%s11373_s30 + $0x1378] sm:$0xff]  ;;  %v5313_v19 = vld [vmem:[%s11373_s30 + $0x8b0] sm:$0xff] }
 0x63b   : > { %7246 = vmatmul.mubr.f32.vlgmr.msra.gmra.mxu0 %v11827_v49  ;;  %7323 = vmatprep.subr.mxu0 %v5418_v26  ;;  %v5562_v24 = vld [vmem:[%s11373_s30 + $0x1078] sm:$0xff] }
 0x63c   : > { %7395 = vmatpush1.msra.mxu1 %v5673_v28  ;;  %7458 = vmatprep.mubr.f32.mxu1 %v11551_v61  ;;  %v5394_v61 = vld [vmem:[%s11373_s30 + $0xb38] sm:$0xff]  ;;  %v5561_v28 = vld [vmem:[%s11373_s30 + $0x1070] sm:$0xff] }
 0x63d   : > { %7324 = vmatpush1.msra.mxu0 %v5417_v29  ;;  %7387 = vmatprep.mubr.f32.mxu0 %v11398_v22  ;;  %v5393_v22 = vld [vmem:[%s11373_s30 + $0xb30] sm:$0xff]  ;;  %v5306_v26 = vld [vmem:[%s11373_s30 + $0x878] sm:$0xff] }
 0x63e   : > { %7396 = vmatprep.subr.mxu1 %v5666_v30  ;;  %7325 = vmatprep.subr.mxu0 %v5410_v32  ;;  %v5305_v29 = vld [vmem:[%s11373_s30 + $0x870] sm:$0xff]  ;;  %v5554_v30 = vld [vmem:[%s11373_s30 + $0x1038] sm:$0xff] }
 0x63f   : > { %7397 = vmatpush1.msra.mxu1 %v5665_v33  ;;  %7326 = vmatpush1.msra.mxu0 %v5409_v23  ;;  %v5298_v32 = vld [vmem:[%s11373_s30 + $0x838] sm:$0xff]  ;;  %v5553_v33 = vld [vmem:[%s11373_s30 + $0x1030] sm:$0xff] }
 0x640   : > { %7398 = vmatprep.subr.mxu1 %v5658_v46  ;;  %7327 = vmatprep.subr.mxu0 %v5402_v34  ;;  %v5297_v23 = vld [vmem:[%s11373_s30 + $0x830] sm:$0xff]  ;;  %v5802_v46 = vld [vmem:[%s11373_s30 + $0x17f8] sm:$0xff] }
 0x641   : > { %7399 = vmatpush1.msra.mxu1 %v5657_v36  ;;  %7328 = vmatpush1.msra.mxu0 %v5401_v38  ;;  %v5546_v34 = vld [vmem:[%s11373_s30 + $0xff8] sm:$0xff]  ;;  %v5801_v36 = vld [vmem:[%s11373_s30 + $0x17f0] sm:$0xff] }
 0x642   : > { %7400 = vmatprep.subr.mxu1 %v5650_v41  ;;  %7329 = vmatprep.subr.mxu0 %v5394_v61  ;;  %v5545_v38 = vld [vmem:[%s11373_s30 + $0xff0] sm:$0xff]  ;;  %v5794_v41 = vld [vmem:[%s11373_s30 + $0x17b8] sm:$0xff] }
 0x643   : > { %7401 = vmatpush1.msra.mxu1 %v5649_v43  ;;  %7330 = vmatpush1.msra.mxu0 %v5393_v22  ;;  %v5538_v61 = vld [vmem:[%s11373_s30 + $0xfb8] sm:$0xff]  ;;  %v5793_v43 = vld [vmem:[%s11373_s30 + $0x17b0] sm:$0xff] }
 0x644   : > { %7402 = vmatprep.subr.mxu1 %v5642_v44  ;;  %7331 = vmatprep.subr.mxu0 %v5386_v47  ;;  %v5537_v22 = vld [vmem:[%s11373_s30 + $0xfb0] sm:$0xff]  ;;  %v5786_v44 = vld [vmem:[%s11373_s30 + $0x1778] sm:$0xff] }
 0x645   : > { %7403 = vmatpush1.msra.mxu1 %v5641_v2  ;;  %7332 = vmatpush1.msra.mxu0 %v5385_v62  ;;  %v5530_v47 = vld [vmem:[%s11373_s30 + $0xf78] sm:$0xff]  ;;  %v5785_v2 = vld [vmem:[%s11373_s30 + $0x1770] sm:$0xff] }
 0x646   : > { %7404 = vmatprep.subr.mxu1 %v5634_v56  ;;  %7333 = vmatprep.subr.mxu0 %v5378_v50  ;;  %v5529_v62 = vld [vmem:[%s11373_s30 + $0xf70] sm:$0xff]  ;;  %v5778_v56 = vld [vmem:[%s11373_s30 + $0x1738] sm:$0xff] }
 0x647   : > { %7405 = vmatpush1.msra.mxu1 %v5633_v59  ;;  %7334 = vmatpush1.msra.mxu0 %v5377_v57  ;;  %v5522_v50 = vld [vmem:[%s11373_s30 + $0xf38] sm:$0xff]  ;;  %v5777_v59 = vld [vmem:[%s11373_s30 + $0x1730] sm:$0xff] }
 0x648   : > { %7406 = vmatprep.subr.mxu1 %v5626_v55  ;;  %7335 = vmatprep.subr.mxu0 %v5370_v35  ;;  %v5521_v57 = vld [vmem:[%s11373_s30 + $0xf30] sm:$0xff]  ;;  %v5770_v55 = vld [vmem:[%s11373_s30 + $0x16f8] sm:$0xff] }
 0x649   : > { %7407 = vmatpush1.msra.mxu1 %v5625_v37  ;;  %7336 = vmatpush1.msra.mxu0 %v5369_v58  ;;  %v5514_v35 = vld [vmem:[%s11373_s30 + $0xef8] sm:$0xff]  ;;  %v5769_v37 = vld [vmem:[%s11373_s30 + $0x16f0] sm:$0xff] }
 0x64a   : > { %7408 = vmatprep.subr.mxu1 %v5618_v60  ;;  %7337 = vmatprep.subr.mxu0 %v5362_v9  ;;  %v5513_v58 = vld [vmem:[%s11373_s30 + $0xef0] sm:$0xff]  ;;  %v5762_v60 = vld [vmem:[%s11373_s30 + $0x16b8] sm:$0xff] }
 0x64b   : > { %7409 = vmatpush1.msra.mxu1 %v5617_v5  ;;  %7338 = vmatpush1.msra.mxu0 %v5361_v21  ;;  %v5506_v9 = vld [vmem:[%s11373_s30 + $0xeb8] sm:$0xff]  ;;  %v5761_v5 = vld [vmem:[%s11373_s30 + $0x16b0] sm:$0xff] }
 0x64c   : > { %7410 = vmatprep.subr.mxu1 %v5610_v25  ;;  %7339 = vmatprep.subr.mxu0 %v5354_v20  ;;  %v5505_v21 = vld [vmem:[%s11373_s30 + $0xeb0] sm:$0xff]  ;;  %v5754_v25 = vld [vmem:[%s11373_s30 + $0x1678] sm:$0xff] }
 0x64d   : > { %7411 = vmatpush1.msra.mxu1 %v5609_v1  ;;  %7340 = vmatpush1.msra.mxu0 %v5353_v39  ;;  %v5498_v20 = vld [vmem:[%s11373_s30 + $0xe78] sm:$0xff]  ;;  %v5753_v1 = vld [vmem:[%s11373_s30 + $0x1670] sm:$0xff] }
 0x64e   : > { %7412 = vmatprep.subr.mxu1 %v5602_v3  ;;  %7341 = vmatprep.subr.mxu0 %v5346_v53  ;;  %v5497_v39 = vld [vmem:[%s11373_s30 + $0xe70] sm:$0xff]  ;;  %v5746_v3 = vld [vmem:[%s11373_s30 + $0x1638] sm:$0xff] }
 0x64f   : > { %7413 = vmatpush1.msra.mxu1 %v5601_v7  ;;  %7342 = vmatpush1.msra.mxu0 %v5345_v51  ;;  %v5490_v53 = vld [vmem:[%s11373_s30 + $0xe38] sm:$0xff]  ;;  %v5745_v7 = vld [vmem:[%s11373_s30 + $0x1630] sm:$0xff] }
 0x650   : > { %7414 = vmatprep.subr.mxu1 %v5594_v6  ;;  %7343 = vmatprep.subr.mxu0 %v5338_v8  ;;  %v5489_v51 = vld [vmem:[%s11373_s30 + $0xe30] sm:$0xff]  ;;  %v5738_v6 = vld [vmem:[%s11373_s30 + $0x15f8] sm:$0xff] }
 0x651   : > { %7415 = vmatpush1.msra.mxu1 %v5593_v16  ;;  %7344 = vmatpush1.msra.mxu0 %v5337_v13  ;;  %v5482_v8 = vld [vmem:[%s11373_s30 + $0xdf8] sm:$0xff]  ;;  %v5737_v16 = vld [vmem:[%s11373_s30 + $0x15f0] sm:$0xff] }
 0x652   : > { %7416 = vmatprep.subr.mxu1 %v5586_v27  ;;  %7345 = vmatprep.subr.mxu0 %v5330_v42  ;;  %v5481_v13 = vld [vmem:[%s11373_s30 + $0xdf0] sm:$0xff]  ;;  %v5730_v27 = vld [vmem:[%s11373_s30 + $0x15b8] sm:$0xff] }
 0x653   : > { %7417 = vmatpush1.msra.mxu1 %v5585_v10  ;;  %7346 = vmatpush1.msra.mxu0 %v5329_v12  ;;  %v5474_v42 = vld [vmem:[%s11373_s30 + $0xdb8] sm:$0xff]  ;;  %v5729_v10 = vld [vmem:[%s11373_s30 + $0x15b0] sm:$0xff] }
 0x654   : > { %7418 = vmatprep.subr.mxu1 %v5578_v54  ;;  %7347 = vmatprep.subr.mxu0 %v5322_v14  ;;  %v5473_v12 = vld [vmem:[%s11373_s30 + $0xdb0] sm:$0xff]  ;;  %v5722_v54 = vld [vmem:[%s11373_s30 + $0x1578] sm:$0xff] }
 0x655   : > { %7419 = vmatpush1.msra.mxu1 %v5577_v11  ;;  %7348 = vmatpush1.msra.mxu0 %v5321_v45  ;;  %v5466_v14 = vld [vmem:[%s11373_s30 + $0xd78] sm:$0xff]  ;;  %v5721_v11 = vld [vmem:[%s11373_s30 + $0x1570] sm:$0xff] }
 0x656   : > { %7420 = vmatprep.subr.mxu1 %v5570_v15  ;;  %7349 = vmatprep.subr.mxu0 %v5314_v17  ;;  %v5465_v45 = vld [vmem:[%s11373_s30 + $0xd70] sm:$0xff]  ;;  %v5714_v15 = vld [vmem:[%s11373_s30 + $0x1538] sm:$0xff] }
 0x657   : > { %7421 = vmatpush1.msra.mxu1 %v5569_v18  ;;  %7350 = vmatpush1.msra.mxu0 %v5313_v19  ;;  %v5458_v17 = vld [vmem:[%s11373_s30 + $0xd38] sm:$0xff]  ;;  %v5713_v18 = vld [vmem:[%s11373_s30 + $0x1530] sm:$0xff] }
 0x658   : > { %7422 = vmatprep.subr.mxu1 %v5562_v24  ;;  %7351 = vmatprep.subr.mxu0 %v5306_v26  ;;  %v5457_v19 = vld [vmem:[%s11373_s30 + $0xd30] sm:$0xff]  ;;  %v5706_v24 = vld [vmem:[%s11373_s30 + $0x14f8] sm:$0xff] }
 0x659   : > { %7423 = vmatpush1.msra.mxu1 %v5561_v28  ;;  %7352 = vmatpush1.msra.mxu0 %v5305_v29  ;;  %v5450_v26 = vld [vmem:[%s11373_s30 + $0xcf8] sm:$0xff]  ;;  %v5705_v28 = vld [vmem:[%s11373_s30 + $0x14f0] sm:$0xff] }
 0x65a   : > { %7424 = vmatprep.subr.mxu1 %v5554_v30  ;;  %7353 = vmatprep.subr.mxu0 %v5298_v32  ;;  %v5449_v29 = vld [vmem:[%s11373_s30 + $0xcf0] sm:$0xff]  ;;  %v5698_v30 = vld [vmem:[%s11373_s30 + $0x14b8] sm:$0xff] }
 0x65b   : > { %7425 = vmatpush1.msra.mxu1 %v5553_v33  ;;  %7354 = vmatpush1.msra.mxu0 %v5297_v23  ;;  %v5442_v32 = vld [vmem:[%s11373_s30 + $0xcb8] sm:$0xff]  ;;  %v5697_v33 = vld [vmem:[%s11373_s30 + $0x14b0] sm:$0xff] }
 0x65c   : > { %7426 = vmatprep.subr.mxu1 %v5802_v46  ;;  %7355 = vmatprep.subr.mxu0 %v5546_v34  ;;  %v5441_v23 = vld [vmem:[%s11373_s30 + $0xcb0] sm:$0xff]  ;;  %v5690_v46 = vld [vmem:[%s11373_s30 + $0x1478] sm:$0xff] }
 0x65d   : > { %7427 = vmatpush2.msra.mxu1 %v5801_v36  ;;  %7356 = vmatpush2.msra.mxu0 %v5545_v38  ;;  %v5434_v34 = vld [vmem:[%s11373_s30 + $0xc78] sm:$0xff]  ;;  %v5689_v36 = vld [vmem:[%s11373_s30 + $0x1470] sm:$0xff] }
 0x65e   : > { %7428 = vmatprep.subr.mxu1 %v5794_v41  ;;  %7357 = vmatprep.subr.mxu0 %v5538_v61  ;;  %v5433_v38 = vld [vmem:[%s11373_s30 + $0xc70] sm:$0xff]  ;;  %v5682_v41 = vld [vmem:[%s11373_s30 + $0x1438] sm:$0xff] }
 0x65f   : > { %7429 = vmatpush2.msra.mxu1 %v5793_v43  ;;  %7358 = vmatpush2.msra.mxu0 %v5537_v22  ;;  %v5426_v61 = vld [vmem:[%s11373_s30 + $0xc38] sm:$0xff]  ;;  %v5681_v43 = vld [vmem:[%s11373_s30 + $0x1430] sm:$0xff] }
 0x660   : > { %7430 = vmatprep.subr.mxu1 %v5786_v44  ;;  %7359 = vmatprep.subr.mxu0 %v5530_v47  ;;  %v5425_v22 = vld [vmem:[%s11373_s30 + $0xc30] sm:$0xff]  ;;  %v6186_v44 = vld [vmem:[%s11373_s30 + $0x23f8] sm:$0xff] }
 0x661   : > { %7431 = vmatpush2.msra.mxu1 %v5785_v2  ;;  %7360 = vmatpush2.msra.mxu0 %v5529_v62  ;;  %v5930_v47 = vld [vmem:[%s11373_s30 + $0x1bf8] sm:$0xff]  ;;  %v6185_v2 = vld [vmem:[%s11373_s30 + $0x23f0] sm:$0xff] }
 0x662   : > { %7432 = vmatprep.subr.mxu1 %v5778_v56  ;;  %7361 = vmatprep.subr.mxu0 %v5522_v50  ;;  %v5929_v62 = vld [vmem:[%s11373_s30 + $0x1bf0] sm:$0xff]  ;;  %v6178_v56 = vld [vmem:[%s11373_s30 + $0x23b8] sm:$0xff] }
 0x663   : > { %7433 = vmatpush2.msra.mxu1 %v5777_v59  ;;  %7362 = vmatpush2.msra.mxu0 %v5521_v57  ;;  %v5922_v50 = vld [vmem:[%s11373_s30 + $0x1bb8] sm:$0xff]  ;;  %v6177_v59 = vld [vmem:[%s11373_s30 + $0x23b0] sm:$0xff] }
 0x664   : > { %7434 = vmatprep.subr.mxu1 %v5770_v55  ;;  %7363 = vmatprep.subr.mxu0 %v5514_v35  ;;  %v5921_v57 = vld [vmem:[%s11373_s30 + $0x1bb0] sm:$0xff]  ;;  %v5914_v55 = vld [vmem:[%s11373_s30 + $0x1b78] sm:$0xff] }
 0x665   : > { %7435 = vmatpush2.msra.mxu1 %v5769_v37  ;;  %7364 = vmatpush2.msra.mxu0 %v5513_v58  ;;  %v5913_v35 = vld [vmem:[%s11373_s30 + $0x1b70] sm:$0xff]  ;;  %v6162_v37 = vld [vmem:[%s11373_s30 + $0x2338] sm:$0xff] }
 0x666   : > { %7436 = vmatprep.subr.mxu1 %v5762_v60  ;;  %7365 = vmatprep.subr.mxu0 %v5506_v9  ;;  %v5906_v58 = vld [vmem:[%s11373_s30 + $0x1b38] sm:$0xff]  ;;  %v6161_v60 = vld [vmem:[%s11373_s30 + $0x2330] sm:$0xff] }
 0x667   : > { %7437 = vmatpush2.msra.mxu1 %v5761_v5  ;;  %7366 = vmatpush2.msra.mxu0 %v5505_v21  ;;  %v6154_v9 = vld [vmem:[%s11373_s30 + $0x22f8] sm:$0xff]  ;;  %v6153_v21 = vld [vmem:[%s11373_s30 + $0x22f0] sm:$0xff] }
 0x668   : > { %7438 = vmatprep.subr.mxu1 %v5754_v25  ;;  %7367 = vmatprep.subr.mxu0 %v5498_v20  ;;  %v5898_v5 = vld [vmem:[%s11373_s30 + $0x1af8] sm:$0xff]  ;;  %v5897_v25 = vld [vmem:[%s11373_s30 + $0x1af0] sm:$0xff] }
 0x669   : > { %7439 = vmatpush2.msra.mxu1 %v5753_v1  ;;  %7368 = vmatpush2.msra.mxu0 %v5497_v39  ;;  %v6146_v20 = vld [vmem:[%s11373_s30 + $0x22b8] sm:$0xff]  ;;  %v6145_v39 = vld [vmem:[%s11373_s30 + $0x22b0] sm:$0xff] }
 0x66a   : > { %7440 = vmatprep.subr.mxu1 %v5746_v3  ;;  %7369 = vmatprep.subr.mxu0 %v5490_v53  ;;  %v5890_v1 = vld [vmem:[%s11373_s30 + $0x1ab8] sm:$0xff]  ;;  %v5889_v3 = vld [vmem:[%s11373_s30 + $0x1ab0] sm:$0xff] }
 0x66b   : > { %7441 = vmatpush2.msra.mxu1 %v5745_v7  ;;  %7370 = vmatpush2.msra.mxu0 %v5489_v51  ;;  %v6138_v53 = vld [vmem:[%s11373_s30 + $0x2278] sm:$0xff]  ;;  %v6137_v51 = vld [vmem:[%s11373_s30 + $0x2270] sm:$0xff] }
 0x66c   : > { %7442 = vmatprep.subr.mxu1 %v5738_v6  ;;  %7371 = vmatprep.subr.mxu0 %v5482_v8  ;;  %v5882_v7 = vld [vmem:[%s11373_s30 + $0x1a78] sm:$0xff]  ;;  %v5881_v6 = vld [vmem:[%s11373_s30 + $0x1a70] sm:$0xff] }
 0x66d   : > { %7443 = vmatpush2.msra.mxu1 %v5737_v16  ;;  %7372 = vmatpush2.msra.mxu0 %v5481_v13  ;;  %v6130_v8 = vld [vmem:[%s11373_s30 + $0x2238] sm:$0xff]  ;;  %v6129_v13 = vld [vmem:[%s11373_s30 + $0x2230] sm:$0xff] }
 0x66e   : > { %7444 = vmatprep.subr.mxu1 %v5730_v27  ;;  %7373 = vmatprep.subr.mxu0 %v5474_v42  ;;  %v5874_v16 = vld [vmem:[%s11373_s30 + $0x1a38] sm:$0xff]  ;;  %v5873_v27 = vld [vmem:[%s11373_s30 + $0x1a30] sm:$0xff] }
 0x66f   : > { %7445 = vmatpush2.msra.mxu1 %v5729_v10  ;;  %7374 = vmatpush2.msra.mxu0 %v5473_v12  ;;  %v6122_v42 = vld [vmem:[%s11373_s30 + $0x21f8] sm:$0xff]  ;;  %v6121_v12 = vld [vmem:[%s11373_s30 + $0x21f0] sm:$0xff] }
 0x670   : > { %7446 = vmatprep.subr.mxu1 %v5722_v54  ;;  %7375 = vmatprep.subr.mxu0 %v5466_v14  ;;  %v5866_v10 = vld [vmem:[%s11373_s30 + $0x19f8] sm:$0xff]  ;;  %v5865_v54 = vld [vmem:[%s11373_s30 + $0x19f0] sm:$0xff] }
 0x671   : > { %7447 = vmatpush2.msra.mxu1 %v5721_v11  ;;  %7376 = vmatpush2.msra.mxu0 %v5465_v45  ;;  %v6114_v14 = vld [vmem:[%s11373_s30 + $0x21b8] sm:$0xff]  ;;  %v6113_v45 = vld [vmem:[%s11373_s30 + $0x21b0] sm:$0xff] }
 0x672   : > { %7448 = vmatprep.subr.mxu1 %v5714_v15  ;;  %7377 = vmatprep.subr.mxu0 %v5458_v17  ;;  %v5858_v11 = vld [vmem:[%s11373_s30 + $0x19b8] sm:$0xff]  ;;  %v5857_v15 = vld [vmem:[%s11373_s30 + $0x19b0] sm:$0xff] }
 0x673   : > { %7449 = vmatpush2.msra.mxu1 %v5713_v18  ;;  %7378 = vmatpush2.msra.mxu0 %v5457_v19  ;;  %v6106_v17 = vld [vmem:[%s11373_s30 + $0x2178] sm:$0xff]  ;;  %v6105_v19 = vld [vmem:[%s11373_s30 + $0x2170] sm:$0xff] }
 0x674   : > { %7450 = vmatprep.subr.mxu1 %v5706_v24  ;;  %7379 = vmatprep.subr.mxu0 %v5450_v26  ;;  %v5850_v18 = vld [vmem:[%s11373_s30 + $0x1978] sm:$0xff]  ;;  %v5849_v24 = vld [vmem:[%s11373_s30 + $0x1970] sm:$0xff] }
 0x675   : > { %7451 = vmatpush2.msra.mxu1 %v5705_v28  ;;  %7380 = vmatpush2.msra.mxu0 %v5449_v29  ;;  %v6098_v26 = vld [vmem:[%s11373_s30 + $0x2138] sm:$0xff]  ;;  %v6097_v29 = vld [vmem:[%s11373_s30 + $0x2130] sm:$0xff] }
 0x676   : > { %7452 = vmatprep.subr.mxu1 %v5698_v30  ;;  %7381 = vmatprep.subr.mxu0 %v5442_v32  ;;  %v5842_v28 = vld [vmem:[%s11373_s30 + $0x1938] sm:$0xff]  ;;  %v5841_v30 = vld [vmem:[%s11373_s30 + $0x1930] sm:$0xff] }
 0x677   : > { %7453 = vmatpush2.msra.mxu1 %v5697_v33  ;;  %7382 = vmatpush2.msra.mxu0 %v5441_v23  ;;  %v6090_v32 = vld [vmem:[%s11373_s30 + $0x20f8] sm:$0xff]  ;;  %v6089_v23 = vld [vmem:[%s11373_s30 + $0x20f0] sm:$0xff] }
 0x678   : > { %7454 = vmatprep.subr.mxu1 %v5690_v46  ;;  %7383 = vmatprep.subr.mxu0 %v5434_v34  ;;  %v5834_v33 = vld [vmem:[%s11373_s30 + $0x18f8] sm:$0xff]  ;;  %v5833_v46 = vld [vmem:[%s11373_s30 + $0x18f0] sm:$0xff] }
 0x679   : > { %7455 = vmatpush2.msra.mxu1 %v5689_v36  ;;  %7384 = vmatpush2.msra.mxu0 %v5433_v38  ;;  %v6082_v34 = vld [vmem:[%s11373_s30 + $0x20b8] sm:$0xff]  ;;  %v6081_v38 = vld [vmem:[%s11373_s30 + $0x20b0] sm:$0xff] }
 0x67a   : > { %7456 = vmatprep.subr.mxu1 %v5682_v41  ;;  %7385 = vmatprep.subr.mxu0 %v5426_v61  ;;  %v5826_v36 = vld [vmem:[%s11373_s30 + $0x18b8] sm:$0xff]  ;;  %v5825_v41 = vld [vmem:[%s11373_s30 + $0x18b0] sm:$0xff] }
 0x67b   : > { %7457 = vmatpush2.msra.mxu1 %v5681_v43  ;;  %7386 = vmatpush2.msra.mxu0 %v5425_v22  ;;  %v6074_v61 = vld [vmem:[%s11373_s30 + $0x2078] sm:$0xff]  ;;  %v6073_v22 = vld [vmem:[%s11373_s30 + $0x2070] sm:$0xff] }
 0x67c   : > { %7459 = vmatmul.mubr.f32.vlgmr.msra.gmra.mxu1 %v11699_v4  ;;  %7536 = vmatprep.subr.mxu1 %v6186_v44  ;;  %v6170_v4 = vld [vmem:[%s11373_s30 + $0x2378] sm:$0xff]  ;;  %v5817_v44 = vld [vmem:[%s11373_s30 + $0x1870] sm:$0xff] }
 0x67d   : > { %7388 = vmatmul.mubr.f32.vlgmr.msra.gmra.mxu0 %v11557_v63  ;;  %7465 = vmatprep.subr.mxu0 %v5930_v47  ;;  %v6169_v63 = vld [vmem:[%s11373_s30 + $0x2370] sm:$0xff]  ;;  %v5818_v43 = vld [vmem:[%s11373_s30 + $0x1878] sm:$0xff] }
 0x67e   : > { %7537 = vmatpush1.msra.mxu1 %v6185_v2  ;;  %7466 = vmatpush1.msra.mxu0 %v5929_v62  ;;  %v6066_v47 = vld [vmem:[%s11373_s30 + $0x2038] sm:$0xff]  ;;  %v6065_v62 = vld [vmem:[%s11373_s30 + $0x2030] sm:$0xff] }
 0x67f   : > { %7529 = vmatprep.mubr.f32.mxu0 %v11744_v48  ;;  %7538 = vmatprep.subr.mxu1 %v6178_v56  ;;  %v5905_v48 = vld [vmem:[%s11373_s30 + $0x1b30] sm:$0xff]  ;;  %v5810_v2 = vld [vmem:[%s11373_s30 + $0x1838] sm:$0xff] }
 0x680   : > { %7467 = vmatprep.subr.mxu0 %v5922_v50  ;;  %7539 = vmatpush1.msra.mxu1 %v6177_v59  ;;  %v5809_v56 = vld [vmem:[%s11373_s30 + $0x1830] sm:$0xff]  ;;  %v6058_v50 = vld [vmem:[%s11373_s30 + $0x1ff8] sm:$0xff] }
 0x681   : > { %7468 = vmatpush1.msra.mxu0 %v5921_v57  ;;  %7540 = vmatprep.subr.mxu1 %v6170_v4  ;;  %v6057_v59 = vld [vmem:[%s11373_s30 + $0x1ff0] sm:$0xff]  ;;  %v6050_v57 = vld [vmem:[%s11373_s30 + $0x1fb8] sm:$0xff] }
 0x682   : > { %7469 = vmatprep.subr.mxu0 %v5914_v55  ;;  %7541 = vmatpush1.msra.mxu1 %v6169_v63  ;;  %v6049_v4 = vld [vmem:[%s11373_s30 + $0x1fb0] sm:$0xff]  ;;  %v6042_v55 = vld [vmem:[%s11373_s30 + $0x1f78] sm:$0xff] }
 0x683   : > { %7470 = vmatpush1.msra.mxu0 %v5913_v35  ;;  %7542 = vmatprep.subr.mxu1 %v6162_v37  ;;  %v6041_v63 = vld [vmem:[%s11373_s30 + $0x1f70] sm:$0xff]  ;;  %v6034_v35 = vld [vmem:[%s11373_s30 + $0x1f38] sm:$0xff] }
 0x684   : > { %7471 = vmatprep.subr.mxu0 %v5906_v58  ;;  %7543 = vmatpush1.msra.mxu1 %v6161_v60  ;;  %v6026_v37 = vld [vmem:[%s11373_s30 + $0x1ef8] sm:$0xff]  ;;  %v6017_v60 = vld [vmem:[%s11373_s30 + $0x1eb0] sm:$0xff] }
 0x685   : > { %7472 = vmatpush1.msra.mxu0 %v5905_v48  ;;  %7544 = vmatprep.subr.mxu1 %v6154_v9  ;;  %v6018_v58 = vld [vmem:[%s11373_s30 + $0x1eb8] sm:$0xff]  ;;  %v6009_v9 = vld [vmem:[%s11373_s30 + $0x1e70] sm:$0xff] }
 0x686   : > { %7473 = vmatprep.subr.mxu0 %v5898_v5  ;;  %7545 = vmatpush1.msra.mxu1 %v6153_v21  ;;  %v6010_v48 = vld [vmem:[%s11373_s30 + $0x1e78] sm:$0xff]  ;;  %v6001_v21 = vld [vmem:[%s11373_s30 + $0x1e30] sm:$0xff] }
 0x687   : > { %7474 = vmatpush1.msra.mxu0 %v5897_v25  ;;  %7546 = vmatprep.subr.mxu1 %v6146_v20  ;;  %v6002_v5 = vld [vmem:[%s11373_s30 + $0x1e38] sm:$0xff]  ;;  %v5993_v20 = vld [vmem:[%s11373_s30 + $0x1df0] sm:$0xff] }
 0x688   : > { %7475 = vmatprep.subr.mxu0 %v5890_v1  ;;  %7547 = vmatpush1.msra.mxu1 %v6145_v39  ;;  %v5994_v25 = vld [vmem:[%s11373_s30 + $0x1df8] sm:$0xff]  ;;  %v5985_v39 = vld [vmem:[%s11373_s30 + $0x1db0] sm:$0xff] }
 0x689   : > { %7476 = vmatpush1.msra.mxu0 %v5889_v3  ;;  %7548 = vmatprep.subr.mxu1 %v6138_v53  ;;  %v5986_v1 = vld [vmem:[%s11373_s30 + $0x1db8] sm:$0xff]  ;;  %v5977_v53 = vld [vmem:[%s11373_s30 + $0x1d70] sm:$0xff] }
 0x68a   : > { %7477 = vmatprep.subr.mxu0 %v5882_v7  ;;  %7549 = vmatpush1.msra.mxu1 %v6137_v51  ;;  %v5978_v3 = vld [vmem:[%s11373_s30 + $0x1d78] sm:$0xff]  ;;  %v5969_v51 = vld [vmem:[%s11373_s30 + $0x1d30] sm:$0xff] }
 0x68b   : > { %7478 = vmatpush1.msra.mxu0 %v5881_v6  ;;  %7550 = vmatprep.subr.mxu1 %v6130_v8  ;;  %v5970_v7 = vld [vmem:[%s11373_s30 + $0x1d38] sm:$0xff]  ;;  %v5961_v8 = vld [vmem:[%s11373_s30 + $0x1cf0] sm:$0xff] }
 0x68c   : > { %7479 = vmatprep.subr.mxu0 %v5874_v16  ;;  %7551 = vmatpush1.msra.mxu1 %v6129_v13  ;;  %v5962_v6 = vld [vmem:[%s11373_s30 + $0x1cf8] sm:$0xff]  ;;  %v5953_v13 = vld [vmem:[%s11373_s30 + $0x1cb0] sm:$0xff] }
 0x68d   : > { %7480 = vmatpush1.msra.mxu0 %v5873_v27  ;;  %7552 = vmatprep.subr.mxu1 %v6122_v42  ;;  %v5954_v16 = vld [vmem:[%s11373_s30 + $0x1cb8] sm:$0xff]  ;;  %v5945_v42 = vld [vmem:[%s11373_s30 + $0x1c70] sm:$0xff] }
 0x68e   : > { %7481 = vmatprep.subr.mxu0 %v5866_v10  ;;  %7553 = vmatpush1.msra.mxu1 %v6121_v12  ;;  %v5946_v27 = vld [vmem:[%s11373_s30 + $0x1c78] sm:$0xff]  ;;  %v5937_v12 = vld [vmem:[%s11373_s30 + $0x1c30] sm:$0xff] }
 0x68f   : > { %7482 = vmatpush1.msra.mxu0 %v5865_v54  ;;  %7554 = vmatprep.subr.mxu1 %v6114_v14  ;;  %v5938_v10 = vld [vmem:[%s11373_s30 + $0x1c38] sm:$0xff]  ;;  %v2388_v54 = vld [vmem:[%s12694_s4] sm:$0xff]  ;;  %v2392_v14 = vstv %s2391_s9 }
 0x690   : > { %7483 = vmatprep.subr.mxu0 %v5858_v11  ;;  %7555 = vmatpush1.msra.mxu1 %v6113_v45  ;;  %v2393_v45 = vmul.f32 %v2392_v14, %v2388_v54 }
 0x691   : > { %7484 = vmatpush1.msra.mxu0 %v5857_v15  ;;  %7556 = vmatprep.subr.mxu1 %v6106_v17  ;;  %v6324_v17 = vpop.f32.mrf.mxu1 }
 0x692   : > { %7485 = vmatprep.subr.mxu0 %v5850_v18  ;;  %7557 = vmatpush1.msra.mxu1 %v6105_v19  ;;  %2398 = vst.msk [vmem:[%s12665_s13] sm:$0xff] %vm12658_vm2, %v2393_v45 }
 0x693   : > { %7486 = vmatpush1.msra.mxu0 %v5849_v24  ;;  %7558 = vmatprep.subr.mxu1 %v6098_v26  ;;  %v6326_v19 = vpop.f32.mrf.mxu1 }
 0x694   : > { %7487 = vmatprep.subr.mxu0 %v5842_v28  ;;  %7559 = vmatpush1.msra.mxu1 %v6097_v29 }
 0x695   : > { %7488 = vmatpush1.msra.mxu0 %v5841_v30  ;;  %7560 = vmatprep.subr.mxu1 %v6090_v32  ;;  %v6466_v24 = vpop.f32.mrf.mxu1 }
 0x696   : > { %7489 = vmatprep.subr.mxu0 %v5834_v33  ;;  %7561 = vmatpush1.msra.mxu1 %v6089_v23 }
 0x697   : > { %7490 = vmatpush1.msra.mxu0 %v5833_v46  ;;  %7562 = vmatprep.subr.mxu1 %v6082_v34  ;;  %v6468_v28 = vpop.f32.mrf.mxu1 }
 0x698   : > { %7491 = vmatprep.subr.mxu0 %v5826_v36  ;;  %7563 = vmatpush1.msra.mxu1 %v6081_v38 }
 0x699   : > { %7492 = vmatpush1.msra.mxu0 %v5825_v41  ;;  %7564 = vmatprep.subr.mxu1 %v6074_v61  ;;  %v6608_v29 = vpop.f32.mrf.mxu1 }
 0x69a   : > { %7493 = vmatprep.subr.mxu0 %v5818_v43  ;;  %7565 = vmatpush1.msra.mxu1 %v6073_v22 }
 0x69b   : > { %7494 = vmatpush1.msra.mxu0 %v5817_v44  ;;  %7566 = vmatprep.subr.mxu1 %v6066_v47  ;;  %v6610_v33 = vpop.f32.mrf.mxu1 }
 0x69c   : > { %7495 = vmatprep.subr.mxu0 %v5810_v2  ;;  %7567 = vmatpush1.msra.mxu1 %v6065_v62 }
 0x69d   : > { %7600 = vmatprep.mubr.f32.mxu1 %v8033_v52  ;;  %7496 = vmatpush1.msra.mxu0 %v5809_v56  ;;  %v6033_v52 = vld [vmem:[%s11373_s30 + $0x1f30] sm:$0xff]  ;;  %v6750_v23 = vpop.f32.mrf.mxu1 }
 0x69e   : > { %7601 = vmatmul.mubr.f32.vlgmr.msra.gmra.mxu1 %v11827_v49  ;;  %7497 = vmatprep.subr.mxu0 %v6058_v50  ;;  %v6025_v49 = vld [vmem:[%s11373_s30 + $0x1ef0] sm:$0xff] }
 0x69f   : > { %7498 = vmatpush2.msra.mxu0 %v6057_v59  ;;  %v6752_v36 = vpop.f32.mrf.mxu1 }
 0x6a0   : > { %7499 = vmatprep.subr.mxu0 %v6050_v57 }
 0x6a1   : > { %7500 = vmatpush2.msra.mxu0 %v6049_v4  ;;  %v6892_v38 = vpop.f32.mrf.mxu1 }
 0x6a2   : > { %7501 = vmatprep.subr.mxu0 %v6042_v55 }
 0x6a3   : > { %7502 = vmatpush2.msra.mxu0 %v6041_v63  ;;  %v6894_v43 = vpop.f32.mrf.mxu1 }
 0x6a4   : > { %7503 = vmatprep.subr.mxu0 %v6034_v35 }
 0x6a5   : > { %7504 = vmatpush2.msra.mxu0 %v6033_v52  ;;  %v7034_v22 = vpop.f32.mrf.mxu1 }
 0x6a6   : > { %7505 = vmatprep.subr.mxu0 %v6026_v37 }
 0x6a7   : > { %7506 = vmatpush2.msra.mxu0 %v6025_v49  ;;  %v7036_v2 = vpop.f32.mrf.mxu1 }
 0x6a8   : > { %7507 = vmatprep.subr.mxu0 %v6018_v58 }
 0x6a9   : > { %7508 = vmatpush2.msra.mxu0 %v6017_v60 }
 0x6aa   : > { %7509 = vmatprep.subr.mxu0 %v6010_v48 }
 0x6ab   : > { %7510 = vmatpush2.msra.mxu0 %v6009_v9 }
 0x6ac   : > { %7511 = vmatprep.subr.mxu0 %v6002_v5  ;;  %v8034_v5 = vmov 1966171168  }
 0x6ad   : > { %7512 = vmatpush2.msra.mxu0 %v6001_v21  ;;  %v7620_v21 = vunpack.c.l.s4 %v8034_v5 }
 0x6ae   : > { %7513 = vmatprep.subr.mxu0 %v5994_v25 }
 0x6af   : > { %7514 = vmatpush2.msra.mxu0 %v5993_v20  ;;  %v7621_v54 = vunpack.c.0.s8 %v7620_v21 }
 0x6b0   : > { %7515 = vmatprep.subr.mxu0 %v5986_v1 }
 0x6b1   : > { %7516 = vmatpush2.msra.mxu0 %v5985_v39 }
 0x6b2   : > { %7517 = vmatprep.subr.mxu0 %v5978_v3 }
 0x6b3   : > { %7518 = vmatpush2.msra.mxu0 %v5977_v53 }
 0x6b4   : > { %7519 = vmatprep.subr.mxu0 %v5970_v7 }
 0x6b5   : > { %7520 = vmatpush2.msra.mxu0 %v5969_v51 }
 0x6b6   : > { %7521 = vmatprep.subr.mxu0 %v5962_v6 }
 0x6b7   : > { %7522 = vmatpush2.msra.mxu0 %v5961_v8 }
 0x6b8   : > { %7523 = vmatprep.subr.mxu0 %v5954_v16  ;;  %v7176_v62 = vpop.f32.mrf.mxu1 }
 0x6b9   : > { %7524 = vmatpush2.msra.mxu0 %v5953_v13 }
 0x6ba   : > { %7525 = vmatprep.subr.mxu0 %v5946_v27  ;;  %v7178_v57 = vpop.f32.mrf.mxu1 }
 0x6bb   : > { %7526 = vmatpush2.msra.mxu0 %v5945_v42 }
 0x6bc   : > { %7527 = vmatprep.subr.mxu0 %v5938_v10 }
 0x6bd   : > { %7528 = vmatpush2.msra.mxu0 %v5937_v12 }
 0x6be   : > { %7530 = vmatmul.mubr.f32.vlgmr.msra.gmra.mxu0 %v11747_v0  ;;  %v6253_v0 = vpop.f32.mrf.mxu0 }
 0x6bf   : > { %v6325_v9 = vadd.f32 %v6324_v17, %v6253_v0 }
 0x6c0   : > { %v6255_v15 = vpop.f32.mrf.mxu0 }
 0x6c1   : > { %v6327_v60 = vadd.f32 %v6326_v19, %v6255_v15 }
 0x6c2   : > { %v6395_v18 = vpop.f32.mrf.mxu0 }
 0x6c3   : > { %v6396_v51 = vadd.f32 %v6395_v18, %v6325_v9 }
 0x6c4   : > { %v6397_v31 = vpop.f32.mrf.mxu0 }
 0x6c5   : > { %v6398_v39 = vadd.f32 %v6397_v31, %v6327_v60  ;;  %v6467_v27 = vadd.f32 %v6466_v24, %v6396_v51 }
 0x6c6   : > { %v6537_v26 = vpop.f32.mrf.mxu0 }
 0x6c7   : > { %v6469_v8 = vadd.f32 %v6468_v28, %v6398_v39  ;;  %v6538_v0 = vadd.f32 %v6537_v26, %v6467_v27  ;;  %v7624_v28 = vsub.s32 %v7621_v54, %v10262_v40 }
 0x6c8   : > { %v6539_v30 = vpop.f32.mrf.mxu0 }
 0x6c9   : > { %v6540_v12 = vadd.f32 %v6539_v30, %v6469_v8 }
 0x6ca   : > { %v6679_v32 = vpop.f32.mrf.mxu0 }
 0x6cb   : > { %v6680_v4 = vadd.f32 %v6679_v32, %v6608_v29 }
 0x6cc   : > { %v6681_v46 = vpop.f32.mrf.mxu0 }
 0x6cd   : > { %v6682_v59 = vadd.f32 %v6681_v46, %v6610_v33  ;;  %v6751_v37 = vadd.f32 %v6750_v23, %v6680_v4  ;;  %v7615_v23 = vcombine.low %v6538_v0, %v6540_v12 }
 0x6ce   : > { %v6821_v34 = vpop.f32.mrf.mxu0 }
 0x6cf   : > { %v6753_v35 = vadd.f32 %v6752_v36, %v6682_v59  ;;  %v6822_v25 = vadd.f32 %v6821_v34, %v6751_v37 }
 0x6d0   : > { %v6823_v41 = vpop.f32.mrf.mxu0 }
 0x6d1   : > { %v6824_v49 = vadd.f32 %v6823_v41, %v6753_v35  ;;  %v6893_v42 = vadd.f32 %v6892_v38, %v6822_v25  ;;  %v7625_v41 = vrot.slane %v7615_v23, %v7624_v28 }
 0x6d2   : > { %v6963_v61 = vpop.f32.mrf.mxu0 }
 0x6d3   : > { %v7035_v3 = vadd.f32 %v7034_v22, %v6963_v61  ;;  %v6895_v6 = vadd.f32 %v6894_v43, %v6824_v49 }
 0x6d4   : > { %v6965_v44 = vpop.f32.mrf.mxu0 }
 0x6d5   : > { %v7037_v48 = vadd.f32 %v7036_v2, %v6965_v44  ;;  %v7616_v15 = vcombine.low %v6893_v42, %v6895_v6 }
 0x6d7   : > { %v7632_v30 = vrot.slane %v7616_v15, %v7624_v28 }
 0x6d9   : > { %v7105_v47 = vpop.f32.mrf.mxu0  ;;  %v7647_v43 = vcombine.low %v7625_v41, %v7632_v30 }
 0x6da   : > { %v7106_v16 = vadd.f32 %v7105_v47, %v7035_v3 }
 0x6db   : > { %v7107_v56 = vpop.f32.mrf.mxu0  ;;  %v7655_v2 = vrot.slane %v7647_v43, %v7624_v28 }
 0x6dc   : > { %v7108_v53 = vadd.f32 %v7107_v56, %v7037_v48  ;;  %v7177_v31 = vadd.f32 %v7176_v62, %v7106_v16  ;;  %v5034_v56 = vld [vmem:[%s12665_s13] sm:$0xff] }
 0x6de   : > { %v7179_v14 = vadd.f32 %v7178_v57, %v7108_v53 }
 0x6fa   : > { %v7318_v55 = vpop.f32.mrf.mxu1 }
 0x6fb   : > { %v7247_v50 = vpop.f32.mrf.mxu0 }
 0x6fc   : > { %v7320_v58 = vpop.f32.mrf.mxu1  ;;  %v7248_v24 = vadd.f32 %v7247_v50, %v7177_v31 }
 0x6fd   : > { %v7249_v63 = vpop.f32.mrf.mxu0 }
 0x6fe   : > { %v7250_v29 = vadd.f32 %v7249_v63, %v7179_v14 }
 0x700   : > { %v7617_v36 = vcombine.low %v7248_v24, %v7250_v29 }
 0x702   : > { %v7639_v22 = vrot.slane %v7617_v36, %v7624_v28 }
 0x73c   : > { %v7460_v20 = vpop.f32.mrf.mxu1 }
 0x73d   : > { %v7389_v52 = vpop.f32.mrf.mxu0 }
 0x73e   : > { %v7390_v7 = vadd.f32 %v7389_v52, %v7318_v55  ;;  %v7462_v10 = vpop.f32.mrf.mxu1 }
 0x73f   : > { %v7391_v1 = vpop.f32.mrf.mxu0 }
 0x740   : > { %v7392_v13 = vadd.f32 %v7391_v1, %v7320_v58  ;;  %v7461_v45 = vadd.f32 %v7460_v20, %v7390_v7 }
 0x742   : > { %v7463_v33 = vadd.f32 %v7462_v10, %v7392_v13 }
 0x75e   : > { %v7602_v17 = vpop.f32.mrf.mxu1 }
 0x760   : > { %v7604_v34 = vpop.f32.mrf.mxu1 }
 0x77e   : > { %v7531_v19 = vpop.f32.mrf.mxu0 }
 0x77f   : > { %v7532_v32 = vadd.f32 %v7531_v19, %v7461_v45 }
 0x780   : > { %v7533_v18 = vpop.f32.mrf.mxu0 }
 0x781   : > { %v7534_v46 = vadd.f32 %v7533_v18, %v7463_v33  ;;  %v7603_v38 = vadd.f32 %v7602_v17, %v7532_v32 }
 0x783   : > { %v7605_v26 = vadd.f32 %v7604_v34, %v7534_v46 }
 0x785   : > { %v7618_v61 = vcombine.low %v7603_v38, %v7605_v26 }
 0x787   : > { %v7646_v44 = vrot.slane %v7618_v61, %v7624_v28 }
 0x789   : > { %v7648_v47 = vcombine.low %v7639_v22, %v7646_v44 }
 0x78b   : > { %v7662_v62 = vrot.slane %v7648_v47, %v7624_v28 }
 0x78d   : > { %v7663_v59 = vcombine.low %v7655_v2, %v7662_v62 }
 0x78f   : > { %v7665_v40 = vadd.f32 %v7663_v59, %v5034_v56 }
 0x791   : > { %7670 = vst.msk [vmem:[%s12665_s13] sm:$0xff] %vm12658_vm2, %v7665_v40 }
 0x792 PF: > { %s15_s22 = sadd.s32 1, %s8031_s22   ;;  %s12700_s18 = smov %s8019_s19 }
 0x793   : > { %p12_p13 = scmp.ge.s32.totalorder %s15_s22, 4   ;;  %s12701_s19 = smov %s8100_s26 }
 0x794   : > { %s12702_s20 = smov %s8027_s21  ;;  %s12703_s21 = smov %s12705_s23 }
 0x795   :  { %14 = sbr.rel (!%p12_p13) target bundleno = 3 (0x3), region = 111 }

</bundles_post_ra>
